<compile_context>
chip_gen: v5e
topology: v5e:2x2
jax: 0.10.0
libtpu: 0.0.40
codegen_flags: <defaults>
</compile_context>

<pallas_src>
import math

import numpy as np
import jax
import jax.numpy as jnp
from jax import lax
from jax.experimental import pallas as pl
from jax.experimental.pallas import tpu as pltpu


# ----------------------------------------------------------------------------
# Trace-time (numpy) constants: exact bilinear-x2 matrix and conv-tap masks
# ----------------------------------------------------------------------------
def _upsample_matrix_np(H, W):
    """(H*W, 2H*2W) matrix: row-major image @ UP == F.interpolate(x2, bilinear,
    align_corners=False)."""
    def axis_mat(n_in, n_out):
        o = np.arange(n_out, dtype=np.float64)
        src = np.maximum(0.5 * (o + 0.5) - 0.5, 0.0)
        i0 = np.floor(src).astype(np.int64)
        frac = src - i0
        i1 = np.minimum(i0 + 1, n_in - 1)
        m = np.zeros((n_in, n_out), np.float64)
        cols = np.arange(n_out)
        m[i0, cols] += 1.0 - frac
        m[i1, cols] += frac
        return m

    mh = axis_mat(H, 2 * H)                      # (H, 2H)
    mw = axis_mat(W, 2 * W)                      # (W, 2W)
    up = np.einsum('ab,cd->acbd', mh, mw)        # (H, W, 2H, 2W)
    return np.ascontiguousarray(
        up.reshape(H * W, 4 * H * W).astype(np.float32))


def _tap_masks_np(N, H2, W2):
    """(9, N*H2*W2) zero-padding masks for the 3x3 conv taps (k = dy*3+dx).
    Also kill cross-image contamination on the flattened pixel axis."""
    P1 = H2 * W2
    idx = np.arange(N * P1)
    col = idx % W2
    row = (idx // W2) % H2
    masks = np.empty((9, N * P1), np.float32)
    k = 0
    for dy in range(3):
        for dx in range(3):
            m = np.ones(N * P1, np.float64)
            if dy == 0:
                m = m * (row >= 1)
            elif dy == 2:
                m = m * (row <= H2 - 2)
            if dx == 0:
                m = m * (col >= 1)
            elif dx == 2:
                m = m * (col <= W2 - 2)
            masks[k] = m.astype(np.float32)
            k += 1
    return masks


# ----------------------------------------------------------------------------
# Fused GBlock kernel
# ----------------------------------------------------------------------------
def _make_gblock_kernel(N, Cin, Chid, Cout, H, W):
    H2, W2 = 2 * H, 2 * W
    P0 = H * W            # pixels per image, input resolution
    P1 = H2 * W2          # pixels per image, output resolution
    PT = N * P1           # total pixels on the conv-stage lane axis
    PAD = 128             # lane-aligned zero pad for the conv taps
    EPS = 1e-5

    def kernel(x_ref, up_ref, masks_ref,
               w1_ref, b1_ref, w2_ref, b2_ref, wsc_ref, bsc_ref,
               g1_ref, be1_ref, g2_ref, be2_ref, out_ref):
        f32 = jnp.float32

        # ---- channel-major, lane-dense view of the whole batch --------------
        # xc[c, n*P0 + p] = x[n, c, p]   (lane concat at 128-aligned offsets)
        xc = jnp.concatenate([x_ref[n] for n in range(N)], axis=1)  # (Cin, N*P0)

        # ---- BN1 (training-mode stats over N,H,W) + ReLU ---------------------
        inv0 = 1.0 / float(N * P0)
        m1 = jnp.sum(xc, axis=1, keepdims=True) * inv0               # (Cin, 1)
        d1 = xc - m1
        v1 = jnp.sum(d1 * d1, axis=1, keepdims=True) * inv0
        s1 = g1_ref[...] * lax.rsqrt(v1 + EPS)
        h0 = jnp.maximum(xc * s1 + (be1_ref[...] - m1 * s1), 0.0)    # (Cin, N*P0)

        # ---- shortcut 1x1 conv at LOW resolution (commutes with upsample) ----
        sc_lo = jnp.dot(wsc_ref[...], xc,
                        preferred_element_type=f32)                  # (Cout, N*P0)

        # ---- exact bilinear x2: one fused MXU matmul per image --------------
        # Stack shortcut (Cout rows, 8-aligned) on top of residual input so a
        # single (Cout+Cin, P0) @ (P0, P1) matmul upsamples both branches.
        comb = jnp.concatenate([sc_lo, h0], axis=0)                  # (Cout+Cin, N*P0)
        up_mat = up_ref[...]                                         # (P0, P1)
        up = jnp.concatenate(
            [jnp.dot(comb[:, n * P0:(n + 1) * P0], up_mat,
                     preferred_element_type=f32) for n in range(N)],
            axis=1)                                                  # (Cout+Cin, PT)
        sc_up = up[:Cout, :]                                         # (Cout, PT)
        h_up = up[Cout:Cout + Cin, :]                                # (Cin, PT)

        masks = masks_ref[...]                                       # (9, PT)

        def conv3x3(act, w9):
            # act: (Ci, PT) lane-dense activation; w9: (9, Co, Ci).
            # 3x3 'same' conv with zero padding = 9 statically shifted,
            # edge-masked taps, each a (Co,Ci)@(Ci,PT) MXU matmul (f32 acc).
            ci = act.shape[0]
            zpad = jnp.zeros((ci, PAD), f32)
            padded = jnp.concatenate([zpad, act, zpad], axis=1)      # aligned concat
            acc = jnp.zeros((w9.shape[1], PT), f32)
            k = 0
            for dy in range(3):
                for dx in range(3):
                    off = (dy - 1) * W2 + (dx - 1)
                    tap = padded[:, PAD + off:PAD + off + PT]
                    if not (dy == 1 and dx == 1):                    # center mask == 1
                        tap = tap * masks[k:k + 1, :]
                    acc = acc + jnp.dot(w9[k], tap, preferred_element_type=f32)
                    k += 1
            return acc

        # ---- conv1 (+bias) -> fused BN2 stats -> ReLU -------------------------
        c1 = conv3x3(h_up, w1_ref[...]) + b1_ref[...]                # (Chid, PT)
        inv1 = 1.0 / float(PT)
        m2 = jnp.sum(c1, axis=1, keepdims=True) * inv1
        d2 = c1 - m2
        v2 = jnp.sum(d2 * d2, axis=1, keepdims=True) * inv1
        s2 = g2_ref[...] * lax.rsqrt(v2 + EPS)
        h2 = jnp.maximum(c1 * s2 + (be2_ref[...] - m2 * s2), 0.0)    # (Chid, PT)

        # ---- conv2 (+bias) + shortcut (+bias) ---------------------------------
        res = (conv3x3(h2, w2_ref[...]) + b2_ref[...]) + (sc_up + bsc_ref[...])

        # lane-dense stores (1024 wide), one image at a time (NCHW row-major)
        for n in range(N):
            out_ref[n, :, :] = res[:, n * P1:(n + 1) * P1]

    return kernel


@jax.jit
def gblock_forward(x_nchw, p):
    """GBlock forward (upsample=True, num_classes=0). NCHW in -> NCHW out."""
    N, Cin, H, W = x_nchw.shape
    Chid = p['w1'].shape[-1]
    Cout = p['w2'].shape[-1]
    H2, W2 = 2 * H, 2 * W

    # trace-time constants
    up_mat = jnp.asarray(_upsample_matrix_np(H, W))          # (H*W, 4*H*W)
    masks = jnp.asarray(_tap_masks_np(N, H2, W2))            # (9, N*H2*W2)

    # tiny one-off parameter relayouts (HWIO -> per-tap (9, Cout, Cin))
    w1_9 = p['w1'].reshape(9, Cin, Chid).transpose(0, 2, 1)
    w2_9 = p['w2'].reshape(9, Chid, Cout).transpose(0, 2, 1)
    wsc_m = p['wsc'].T                                        # (Cout, Cin)

    args = (
        x_nchw.reshape(N, Cin, H * W),
        up_mat, masks,
        w1_9, p['b1'].reshape(Chid, 1),
        w2_9, p['b2'].reshape(Cout, 1),
        wsc_m, p['bsc'].reshape(Cout, 1),
        p['g1'].reshape(Cin, 1), p['be1'].reshape(Cin, 1),
        p['g2'].reshape(Chid, 1), p['be2'].reshape(Chid, 1),
    )
    vmem = pl.BlockSpec(memory_space=pltpu.MemorySpace.VMEM)
    out = pl.pallas_call(
        _make_gblock_kernel(N, Cin, Chid, Cout, H, W),
        out_shape=jax.ShapeDtypeStruct((N, Cout, H2 * W2), jnp.float32),
        in_specs=[vmem] * len(args),
        out_specs=vmem,
    )(*args)
    return out.reshape(N, Cout, H2, W2)


# ----------------------------------------------------------------------------
# Pure-JAX reference (lax.conv + gather-based bilinear) for validation
# ----------------------------------------------------------------------------
def bilinear_upsample_x2(x):
    # F.interpolate(scale_factor=2, mode='bilinear', align_corners=False), NHWC
    N, H, W, C = x.shape

    def coords(n_in, n_out):
        o = jnp.arange(n_out, dtype=jnp.float32)
        src = jnp.maximum(0.5 * (o + 0.5) - 0.5, 0.0)
        i0 = jnp.floor(src).astype(jnp.int32)
        frac = src - i0.astype(jnp.float32)
        i1 = jnp.minimum(i0 + 1, n_in - 1)
        return i0, i1, frac

    h0, h1, fh = coords(H, 2 * H)
    w0, w1, fw = coords(W, 2 * W)
    xh = (x[:, h0] * (1.0 - fh)[None, :, None, None]
          + x[:, h1] * fh[None, :, None, None])
    return (xh[:, :, w0] * (1.0 - fw)[None, None, :, None]
            + xh[:, :, w1] * fw[None, None, :, None])


def bn_fold(x, gamma, beta, eps=1e-5):
    mean = jnp.mean(x, axis=(0, 1, 2))
    var = jnp.mean((x - mean) ** 2, axis=(0, 1, 2))
    scale = gamma / jnp.sqrt(var + eps)
    return scale, beta - mean * scale


def _ref_conv(x, w, b, pad):
    y = lax.conv_general_dilated(x, w, (1, 1), [(pad, pad), (pad, pad)],
                                 dimension_numbers=('NHWC', 'HWIO', 'NHWC'),
                                 precision=lax.Precision.HIGHEST)
    return y + b.reshape(1, 1, 1, -1)


def gblock_reference(x_nchw, p):
    x = jnp.transpose(x_nchw, (0, 2, 3, 1))
    s1, o1 = bn_fold(x, p['g1'], p['be1'])
    h = jnp.maximum(x * s1 + o1, 0.0)
    h = bilinear_upsample_x2(h)
    h = _ref_conv(h, p['w1'], p['b1'], 1)
    s2, o2 = bn_fold(h, p['g2'], p['be2'])
    h = jnp.maximum(h * s2 + o2, 0.0)
    h = _ref_conv(h, p['w2'], p['b2'], 1)
    wsc = p['wsc'].reshape(1, 1, *p['wsc'].shape)
    sc = _ref_conv(bilinear_upsample_x2(x), wsc, p['bsc'], 0)
    return jnp.transpose(h + sc, (0, 3, 1, 2))


# ----------------------------------------------------------------------------
# Deterministic parameter init (xavier_uniform, matching the module __init__)
# ----------------------------------------------------------------------------
def xavier_uniform(key, shape, gain):
    receptive = shape[0] * shape[1] if len(shape) == 4 else 1
    fan_in = receptive * shape[-2]
    fan_out = receptive * shape[-1]
    a = gain * math.sqrt(6.0 / (fan_in + fan_out))
    return jax.random.uniform(key, shape, jnp.float32, -a, a)


if __name__ == "__main__":
    N, Cin, Cout, H, W = 2, 4, 8, 16, 16
    Chid = Cout  # hidden_channels defaults to out_channels

    key = jax.random.PRNGKey(0)
    ks = jax.random.split(key, 8)
    params = dict(
        w1=xavier_uniform(ks[0], (3, 3, Cin, Chid), math.sqrt(2.0)),
        b1=jax.random.uniform(ks[1], (Chid,), jnp.float32, -0.1, 0.1),
        w2=xavier_uniform(ks[2], (3, 3, Chid, Cout), math.sqrt(2.0)),
        b2=jax.random.uniform(ks[3], (Cout,), jnp.float32, -0.1, 0.1),
        wsc=xavier_uniform(ks[4], (1, 1, Cin, Cout), 1.0).reshape(Cin, Cout),
        bsc=jax.random.uniform(ks[5], (Cout,), jnp.float32, -0.1, 0.1),
        g1=jnp.ones((Cin,), jnp.float32),     # BatchNorm2d default init
        be1=jnp.zeros((Cin,), jnp.float32),
        g2=jnp.ones((Chid,), jnp.float32),
        be2=jnp.zeros((Chid,), jnp.float32),
    )

    x = jax.random.normal(ks[6], (N, Cin, H, W), jnp.float32)

    out = jax.block_until_ready(gblock_forward(x, params))
    ref = jax.block_until_ready(gblock_reference(x, params))

    assert out.shape == (N, Cout, 2 * H, 2 * W), out.shape
    err = float(jnp.max(jnp.abs(out - ref)))
    assert err < 2e-2, f"max abs error vs reference: {err}"
    print("KERNEL_OK")
</pallas_src>

<mosaic_0001>
module attributes {stable_mosaic.version = 11 : i64} {
  func.func @kernel(%arg0: memref<2x4x256xf32, #tpu.memory_space<vmem>>, %arg1: memref<256x1024xf32, #tpu.memory_space<vmem>>, %arg2: memref<9x2048xf32, #tpu.memory_space<vmem>>, %arg3: memref<9x8x4xf32, #tpu.memory_space<vmem>>, %arg4: memref<8x1xf32, #tpu.memory_space<vmem>>, %arg5: memref<9x8x8xf32, #tpu.memory_space<vmem>>, %arg6: memref<8x1xf32, #tpu.memory_space<vmem>>, %arg7: memref<8x4xf32, #tpu.memory_space<vmem>>, %arg8: memref<8x1xf32, #tpu.memory_space<vmem>>, %arg9: memref<4x1xf32, #tpu.memory_space<vmem>>, %arg10: memref<4x1xf32, #tpu.memory_space<vmem>>, %arg11: memref<8x1xf32, #tpu.memory_space<vmem>>, %arg12: memref<8x1xf32, #tpu.memory_space<vmem>>, %arg13: memref<2x8x1024xf32, #tpu.memory_space<vmem>>) attributes {dimension_semantics = [], scalar_prefetch = 0 : i64, scratch_operands = 0 : i64, tpu.core_type = #tpu.core_type<tc>} {
    %c0 = arith.constant 0 : index
    %c0_0 = arith.constant 0 : index
    %c0_1 = arith.constant 0 : index
    %0 = vector.load %arg0[%c0, %c0_0, %c0_1] : memref<2x4x256xf32, #tpu.memory_space<vmem>>, vector<1x4x256xf32>
    %1 = vector.shape_cast %0 : vector<1x4x256xf32> to vector<4x256xf32>
    %c1 = arith.constant 1 : index
    %c0_2 = arith.constant 0 : index
    %c0_3 = arith.constant 0 : index
    %2 = vector.load %arg0[%c1, %c0_2, %c0_3] : memref<2x4x256xf32, #tpu.memory_space<vmem>>, vector<1x4x256xf32>
    %3 = vector.shape_cast %2 : vector<1x4x256xf32> to vector<4x256xf32>
    %4 = tpu.concatenate %1, %3 in 1 : vector<4x256xf32>, vector<4x256xf32> -> vector<4x512xf32>
    %cst = arith.constant dense<0.000000e+00> : vector<4xf32>
    %5 = vector.multi_reduction <add>, %4, %cst [1] : vector<4x512xf32> to vector<4xf32>
    %6 = vector.shape_cast %5 : vector<4xf32> to vector<4x1xf32>
    %cst_4 = arith.constant 0.001953125 : f32
    %7 = vector.broadcast %cst_4 : f32 to vector<4x1xf32>
    %8 = arith.mulf %6, %7 : vector<4x1xf32>
    %9 = vector.broadcast %8 : vector<4x1xf32> to vector<4x512xf32>
    %10 = arith.subf %4, %9 : vector<4x512xf32>
    %11 = arith.mulf %10, %10 : vector<4x512xf32>
    %cst_5 = arith.constant dense<0.000000e+00> : vector<4xf32>
    %12 = vector.multi_reduction <add>, %11, %cst_5 [1] : vector<4x512xf32> to vector<4xf32>
    %13 = vector.shape_cast %12 : vector<4xf32> to vector<4x1xf32>
    %cst_6 = arith.constant 0.001953125 : f32
    %14 = vector.broadcast %cst_6 : f32 to vector<4x1xf32>
    %15 = arith.mulf %13, %14 : vector<4x1xf32>
    %c0_7 = arith.constant 0 : index
    %c0_8 = arith.constant 0 : index
    %16 = vector.load %arg9[%c0_7, %c0_8] : memref<4x1xf32, #tpu.memory_space<vmem>>, vector<4x1xf32>
    %cst_9 = arith.constant 9.99999974E-6 : f32
    %17 = vector.broadcast %cst_9 : f32 to vector<4x1xf32>
    %18 = arith.addf %15, %17 : vector<4x1xf32>
    %19 = math.rsqrt %18 : vector<4x1xf32>
    %20 = arith.mulf %16, %19 : vector<4x1xf32>
    %21 = vector.broadcast %20 : vector<4x1xf32> to vector<4x512xf32>
    %22 = arith.mulf %4, %21 : vector<4x512xf32>
    %c0_10 = arith.constant 0 : index
    %c0_11 = arith.constant 0 : index
    %23 = vector.load %arg10[%c0_10, %c0_11] : memref<4x1xf32, #tpu.memory_space<vmem>>, vector<4x1xf32>
    %24 = arith.mulf %8, %20 : vector<4x1xf32>
    %25 = arith.subf %23, %24 : vector<4x1xf32>
    %26 = vector.broadcast %25 : vector<4x1xf32> to vector<4x512xf32>
    %27 = arith.addf %22, %26 : vector<4x512xf32>
    %cst_12 = arith.constant 0.000000e+00 : f32
    %28 = vector.broadcast %cst_12 : f32 to vector<4x512xf32>
    %29 = arith.maximumf %27, %28 : vector<4x512xf32>
    %c0_13 = arith.constant 0 : index
    %c0_14 = arith.constant 0 : index
    %30 = vector.load %arg7[%c0_13, %c0_14] : memref<8x4xf32, #tpu.memory_space<vmem>>, vector<8x4xf32>
    %cst_15 = arith.constant dense<0.000000e+00> : vector<8x512xf32>
    %31 = tpu.matmul %30, %4, %cst_15 {dimension_numbers = #tpu.dot_dimension_numbers<[1], [0], [0], [1], [0, 0, 1, 1], [], []>} : vector<8x4xf32>, vector<4x512xf32>, vector<8x512xf32> -> vector<8x512xf32>
    %32 = tpu.concatenate %31, %29 in 0 : vector<8x512xf32>, vector<4x512xf32> -> vector<12x512xf32>
    %c0_16 = arith.constant 0 : index
    %c0_17 = arith.constant 0 : index
    %33 = vector.load %arg1[%c0_16, %c0_17] : memref<256x1024xf32, #tpu.memory_space<vmem>>, vector<256x1024xf32>
    %34 = vector.extract_strided_slice %32 {offsets = [0, 0], sizes = [12, 256], strides = [1, 1]} : vector<12x512xf32> to vector<12x256xf32>
    %cst_18 = arith.constant dense<0.000000e+00> : vector<12x1024xf32>
    %35 = tpu.matmul %34, %33, %cst_18 {dimension_numbers = #tpu.dot_dimension_numbers<[1], [0], [0], [1], [0, 0, 1, 1], [], []>} : vector<12x256xf32>, vector<256x1024xf32>, vector<12x1024xf32> -> vector<12x1024xf32>
    %36 = vector.extract_strided_slice %32 {offsets = [0, 256], sizes = [12, 256], strides = [1, 1]} : vector<12x512xf32> to vector<12x256xf32>
    %cst_19 = arith.constant dense<0.000000e+00> : vector<12x1024xf32>
    %37 = tpu.matmul %36, %33, %cst_19 {dimension_numbers = #tpu.dot_dimension_numbers<[1], [0], [0], [1], [0, 0, 1, 1], [], []>} : vector<12x256xf32>, vector<256x1024xf32>, vector<12x1024xf32> -> vector<12x1024xf32>
    %38 = tpu.concatenate %35, %37 in 1 : vector<12x1024xf32>, vector<12x1024xf32> -> vector<12x2048xf32>
    %39 = vector.extract_strided_slice %38 {offsets = [0, 0], sizes = [8, 2048], strides = [1, 1]} : vector<12x2048xf32> to vector<8x2048xf32>
    %40 = vector.extract_strided_slice %38 {offsets = [8, 0], sizes = [4, 2048], strides = [1, 1]} : vector<12x2048xf32> to vector<4x2048xf32>
    %c0_20 = arith.constant 0 : index
    %c0_21 = arith.constant 0 : index
    %41 = vector.load %arg2[%c0_20, %c0_21] : memref<9x2048xf32, #tpu.memory_space<vmem>>, vector<9x2048xf32>
    %c0_22 = arith.constant 0 : index
    %c0_23 = arith.constant 0 : index
    %c0_24 = arith.constant 0 : index
    %42 = vector.load %arg3[%c0_22, %c0_23, %c0_24] : memref<9x8x4xf32, #tpu.memory_space<vmem>>, vector<9x8x4xf32>
    %cst_25 = arith.constant 0.000000e+00 : f32
    %43 = vector.broadcast %cst_25 : f32 to vector<4x128xf32>
    %44 = tpu.concatenate %43, %40, %43 in 1 : vector<4x128xf32>, vector<4x2048xf32>, vector<4x128xf32> -> vector<4x2304xf32>
    %cst_26 = arith.constant 0.000000e+00 : f32
    %45 = vector.broadcast %cst_26 : f32 to vector<8x2048xf32>
    %46 = vector.extract_strided_slice %44 {offsets = [0, 95], sizes = [4, 2048], strides = [1, 1]} : vector<4x2304xf32> to vector<4x2048xf32>
    %47 = vector.extract_strided_slice %41 {offsets = [0, 0], sizes = [1, 2048], strides = [1, 1]} : vector<9x2048xf32> to vector<1x2048xf32>
    %48 = vector.broadcast %47 : vector<1x2048xf32> to vector<4x2048xf32>
    %49 = arith.mulf %46, %48 : vector<4x2048xf32>
    %50 = vector.extract_strided_slice %42 {offsets = [0, 0, 0], sizes = [1, 8, 4], strides = [1, 1, 1]} : vector<9x8x4xf32> to vector<1x8x4xf32>
    %51 = vector.shape_cast %50 : vector<1x8x4xf32> to vector<8x4xf32>
    %cst_27 = arith.constant dense<0.000000e+00> : vector<8x2048xf32>
    %52 = tpu.matmul %51, %49, %cst_27 {dimension_numbers = #tpu.dot_dimension_numbers<[1], [0], [0], [1], [0, 0, 1, 1], [], []>} : vector<8x4xf32>, vector<4x2048xf32>, vector<8x2048xf32> -> vector<8x2048xf32>
    %53 = arith.addf %45, %52 : vector<8x2048xf32>
    %54 = vector.extract_strided_slice %44 {offsets = [0, 96], sizes = [4, 2048], strides = [1, 1]} : vector<4x2304xf32> to vector<4x2048xf32>
    %55 = vector.extract_strided_slice %41 {offsets = [1, 0], sizes = [1, 2048], strides = [1, 1]} : vector<9x2048xf32> to vector<1x2048xf32>
    %56 = vector.broadcast %55 : vector<1x2048xf32> to vector<4x2048xf32>
    %57 = arith.mulf %54, %56 : vector<4x2048xf32>
    %58 = vector.extract_strided_slice %42 {offsets = [1, 0, 0], sizes = [1, 8, 4], strides = [1, 1, 1]} : vector<9x8x4xf32> to vector<1x8x4xf32>
    %59 = vector.shape_cast %58 : vector<1x8x4xf32> to vector<8x4xf32>
    %cst_28 = arith.constant dense<0.000000e+00> : vector<8x2048xf32>
    %60 = tpu.matmul %59, %57, %cst_28 {dimension_numbers = #tpu.dot_dimension_numbers<[1], [0], [0], [1], [0, 0, 1, 1], [], []>} : vector<8x4xf32>, vector<4x2048xf32>, vector<8x2048xf32> -> vector<8x2048xf32>
    %61 = arith.addf %53, %60 : vector<8x2048xf32>
    %62 = vector.extract_strided_slice %44 {offsets = [0, 97], sizes = [4, 2048], strides = [1, 1]} : vector<4x2304xf32> to vector<4x2048xf32>
    %63 = vector.extract_strided_slice %41 {offsets = [2, 0], sizes = [1, 2048], strides = [1, 1]} : vector<9x2048xf32> to vector<1x2048xf32>
    %64 = vector.broadcast %63 : vector<1x2048xf32> to vector<4x2048xf32>
    %65 = arith.mulf %62, %64 : vector<4x2048xf32>
    %66 = vector.extract_strided_slice %42 {offsets = [2, 0, 0], sizes = [1, 8, 4], strides = [1, 1, 1]} : vector<9x8x4xf32> to vector<1x8x4xf32>
    %67 = vector.shape_cast %66 : vector<1x8x4xf32> to vector<8x4xf32>
    %cst_29 = arith.constant dense<0.000000e+00> : vector<8x2048xf32>
    %68 = tpu.matmul %67, %65, %cst_29 {dimension_numbers = #tpu.dot_dimension_numbers<[1], [0], [0], [1], [0, 0, 1, 1], [], []>} : vector<8x4xf32>, vector<4x2048xf32>, vector<8x2048xf32> -> vector<8x2048xf32>
    %69 = arith.addf %61, %68 : vector<8x2048xf32>
    %70 = vector.extract_strided_slice %44 {offsets = [0, 127], sizes = [4, 2048], strides = [1, 1]} : vector<4x2304xf32> to vector<4x2048xf32>
    %71 = vector.extract_strided_slice %41 {offsets = [3, 0], sizes = [1, 2048], strides = [1, 1]} : vector<9x2048xf32> to vector<1x2048xf32>
    %72 = vector.broadcast %71 : vector<1x2048xf32> to vector<4x2048xf32>
    %73 = arith.mulf %70, %72 : vector<4x2048xf32>
    %74 = vector.extract_strided_slice %42 {offsets = [3, 0, 0], sizes = [1, 8, 4], strides = [1, 1, 1]} : vector<9x8x4xf32> to vector<1x8x4xf32>
    %75 = vector.shape_cast %74 : vector<1x8x4xf32> to vector<8x4xf32>
    %cst_30 = arith.constant dense<0.000000e+00> : vector<8x2048xf32>
    %76 = tpu.matmul %75, %73, %cst_30 {dimension_numbers = #tpu.dot_dimension_numbers<[1], [0], [0], [1], [0, 0, 1, 1], [], []>} : vector<8x4xf32>, vector<4x2048xf32>, vector<8x2048xf32> -> vector<8x2048xf32>
    %77 = arith.addf %69, %76 : vector<8x2048xf32>
    %78 = vector.extract_strided_slice %44 {offsets = [0, 128], sizes = [4, 2048], strides = [1, 1]} : vector<4x2304xf32> to vector<4x2048xf32>
    %79 = vector.extract_strided_slice %42 {offsets = [4, 0, 0], sizes = [1, 8, 4], strides = [1, 1, 1]} : vector<9x8x4xf32> to vector<1x8x4xf32>
    %80 = vector.shape_cast %79 : vector<1x8x4xf32> to vector<8x4xf32>
    %cst_31 = arith.constant dense<0.000000e+00> : vector<8x2048xf32>
    %81 = tpu.matmul %80, %78, %cst_31 {dimension_numbers = #tpu.dot_dimension_numbers<[1], [0], [0], [1], [0, 0, 1, 1], [], []>} : vector<8x4xf32>, vector<4x2048xf32>, vector<8x2048xf32> -> vector<8x2048xf32>
    %82 = arith.addf %77, %81 : vector<8x2048xf32>
    %83 = vector.extract_strided_slice %44 {offsets = [0, 129], sizes = [4, 2048], strides = [1, 1]} : vector<4x2304xf32> to vector<4x2048xf32>
    %84 = vector.extract_strided_slice %41 {offsets = [5, 0], sizes = [1, 2048], strides = [1, 1]} : vector<9x2048xf32> to vector<1x2048xf32>
    %85 = vector.broadcast %84 : vector<1x2048xf32> to vector<4x2048xf32>
    %86 = arith.mulf %83, %85 : vector<4x2048xf32>
    %87 = vector.extract_strided_slice %42 {offsets = [5, 0, 0], sizes = [1, 8, 4], strides = [1, 1, 1]} : vector<9x8x4xf32> to vector<1x8x4xf32>
    %88 = vector.shape_cast %87 : vector<1x8x4xf32> to vector<8x4xf32>
    %cst_32 = arith.constant dense<0.000000e+00> : vector<8x2048xf32>
    %89 = tpu.matmul %88, %86, %cst_32 {dimension_numbers = #tpu.dot_dimension_numbers<[1], [0], [0], [1], [0, 0, 1, 1], [], []>} : vector<8x4xf32>, vector<4x2048xf32>, vector<8x2048xf32> -> vector<8x2048xf32>
    %90 = arith.addf %82, %89 : vector<8x2048xf32>
    %91 = vector.extract_strided_slice %44 {offsets = [0, 159], sizes = [4, 2048], strides = [1, 1]} : vector<4x2304xf32> to vector<4x2048xf32>
    %92 = vector.extract_strided_slice %41 {offsets = [6, 0], sizes = [1, 2048], strides = [1, 1]} : vector<9x2048xf32> to vector<1x2048xf32>
    %93 = vector.broadcast %92 : vector<1x2048xf32> to vector<4x2048xf32>
    %94 = arith.mulf %91, %93 : vector<4x2048xf32>
    %95 = vector.extract_strided_slice %42 {offsets = [6, 0, 0], sizes = [1, 8, 4], strides = [1, 1, 1]} : vector<9x8x4xf32> to vector<1x8x4xf32>
    %96 = vector.shape_cast %95 : vector<1x8x4xf32> to vector<8x4xf32>
    %cst_33 = arith.constant dense<0.000000e+00> : vector<8x2048xf32>
    %97 = tpu.matmul %96, %94, %cst_33 {dimension_numbers = #tpu.dot_dimension_numbers<[1], [0], [0], [1], [0, 0, 1, 1], [], []>} : vector<8x4xf32>, vector<4x2048xf32>, vector<8x2048xf32> -> vector<8x2048xf32>
    %98 = arith.addf %90, %97 : vector<8x2048xf32>
    %99 = vector.extract_strided_slice %44 {offsets = [0, 160], sizes = [4, 2048], strides = [1, 1]} : vector<4x2304xf32> to vector<4x2048xf32>
    %100 = vector.extract_strided_slice %41 {offsets = [7, 0], sizes = [1, 2048], strides = [1, 1]} : vector<9x2048xf32> to vector<1x2048xf32>
    %101 = vector.broadcast %100 : vector<1x2048xf32> to vector<4x2048xf32>
    %102 = arith.mulf %99, %101 : vector<4x2048xf32>
    %103 = vector.extract_strided_slice %42 {offsets = [7, 0, 0], sizes = [1, 8, 4], strides = [1, 1, 1]} : vector<9x8x4xf32> to vector<1x8x4xf32>
    %104 = vector.shape_cast %103 : vector<1x8x4xf32> to vector<8x4xf32>
    %cst_34 = arith.constant dense<0.000000e+00> : vector<8x2048xf32>
    %105 = tpu.matmul %104, %102, %cst_34 {dimension_numbers = #tpu.dot_dimension_numbers<[1], [0], [0], [1], [0, 0, 1, 1], [], []>} : vector<8x4xf32>, vector<4x2048xf32>, vector<8x2048xf32> -> vector<8x2048xf32>
    %106 = arith.addf %98, %105 : vector<8x2048xf32>
    %107 = vector.extract_strided_slice %44 {offsets = [0, 161], sizes = [4, 2048], strides = [1, 1]} : vector<4x2304xf32> to vector<4x2048xf32>
    %108 = vector.extract_strided_slice %41 {offsets = [8, 0], sizes = [1, 2048], strides = [1, 1]} : vector<9x2048xf32> to vector<1x2048xf32>
    %109 = vector.broadcast %108 : vector<1x2048xf32> to vector<4x2048xf32>
    %110 = arith.mulf %107, %109 : vector<4x2048xf32>
    %111 = vector.extract_strided_slice %42 {offsets = [8, 0, 0], sizes = [1, 8, 4], strides = [1, 1, 1]} : vector<9x8x4xf32> to vector<1x8x4xf32>
    %112 = vector.shape_cast %111 : vector<1x8x4xf32> to vector<8x4xf32>
    %cst_35 = arith.constant dense<0.000000e+00> : vector<8x2048xf32>
    %113 = tpu.matmul %112, %110, %cst_35 {dimension_numbers = #tpu.dot_dimension_numbers<[1], [0], [0], [1], [0, 0, 1, 1], [], []>} : vector<8x4xf32>, vector<4x2048xf32>, vector<8x2048xf32> -> vector<8x2048xf32>
    %114 = arith.addf %106, %113 : vector<8x2048xf32>
    %c0_36 = arith.constant 0 : index
    %c0_37 = arith.constant 0 : index
    %115 = vector.load %arg4[%c0_36, %c0_37] : memref<8x1xf32, #tpu.memory_space<vmem>>, vector<8x1xf32>
    %116 = vector.broadcast %115 : vector<8x1xf32> to vector<8x2048xf32>
    %117 = arith.addf %114, %116 : vector<8x2048xf32>
    %cst_38 = arith.constant dense<0.000000e+00> : vector<8xf32>
    %118 = vector.multi_reduction <add>, %117, %cst_38 [1] : vector<8x2048xf32> to vector<8xf32>
    %119 = vector.shape_cast %118 : vector<8xf32> to vector<8x1xf32>
    %cst_39 = arith.constant 4.8828125E-4 : f32
    %120 = vector.broadcast %cst_39 : f32 to vector<8x1xf32>
    %121 = arith.mulf %119, %120 : vector<8x1xf32>
    %122 = vector.broadcast %121 : vector<8x1xf32> to vector<8x2048xf32>
    %123 = arith.subf %117, %122 : vector<8x2048xf32>
    %124 = arith.mulf %123, %123 : vector<8x2048xf32>
    %cst_40 = arith.constant dense<0.000000e+00> : vector<8xf32>
    %125 = vector.multi_reduction <add>, %124, %cst_40 [1] : vector<8x2048xf32> to vector<8xf32>
    %126 = vector.shape_cast %125 : vector<8xf32> to vector<8x1xf32>
    %cst_41 = arith.constant 4.8828125E-4 : f32
    %127 = vector.broadcast %cst_41 : f32 to vector<8x1xf32>
    %128 = arith.mulf %126, %127 : vector<8x1xf32>
    %c0_42 = arith.constant 0 : index
    %c0_43 = arith.constant 0 : index
    %129 = vector.load %arg11[%c0_42, %c0_43] : memref<8x1xf32, #tpu.memory_space<vmem>>, vector<8x1xf32>
    %cst_44 = arith.constant 9.99999974E-6 : f32
    %130 = vector.broadcast %cst_44 : f32 to vector<8x1xf32>
    %131 = arith.addf %128, %130 : vector<8x1xf32>
    %132 = math.rsqrt %131 : vector<8x1xf32>
    %133 = arith.mulf %129, %132 : vector<8x1xf32>
    %134 = vector.broadcast %133 : vector<8x1xf32> to vector<8x2048xf32>
    %135 = arith.mulf %117, %134 : vector<8x2048xf32>
    %c0_45 = arith.constant 0 : index
    %c0_46 = arith.constant 0 : index
    %136 = vector.load %arg12[%c0_45, %c0_46] : memref<8x1xf32, #tpu.memory_space<vmem>>, vector<8x1xf32>
    %137 = arith.mulf %121, %133 : vector<8x1xf32>
    %138 = arith.subf %136, %137 : vector<8x1xf32>
    %139 = vector.broadcast %138 : vector<8x1xf32> to vector<8x2048xf32>
    %140 = arith.addf %135, %139 : vector<8x2048xf32>
    %cst_47 = arith.constant 0.000000e+00 : f32
    %141 = vector.broadcast %cst_47 : f32 to vector<8x2048xf32>
    %142 = arith.maximumf %140, %141 : vector<8x2048xf32>
    %c0_48 = arith.constant 0 : index
    %c0_49 = arith.constant 0 : index
    %c0_50 = arith.constant 0 : index
    %143 = vector.load %arg5[%c0_48, %c0_49, %c0_50] : memref<9x8x8xf32, #tpu.memory_space<vmem>>, vector<9x8x8xf32>
    %cst_51 = arith.constant 0.000000e+00 : f32
    %144 = vector.broadcast %cst_51 : f32 to vector<8x128xf32>
    %145 = tpu.concatenate %144, %142, %144 in 1 : vector<8x128xf32>, vector<8x2048xf32>, vector<8x128xf32> -> vector<8x2304xf32>
    %cst_52 = arith.constant 0.000000e+00 : f32
    %146 = vector.broadcast %cst_52 : f32 to vector<8x2048xf32>
    %147 = vector.extract_strided_slice %145 {offsets = [0, 95], sizes = [8, 2048], strides = [1, 1]} : vector<8x2304xf32> to vector<8x2048xf32>
    %148 = vector.extract_strided_slice %41 {offsets = [0, 0], sizes = [1, 2048], strides = [1, 1]} : vector<9x2048xf32> to vector<1x2048xf32>
    %149 = vector.broadcast %148 : vector<1x2048xf32> to vector<8x2048xf32>
    %150 = arith.mulf %147, %149 : vector<8x2048xf32>
    %151 = vector.extract_strided_slice %143 {offsets = [0, 0, 0], sizes = [1, 8, 8], strides = [1, 1, 1]} : vector<9x8x8xf32> to vector<1x8x8xf32>
    %152 = vector.shape_cast %151 : vector<1x8x8xf32> to vector<8x8xf32>
    %cst_53 = arith.constant dense<0.000000e+00> : vector<8x2048xf32>
    %153 = tpu.matmul %152, %150, %cst_53 {dimension_numbers = #tpu.dot_dimension_numbers<[1], [0], [0], [1], [0, 0, 1, 1], [], []>} : vector<8x8xf32>, vector<8x2048xf32>, vector<8x2048xf32> -> vector<8x2048xf32>
    %154 = arith.addf %146, %153 : vector<8x2048xf32>
    %155 = vector.extract_strided_slice %145 {offsets = [0, 96], sizes = [8, 2048], strides = [1, 1]} : vector<8x2304xf32> to vector<8x2048xf32>
    %156 = vector.extract_strided_slice %41 {offsets = [1, 0], sizes = [1, 2048], strides = [1, 1]} : vector<9x2048xf32> to vector<1x2048xf32>
    %157 = vector.broadcast %156 : vector<1x2048xf32> to vector<8x2048xf32>
    %158 = arith.mulf %155, %157 : vector<8x2048xf32>
    %159 = vector.extract_strided_slice %143 {offsets = [1, 0, 0], sizes = [1, 8, 8], strides = [1, 1, 1]} : vector<9x8x8xf32> to vector<1x8x8xf32>
    %160 = vector.shape_cast %159 : vector<1x8x8xf32> to vector<8x8xf32>
    %cst_54 = arith.constant dense<0.000000e+00> : vector<8x2048xf32>
    %161 = tpu.matmul %160, %158, %cst_54 {dimension_numbers = #tpu.dot_dimension_numbers<[1], [0], [0], [1], [0, 0, 1, 1], [], []>} : vector<8x8xf32>, vector<8x2048xf32>, vector<8x2048xf32> -> vector<8x2048xf32>
    %162 = arith.addf %154, %161 : vector<8x2048xf32>
    %163 = vector.extract_strided_slice %145 {offsets = [0, 97], sizes = [8, 2048], strides = [1, 1]} : vector<8x2304xf32> to vector<8x2048xf32>
    %164 = vector.extract_strided_slice %41 {offsets = [2, 0], sizes = [1, 2048], strides = [1, 1]} : vector<9x2048xf32> to vector<1x2048xf32>
    %165 = vector.broadcast %164 : vector<1x2048xf32> to vector<8x2048xf32>
    %166 = arith.mulf %163, %165 : vector<8x2048xf32>
    %167 = vector.extract_strided_slice %143 {offsets = [2, 0, 0], sizes = [1, 8, 8], strides = [1, 1, 1]} : vector<9x8x8xf32> to vector<1x8x8xf32>
    %168 = vector.shape_cast %167 : vector<1x8x8xf32> to vector<8x8xf32>
    %cst_55 = arith.constant dense<0.000000e+00> : vector<8x2048xf32>
    %169 = tpu.matmul %168, %166, %cst_55 {dimension_numbers = #tpu.dot_dimension_numbers<[1], [0], [0], [1], [0, 0, 1, 1], [], []>} : vector<8x8xf32>, vector<8x2048xf32>, vector<8x2048xf32> -> vector<8x2048xf32>
    %170 = arith.addf %162, %169 : vector<8x2048xf32>
    %171 = vector.extract_strided_slice %145 {offsets = [0, 127], sizes = [8, 2048], strides = [1, 1]} : vector<8x2304xf32> to vector<8x2048xf32>
    %172 = vector.extract_strided_slice %41 {offsets = [3, 0], sizes = [1, 2048], strides = [1, 1]} : vector<9x2048xf32> to vector<1x2048xf32>
    %173 = vector.broadcast %172 : vector<1x2048xf32> to vector<8x2048xf32>
    %174 = arith.mulf %171, %173 : vector<8x2048xf32>
    %175 = vector.extract_strided_slice %143 {offsets = [3, 0, 0], sizes = [1, 8, 8], strides = [1, 1, 1]} : vector<9x8x8xf32> to vector<1x8x8xf32>
    %176 = vector.shape_cast %175 : vector<1x8x8xf32> to vector<8x8xf32>
    %cst_56 = arith.constant dense<0.000000e+00> : vector<8x2048xf32>
    %177 = tpu.matmul %176, %174, %cst_56 {dimension_numbers = #tpu.dot_dimension_numbers<[1], [0], [0], [1], [0, 0, 1, 1], [], []>} : vector<8x8xf32>, vector<8x2048xf32>, vector<8x2048xf32> -> vector<8x2048xf32>
    %178 = arith.addf %170, %177 : vector<8x2048xf32>
    %179 = vector.extract_strided_slice %145 {offsets = [0, 128], sizes = [8, 2048], strides = [1, 1]} : vector<8x2304xf32> to vector<8x2048xf32>
    %180 = vector.extract_strided_slice %143 {offsets = [4, 0, 0], sizes = [1, 8, 8], strides = [1, 1, 1]} : vector<9x8x8xf32> to vector<1x8x8xf32>
    %181 = vector.shape_cast %180 : vector<1x8x8xf32> to vector<8x8xf32>
    %cst_57 = arith.constant dense<0.000000e+00> : vector<8x2048xf32>
    %182 = tpu.matmul %181, %179, %cst_57 {dimension_numbers = #tpu.dot_dimension_numbers<[1], [0], [0], [1], [0, 0, 1, 1], [], []>} : vector<8x8xf32>, vector<8x2048xf32>, vector<8x2048xf32> -> vector<8x2048xf32>
    %183 = arith.addf %178, %182 : vector<8x2048xf32>
    %184 = vector.extract_strided_slice %145 {offsets = [0, 129], sizes = [8, 2048], strides = [1, 1]} : vector<8x2304xf32> to vector<8x2048xf32>
    %185 = vector.extract_strided_slice %41 {offsets = [5, 0], sizes = [1, 2048], strides = [1, 1]} : vector<9x2048xf32> to vector<1x2048xf32>
    %186 = vector.broadcast %185 : vector<1x2048xf32> to vector<8x2048xf32>
    %187 = arith.mulf %184, %186 : vector<8x2048xf32>
    %188 = vector.extract_strided_slice %143 {offsets = [5, 0, 0], sizes = [1, 8, 8], strides = [1, 1, 1]} : vector<9x8x8xf32> to vector<1x8x8xf32>
    %189 = vector.shape_cast %188 : vector<1x8x8xf32> to vector<8x8xf32>
    %cst_58 = arith.constant dense<0.000000e+00> : vector<8x2048xf32>
    %190 = tpu.matmul %189, %187, %cst_58 {dimension_numbers = #tpu.dot_dimension_numbers<[1], [0], [0], [1], [0, 0, 1, 1], [], []>} : vector<8x8xf32>, vector<8x2048xf32>, vector<8x2048xf32> -> vector<8x2048xf32>
    %191 = arith.addf %183, %190 : vector<8x2048xf32>
    %192 = vector.extract_strided_slice %145 {offsets = [0, 159], sizes = [8, 2048], strides = [1, 1]} : vector<8x2304xf32> to vector<8x2048xf32>
    %193 = vector.extract_strided_slice %41 {offsets = [6, 0], sizes = [1, 2048], strides = [1, 1]} : vector<9x2048xf32> to vector<1x2048xf32>
    %194 = vector.broadcast %193 : vector<1x2048xf32> to vector<8x2048xf32>
    %195 = arith.mulf %192, %194 : vector<8x2048xf32>
    %196 = vector.extract_strided_slice %143 {offsets = [6, 0, 0], sizes = [1, 8, 8], strides = [1, 1, 1]} : vector<9x8x8xf32> to vector<1x8x8xf32>
    %197 = vector.shape_cast %196 : vector<1x8x8xf32> to vector<8x8xf32>
    %cst_59 = arith.constant dense<0.000000e+00> : vector<8x2048xf32>
    %198 = tpu.matmul %197, %195, %cst_59 {dimension_numbers = #tpu.dot_dimension_numbers<[1], [0], [0], [1], [0, 0, 1, 1], [], []>} : vector<8x8xf32>, vector<8x2048xf32>, vector<8x2048xf32> -> vector<8x2048xf32>
    %199 = arith.addf %191, %198 : vector<8x2048xf32>
    %200 = vector.extract_strided_slice %145 {offsets = [0, 160], sizes = [8, 2048], strides = [1, 1]} : vector<8x2304xf32> to vector<8x2048xf32>
    %201 = vector.extract_strided_slice %41 {offsets = [7, 0], sizes = [1, 2048], strides = [1, 1]} : vector<9x2048xf32> to vector<1x2048xf32>
    %202 = vector.broadcast %201 : vector<1x2048xf32> to vector<8x2048xf32>
    %203 = arith.mulf %200, %202 : vector<8x2048xf32>
    %204 = vector.extract_strided_slice %143 {offsets = [7, 0, 0], sizes = [1, 8, 8], strides = [1, 1, 1]} : vector<9x8x8xf32> to vector<1x8x8xf32>
    %205 = vector.shape_cast %204 : vector<1x8x8xf32> to vector<8x8xf32>
    %cst_60 = arith.constant dense<0.000000e+00> : vector<8x2048xf32>
    %206 = tpu.matmul %205, %203, %cst_60 {dimension_numbers = #tpu.dot_dimension_numbers<[1], [0], [0], [1], [0, 0, 1, 1], [], []>} : vector<8x8xf32>, vector<8x2048xf32>, vector<8x2048xf32> -> vector<8x2048xf32>
    %207 = arith.addf %199, %206 : vector<8x2048xf32>
    %208 = vector.extract_strided_slice %145 {offsets = [0, 161], sizes = [8, 2048], strides = [1, 1]} : vector<8x2304xf32> to vector<8x2048xf32>
    %209 = vector.extract_strided_slice %41 {offsets = [8, 0], sizes = [1, 2048], strides = [1, 1]} : vector<9x2048xf32> to vector<1x2048xf32>
    %210 = vector.broadcast %209 : vector<1x2048xf32> to vector<8x2048xf32>
    %211 = arith.mulf %208, %210 : vector<8x2048xf32>
    %212 = vector.extract_strided_slice %143 {offsets = [8, 0, 0], sizes = [1, 8, 8], strides = [1, 1, 1]} : vector<9x8x8xf32> to vector<1x8x8xf32>
    %213 = vector.shape_cast %212 : vector<1x8x8xf32> to vector<8x8xf32>
    %cst_61 = arith.constant dense<0.000000e+00> : vector<8x2048xf32>
    %214 = tpu.matmul %213, %211, %cst_61 {dimension_numbers = #tpu.dot_dimension_numbers<[1], [0], [0], [1], [0, 0, 1, 1], [], []>} : vector<8x8xf32>, vector<8x2048xf32>, vector<8x2048xf32> -> vector<8x2048xf32>
    %215 = arith.addf %207, %214 : vector<8x2048xf32>
    %c0_62 = arith.constant 0 : index
    %c0_63 = arith.constant 0 : index
    %216 = vector.load %arg6[%c0_62, %c0_63] : memref<8x1xf32, #tpu.memory_space<vmem>>, vector<8x1xf32>
    %217 = vector.broadcast %216 : vector<8x1xf32> to vector<8x2048xf32>
    %218 = arith.addf %215, %217 : vector<8x2048xf32>
    %c0_64 = arith.constant 0 : index
    %c0_65 = arith.constant 0 : index
    %219 = vector.load %arg8[%c0_64, %c0_65] : memref<8x1xf32, #tpu.memory_space<vmem>>, vector<8x1xf32>
    %220 = vector.broadcast %219 : vector<8x1xf32> to vector<8x2048xf32>
    %221 = arith.addf %39, %220 : vector<8x2048xf32>
    %222 = arith.addf %218, %221 : vector<8x2048xf32>
    %223 = vector.extract_strided_slice %222 {offsets = [0, 0], sizes = [8, 1024], strides = [1, 1]} : vector<8x2048xf32> to vector<8x1024xf32>
    %c0_66 = arith.constant 0 : index
    %c0_67 = arith.constant 0 : index
    %c0_68 = arith.constant 0 : index
    %224 = vector.load %arg13[%c0_66, %c0_67, %c0_68] : memref<2x8x1024xf32, #tpu.memory_space<vmem>>, vector<1x8x1024xf32>
    %225 = vector.shape_cast %224 : vector<1x8x1024xf32> to vector<8x1024xf32>
    %226 = vector.shape_cast %223 : vector<8x1024xf32> to vector<1x8x1024xf32>
    tpu.vector_store %arg13[%c0_66, %c0_67, %c0_68], %226 {strides = array<i32>} : memref<2x8x1024xf32, #tpu.memory_space<vmem>>, vector<1x8x1024xf32>,
    %227 = vector.extract_strided_slice %222 {offsets = [0, 1024], sizes = [8, 1024], strides = [1, 1]} : vector<8x2048xf32> to vector<8x1024xf32>
    %c1_69 = arith.constant 1 : index
    %c0_70 = arith.constant 0 : index
    %c0_71 = arith.constant 0 : index
    %228 = vector.load %arg13[%c1_69, %c0_70, %c0_71] : memref<2x8x1024xf32, #tpu.memory_space<vmem>>, vector<1x8x1024xf32>
    %229 = vector.shape_cast %228 : vector<1x8x1024xf32> to vector<8x1024xf32>
    %230 = vector.shape_cast %227 : vector<8x1024xf32> to vector<1x8x1024xf32>
    tpu.vector_store %arg13[%c1_69, %c0_70, %c0_71], %230 {strides = array<i32>} : memref<2x8x1024xf32, #tpu.memory_space<vmem>>, vector<1x8x1024xf32>,
    return
  }
}

</mosaic_0001>

<bundles_post_ra>
// kernel: gblock_forward.1
= control target key start
LH: loop header
LB: loop body
LE: loop exit
PB: predicated region body
PF: predicated region fallthrough
CT: control target
= control target key end

     0   :  { %18 = vsyncpa [#allocation3], 0  ;;  %s16203_s0 = inlined_call_operand.vmem [shape: f32[2,4,256], index: 0, kind: input, shape index: {}]   ;;  %s16204_s1 = inlined_call_operand.hbm [shape: f32[256,1024], index: 1, kind: input, shape index: {}]   ;;  %s16205_s2 = inlined_call_operand.hbm [shape: f32[9,2048], index: 2, kind: input, shape index: {}]   ;;  %s16206_s3 = inlined_call_operand.vmem [shape: f32[9,8,4], index: 3, kind: input, shape index: {}]   ;;  %s16207_s4 = inlined_call_operand.vmem [shape: f32[8,1], index: 4, kind: input, shape index: {}]   ;;  %s16208_s5 = inlined_call_operand.vmem [shape: f32[9,8,8], index: 5, kind: input, shape index: {}]   ;;  %s16209_s6 = inlined_call_operand.vmem [shape: f32[8,1], index: 6, kind: input, shape index: {}]   ;;  %s16210_s7 = inlined_call_operand.vmem [shape: f32[8,4], index: 7, kind: input, shape index: {}]   ;;  %s16211_s8 = inlined_call_operand.vmem [shape: f32[8,1], index: 8, kind: input, shape index: {}]   ;;  %s16212_s9 = inlined_call_operand.vmem [shape: f32[4,1], index: 9, kind: input, shape index: {}]   ;;  %s16213_s10 = inlined_call_operand.vmem [shape: f32[4,1], index: 10, kind: input, shape index: {}]   ;;  %s16214_s11 = inlined_call_operand.vmem [shape: f32[8,1], index: 11, kind: input, shape index: {}]   ;;  %s16215_s12 = inlined_call_operand.vmem [shape: f32[8,1], index: 12, kind: input, shape index: {}]   ;;  %s16216_s13 = inlined_call_operand.vmem [shape: f32[2,8,1024], index: 13, kind: output, shape index: {}]  }
   0x1   :  { %s26_s27 = sshll.u32 %s16204_s1, 4  ;;  %s27_s27 = int_to_ptr.hbm [resolvable:$true] %s26_s27 }
   0x2   :  { %19 = vsyncpa [#allocation5], 0  ;;  %s11116_s28 = smov [#allocation2]   ;;  %s39_s15 = sshll.u32 %s16205_s2, 4  ;;  %s40_s15 = int_to_ptr.hbm [resolvable:$true] %s39_s15 }
   0x3   :  { %s28_s29 = sshll.u32 %s11116_s28, 4  ;;  %s11117_s16 = smov 1024   ;;  %s29_s29 = int_to_ptr.vmem [resolvable:$true] %s28_s29 }
   0x4   :  { %s11118_s17 = smov 64   ;;  %s11119_s18 = smov [#allocation4]  }
   0x5   :  { %34 = dma.hbm_to_vmem [thread:$0]  %s27_s27, 32768, %s29_s29, [#allocation3], %s11117_s16, %s11117_s16, %s11118_s17  }
   0x6   :  { %s41_s19 = sshll.u32 %s11119_s18, 4  ;;  %s11120_s20 = smov 2048   ;;  %s42_s19 = int_to_ptr.vmem [resolvable:$true] %s41_s19 }
   0x7   :  { %s11121_s21 = smov 128  }
   0x8   :  { %47 = dma.hbm_to_vmem [thread:$0]  %s40_s15, 4096, %s42_s19, [#allocation5], %s11120_s20, %s11120_s20, %s11121_s21  }
   0x9   :  { %11112 = dma.done.wait [#allocation3], 32768  }
   0xa   :  { %11113 = vsyncadd [#allocation3], 4294934528 }
   0xb   :  { %11114 = dma.done.wait [#allocation5], 4096  }
   0xc   :  { %11115 = vsyncadd [#allocation5], 4294963200  ;;  %v11207_v0 = vld [vmem:[#allocation4 + $0x18] sm:$0xff]  ;;  %v11209_v1 = vld [vmem:[#allocation4 + $0x10] sm:$0xff]  ;;  %s11122_s1 = smov 95   ;;  %vm91_vm0 = vcmask 1043456  }
   0xd   :  { %v11211_v2 = vld [vmem:[#allocation4] sm:$0xff]  ;;  %v1287_v3 = vperm.slane %v11207_v0, 0  ;;  %v1286_v4 = vperm.slane %v11209_v1, 0  ;;  %v11216_v6 = vld [vmem:[#allocation4 + $0x28] sm:$0xff]  ;;  %v76_v9 = vld [vmem:[%s16203_s0] sm:$0xff]  ;;  %v1401_v38 = vperm.slane %v11207_v0, 1 }
   0xe   :  { %v1284_v5 = vperm.slane %v11211_v2, 0  ;;  %v11218_v7 = vld [vmem:[#allocation4 + $0x48] sm:$0xff]  ;;  %v1289_v10 = vperm.slane %v11216_v6, 0  ;;  %80 = vst [vmem:[#allocation1] ss:$2 sm:$0xff] %v76_v9  ;;  %v10099_v13 = vld [vmem:[%s16203_s0 + $0x8] sm:$0xff] }
   0xf   :  { %v11220_v8 = vld [vmem:[#allocation4 + $0x8] sm:$0xff]  ;;  %1322 = vrot.lane.b32.xlu1 %v1287_v3, %s11122_s1  ;;  %1320 = vrot.lane.b32.xlu0 %v1286_v4, %s11122_s1  ;;  %v1293_v11 = vperm.slane %v11218_v7, 0  ;;  %v11241_v16 = vld [vmem:[#allocation4 + $0x38] sm:$0xff]  ;;  %v11245_v17 = vld [vmem:[#allocation4 + $0x20] sm:$0xff]  ;;  %v1398_v33 = vperm.slane %v11211_v2, 1  ;;  %s11123_s0 = smov 96  }
  0x10   :  { %1316 = vrot.lane.b32.xlu2 %v1284_v5, %s11122_s1  ;;  %v1285_v12 = vperm.slane %v11220_v8, 0  ;;  %v1291_v18 = vperm.slane %v11241_v16, 0  ;;  %v1288_v19 = vperm.slane %v11245_v17, 0  ;;  %v11255_v21 = vld [vmem:[#allocation4 + $0x50] sm:$0xff]  ;;  %v11269_v26 = vld [vmem:[#allocation4 + $0x68] sm:$0xff]  ;;  %v11271_v27 = vld [vmem:[#allocation4 + $0x40] sm:$0xff] }
  0x11   :  { %v11261_v23 = vld [vmem:[#allocation4 + $0x30] sm:$0xff]  ;;  %v1294_v24 = vperm.slane %v11255_v21, 0  ;;  %v1297_v28 = vperm.slane %v11269_v26, 0  ;;  %v1292_v29 = vperm.slane %v11271_v27, 0  ;;  %v11290_v40 = vld [vmem:[#allocation4 + $0x58] sm:$0xff]  ;;  %v11294_v42 = vld [vmem:[#allocation4 + $0x60] sm:$0xff] }
  0x12   :  { %v1290_v25 = vperm.slane %v11261_v23, 0  ;;  %v1404_v39 = vperm.slane %v11261_v23, 1  ;;  %v1295_v41 = vperm.slane %v11290_v40, 0  ;;  %v1296_v43 = vperm.slane %v11294_v42, 0  ;;  %v11299_v45 = vld [vmem:[#allocation4 + $0x70] sm:$0xff]  ;;  %v11304_v47 = vld [vmem:[#allocation4 + $0x78] sm:$0xff] }
  0x13   :  { %v1407_v44 = vperm.slane %v11218_v7, 1  ;;  %v1298_v46 = vperm.slane %v11299_v45, 0  ;;  %v1299_v48 = vperm.slane %v11304_v47, 0  ;;  %v1410_v49 = vperm.slane %v11294_v42, 1  ;;  %s11124_s25 = smov 97   ;;  %s11125_s26 = smov 33  }
  0x14   :  { %v1399_v50 = vperm.slane %v11220_v8, 1  ;;  %v1400_v51 = vperm.slane %v11209_v1, 1  ;;  %v1413_v52 = vperm.slane %v11304_v47, 1  ;;  %v1402_v53 = vperm.slane %v11245_v17, 1  ;;  %s11126_s27 = smov 127   ;;  %s11127_s28 = smov 32  }
  0x15   :  { %v11236_v14 = vld.sshfl [vmem:[#allocation1] sm:$0xff pattern:$0x75316420]  ;;  %v11238_v15 = vld.sshfl [vmem:[#allocation1 + $0x8] sm:$0xff pattern:$0x75316420] }
  0x16   :  { %86 = vst [vmem:[#allocation1] ss:$2 sm:$0xff] %v10099_v13  ;;  %10100 = vmatpush.msk.msra.mxu0 %vm91_vm0, %v11236_v14  ;;  %10102 = vmatpush.msk.msra.mxu1 %vm91_vm0, %v11238_v15  ;;  %v92_v30 = vsel %vm91_vm0, %v11236_v14, 0.0  ;;  %v93_v31 = vsel %vm91_vm0, %v11238_v15, 0.0  ;;  %v1403_v54 = vperm.slane %v11216_v6, 1  ;;  %v2360_v55 = vperm.slane %v11209_v1, 2 }
  0x17   :  { %1326 = vrot.lane.b32.xlu1 %v1289_v10, %s11122_s1  ;;  %1334 = vrot.lane.b32.xlu0 %v1293_v11, %s11122_s1  ;;  %v94_v32 = vadd.f32 %v93_v31, %v92_v30  ;;  %v1405_v56 = vperm.slane %v11241_v16, 1  ;;  %v1406_v57 = vperm.slane %v11271_v27, 1  ;;  %v2362_v58 = vperm.slane %v11245_v17, 2  ;;  %s11128_s29 = smov 31  }
  0x18   :  { %1318 = vrot.lane.b32.xlu2 %v1285_v12, %s11122_s1  ;;  %v1408_v59 = vperm.slane %v11255_v21, 1  ;;  %v1409_v60 = vperm.slane %v11290_v40, 1  ;;  %v2364_v61 = vperm.slane %v11261_v23, 2  ;;  %v1411_v62 = vperm.slane %v11269_v26, 1 }
  0x19   :  { %v1412_v63 = vperm.slane %v11299_v45, 1  ;;  %v2359_v3 = vperm.slane %v11220_v8, 2  ;;  %v2358_v4 = vperm.slane %v11211_v2, 2  ;;  %v2363_v5 = vperm.slane %v11216_v6, 2 }
  0x1a   :  { %vm159_vm1 = vcmask 31744   ;;  %vm1462_vm5 = vcmask 785408   ;;  %vm1348_vm6 = vcmask 777216   ;;  %vm2422_vm7 = vcmask 793600  }
  0x1b   :  { %vm2975_vm8 = vcmask 1039360   ;;  %vm3076_vm9 = vcmask 7168   ;;  %vm1563_vm10 = vcmask 261120   ;;  %vm2523_vm11 = vcmask 252928  }
  0x1c   :  { %vm1986_vm12 = vcmask 269312  }
  0x1d   :  { %v11252_v20 = vld.sshfl [vmem:[#allocation1] sm:$0xff pattern:$0x75316420]  ;;  %v11257_v22 = vld.sshfl [vmem:[#allocation1 + $0x8] sm:$0xff pattern:$0x75316420] }
  0x1e   :  { %10104 = vmatpush.msk.msra.mxu2 %vm91_vm0, %v11252_v20  ;;  %10106 = vmatpush.msk.msra.mxu3 %vm91_vm0, %v11257_v22  ;;  %v95_v34 = vsel %vm91_vm0, %v11252_v20, 0.0  ;;  %v97_v36 = vsel %vm91_vm0, %v11257_v22, 0.0 }
  0x1f   :  { %1330 = vrot.lane.b32.xlu1 %v1291_v18, %s11122_s1  ;;  %v96_v35 = vadd.f32 %v95_v34, %v94_v32 }
  0x20   :  { %1324 = vrot.lane.b32.xlu2 %v1288_v19, %s11122_s1 }
  0x21   :  { %v98_v37 = vadd.f32 %v97_v36, %v96_v35 }
  0x27   :  { %1336 = vrot.lane.b32.xlu1 %v1294_v24, %s11122_s1 }
  0x28   :  { %1328 = vrot.lane.b32.xlu2 %v1290_v25, %s11122_s1 }
  0x2f   :  { %1342 = vrot.lane.b32.xlu1 %v1297_v28, %s11122_s1 }
  0x30   :  { %1332 = vrot.lane.b32.xlu2 %v1292_v29, %s11122_s1 }
  0x37   :  { %1430 = vrot.lane.b32.xlu1 %v1398_v33, %s11123_s0 }
  0x38   :  { %1338 = vrot.lane.b32.xlu2 %v1295_v41, %s11122_s1 }
  0x3f   :  { %1436 = vrot.lane.b32.xlu1 %v1401_v38, %s11123_s0 }
  0x40   :  { %1344 = vrot.lane.b32.xlu2 %v1298_v46, %s11122_s1 }
  0x41   :  { %99 = vadd.xlane.f32.xlu0 %v98_v37 }
  0x47   :  { %1442 = vrot.lane.b32.xlu1 %v1404_v39, %s11123_s0 }
  0x48   :  { %1432 = vrot.lane.b32.xlu2 %v1399_v50, %s11123_s0  ;;  %v2372_v50 = vperm.slane %v11299_v45, 2 }
  0x4f   :  { %1448 = vrot.lane.b32.xlu1 %v1407_v44, %s11123_s0 }
  0x50   :  { %1438 = vrot.lane.b32.xlu2 %v1402_v53, %s11123_s0  ;;  %v2912_v53 = vperm.slane %v11220_v8, 3 }
  0x55   :  { %1340 = vrot.lane.b32.xlu0 %v1296_v43, %s11122_s1 }
  0x57   :  { %1454 = vrot.lane.b32.xlu1 %v1410_v49, %s11123_s0 }
  0x58   :  { %1444 = vrot.lane.b32.xlu2 %v1405_v56, %s11123_s0 }
  0x5d   :  { %1346 = vrot.lane.b32.xlu0 %v1299_v48, %s11122_s1  ;;  %v2367_v48 = vperm.slane %v11218_v7, 2 }
  0x5f   :  { %1460 = vrot.lane.b32.xlu1 %v1413_v52, %s11123_s0 }
  0x60   :  { %1450 = vrot.lane.b32.xlu2 %v1408_v59, %s11123_s0  ;;  %v2365_v59 = vperm.slane %v11241_v16, 2 }
  0x65   :  { %1434 = vrot.lane.b32.xlu0 %v1400_v51, %s11123_s0 }
  0x67   :  { %2394 = vrot.lane.b32.xlu1 %v2360_v55, %s11124_s25 }
  0x68   :  { %1456 = vrot.lane.b32.xlu2 %v1411_v62, %s11123_s0  ;;  %v2373_v62 = vperm.slane %v11304_v47, 2 }
  0x6a   :  { %v11345_v9 = vpop.permute.xlu2 %1316 }
  0x6b   :  { %16532 = vst [vmem:[#allocation8_spill] sm:$0xff] %v11345_v9  ;;  %v1381_v10 = vmul.f32 0.0, %v11345_v9  ;;  %v11711_v9 = vld [vmem:[#allocation2 + $0x4e8] sm:$0xff] }
  0x6c   :  { %16597 = vst [vmem:[#allocation73_spill] sm:$0xff] %v11711_v9 }
  0x6d   :  { %1440 = vrot.lane.b32.xlu0 %v1403_v54, %s11123_s0  ;;  %v2361_v54 = vperm.slane %v11207_v0, 2 }
  0x6f   :  { %2398 = vrot.lane.b32.xlu1 %v2362_v58, %s11124_s25  ;;  %v2915_v58 = vperm.slane %v11245_v17, 3  ;;  %v2916_v17 = vperm.slane %v11216_v6, 3  ;;  %v2369_v6 = vperm.slane %v11290_v40, 2 }
  0x70   :  { %2396 = vrot.lane.b32.xlu2 %v2361_v54, %s11124_s25 }
  0x72   :  { %v11391_v55 = vpop.permute.xlu2 %1318 }
  0x73   :  { %16544 = vst [vmem:[#allocation20_spill] sm:$0xff] %v11391_v55  ;;  %v11713_v55 = vld [vmem:[#allocation4 + $0x30] sm:$0xff] }
  0x75   :  { %1446 = vrot.lane.b32.xlu0 %v1406_v57, %s11123_s0 }
  0x77   :  { %2402 = vrot.lane.b32.xlu1 %v2364_v61, %s11124_s25 }
  0x78   :  { %2404 = vrot.lane.b32.xlu2 %v2365_v59, %s11124_s25 }
  0x7a   :  { %v11404_v8 = vpop.permute.xlu2 %1324 }
  0x7b   :  { %16547 = vst [vmem:[#allocation23_spill] sm:$0xff] %v11404_v8 }
  0x7d   :  { %1452 = vrot.lane.b32.xlu0 %v1409_v60, %s11123_s0  ;;  %v2368_v60 = vperm.slane %v11255_v21, 2 }
  0x7f   :  { %2410 = vrot.lane.b32.xlu1 %v2368_v60, %s11124_s25 }
  0x81   :  { %v11348_v11 = vpop.permute.xlu0 %1320  ;;  %v11371_v43 = vpop.permute.xlu1 %1322 }
  0x82   :  { %16533 = vst [vmem:[#allocation9_spill] sm:$0xff] %v11348_v11 }
  0x83   :  { %16537 = vst [vmem:[#allocation13_spill] sm:$0xff] %v11371_v43  ;;  %v10904_v43 = vld [vmem:[#allocation4 + $0x68] sm:$0xff] }
  0x84   :  { %v2924_v8 = vperm.slane %v10904_v43, 3  ;;  %v3864_v11 = vperm.slane %v10904_v43, 5  ;;  %v11699_v43 = vld [vmem:[#allocation2 + $0x528] sm:$0xff] }
  0x85   :  { %1458 = vrot.lane.b32.xlu0 %v1412_v63, %s11123_s0  ;;  %v2366_v63 = vperm.slane %v11271_v27, 2  ;;  %16593 = vst [vmem:[#allocation69_spill] sm:$0xff] %v11699_v43 }
  0x87   :  { %2420 = vrot.lane.b32.xlu1 %v2373_v62, %s11124_s25  ;;  %2406 = vrot.lane.b32.xlu2 %v2366_v63, %s11124_s25 }
  0x89   :  { %v11351_v12 = vpop.permute.xlu0 %1334  ;;  %v11375_v46 = vpop.permute.xlu1 %1326 }
  0x8a   :  { %16534 = vst [vmem:[#allocation10_spill] sm:$0xff] %v11351_v12  ;;  %v11627_v12 = vld [vmem:[#allocation2 + $0x668] sm:$0xff] }
  0x8b   :  { %16539 = vst [vmem:[#allocation15_spill] sm:$0xff] %v11375_v46  ;;  %v11659_v46 = vld [vmem:[#allocation2 + $0x5e8] sm:$0xff] }
  0x8d   :  { %2392 = vrot.lane.b32.xlu0 %v2359_v3, %s11124_s25 }
  0x91   :  { %v11384_v51 = vpop.permute.xlu1 %1330 }
  0x92   :  { %16542 = vst [vmem:[#allocation18_spill] sm:$0xff] %v11384_v51  ;;  %v11640_v51 = vld [vmem:[#allocation2 + $0x228] sm:$0xff] }
  0x95   :  { %2390 = vrot.lane.b32.xlu0 %v2358_v4, %s11124_s25  ;;  %v11417_v4 = vpop.permute.xlu2 %1328 }
  0x96   :  { %16550 = vst [vmem:[#allocation26_spill] sm:$0xff] %v11417_v4  ;;  %v11654_v4 = vld [vmem:[#allocation4 + $0x10] sm:$0xff] }
  0x99   :  { %v11394_v56 = vpop.permute.xlu1 %1336 }
  0x9a   :  { %16545 = vst [vmem:[#allocation21_spill] sm:$0xff] %v11394_v56  ;;  %v11629_v56 = vld [vmem:[#allocation4 + $0x50] sm:$0xff] }
  0x9d   :  { %2400 = vrot.lane.b32.xlu0 %v2363_v5, %s11124_s25 }
  0xa1   :  { %v11406_v61 = vpop.permute.xlu1 %1342 }
  0xa2   :  { %16548 = vst [vmem:[#allocation24_spill] sm:$0xff] %v11406_v61  ;;  %v11581_v61 = vld [vmem:[#allocation2 + $0x728] sm:$0xff] }
  0xa5   :  { %1952 = vrot.lane.b32.xlu0 %v1381_v10, %s11125_s26 }
  0xa9   :  { %v11419_v5 = vpop.permute.xlu1 %1430 }
  0xaa   :  { %16551 = vst [vmem:[#allocation27_spill] sm:$0xff] %v11419_v5  ;;  %v1495_v10 = vmul.f32 0.0, %v11419_v5  ;;  %v3857_v5 = vperm.slane %v11713_v55, 5 }
  0xac   :  { %1529 = vrot.lane.b32.xlu2 %v1495_v10, %s11127_s28  ;;  %v120_v10 = vld [vmem:[%s16212_s9] sm:$0xf]  ;;  %s11130_s9 = smov 1  }
  0xb1   :  { %v11476_v59 = vpop.permute.xlu1 %1436 }
  0xb2   :  { %16562 = vst [vmem:[#allocation38_spill] sm:$0xff] %v11476_v59  ;;  %v11697_v59 = vld [vmem:[#allocation2 + $0x128] sm:$0xff] }
  0xb3   :  { %16592 = vst [vmem:[#allocation68_spill] sm:$0xff] %v11697_v59 }
  0xb4   :  { %v100_v13 = vpop.xlane.xlu0 %99  ;;  %2412 = vrot.lane.b32.xlu2 %v2369_v6, %s11124_s25 }
  0xb5   :  { %v11353_v18 = vmul.f32 0.001953125, %v100_v13 }
  0xb7   :  { %v102_v19 = vsub.f32 %v11236_v14, %v11353_v18  ;;  %v103_v24 = vsub.f32 %v11238_v15, %v11353_v18  ;;  %v104_v29 = vsub.f32 %v11252_v20, %v11353_v18  ;;  %v105_v32 = vsub.f32 %v11257_v22, %v11353_v18 }
  0xb9   :  { %v106_v25 = vmul.f32 %v102_v19, %v102_v19  ;;  %v107_v28 = vmul.f32 %v103_v24, %v103_v24  ;;  %v108_v33 = vmul.f32 %v104_v29, %v104_v29  ;;  %v109_v36 = vmul.f32 %v105_v32, %v105_v32  ;;  %v11428_v24 = vpop.permute.xlu2 %1332  ;;  %v158_v32 = vld [vmem:[%s16210_s7] sm:$0xff] }
  0xba   :  { %16553 = vst [vmem:[#allocation29_spill] sm:$0xff] %v11428_v24  ;;  %10101 = vmatmul.msk.f32.vlgmr.msra.gmra.mxu0 %vm159_vm1, %v158_v32  ;;  %10103 = vmatmul.msk.f32.vlgmr.msra.gmra.mxu1 %vm159_vm1, %v158_v32 }
  0xbb   :  { %v110_v30 = vsel %vm91_vm0, %v106_v25, 0.0  ;;  %v111_v31 = vsel %vm91_vm0, %v107_v28, 0.0  ;;  %v113_v37 = vsel %vm91_vm0, %v108_v33, 0.0  ;;  %v115_v39 = vsel %vm91_vm0, %v109_v36, 0.0  ;;  %10105 = vmatmul.msk.f32.vlgmr.msra.gmra.mxu2 %vm159_vm1, %v158_v32  ;;  %10107 = vmatmul.msk.f32.vlgmr.msra.gmra.mxu3 %vm159_vm1, %v158_v32 }
  0xbc   :  { %v112_v34 = vadd.f32 %v111_v31, %v110_v30  ;;  %v2370_v25 = vperm.slane %v11294_v42, 2  ;;  %v2913_v30 = vperm.slane %v11209_v1, 3  ;;  %v2371_v31 = vperm.slane %v11269_v26, 2 }
  0xbd   :  { %v2917_v1 = vperm.slane %v11261_v23, 3  ;;  %v2914_v26 = vperm.slane %v11207_v0, 3  ;;  %v2911_v36 = vperm.slane %v11211_v2, 3 }
  0xbe   :  { %v114_v38 = vadd.f32 %v113_v37, %v112_v34  ;;  %2414 = vrot.lane.b32.xlu2 %v2370_v25, %s11124_s25  ;;  %2947 = vrot.lane.b32.xlu1 %v2913_v30, %s11126_s27  ;;  %v2921_v34 = vperm.slane %v11255_v21, 3  ;;  %v2920_v37 = vperm.slane %v11218_v7, 3  ;;  %v2919_v7 = vperm.slane %v11271_v27, 3 }
  0xc0   :  { %v116_v41 = vadd.f32 %v115_v39, %v114_v38  ;;  %v11129_v38 = vmov 0   ;;  %v2918_v39 = vperm.slane %v11241_v16, 3 }
  0xc1   :  { %v11432_v28 = vpop.permute.xlu2 %1338  ;;  %10563 = vset.pattern.permute.xlu1 %v11129_v38  ;;  %10564 = vset.pattern.permute.xlu0 %v11129_v38  ;;  %v491_v38 = vld [vmem:[#allocation2 + $0x780] sm:$0xff] }
  0xc2   :  { %16554 = vst [vmem:[#allocation30_spill] sm:$0xff] %v11432_v28  ;;  %v11604_v28 = vld [vmem:[#allocation2 + $0x6a0] sm:$0xff] }
  0xc6   :  { %2416 = vrot.lane.b32.xlu2 %v2371_v31, %s11124_s25  ;;  %2955 = vrot.lane.b32.xlu1 %v2917_v1, %s11126_s27  ;;  %v142_v31 = vld [vmem:[%s16213_s10] sm:$0xf]  ;;  %v371_v1 = vld [vmem:[#allocation2 + $0x3c0] sm:$0xff] }
  0xc7   :  { %v11365_v35 = vpop.permute.xlu0 %1340  ;;  %507 = vmatpush.msrb.mxu0 %v371_v1  ;;  %v459_v1 = vld [vmem:[#allocation2 + $0x680] sm:$0xff] }
  0xc8   :  { %16535 = vst [vmem:[#allocation11_spill] sm:$0xff] %v11365_v35  ;;  %v11606_v35 = vld [vmem:[#allocation2 + $0x2a8] sm:$0xff] }
  0xc9   :  { %v11435_v29 = vpop.permute.xlu2 %1344 }
  0xca   :  { %16555 = vst [vmem:[#allocation31_spill] sm:$0xff] %v11435_v29 }
  0xce   :  { %2949 = vrot.lane.b32.xlu2 %v2914_v26, %s11126_s27  ;;  %2963 = vrot.lane.b32.xlu1 %v2921_v34, %s11126_s27  ;;  %v499_v26 = vld [vmem:[#allocation2 + $0x7c0] sm:$0xff]  ;;  %v372_v34 = vld [vmem:[#allocation2 + $0x3c8] sm:$0xff] }
  0xcf   :  { %117 = vadd.xlane.f32.xlu0 %v116_v41  ;;  %v11369_v20 = vpop.permute.xlu0 %1346  ;;  %530 = vmatpush.msrb.mxu1 %v499_v26  ;;  %v332_v26 = vld [vmem:[#allocation2 + $0x288] sm:$0xff] }
  0xd0   :  { %16536 = vst [vmem:[#allocation12_spill] sm:$0xff] %v11369_v20  ;;  %553 = vmatpush.msrb.mxu2 %v372_v34  ;;  %v460_v34 = vld [vmem:[#allocation2 + $0x688] sm:$0xff] }
  0xd1   :  { %v11450_v42 = vpop.permute.xlu2 %1432  ;;  %531 = vmatpush.msrb.mxu1 %v491_v38  ;;  %v324_v38 = vld [vmem:[#allocation2 + $0x248] sm:$0xff] }
  0xd2   :  { %16556 = vst [vmem:[#allocation32_spill] sm:$0xff] %v11450_v42  ;;  %v11722_v42 = vld [vmem:[#allocation2 + $0x4a0] sm:$0xff] }
  0xd3   :  { %16599 = vst [vmem:[#allocation75_spill] sm:$0xff] %v11722_v42 }
  0xd6   :  { %2943 = vrot.lane.b32.xlu2 %v2911_v36, %s11126_s27  ;;  %v500_v36 = vld [vmem:[#allocation2 + $0x7c8] sm:$0xff] }
  0xd7   :  { %v11373_v44 = vpop.permute.xlu0 %1434  ;;  %576 = vmatpush.msrb.mxu3 %v500_v36  ;;  %v323_v36 = vld [vmem:[#allocation2 + $0x240] sm:$0xff] }
  0xd8   :  { %16538 = vst [vmem:[#allocation14_spill] sm:$0xff] %v11373_v44  ;;  %v11693_v44 = vld [vmem:[#allocation2 + $0x520] sm:$0xff] }
  0xd9   :  { %v11461_v23 = vpop.permute.xlu2 %1438  ;;  %16591 = vst [vmem:[#allocation67_spill] sm:$0xff] %v11693_v44 }
  0xda   :  { %16558 = vst [vmem:[#allocation34_spill] sm:$0xff] %v11461_v23  ;;  %v11665_v23 = vld [vmem:[#allocation2 + $0x5a0] sm:$0xff] }
  0xde   :  { %2957 = vrot.lane.b32.xlu2 %v2918_v39, %s11126_s27  ;;  %v364_v39 = vld [vmem:[#allocation2 + $0x388] sm:$0xff] }
  0xdf   :  { %v11377_v22 = vpop.permute.xlu0 %1440  ;;  %554 = vmatpush.msrb.mxu2 %v364_v39  ;;  %v452_v39 = vld [vmem:[#allocation2 + $0x648] sm:$0xff] }
  0xe0   :  { %16540 = vst [vmem:[#allocation16_spill] sm:$0xff] %v11377_v22  ;;  %v11652_v22 = vld [vmem:[#allocation2 + $0x1e8] sm:$0xff] }
  0xe1   :  { %v11468_v2 = vpop.permute.xlu2 %1444 }
  0xe2   :  { %16560 = vst [vmem:[#allocation36_spill] sm:$0xff] %v11468_v2  ;;  %v11619_v2 = vld [vmem:[#allocation2 + $0x260] sm:$0xff] }
  0xe3   :  { %2408 = vrot.lane.b32.xlu0 %v2367_v48, %s11124_s25 }
  0xe6   :  { %2959 = vrot.lane.b32.xlu2 %v2919_v7, %s11126_s27  ;;  %v492_v7 = vld [vmem:[#allocation2 + $0x788] sm:$0xff] }
  0xe7   :  { %v11381_v49 = vpop.permute.xlu0 %1446  ;;  %577 = vmatpush.msrb.mxu3 %v492_v7  ;;  %v315_v7 = vld [vmem:[#allocation2 + $0x200] sm:$0xff] }
  0xe8   :  { %16541 = vst [vmem:[#allocation17_spill] sm:$0xff] %v11381_v49  ;;  %v3861_v49 = vperm.slane %v11629_v56, 5 }
  0xe9   :  { %v11473_v54 = vpop.permute.xlu2 %1450 }
  0xea   :  { %16561 = vst [vmem:[#allocation37_spill] sm:$0xff] %v11473_v54 }
  0xeb   :  { %2418 = vrot.lane.b32.xlu0 %v2372_v50, %s11124_s25 }
  0xef   :  { %v11387_v52 = vpop.permute.xlu0 %1452 }
  0xf0   :  { %16543 = vst [vmem:[#allocation19_spill] sm:$0xff] %v11387_v52  ;;  %v11608_v52 = vld [vmem:[#allocation4 + $0x60] sm:$0xff] }
  0xf3   :  { %2945 = vrot.lane.b32.xlu0 %v2912_v53, %s11126_s27  ;;  %v2922_v53 = vperm.slane %v11290_v40, 3 }
  0xf5   :  { %2965 = vrot.lane.b32.xlu2 %v2922_v53, %s11126_s27 }
  0xf7   :  { %v11397_v57 = vpop.permute.xlu0 %1458 }
  0xf8   :  { %16546 = vst [vmem:[#allocation22_spill] sm:$0xff] %v11397_v57  ;;  %v11575_v57 = vld [vmem:[#allocation2 + $0x720] sm:$0xff] }
  0xfb   :  { %2951 = vrot.lane.b32.xlu0 %v2915_v58, %s11126_s27 }
  0xff   :  { %v11411_v3 = vpop.permute.xlu0 %2392 }
 0x100   :  { %16549 = vst [vmem:[#allocation25_spill] sm:$0xff] %v11411_v3  ;;  %v11709_v3 = vld [vmem:[#allocation2 + $0xe8] sm:$0xff] }
 0x101   :  { %16596 = vst [vmem:[#allocation72_spill] sm:$0xff] %v11709_v3 }
 0x103   :  { %2953 = vrot.lane.b32.xlu0 %v2916_v17, %s11126_s27  ;;  %v11478_v17 = vpop.permute.xlu2 %1456 }
 0x104   :  { %16563 = vst [vmem:[#allocation39_spill] sm:$0xff] %v11478_v17  ;;  %v11587_v17 = vld [vmem:[#allocation2 + $0x2e0] sm:$0xff] }
 0x107   :  { %v11422_v13 = vpop.permute.xlu0 %2390 }
 0x108   :  { %16552 = vst [vmem:[#allocation28_spill] sm:$0xff] %v11422_v13  ;;  %v2455_v19 = vmul.f32 0.0, %v11422_v13  ;;  %v11703_v13 = vld [vmem:[#allocation2 + $0xe0] sm:$0xff] }
 0x109   :  { %16594 = vst [vmem:[#allocation70_spill] sm:$0xff] %v11703_v13 }
 0x10b   :  { %2489 = vrot.lane.b32.xlu0 %v2455_v19, %s11128_s29  ;;  %v11483_v19 = vpop.permute.xlu1 %1442  ;;  %v11485_v30 = vpop.permute.xlu2 %2396 }
 0x10c   :  { %16564 = vst [vmem:[#allocation40_spill] sm:$0xff] %v11483_v19  ;;  %v11646_v19 = vld [vmem:[#allocation2 + $0x1e0] sm:$0xff] }
 0x10d   :  { %16565 = vst [vmem:[#allocation41_spill] sm:$0xff] %v11485_v30  ;;  %v11669_v30 = vld [vmem:[#allocation2 + $0x1a8] sm:$0xff] }
 0x10e   :  { %16583 = vst [vmem:[#allocation59_spill] sm:$0xff] %v11669_v30 }
 0x10f   :  { %v11454_v33 = vpop.permute.xlu0 %2400 }
 0x110   :  { %16557 = vst [vmem:[#allocation33_spill] sm:$0xff] %v11454_v33  ;;  %v3853_v33 = vperm.slane %v11654_v4, 5 }
 0x113   :  { %2961 = vrot.lane.b32.xlu0 %v2920_v37, %s11126_s27  ;;  %v363_v37 = vld [vmem:[#allocation2 + $0x380] sm:$0xff]  ;;  %v11491_v53 = vpop.permute.xlu1 %1448 }
 0x114   :  { %508 = vmatpush.msrb.mxu0 %v363_v37  ;;  %16566 = vst [vmem:[#allocation42_spill] sm:$0xff] %v11491_v53  ;;  %v451_v37 = vld [vmem:[#allocation2 + $0x640] sm:$0xff] }
 0x115   :  { %v11638_v53 = vld [vmem:[#allocation2 + $0x620] sm:$0xff] }
 0x117   :  { %v11465_v41 = vpop.permute.xlu0 %1952 }
 0x118   :  { %16559 = vst [vmem:[#allocation35_spill] sm:$0xff] %v11465_v41  ;;  %v11519_v41 = vld [vmem:[#allocation4] sm:$0xff] }
 0x142   :  { %v118_v21 = vpop.xlane.xlu0 %117 }
 0x143   :  { %v119_v48 = vmul.f32 0.001953125, %v118_v21  ;;  %v355_v21 = vld [vmem:[#allocation2 + $0x340] sm:$0xff] }
 0x144   :  { %509 = vmatpush.msrb.mxu0 %v355_v21  ;;  %v443_v21 = vld [vmem:[#allocation2 + $0x600] sm:$0xff] }
 0x145   :  { %v121_v50 = vadd.f32 1e-05, %v119_v48  ;;  %v483_v48 = vld [vmem:[#allocation2 + $0x740] sm:$0xff] }
 0x146   :  { %532 = vmatpush.msrb.mxu1 %v483_v48  ;;  %v316_v48 = vld [vmem:[#allocation2 + $0x208] sm:$0xff] }
 0x147   :  { %10896 = vrsqrt.f32 %v121_v50  ;;  %vm128_vm3 = vweird.f32 %v121_v50 }
 0x14d   :  { %v10897_v58 = vpop.eup %10896 }
 0x14e   :  { %v123_v60 = vmul.f32 %v10897_v58, %v121_v50  ;;  %vm129_vm2 = vweird.f32 %v10897_v58  ;;  %v356_v50 = vld [vmem:[#allocation2 + $0x348] sm:$0xff] }
 0x14f   :  { %vm130_vm4 = vmor %vm128_vm3, %vm129_vm2  ;;  %555 = vmatpush.msrb.mxu2 %v356_v50  ;;  %v11495_v50 = vpop.permute.xlu1 %1454 }
 0x150   :  { %v124_v62 = vmul.f32 %v10897_v58, %v123_v60  ;;  %v347_v60 = vld [vmem:[#allocation2 + $0x300] sm:$0xff]  ;;  %16568 = vst [vmem:[#allocation44_spill] sm:$0xff] %v11495_v50  ;;  %v2923_v50 = vperm.slane %v11608_v52, 3 }
 0x151   :  { %510 = vmatpush.msrb.mxu0 %v347_v60  ;;  %v435_v60 = vld [vmem:[#allocation2 + $0x5c0] sm:$0xff] }
 0x152   :  { %v125_v63 = vmul.f32 0.5, %v124_v62  ;;  %v475_v62 = vld [vmem:[#allocation2 + $0x700] sm:$0xff]  ;;  %2967 = vrot.lane.b32.xlu2 %v2923_v50, %s11126_s27 }
 0x153   :  { %533 = vmatpush.msrb.mxu1 %v475_v62  ;;  %v308_v62 = vld [vmem:[#allocation2 + $0x1c8] sm:$0xff]  ;;  %v11650_v50 = vld [vmem:[#allocation2 + $0x5e0] sm:$0xff] }
 0x154   :  { %v126_v27 = vsub.f32 1.5, %v125_v63  ;;  %v348_v63 = vld [vmem:[#allocation2 + $0x308] sm:$0xff] }
 0x155   :  { %556 = vmatpush.msrb.mxu2 %v348_v63  ;;  %v436_v63 = vld [vmem:[#allocation2 + $0x5c8] sm:$0xff] }
 0x156   :  { %v127_v40 = vmul.f32 %v10897_v58, %v126_v27  ;;  %v476_v27 = vld [vmem:[#allocation2 + $0x708] sm:$0xff] }
 0x158   :  { %v131_v6 = vsel %vm130_vm4, %v10897_v58, %v127_v40  ;;  %v484_v58 = vld [vmem:[#allocation2 + $0x748] sm:$0xff]  ;;  %v467_v40 = vld [vmem:[#allocation2 + $0x6c0] sm:$0xff] }
 0x159   :  { %v132_v25 = vmul.f32 %v131_v6, %v120_v10  ;;  %v339_v10 = vld [vmem:[#allocation2 + $0x2c0] sm:$0xff]  ;;  %578 = vmatpush.msrb.mxu3 %v484_v58  ;;  %v340_v6 = vld [vmem:[#allocation2 + $0x2c8] sm:$0xff]  ;;  %534 = vmatpush.msrb.mxu1 %v467_v40 }
 0x15a   :  { %511 = vmatpush.msrb.mxu0 %v339_v10  ;;  %557 = vmatpush.msrb.mxu2 %v340_v6  ;;  %v307_v58 = vld [vmem:[#allocation2 + $0x1c0] sm:$0xff]  ;;  %v300_v40 = vld [vmem:[#allocation2 + $0x188] sm:$0xff] }
 0x15b   :  { %135 = vperm.xlu1 %10563, %v132_v25   ;;  %v143_v32 = vmul.f32 %v132_v25, %v11353_v18  ;;  %v11493_v25 = vpop.permute.xlu2 %2404  ;;  %579 = vmatpush.msrb.mxu3 %v476_v27  ;;  %v299_v27 = vld [vmem:[#allocation2 + $0x180] sm:$0xff] }
 0x15c   :  { %16567 = vst [vmem:[#allocation43_spill] sm:$0xff] %v11493_v25  ;;  %535 = vmatpush.msrb.mxu1 %v459_v1  ;;  %558 = vmatpush.msrb.mxu2 %v332_v26  ;;  %v427_v10 = vld [vmem:[#allocation2 + $0x580] sm:$0xff]  ;;  %v292_v26 = vld [vmem:[#allocation2 + $0x148] sm:$0xff] }
 0x15d   :  { %v144_v18 = vsub.f32 %v142_v31, %v143_v32  ;;  %v468_v31 = vld [vmem:[#allocation2 + $0x6c8] sm:$0xff]  ;;  %v331_v32 = vld [vmem:[#allocation2 + $0x280] sm:$0xff]  ;;  %2969 = vrot.lane.b32.xlu2 %v2924_v8, %s11126_s27 }
 0x15e   :  { %580 = vmatpush.msrb.mxu3 %v468_v31  ;;  %512 = vmatpush.msrb.mxu0 %v331_v32  ;;  %v428_v31 = vld [vmem:[#allocation2 + $0x588] sm:$0xff]  ;;  %v291_v32 = vld [vmem:[#allocation2 + $0x140] sm:$0xff] }
 0x15f   :  { %536 = vmatpush.msrb.mxu1 %v451_v37  ;;  %559 = vmatpush.msrb.mxu2 %v324_v38  ;;  %v419_v1 = vld [vmem:[#allocation2 + $0x540] sm:$0xff]  ;;  %v284_v38 = vld [vmem:[#allocation2 + $0x108] sm:$0xff] }
 0x160   :  { %581 = vmatpush.msrb.mxu3 %v460_v34  ;;  %513 = vmatpush.msrb.mxu0 %v323_v36  ;;  %v420_v34 = vld [vmem:[#allocation2 + $0x548] sm:$0xff]  ;;  %v283_v36 = vld [vmem:[#allocation2 + $0x100] sm:$0xff] }
 0x161   :  { %537 = vmatpush.msrb.mxu1 %v443_v21  ;;  %560 = vmatpush.msrb.mxu2 %v316_v48  ;;  %v411_v37 = vld [vmem:[#allocation2 + $0x500] sm:$0xff]  ;;  %v276_v48 = vld [vmem:[#allocation2 + $0xc8] sm:$0xff] }
 0x162   :  { %582 = vmatpush.msrb.mxu3 %v452_v39  ;;  %514 = vmatpush.msrb.mxu0 %v315_v7  ;;  %v412_v39 = vld [vmem:[#allocation2 + $0x508] sm:$0xff]  ;;  %v275_v7 = vld [vmem:[#allocation2 + $0xc0] sm:$0xff] }
 0x163   :  { %147 = vperm.xlu1 %10563, %v144_v18   ;;  %v444_v18 = vld [vmem:[#allocation2 + $0x608] sm:$0xff]  ;;  %v11497_v6 = vpop.permute.xlu2 %2406  ;;  %538 = vmatpush.msrb.mxu1 %v435_v60  ;;  %v403_v21 = vld [vmem:[#allocation2 + $0x4c0] sm:$0xff] }
 0x164   :  { %583 = vmatpush.msrb.mxu3 %v444_v18  ;;  %515 = vmatpush.msrb.mxu0 %v307_v58  ;;  %16569 = vst [vmem:[#allocation45_spill] sm:$0xff] %v11497_v6  ;;  %v11499_v18 = vpop.permute.xlu1 %1460  ;;  %v404_v58 = vld [vmem:[#allocation2 + $0x4c8] sm:$0xff]  ;;  %v267_v60 = vld [vmem:[#allocation2 + $0x80] sm:$0xff] }
 0x165   :  { %561 = vmatpush.msrb.mxu2 %v308_v62  ;;  %539 = vmatpush.msrb.mxu1 %v427_v10  ;;  %16570 = vst [vmem:[#allocation46_spill] sm:$0xff] %v11499_v18  ;;  %v395_v62 = vld [vmem:[#allocation2 + $0x480] sm:$0xff]  ;;  %v11579_v18 = vld [vmem:[#allocation2 + $0x328] sm:$0xff] }
 0x166   :  { %584 = vmatpush.msrb.mxu3 %v436_v63  ;;  %516 = vmatpush.msrb.mxu0 %v299_v27  ;;  %v268_v63 = vld [vmem:[#allocation2 + $0x88] sm:$0xff]  ;;  %v259_v10 = vld [vmem:[#allocation2 + $0x40] sm:$0xff] }
 0x167   :  { %562 = vmatpush.msrb.mxu2 %v300_v40  ;;  %540 = vmatpush.msrb.mxu1 %v419_v1  ;;  %v396_v27 = vld [vmem:[#allocation2 + $0x488] sm:$0xff]  ;;  %v387_v40 = vld [vmem:[#allocation2 + $0x440] sm:$0xff] }
 0x168   :  { %585 = vmatpush.msrb.mxu3 %v428_v31  ;;  %517 = vmatpush.msrb.mxu0 %v291_v32  ;;  %v260_v31 = vld [vmem:[#allocation2 + $0x48] sm:$0xff]  ;;  %v11600_v6 = vld [vmem:[#allocation2 + $0x2a0] sm:$0xff] }
 0x169   :  { %563 = vmatpush.msrb.mxu2 %v292_v26  ;;  %541 = vmatpush.msrb.mxu1 %v411_v37  ;;  %v388_v1 = vld [vmem:[#allocation2 + $0x448] sm:$0xff]  ;;  %v251_v26 = vld [vmem:[#allocation2] sm:$0xff] }
 0x16a   :  { %586 = vmatpush.msrb.mxu3 %v420_v34  ;;  %518 = vmatpush.msrb.mxu0 %v283_v36  ;;  %v379_v34 = vld [vmem:[#allocation2 + $0x400] sm:$0xff]  ;;  %v252_v36 = vld [vmem:[#allocation2 + $0x8] sm:$0xff] }
 0x16b   :  { %564 = vmatpush.msrb.mxu2 %v284_v38  ;;  %542 = vmatpush.msrb.mxu1 %v403_v21  ;;  %v11501_v32 = vpop.permute.xlu2 %1529  ;;  %v380_v37 = vld [vmem:[#allocation2 + $0x408] sm:$0xff]  ;;  %v373_v38 = vld [vmem:[#allocation2 + $0x3d0] sm:$0xff]  ;;  %v502_v21 = vld [vmem:[#allocation2 + $0x7d8] sm:$0xff] }
 0x16c   :  { %587 = vmatpush.msrb.mxu3 %v412_v39  ;;  %519 = vmatpush.msrb.mxu0 %v275_v7  ;;  %16571 = vst [vmem:[#allocation47_spill] sm:$0xff] %v11501_v32  ;;  %v501_v39 = vld [vmem:[#allocation2 + $0x7d0] sm:$0xff]  ;;  %v374_v7 = vld [vmem:[#allocation2 + $0x3d8] sm:$0xff]  ;;  %v11615_v32 = vld [vmem:[#allocation2 + $0x6a8] sm:$0xff] }
 0x16d   :  { %565 = vmatpush.msrb.mxu2 %v276_v48  ;;  %543 = vmatpush.msrb.mxu1 %v395_v62  ;;  %v365_v48 = vld [vmem:[#allocation2 + $0x390] sm:$0xff]  ;;  %v11503_v62 = vpop.permute.xlu1 %2394  ;;  %v11625_v25 = vld [vmem:[#allocation2 + $0x268] sm:$0xff]  ;;  %v11705_v8 = vld [vmem:[#allocation2 + $0x4e0] sm:$0xff] }
 0x16e   :  { %588 = vmatpush.msrb.mxu3 %v404_v58  ;;  %520 = vmatpush.msrb.mxu0 %v267_v60  ;;  %v493_v58 = vld [vmem:[#allocation2 + $0x790] sm:$0xff]  ;;  %v366_v60 = vld [vmem:[#allocation2 + $0x398] sm:$0xff]  ;;  %16572 = vst [vmem:[#allocation48_spill] sm:$0xff] %v11503_v62 }
 0x16f   :  { %566 = vmatpush.msrb.mxu2 %v268_v63  ;;  %544 = vmatpush.msrb.mxu1 %v387_v40  ;;  %v494_v63 = vld [vmem:[#allocation2 + $0x798] sm:$0xff]  ;;  %16595 = vst [vmem:[#allocation71_spill] sm:$0xff] %v11705_v8 }
 0x170   :  { %589 = vmatpush.msrb.mxu3 %v396_v27  ;;  %521 = vmatpush.msrb.mxu0 %v259_v10  ;;  %v357_v27 = vld [vmem:[#allocation2 + $0x350] sm:$0xff]  ;;  %v358_v40 = vld [vmem:[#allocation2 + $0x358] sm:$0xff] }
 0x171   :  { %567 = vmatpush.msrb.mxu2 %v260_v31  ;;  %545 = vmatpush.msrb.mxu1 %v379_v34  ;;  %v485_v10 = vld [vmem:[#allocation2 + $0x750] sm:$0xff]  ;;  %v486_v31 = vld [vmem:[#allocation2 + $0x758] sm:$0xff] }
 0x172   :  { %590 = vmatpush.msrb.mxu3 %v388_v1  ;;  %522 = vmatpush.msrb.mxu0 %v251_v26  ;;  %v349_v1 = vld [vmem:[#allocation2 + $0x310] sm:$0xff]  ;;  %v350_v34 = vld [vmem:[#allocation2 + $0x318] sm:$0xff] }
 0x173   :  { %568 = vmatpush.msrb.mxu2 %v252_v36  ;;  %622 = vmatpush.msra.mxu1 %v501_v39  ;;  %v477_v26 = vld [vmem:[#allocation2 + $0x710] sm:$0xff]  ;;  %v11505_v36 = vpop.permute.xlu2 %2412 }
 0x174   :  { %591 = vmatpush.msrb.mxu3 %v380_v37  ;;  %599 = vmatpush.msra.mxu0 %v373_v38  ;;  %16573 = vst [vmem:[#allocation49_spill] sm:$0xff] %v11505_v36  ;;  %v478_v37 = vld [vmem:[#allocation2 + $0x718] sm:$0xff]  ;;  %v341_v38 = vld [vmem:[#allocation2 + $0x2d0] sm:$0xff]  ;;  %v11594_v36 = vld [vmem:[#allocation2 + $0x2e8] sm:$0xff] }
 0x175   :  { %645 = vmatpush.msra.mxu2 %v374_v7  ;;  %623 = vmatpush.msra.mxu1 %v493_v58  ;;  %v469_v39 = vld [vmem:[#allocation2 + $0x6d0] sm:$0xff]  ;;  %v342_v7 = vld [vmem:[#allocation2 + $0x2d8] sm:$0xff] }
 0x176   :  { %668 = vmatpush.msra.mxu3 %v502_v21  ;;  %600 = vmatpush.msra.mxu0 %v365_v48  ;;  %v470_v21 = vld [vmem:[#allocation2 + $0x6d8] sm:$0xff]  ;;  %v333_v48 = vld [vmem:[#allocation2 + $0x290] sm:$0xff] }
 0x177   :  { %646 = vmatpush.msra.mxu2 %v366_v60  ;;  %624 = vmatpush.msra.mxu1 %v485_v10  ;;  %v461_v58 = vld [vmem:[#allocation2 + $0x690] sm:$0xff]  ;;  %v334_v60 = vld [vmem:[#allocation2 + $0x298] sm:$0xff] }
 0x178   :  { %669 = vmatpush.msra.mxu3 %v494_v63  ;;  %601 = vmatpush.msra.mxu0 %v357_v27  ;;  %v2926_v63 = vperm.slane %v11304_v47, 3  ;;  %v462_v27 = vld [vmem:[#allocation2 + $0x698] sm:$0xff]  ;;  %v325_v10 = vld [vmem:[#allocation2 + $0x250] sm:$0xff] }
 0x179   :  { %647 = vmatpush.msra.mxu2 %v358_v40  ;;  %625 = vmatpush.msra.mxu1 %v477_v26  ;;  %v453_v40 = vld [vmem:[#allocation2 + $0x650] sm:$0xff]  ;;  %v454_v26 = vld [vmem:[#allocation2 + $0x658] sm:$0xff] }
 0x17a   :  { %670 = vmatpush.msra.mxu3 %v486_v31  ;;  %602 = vmatpush.msra.mxu0 %v349_v1  ;;  %v11508_v31 = vpop.permute.xlu1 %2398  ;;  %v326_v1 = vld [vmem:[#allocation2 + $0x258] sm:$0xff] }
 0x17b   :  { %648 = vmatpush.msra.mxu2 %v350_v34  ;;  %626 = vmatpush.msra.mxu1 %v469_v39  ;;  %16574 = vst [vmem:[#allocation50_spill] sm:$0xff] %v11508_v31  ;;  %v317_v34 = vld [vmem:[#allocation2 + $0x210] sm:$0xff]  ;;  %v318_v47 = vld [vmem:[#allocation2 + $0x218] sm:$0xff]  ;;  %v11671_v31 = vld [vmem:[#allocation2 + $0x5a8] sm:$0xff] }
 0x17c   :  { %671 = vmatpush.msra.mxu3 %v478_v37  ;;  %603 = vmatpush.msra.mxu0 %v341_v38  ;;  %v445_v37 = vld [vmem:[#allocation2 + $0x610] sm:$0xff]  ;;  %v446_v38 = vld [vmem:[#allocation2 + $0x618] sm:$0xff]  ;;  %16584 = vst [vmem:[#allocation60_spill] sm:$0xff] %v11671_v31 }
 0x17d   :  { %649 = vmatpush.msra.mxu2 %v342_v7  ;;  %627 = vmatpush.msra.mxu1 %v461_v58  ;;  %v309_v39 = vld [vmem:[#allocation2 + $0x1d0] sm:$0xff]  ;;  %v438_v58 = vld [vmem:[#allocation2 + $0x5d8] sm:$0xff] }
 0x17e   :  { %672 = vmatpush.msra.mxu3 %v470_v21  ;;  %604 = vmatpush.msra.mxu0 %v333_v48  ;;  %v437_v7 = vld [vmem:[#allocation2 + $0x5d0] sm:$0xff]  ;;  %v11511_v21 = vpop.permute.xlu2 %2414  ;;  %v310_v48 = vld [vmem:[#allocation2 + $0x1d8] sm:$0xff] }
 0x17f   :  { %650 = vmatpush.msra.mxu2 %v334_v60  ;;  %2973 = vrot.lane.b32.xlu1 %v2926_v63, %s11126_s27  ;;  %16575 = vst [vmem:[#allocation51_spill] sm:$0xff] %v11511_v21  ;;  %v301_v60 = vld [vmem:[#allocation2 + $0x190] sm:$0xff]  ;;  %v11596_v21 = vld [vmem:[#allocation2 + $0x6e8] sm:$0xff] }
 0x180   :  { %673 = vmatpush.msra.mxu3 %v462_v27  ;;  %605 = vmatpush.msra.mxu0 %v325_v10  ;;  %v429_v63 = vld [vmem:[#allocation2 + $0x590] sm:$0xff]  ;;  %v302_v27 = vld [vmem:[#allocation2 + $0x198] sm:$0xff] }
 0x181   :  { %628 = vmatpush.msra.mxu1 %v453_v40  ;;  %651 = vmatpush.msra.mxu2 %v326_v1  ;;  %v430_v10 = vld [vmem:[#allocation2 + $0x598] sm:$0xff]  ;;  %v3854_v40 = vperm.slane %v11207_v0, 5  ;;  %v293_v1 = vld [vmem:[#allocation2 + $0x150] sm:$0xff] }
 0x182   :  { %674 = vmatpush.msra.mxu3 %v454_v26  ;;  %606 = vmatpush.msra.mxu0 %v317_v34  ;;  %v421_v26 = vld [vmem:[#allocation2 + $0x550] sm:$0xff]  ;;  %v294_v34 = vld [vmem:[#allocation2 + $0x158] sm:$0xff] }
 0x183   :  { %629 = vmatpush.msra.mxu1 %v445_v37  ;;  %652 = vmatpush.msra.mxu2 %v318_v47  ;;  %v422_v37 = vld [vmem:[#allocation2 + $0x558] sm:$0xff]  ;;  %v285_v47 = vld [vmem:[#allocation2 + $0x110] sm:$0xff] }
 0x184   :  { %675 = vmatpush.msra.mxu3 %v446_v38  ;;  %607 = vmatpush.msra.mxu0 %v309_v39  ;;  %v11514_v38 = vpop.permute.xlu1 %2402  ;;  %v413_v39 = vld [vmem:[#allocation2 + $0x510] sm:$0xff]  ;;  %v414_v0 = vld [vmem:[#allocation2 + $0x518] sm:$0xff] }
 0x185   :  { %630 = vmatpush.msra.mxu1 %v437_v7  ;;  %653 = vmatpush.msra.mxu2 %v310_v48  ;;  %16576 = vst [vmem:[#allocation52_spill] sm:$0xff] %v11514_v38  ;;  %v286_v7 = vld [vmem:[#allocation2 + $0x118] sm:$0xff]  ;;  %v277_v48 = vld [vmem:[#allocation2 + $0xd0] sm:$0xff]  ;;  %v11644_v38 = vld [vmem:[#allocation2 + $0x628] sm:$0xff] }
 0x186   :  { %676 = vmatpush.msra.mxu3 %v438_v58  ;;  %608 = vmatpush.msra.mxu0 %v301_v60  ;;  %v405_v58 = vld [vmem:[#allocation2 + $0x4d0] sm:$0xff]  ;;  %v278_v60 = vld [vmem:[#allocation2 + $0xd8] sm:$0xff] }
 0x187   :  { %631 = vmatpush.msra.mxu1 %v429_v63  ;;  %654 = vmatpush.msra.mxu2 %v302_v27  ;;  %v406_v63 = vld [vmem:[#allocation2 + $0x4d8] sm:$0xff]  ;;  %v269_v27 = vld [vmem:[#allocation2 + $0x90] sm:$0xff] }
 0x188   :  { %677 = vmatpush.msra.mxu3 %v430_v10  ;;  %3889 = vrot.lane.b32.xlu1 %v3854_v40, %s11130_s9  ;;  %v11517_v10 = vpop.permute.xlu2 %2416  ;;  %v397_v40 = vld [vmem:[#allocation2 + $0x490] sm:$0xff] }
 0x189   :  { %609 = vmatpush.msra.mxu0 %v293_v1  ;;  %632 = vmatpush.msra.mxu1 %v421_v26  ;;  %16577 = vst [vmem:[#allocation53_spill] sm:$0xff] %v11517_v10  ;;  %v270_v1 = vld [vmem:[#allocation2 + $0x98] sm:$0xff]  ;;  %v3851_v26 = vperm.slane %v11519_v41, 5  ;;  %v11589_v10 = vld [vmem:[#allocation2 + $0x6e0] sm:$0xff] }
 0x18a   :  { %655 = vmatpush.msra.mxu2 %v294_v34  ;;  %678 = vmatpush.msra.mxu3 %v422_v37  ;;  %v398_v34 = vld [vmem:[#allocation2 + $0x498] sm:$0xff]  ;;  %v261_v37 = vld [vmem:[#allocation2 + $0x50] sm:$0xff] }
 0x18b   :  { %610 = vmatpush.msra.mxu0 %v285_v47  ;;  %633 = vmatpush.msra.mxu1 %v413_v39  ;;  %v389_v47 = vld [vmem:[#allocation2 + $0x450] sm:$0xff]  ;;  %v262_v39 = vld [vmem:[#allocation2 + $0x58] sm:$0xff] }
 0x18c   :  { %656 = vmatpush.msra.mxu2 %v286_v7  ;;  %679 = vmatpush.msra.mxu3 %v414_v0  ;;  %v390_v7 = vld [vmem:[#allocation2 + $0x458] sm:$0xff]  ;;  %v11522_v20 = vpop.permute.xlu1 %2410  ;;  %v253_v0 = vld [vmem:[#allocation2 + $0x10] sm:$0xff] }
 0x18d   :  { %611 = vmatpush.msra.mxu0 %v277_v48  ;;  %634 = vmatpush.msra.mxu1 %v405_v58  ;;  %16578 = vst [vmem:[#allocation54_spill] sm:$0xff] %v11522_v20  ;;  %v381_v48 = vld [vmem:[#allocation2 + $0x410] sm:$0xff]  ;;  %v254_v58 = vld [vmem:[#allocation2 + $0x18] sm:$0xff]  ;;  %v11621_v20 = vld [vmem:[#allocation2 + $0x660] sm:$0xff] }
 0x18e   :  { %657 = vmatpush.msra.mxu2 %v278_v60  ;;  %680 = vmatpush.msra.mxu3 %v406_v63  ;;  %v382_v60 = vld [vmem:[#allocation2 + $0x418] sm:$0xff]  ;;  %v2925_v63 = vperm.slane %v11299_v45, 3  ;;  %v11541_v45 = vld [vmem:[#allocation2 + $0x3e8] sm:$0xff] }
 0x18f   :  { %612 = vmatpush.msra.mxu0 %v269_v27  ;;  %635 = vmatpush.msra.mxu1 %v397_v40  ;;  %v3858_v27 = vperm.slane %v11241_v16, 5  ;;  %v11543_v16 = vld [vmem:[#allocation2 + $0x7e8] sm:$0xff] }
 0x190   :  { %658 = vmatpush.msra.mxu2 %v270_v1  ;;  %681 = vmatpush.msra.mxu3 %v398_v34  ;;  %v11528_v40 = vpop.permute.xlu2 %2949  ;;  %v11530_v1 = vpop.f32.mrf.mxu0  ;;  %v11534_v34 = vld [vmem:[#allocation2 + $0x3e0] sm:$0xff] }
 0x191   :  { %3883 = vrot.lane.b32.xlu1 %v3851_v26, %s11130_s9  ;;  %613 = vmatpush.msra.mxu0 %v261_v37  ;;  %16579 = vst [vmem:[#allocation55_spill] sm:$0xff] %v11528_v40  ;;  %v11532_v26 = vpop.f32.mrf.mxu1  ;;  %v11536_v37 = vld [vmem:[#allocation2 + $0x7e0] sm:$0xff] }
 0x192   :  { %636 = vmatpush.msra.mxu1 %v389_v47  ;;  %659 = vmatpush.msra.mxu2 %v262_v39  ;;  %v11549_v39 = vld [vmem:[#allocation2 + $0x3a0] sm:$0xff] }
 0x193   :  { %682 = vmatpush.msra.mxu3 %v390_v7  ;;  %614 = vmatpush.msra.mxu0 %v253_v0  ;;  %v11551_v7 = vld [vmem:[#allocation2 + $0x7a0] sm:$0xff]  ;;  %v11555_v0 = vld [vmem:[#allocation2 + $0x3a8] sm:$0xff] }
 0x194   :  { %637 = vmatpush.msra.mxu1 %v381_v48  ;;  %660 = vmatpush.msra.mxu2 %v254_v58  ;;  %v11545_v47 = vpop.permute.xlu1 %2420  ;;  %v11557_v48 = vld [vmem:[#allocation2 + $0x7a8] sm:$0xff]  ;;  %v11561_v58 = vld [vmem:[#allocation2 + $0x360] sm:$0xff] }
 0x195   :  { %683 = vmatpush.msra.mxu3 %v382_v60  ;;  %2971 = vrot.lane.b32.xlu0 %v2925_v63, %s11126_s27  ;;  %16580 = vst [vmem:[#allocation56_spill] sm:$0xff] %v11545_v47  ;;  %v11563_v60 = vld [vmem:[#allocation2 + $0x760] sm:$0xff]  ;;  %v11567_v63 = vld [vmem:[#allocation2 + $0x368] sm:$0xff] }
 0x196   :  { %523 = vmatmul.f32.vlgmr.msrb.gmra.mxu0 %v11530_v1  ;;  %546 = vmatmul.f32.vlgmr.msrb.gmra.mxu1 %v11532_v26  ;;  %v11573_v47 = vld [vmem:[#allocation2 + $0x320] sm:$0xff] }
 0x197   :  { %569 = vmatmul.f32.vlgmr.msrb.gmra.mxu2 %v11530_v1  ;;  %592 = vmatmul.f32.vlgmr.msrb.gmra.mxu3 %v11532_v26  ;;  %v11681_v40 = vld [vmem:[#allocation2 + $0x560] sm:$0xff] }
 0x198   :  { %691 = vmatpush.msrb.mxu0 %v11534_v34  ;;  %714 = vmatpush.msrb.mxu1 %v11536_v37  ;;  %v11583_v29 = vpop.permute.xlu2 %2943  ;;  %16587 = vst [vmem:[#allocation63_spill] sm:$0xff] %v11681_v40 }
 0x199   :  { %3897 = vrot.lane.b32.xlu1 %v3858_v27, %s11130_s9  ;;  %737 = vmatpush.msrb.mxu2 %v11541_v45  ;;  %v11569_v27 = vld [vmem:[#allocation2 + $0x768] sm:$0xff]  ;;  %16581 = vst [vmem:[#allocation57_spill] sm:$0xff] %v11583_v29  ;;  %v3008_v54 = vmul.f32 0.0, %v11583_v29 }
 0x19a   :  { %760 = vmatpush.msrb.mxu3 %v11543_v16  ;;  %692 = vmatpush.msrb.mxu0 %v11549_v39  ;;  %v11683_v29 = vld [vmem:[#allocation2 + $0x168] sm:$0xff] }
 0x19b   :  { %715 = vmatpush.msrb.mxu1 %v11551_v7  ;;  %738 = vmatpush.msrb.mxu2 %v11555_v0  ;;  %16588 = vst [vmem:[#allocation64_spill] sm:$0xff] %v11683_v29 }
 0x19c   :  { %761 = vmatpush.msrb.mxu3 %v11557_v48  ;;  %693 = vmatpush.msrb.mxu0 %v11561_v58  ;;  %v11611_v24 = vpop.permute.xlu1 %2947 }
 0x19d   :  { %716 = vmatpush.msrb.mxu1 %v11563_v60  ;;  %739 = vmatpush.msrb.mxu2 %v11567_v63  ;;  %16582 = vst [vmem:[#allocation58_spill] sm:$0xff] %v11611_v24  ;;  %v11677_v24 = vld [vmem:[#allocation2 + $0x160] sm:$0xff] }
 0x19e   :  { %762 = vmatpush.msrb.mxu3 %v11569_v27  ;;  %694 = vmatpush.msrb.mxu0 %v11573_v47  ;;  %16586 = vst [vmem:[#allocation62_spill] sm:$0xff] %v11677_v24 }
 0x19f   :  { %717 = vmatpush.msrb.mxu1 %v11575_v57  ;;  %740 = vmatpush.msrb.mxu2 %v11579_v18 }
 0x1a0   :  { %763 = vmatpush.msrb.mxu3 %v11581_v61  ;;  %695 = vmatpush.msrb.mxu0 %v11587_v17 }
 0x1a1   :  { %718 = vmatpush.msrb.mxu1 %v11589_v10  ;;  %741 = vmatpush.msrb.mxu2 %v11594_v36 }
 0x1a2   :  { %764 = vmatpush.msrb.mxu3 %v11596_v21  ;;  %3042 = vrot.lane.b32.xlu0 %v3008_v54, %s11130_s9  ;;  %v11634_v54 = vld [vmem:[#allocation2 + $0x220] sm:$0xff] }
 0x1a3   :  { %696 = vmatpush.msrb.mxu0 %v11600_v6  ;;  %719 = vmatpush.msrb.mxu1 %v11604_v28 }
 0x1a4   :  { %742 = vmatpush.msrb.mxu2 %v11606_v35  ;;  %765 = vmatpush.msrb.mxu3 %v11615_v32  ;;  %v11673_v62 = vpop.permute.xlu1 %2955 }
 0x1a5   :  { %697 = vmatpush.msrb.mxu0 %v11619_v2  ;;  %720 = vmatpush.msrb.mxu1 %v11621_v20  ;;  %16585 = vst [vmem:[#allocation61_spill] sm:$0xff] %v11673_v62  ;;  %v11687_v62 = vld [vmem:[#allocation2 + $0x568] sm:$0xff] }
 0x1a6   :  { %743 = vmatpush.msrb.mxu2 %v11625_v25  ;;  %766 = vmatpush.msrb.mxu3 %v11627_v12  ;;  %16589 = vst [vmem:[#allocation65_spill] sm:$0xff] %v11687_v62 }
 0x1a7   :  { %3903 = vrot.lane.b32.xlu1 %v3861_v49, %s11130_s9  ;;  %698 = vmatpush.msrb.mxu0 %v11634_v54  ;;  %v11663_v49 = vld [vmem:[#allocation2 + $0x1a0] sm:$0xff] }
 0x1a8   :  { %721 = vmatpush.msrb.mxu1 %v11638_v53  ;;  %744 = vmatpush.msrb.mxu2 %v11640_v51 }
 0x1a9   :  { %767 = vmatpush.msrb.mxu3 %v11644_v38  ;;  %699 = vmatpush.msrb.mxu0 %v11646_v19 }
 0x1aa   :  { %722 = vmatpush.msrb.mxu1 %v11650_v50  ;;  %745 = vmatpush.msrb.mxu2 %v11652_v22 }
 0x1ab   :  { %768 = vmatpush.msrb.mxu3 %v11659_v46  ;;  %3887 = vrot.lane.b32.xlu0 %v3853_v33, %s11130_s9  ;;  %v11691_v33 = vld [vmem:[#allocation2 + $0x120] sm:$0xff] }
 0x1ac   :  { %700 = vmatpush.msrb.mxu0 %v11663_v49  ;;  %723 = vmatpush.msrb.mxu1 %v11665_v23  ;;  %16590 = vst [vmem:[#allocation66_spill] sm:$0xff] %v11691_v33 }
 0x1ad   :  { %746 = vmatpush.msrb.mxu2 %v11669_v30  ;;  %769 = vmatpush.msrb.mxu3 %v11671_v31  ;;  %v11835_v31 = vld [vmem:[#allocation2 + $0x378] sm:$0xff] }
 0x1ae   :  { %701 = vmatpush.msrb.mxu0 %v11677_v24  ;;  %724 = vmatpush.msrb.mxu1 %v11681_v40  ;;  %v11829_v40 = vld [vmem:[#allocation2 + $0x370] sm:$0xff]  ;;  %16622 = vst [vmem:[#allocation98_spill] sm:$0xff] %v11835_v31  ;;  %v11998_v30 = vld [vmem:[#allocation2 + $0x478] sm:$0xff] }
 0x1af   :  { %747 = vmatpush.msrb.mxu2 %v11683_v29  ;;  %770 = vmatpush.msrb.mxu3 %v11687_v62  ;;  %v11728_v29 = vld [vmem:[#allocation2 + $0x4a8] sm:$0xff]  ;;  %16620 = vst [vmem:[#allocation96_spill] sm:$0xff] %v11829_v40  ;;  %v11831_v24 = vld [vmem:[#allocation2 + $0x770] sm:$0xff] }
 0x1b0   :  { %3909 = vrot.lane.b32.xlu1 %v3864_v11, %s11130_s9  ;;  %702 = vmatpush.msrb.mxu0 %v11691_v33  ;;  %v11718_v11 = vld [vmem:[#allocation2 + $0xa0] sm:$0xff]  ;;  %v10906_v33 = vld [vmem:[#allocation4 + $0x8] sm:$0xff]  ;;  %16601 = vst [vmem:[#allocation77_spill] sm:$0xff] %v11728_v29 }
 0x1b1   :  { %725 = vmatpush.msrb.mxu1 %v11693_v44  ;;  %748 = vmatpush.msrb.mxu2 %v11697_v59  ;;  %16598 = vst [vmem:[#allocation74_spill] sm:$0xff] %v11718_v11  ;;  %v11724_v44 = vld [vmem:[#allocation2 + $0xa8] sm:$0xff]  ;;  %v3852_v62 = vperm.slane %v10906_v33, 5  ;;  %v11730_v59 = vpop.permute.xlu1 %2963 }
 0x1b2   :  { %771 = vmatpush.msrb.mxu3 %v11699_v43  ;;  %703 = vmatpush.msrb.mxu0 %v11703_v13  ;;  %16600 = vst [vmem:[#allocation76_spill] sm:$0xff] %v11724_v44  ;;  %v11734_v13 = vld [vmem:[#allocation2 + $0x60] sm:$0xff]  ;;  %v11740_v43 = vld [vmem:[#allocation2 + $0x68] sm:$0xff] }
 0x1b3   :  { %726 = vmatpush.msrb.mxu1 %v11705_v8  ;;  %749 = vmatpush.msrb.mxu2 %v11709_v3  ;;  %16602 = vst [vmem:[#allocation78_spill] sm:$0xff] %v11730_v59  ;;  %v11736_v8 = vld [vmem:[#allocation2 + $0x460] sm:$0xff]  ;;  %v11742_v3 = vld [vmem:[#allocation2 + $0x468] sm:$0xff] }
 0x1b4   :  { %772 = vmatpush.msrb.mxu3 %v11711_v9  ;;  %3895 = vrot.lane.b32.xlu0 %v3857_v5, %s11130_s9  ;;  %16603 = vst [vmem:[#allocation79_spill] sm:$0xff] %v11734_v13  ;;  %v4403_v9 = vperm.slane %v10906_v33, 6  ;;  %v11746_v5 = vld [vmem:[#allocation2 + $0x20] sm:$0xff]  ;;  %v11758_v33 = vld [vmem:[#allocation4 + $0x48] sm:$0xff] }
 0x1b5   :  { %704 = vmatpush.msrb.mxu0 %v11718_v11  ;;  %16604 = vst [vmem:[#allocation80_spill] sm:$0xff] %v11736_v8  ;;  %727 = vmatpush.msrb.mxu1 %v11722_v42  ;;  %v11750_v59 = vld [vmem:[#allocation2 + $0x420] sm:$0xff]  ;;  %v11752_v42 = vld [vmem:[#allocation2 + $0x28] sm:$0xff]  ;;  %v11825_v11 = vld [vmem:[#allocation2 + $0x7b8] sm:$0xff] }
 0x1b6   :  { %750 = vmatpush.msrb.mxu2 %v11724_v44  ;;  %16605 = vst [vmem:[#allocation81_spill] sm:$0xff] %v11740_v43  ;;  %773 = vmatpush.msrb.mxu3 %v11728_v29  ;;  %v11756_v44 = vld [vmem:[#allocation2 + $0x428] sm:$0xff]  ;;  %v11793_v29 = vld [vmem:[#allocation4 + $0x78] sm:$0xff] }
 0x1b7   :  { %16606 = vst [vmem:[#allocation82_spill] sm:$0xff] %v11742_v3  ;;  %3885 = vrot.lane.b32.xlu2 %v3852_v62, %s11130_s9  ;;  %705 = vmatpush.msrb.mxu0 %v11734_v13  ;;  %v3860_v62 = vperm.slane %v11758_v33, 5 }
 0x1b8   :  { %16607 = vst [vmem:[#allocation83_spill] sm:$0xff] %v11746_v5  ;;  %728 = vmatpush.msrb.mxu1 %v11736_v8  ;;  %751 = vmatpush.msrb.mxu2 %v11740_v43  ;;  %v11765_v8 = vld [vmem:[#allocation4 + $0x20] sm:$0xff] }
 0x1b9   :  { %16608 = vst [vmem:[#allocation84_spill] sm:$0xff] %v11750_v59  ;;  %774 = vmatpush.msrb.mxu3 %v11742_v3  ;;  %4436 = vrot.lane.b32.xlu1 %v4403_v9, %s11128_s29  ;;  %v3855_v43 = vperm.slane %v11765_v8, 5  ;;  %v4402_v3 = vperm.slane %v11519_v41, 6  ;;  %v3863_v9 = vperm.slane %v11608_v52, 5 }
 0x1ba   :  { %16609 = vst [vmem:[#allocation85_spill] sm:$0xff] %v11752_v42  ;;  %706 = vmatpush.msrb.mxu0 %v11746_v5  ;;  %729 = vmatpush.msrb.mxu1 %v11750_v59  ;;  %v11776_v59 = vld [vmem:[#allocation4 + $0x28] sm:$0xff] }
 0x1bb   :  { %16610 = vst [vmem:[#allocation86_spill] sm:$0xff] %v11756_v44  ;;  %752 = vmatpush.msrb.mxu2 %v11752_v42  ;;  %775 = vmatpush.msrb.mxu3 %v11756_v44  ;;  %v3856_v42 = vperm.slane %v11776_v59, 5 }
 0x1bc   :  { %3901 = vrot.lane.b32.xlu0 %v3860_v62, %s11130_s9  ;;  %16611 = vst [vmem:[#allocation87_spill] sm:$0xff] %v11793_v29 }
 0x1bd   :  { %16619 = vst [vmem:[#allocation95_spill] sm:$0xff] %v11825_v11 }
 0x1be   :  { %16621 = vst [vmem:[#allocation97_spill] sm:$0xff] %v11831_v24 }
 0x1bf   :  { %3891 = vrot.lane.b32.xlu2 %v3855_v43, %s11130_s9  ;;  %16669 = vst [vmem:[#allocation145_spill] sm:$0xff] %v11998_v30 }
 0x1c1   :  { %4434 = vrot.lane.b32.xlu1 %v4402_v3, %s11128_s29 }
 0x1c4   :  { %3907 = vrot.lane.b32.xlu0 %v3863_v9, %s11130_s9  ;;  %v3866_v9 = vperm.slane %v11793_v29, 5  ;;  %v11996_v29 = vld [vmem:[#allocation2 + $0x78] sm:$0xff] }
 0x1c5   :  { %16668 = vst [vmem:[#allocation144_spill] sm:$0xff] %v11996_v29 }
 0x1c7   :  { %3893 = vrot.lane.b32.xlu2 %v3856_v42, %s11130_s9  ;;  %v11807_v42 = vld [vmem:[#allocation2 + $0x7f0] sm:$0xff] }
 0x1c8   :  { %16613 = vst [vmem:[#allocation89_spill] sm:$0xff] %v11807_v42 }
 0x1cc   :  { %3913 = vrot.lane.b32.xlu0 %v3866_v9, %s11130_s9  ;;  %v11819_v9 = vld [vmem:[#allocation2 + $0x7b0] sm:$0xff] }
 0x1cd   :  { %v11771_v13 = vpop.permute.xlu1 %135  ;;  %16617 = vst [vmem:[#allocation93_spill] sm:$0xff] %v11819_v9 }
 0x1ce   :  { %v138_v44 = vmul.f32 %v11771_v13, %v11236_v14  ;;  %v139_v41 = vmul.f32 %v11771_v13, %v11238_v15  ;;  %v11800_v14 = vld [vmem:[#allocation4 + $0x40] sm:$0xff] }
 0x1cf   :  { %v3859_v15 = vperm.slane %v11800_v14, 5 }
 0x1d1   :  { %3899 = vrot.lane.b32.xlu2 %v3859_v15, %s11130_s9  ;;  %v11823_v15 = vld [vmem:[#allocation2 + $0x3b8] sm:$0xff] }
 0x1d2   :  { %16618 = vst [vmem:[#allocation94_spill] sm:$0xff] %v11823_v15 }
 0x1d5   :  { %v11784_v62 = vpop.permute.xlu1 %147 }
 0x1d6   :  { %v150_v52 = vadd.f32 %v11784_v62, %v138_v44  ;;  %v151_v3 = vadd.f32 %v11784_v62, %v139_v41  ;;  %v11805_v44 = vld [vmem:[#allocation2 + $0x3f0] sm:$0xff]  ;;  %v11811_v41 = vld [vmem:[#allocation2 + $0x3f8] sm:$0xff] }
 0x1d7   :  { %16612 = vst [vmem:[#allocation88_spill] sm:$0xff] %v11805_v44 }
 0x1d8   :  { %v11789_v43 = vmax.f32 %v150_v52, 0.0  ;;  %v11791_v5 = vmax.f32 %v151_v3, 0.0  ;;  %16614 = vst [vmem:[#allocation90_spill] sm:$0xff] %v11811_v41  ;;  %v11813_v52 = vld [vmem:[#allocation2 + $0x7f8] sm:$0xff]  ;;  %v11817_v3 = vld [vmem:[#allocation2 + $0x3b0] sm:$0xff] }
 0x1d9   :  { %16615 = vst [vmem:[#allocation91_spill] sm:$0xff] %v11813_v52 }
 0x1da   :  { %526 = vmatmul.f32.gmra.mxu0 %v11789_v43  ;;  %549 = vmatmul.f32.gmra.mxu1 %v11791_v5  ;;  %16616 = vst [vmem:[#allocation92_spill] sm:$0xff] %v11817_v3 }
 0x1db   :  { %572 = vmatmul.f32.gmra.mxu2 %v11789_v43  ;;  %595 = vmatmul.f32.gmra.mxu3 %v11791_v5 }
 0x1e2   :  { %615 = vmatmul.f32.vlgmr.msra.gmra.mxu0 %v11530_v1  ;;  %638 = vmatmul.f32.vlgmr.msra.gmra.mxu1 %v11532_v26 }
 0x1e3   :  { %661 = vmatmul.f32.vlgmr.msra.gmra.mxu2 %v11530_v1  ;;  %684 = vmatmul.f32.vlgmr.msra.gmra.mxu3 %v11532_v26 }
 0x1e4   :  { %783 = vmatpush.msra.mxu0 %v11805_v44  ;;  %806 = vmatpush.msra.mxu1 %v11807_v42  ;;  %v11837_v44 = vld [vmem:[#allocation2 + $0x778] sm:$0xff]  ;;  %v11841_v42 = vld [vmem:[#allocation2 + $0x330] sm:$0xff] }
 0x1e5   :  { %829 = vmatpush.msra.mxu2 %v11811_v41  ;;  %852 = vmatpush.msra.mxu3 %v11813_v52  ;;  %16623 = vst [vmem:[#allocation99_spill] sm:$0xff] %v11837_v44  ;;  %v11843_v41 = vld [vmem:[#allocation2 + $0x730] sm:$0xff]  ;;  %v11847_v52 = vld [vmem:[#allocation2 + $0x338] sm:$0xff] }
 0x1e6   :  { %784 = vmatpush.msra.mxu0 %v11817_v3  ;;  %807 = vmatpush.msra.mxu1 %v11819_v9  ;;  %16624 = vst [vmem:[#allocation100_spill] sm:$0xff] %v11841_v42  ;;  %v11849_v3 = vld [vmem:[#allocation2 + $0x738] sm:$0xff] }
 0x1e7   :  { %830 = vmatpush.msra.mxu2 %v11823_v15  ;;  %853 = vmatpush.msra.mxu3 %v11825_v11  ;;  %16625 = vst [vmem:[#allocation101_spill] sm:$0xff] %v11843_v41  ;;  %v11857_v11 = vld [vmem:[#allocation2 + $0x2f0] sm:$0xff]  ;;  %v11887_v9 = vld [vmem:[#allocation2 + $0x278] sm:$0xff] }
 0x1e8   :  { %785 = vmatpush.msra.mxu0 %v11829_v40  ;;  %808 = vmatpush.msra.mxu1 %v11831_v24  ;;  %16626 = vst [vmem:[#allocation102_spill] sm:$0xff] %v11847_v52  ;;  %v11859_v40 = vld [vmem:[#allocation2 + $0x6f0] sm:$0xff]  ;;  %v11863_v24 = vld [vmem:[#allocation2 + $0x2f8] sm:$0xff] }
 0x1e9   :  { %16627 = vst [vmem:[#allocation103_spill] sm:$0xff] %v11849_v3  ;;  %831 = vmatpush.msra.mxu2 %v11835_v31  ;;  %854 = vmatpush.msra.mxu3 %v11837_v44  ;;  %v11865_v31 = vld [vmem:[#allocation2 + $0x6f8] sm:$0xff]  ;;  %v11881_v44 = vld [vmem:[#allocation2 + $0x270] sm:$0xff] }
 0x1ea   :  { %786 = vmatpush.msra.mxu0 %v11841_v42  ;;  %809 = vmatpush.msra.mxu1 %v11843_v41  ;;  %16628 = vst [vmem:[#allocation104_spill] sm:$0xff] %v11857_v11  ;;  %v11869_v41 = vld [vmem:[#allocation2 + $0x2b0] sm:$0xff]  ;;  %v11877_v42 = vld [vmem:[#allocation2 + $0x6b8] sm:$0xff] }
 0x1eb   :  { %832 = vmatpush.msra.mxu2 %v11847_v52  ;;  %855 = vmatpush.msra.mxu3 %v11849_v3  ;;  %16629 = vst [vmem:[#allocation105_spill] sm:$0xff] %v11859_v40  ;;  %v11871_v52 = vld [vmem:[#allocation2 + $0x6b0] sm:$0xff]  ;;  %v11875_v3 = vld [vmem:[#allocation2 + $0x2b8] sm:$0xff] }
 0x1ec   :  { %618 = vmatmul.f32.gmra.mxu0 %v11789_v43  ;;  %641 = vmatmul.f32.gmra.mxu1 %v11791_v5  ;;  %16630 = vst [vmem:[#allocation106_spill] sm:$0xff] %v11863_v24  ;;  %v11883_v15 = vld [vmem:[#allocation2 + $0x670] sm:$0xff] }
 0x1ed   :  { %16631 = vst [vmem:[#allocation107_spill] sm:$0xff] %v11865_v31  ;;  %664 = vmatmul.f32.gmra.mxu2 %v11789_v43  ;;  %687 = vmatmul.f32.gmra.mxu3 %v11791_v5 }
 0x1ee   :  { %16632 = vst [vmem:[#allocation108_spill] sm:$0xff] %v11869_v41  ;;  %787 = vmatpush.msra.mxu0 %v11857_v11  ;;  %810 = vmatpush.msra.mxu1 %v11859_v40  ;;  %v11889_v11 = vld [vmem:[#allocation2 + $0x678] sm:$0xff]  ;;  %v11893_v40 = vld [vmem:[#allocation2 + $0x230] sm:$0xff] }
 0x1ef   :  { %16633 = vst [vmem:[#allocation109_spill] sm:$0xff] %v11871_v52  ;;  %833 = vmatpush.msra.mxu2 %v11863_v24  ;;  %856 = vmatpush.msra.mxu3 %v11865_v31  ;;  %v11895_v24 = vld [vmem:[#allocation2 + $0x630] sm:$0xff]  ;;  %v11899_v31 = vld [vmem:[#allocation2 + $0x238] sm:$0xff] }
 0x1f0   :  { %16634 = vst [vmem:[#allocation110_spill] sm:$0xff] %v11875_v3  ;;  %788 = vmatpush.msra.mxu0 %v11869_v41  ;;  %811 = vmatpush.msra.mxu1 %v11871_v52  ;;  %v11901_v41 = vld [vmem:[#allocation2 + $0x638] sm:$0xff] }
 0x1f1   :  { %16635 = vst [vmem:[#allocation111_spill] sm:$0xff] %v11877_v42  ;;  %834 = vmatpush.msra.mxu2 %v11875_v3  ;;  %857 = vmatpush.msra.mxu3 %v11877_v42  ;;  %v11909_v42 = vld [vmem:[#allocation2 + $0x1f0] sm:$0xff]  ;;  %v11939_v52 = vld [vmem:[#allocation2 + $0x178] sm:$0xff] }
 0x1f2   :  { %16636 = vst [vmem:[#allocation112_spill] sm:$0xff] %v11881_v44  ;;  %789 = vmatpush.msra.mxu0 %v11881_v44  ;;  %812 = vmatpush.msra.mxu1 %v11883_v15  ;;  %v11911_v44 = vld [vmem:[#allocation2 + $0x5f0] sm:$0xff] }
 0x1f3   :  { %16637 = vst [vmem:[#allocation113_spill] sm:$0xff] %v11883_v15  ;;  %835 = vmatpush.msra.mxu2 %v11887_v9  ;;  %858 = vmatpush.msra.mxu3 %v11889_v11  ;;  %v11915_v15 = vld [vmem:[#allocation2 + $0x1f8] sm:$0xff]  ;;  %v11935_v3 = vld [vmem:[#allocation2 + $0x570] sm:$0xff] }
 0x1f4   :  { %16638 = vst [vmem:[#allocation114_spill] sm:$0xff] %v11887_v9  ;;  %790 = vmatpush.msra.mxu0 %v11893_v40  ;;  %813 = vmatpush.msra.mxu1 %v11895_v24  ;;  %v11917_v9 = vld [vmem:[#allocation2 + $0x5f8] sm:$0xff] }
 0x1f5   :  { %16639 = vst [vmem:[#allocation115_spill] sm:$0xff] %v11889_v11  ;;  %836 = vmatpush.msra.mxu2 %v11899_v31  ;;  %859 = vmatpush.msra.mxu3 %v11901_v41  ;;  %v11933_v11 = vld [vmem:[#allocation2 + $0x170] sm:$0xff] }
 0x1f6   :  { %16640 = vst [vmem:[#allocation116_spill] sm:$0xff] %v11893_v40  ;;  %707 = vmatmul.f32.vlgmr.msrb.gmra.mxu0 %v11530_v1  ;;  %730 = vmatmul.f32.vlgmr.msrb.gmra.mxu1 %v11532_v26  ;;  %v11929_v40 = vld [vmem:[#allocation2 + $0x5b8] sm:$0xff] }
 0x1f7   :  { %16641 = vst [vmem:[#allocation117_spill] sm:$0xff] %v11895_v24  ;;  %753 = vmatmul.f32.vlgmr.msrb.gmra.mxu2 %v11530_v1  ;;  %776 = vmatmul.f32.vlgmr.msrb.gmra.mxu3 %v11532_v26  ;;  %v11921_v24 = vld [vmem:[#allocation2 + $0x1b0] sm:$0xff] }
 0x1f8   :  { %16642 = vst [vmem:[#allocation118_spill] sm:$0xff] %v11899_v31  ;;  %v11923_v31 = vld [vmem:[#allocation2 + $0x5b0] sm:$0xff]  ;;  %791 = vmatpush.msra.mxu0 %v11909_v42  ;;  %814 = vmatpush.msra.mxu1 %v11911_v44 }
 0x1f9   :  { %16643 = vst [vmem:[#allocation119_spill] sm:$0xff] %v11901_v41  ;;  %v11927_v41 = vld [vmem:[#allocation2 + $0x1b8] sm:$0xff]  ;;  %837 = vmatpush.msra.mxu2 %v11915_v15  ;;  %860 = vmatpush.msra.mxu3 %v11917_v9 }
 0x1fa   :  { %16644 = vst [vmem:[#allocation120_spill] sm:$0xff] %v11909_v42  ;;  %792 = vmatpush.msra.mxu0 %v11921_v24  ;;  %815 = vmatpush.msra.mxu1 %v11923_v31  ;;  %v11941_v42 = vld [vmem:[#allocation2 + $0x578] sm:$0xff] }
 0x1fb   :  { %16645 = vst [vmem:[#allocation121_spill] sm:$0xff] %v11911_v44  ;;  %838 = vmatpush.msra.mxu2 %v11927_v41  ;;  %861 = vmatpush.msra.mxu3 %v11929_v40  ;;  %v11945_v44 = vld [vmem:[#allocation2 + $0x130] sm:$0xff] }
 0x1fc   :  { %16646 = vst [vmem:[#allocation122_spill] sm:$0xff] %v11915_v15  ;;  %v11947_v15 = vld [vmem:[#allocation2 + $0x530] sm:$0xff]  ;;  %793 = vmatpush.msra.mxu0 %v11933_v11  ;;  %816 = vmatpush.msra.mxu1 %v11935_v3 }
 0x1fd   :  { %16647 = vst [vmem:[#allocation123_spill] sm:$0xff] %v11917_v9  ;;  %v11951_v9 = vld [vmem:[#allocation2 + $0x138] sm:$0xff]  ;;  %839 = vmatpush.msra.mxu2 %v11939_v52  ;;  %862 = vmatpush.msra.mxu3 %v11941_v42 }
 0x1fe   :  { %16648 = vst [vmem:[#allocation124_spill] sm:$0xff] %v11921_v24  ;;  %v11953_v24 = vld [vmem:[#allocation2 + $0x538] sm:$0xff]  ;;  %794 = vmatpush.msra.mxu0 %v11945_v44  ;;  %817 = vmatpush.msra.mxu1 %v11947_v15 }
 0x1ff   :  { %16649 = vst [vmem:[#allocation125_spill] sm:$0xff] %v11923_v31  ;;  %840 = vmatpush.msra.mxu2 %v11951_v9  ;;  %863 = vmatpush.msra.mxu3 %v11953_v24 }
 0x200   :  { %16650 = vst [vmem:[#allocation126_spill] sm:$0xff] %v11927_v41  ;;  %710 = vmatmul.f32.gmra.mxu0 %v11789_v43  ;;  %733 = vmatmul.f32.gmra.mxu1 %v11791_v5  ;;  %v11981_v41 = vld [vmem:[#allocation4 + $0x58] sm:$0xff] }
 0x201   :  { %16651 = vst [vmem:[#allocation127_spill] sm:$0xff] %v11929_v40  ;;  %v11961_v40 = vld [vmem:[#allocation2 + $0xf0] sm:$0xff]  ;;  %756 = vmatmul.f32.gmra.mxu2 %v11789_v43  ;;  %779 = vmatmul.f32.gmra.mxu3 %v11791_v5  ;;  %v3862_v31 = vperm.slane %v11981_v41, 5 }
 0x202   :  { %16652 = vst [vmem:[#allocation128_spill] sm:$0xff] %v11933_v11  ;;  %v11963_v11 = vld [vmem:[#allocation2 + $0x4f0] sm:$0xff]  ;;  %795 = vmatpush.msra.mxu0 %v11961_v40 }
 0x203   :  { %16653 = vst [vmem:[#allocation129_spill] sm:$0xff] %v11935_v3  ;;  %v11967_v3 = vld [vmem:[#allocation2 + $0xf8] sm:$0xff]  ;;  %818 = vmatpush.msra.mxu1 %v11963_v11  ;;  %3905 = vrot.lane.b32.xlu2 %v3862_v31, %s11130_s9  ;;  %v10914_v31 = vld [vmem:[#allocation2 + $0x3c0] sm:$0xff] }
 0x204   :  { %16654 = vst [vmem:[#allocation130_spill] sm:$0xff] %v11939_v52  ;;  %v11969_v52 = vld [vmem:[#allocation2 + $0x4f8] sm:$0xff]  ;;  %841 = vmatpush.msra.mxu2 %v11967_v3 }
 0x205   :  { %16655 = vst [vmem:[#allocation131_spill] sm:$0xff] %v11941_v42  ;;  %v10912_v42 = vld [vmem:[#allocation4 + $0x18] sm:$0xff]  ;;  %864 = vmatpush.msra.mxu3 %v11969_v52 }
 0x206   :  { %16656 = vst [vmem:[#allocation132_spill] sm:$0xff] %v11945_v44  ;;  %v4405_v44 = vperm.slane %v10912_v42, 6  ;;  %v11986_v42 = vld [vmem:[#allocation2 + $0x4b8] sm:$0xff] }
 0x207   :  { %16657 = vst [vmem:[#allocation133_spill] sm:$0xff] %v11947_v15  ;;  %v11979_v15 = vld [vmem:[#allocation2 + $0xb8] sm:$0xff]  ;;  %865 = vmatpush.msra.mxu3 %v11986_v42 }
 0x208   :  { %16658 = vst [vmem:[#allocation134_spill] sm:$0xff] %v11951_v9  ;;  %v11973_v9 = vld [vmem:[#allocation2 + $0xb0] sm:$0xff]  ;;  %4440 = vrot.lane.b32.xlu0 %v4405_v44, %s11128_s29  ;;  %842 = vmatpush.msra.mxu2 %v11979_v15 }
 0x209   :  { %16659 = vst [vmem:[#allocation135_spill] sm:$0xff] %v11953_v24  ;;  %v11977_v24 = vld [vmem:[#allocation2 + $0x4b0] sm:$0xff]  ;;  %796 = vmatpush.msra.mxu0 %v11973_v9  ;;  %866 = vmatpush.msra.mxu3 %v11998_v30  ;;  %v10925_v30 = vld [vmem:[#allocation2 + $0x348] sm:$0xff] }
 0x20a   :  { %16660 = vst [vmem:[#allocation136_spill] sm:$0xff] %v11961_v40  ;;  %v11990_v40 = vld [vmem:[#allocation2 + $0x70] sm:$0xff]  ;;  %819 = vmatpush.msra.mxu1 %v11977_v24  ;;  %843 = vmatpush.msra.mxu2 %v11996_v29  ;;  %v10930_v29 = vld [vmem:[#allocation2 + $0x708] sm:$0xff] }
 0x20b   :  { %16661 = vst [vmem:[#allocation137_spill] sm:$0xff] %v11963_v11  ;;  %v11992_v11 = vld [vmem:[#allocation2 + $0x470] sm:$0xff]  ;;  %797 = vmatpush.msra.mxu0 %v11990_v40 }
 0x20c   :  { %16662 = vst [vmem:[#allocation138_spill] sm:$0xff] %v11969_v52  ;;  %v12002_v52 = vld [vmem:[#allocation2 + $0x30] sm:$0xff]  ;;  %820 = vmatpush.msra.mxu1 %v11992_v11 }
 0x20d   :  { %16663 = vst [vmem:[#allocation139_spill] sm:$0xff] %v11973_v9  ;;  %v12004_v44 = vld [vmem:[#allocation2 + $0x430] sm:$0xff]  ;;  %v12008_v9 = vld [vmem:[#allocation2 + $0x38] sm:$0xff]  ;;  %798 = vmatpush.msra.mxu0 %v12002_v52 }
 0x20e   :  { %16664 = vst [vmem:[#allocation140_spill] sm:$0xff] %v11977_v24  ;;  %v12010_v24 = vld [vmem:[#allocation2 + $0x438] sm:$0xff]  ;;  %821 = vmatpush.msra.mxu1 %v12004_v44  ;;  %844 = vmatpush.msra.mxu2 %v12008_v9 }
 0x20f   :  { %16665 = vst [vmem:[#allocation141_spill] sm:$0xff] %v11986_v42  ;;  %867 = vmatpush.msra.mxu3 %v12010_v24  ;;  %875 = vmatpush.msrb.mxu0 %v10914_v31  ;;  %v10917_v42 = vld [vmem:[#allocation2 + $0x7c8] sm:$0xff] }
 0x210   :  { %16666 = vst [vmem:[#allocation142_spill] sm:$0xff] %v11990_v40  ;;  %v10915_v40 = vld [vmem:[#allocation2 + $0x7c0] sm:$0xff]  ;;  %799 = vmatmul.f32.vlgmr.msra.gmra.mxu0 %v11530_v1  ;;  %822 = vmatmul.f32.vlgmr.msra.gmra.mxu1 %v11532_v26  ;;  %v10921_v31 = vld [vmem:[#allocation2 + $0x388] sm:$0xff] }
 0x211   :  { %16667 = vst [vmem:[#allocation143_spill] sm:$0xff] %v11992_v11  ;;  %898 = vmatpush.msrb.mxu1 %v10915_v40  ;;  %v10916_v11 = vld [vmem:[#allocation2 + $0x3c8] sm:$0xff]  ;;  %944 = vmatpush.msrb.mxu3 %v10917_v42  ;;  %v10923_v42 = vld [vmem:[#allocation2 + $0x340] sm:$0xff] }
 0x212   :  { %16670 = vst [vmem:[#allocation146_spill] sm:$0xff] %v12002_v52  ;;  %921 = vmatpush.msrb.mxu2 %v10916_v11  ;;  %868 = vmatmul.f32.vlgmr.msra.gmra.mxu3 %v11532_v26  ;;  %v10922_v11 = vld [vmem:[#allocation2 + $0x788] sm:$0xff]  ;;  %v10924_v52 = vld [vmem:[#allocation2 + $0x740] sm:$0xff] }
 0x213   :  { %16671 = vst [vmem:[#allocation147_spill] sm:$0xff] %v12004_v44  ;;  %845 = vmatmul.f32.vlgmr.msra.gmra.mxu2 %v11530_v1  ;;  %v10918_v44 = vld [vmem:[#allocation2 + $0x380] sm:$0xff]  ;;  %945 = vmatpush.msrb.mxu3 %v10922_v11  ;;  %v10926_v1 = vld [vmem:[#allocation2 + $0x748] sm:$0xff] }
 0x214   :  { %16672 = vst [vmem:[#allocation148_spill] sm:$0xff] %v12008_v9  ;;  %876 = vmatpush.msrb.mxu0 %v10918_v44  ;;  %v10919_v9 = vld [vmem:[#allocation2 + $0x780] sm:$0xff]  ;;  %922 = vmatpush.msrb.mxu2 %v10921_v31  ;;  %v10929_v44 = vld [vmem:[#allocation2 + $0x308] sm:$0xff] }
 0x215   :  { %16673 = vst [vmem:[#allocation149_spill] sm:$0xff] %v12010_v24  ;;  %899 = vmatpush.msrb.mxu1 %v10919_v9  ;;  %v12022_v24 = vld [vmem:[#allocation4 + $0x70] sm:$0xff]  ;;  %946 = vmatpush.msrb.mxu3 %v10926_v1  ;;  %v10927_v26 = vld [vmem:[#allocation2 + $0x300] sm:$0xff]  ;;  %v10937_v1 = vld [vmem:[#allocation2 + $0x288] sm:$0xff] }
 0x216   :  { %v3865_v40 = vperm.slane %v12022_v24, 5  ;;  %877 = vmatpush.msrb.mxu0 %v10923_v42  ;;  %923 = vmatpush.msrb.mxu2 %v10925_v30  ;;  %v10928_v9 = vld [vmem:[#allocation2 + $0x700] sm:$0xff]  ;;  %v10933_v42 = vld [vmem:[#allocation2 + $0x2c8] sm:$0xff]  ;;  %v4407_v30 = vperm.slane %v11776_v59, 6 }
 0x217   :  { %900 = vmatpush.msrb.mxu1 %v10924_v52  ;;  %947 = vmatpush.msrb.mxu3 %v10930_v29  ;;  %v10931_v31 = vld [vmem:[#allocation2 + $0x2c0] sm:$0xff]  ;;  %v10934_v52 = vld [vmem:[#allocation2 + $0x6c8] sm:$0xff] }
 0x218   :  { %3911 = vrot.lane.b32.xlu2 %v3865_v40, %s11130_s9  ;;  %878 = vmatpush.msrb.mxu0 %v10927_v26  ;;  %v10932_v11 = vld [vmem:[#allocation2 + $0x6c0] sm:$0xff]  ;;  %v4404_v26 = vperm.slane %v11654_v4, 6  ;;  %v10946_v4 = vld [vmem:[#allocation2 + $0x608] sm:$0xff] }
 0x219   :  { %901 = vmatpush.msrb.mxu1 %v10928_v9  ;;  %924 = vmatpush.msrb.mxu2 %v10929_v44  ;;  %v10935_v40 = vld [vmem:[#allocation2 + $0x280] sm:$0xff]  ;;  %v10938_v9 = vld [vmem:[#allocation2 + $0x688] sm:$0xff] }
 0x21a   :  { %879 = vmatpush.msrb.mxu0 %v10931_v31  ;;  %948 = vmatpush.msrb.mxu3 %v10934_v52  ;;  %v10936_v29 = vld [vmem:[#allocation2 + $0x680] sm:$0xff]  ;;  %v10941_v31 = vld [vmem:[#allocation2 + $0x248] sm:$0xff] }
 0x21b   :  { %902 = vmatpush.msrb.mxu1 %v10932_v11  ;;  %925 = vmatpush.msrb.mxu2 %v10933_v42  ;;  %v10939_v44 = vld [vmem:[#allocation2 + $0x240] sm:$0xff]  ;;  %v10945_v42 = vld [vmem:[#allocation2 + $0x208] sm:$0xff] }
 0x21c   :  { %802 = vmatmul.f32.gmra.mxu0 %v11789_v43  ;;  %825 = vmatmul.f32.gmra.mxu1 %v11791_v5  ;;  %v10940_v59 = vld [vmem:[#allocation2 + $0x640] sm:$0xff] }
 0x21d   :  { %848 = vmatmul.f32.gmra.mxu2 %v11789_v43  ;;  %871 = vmatmul.f32.gmra.mxu3 %v11791_v5  ;;  %v10942_v43 = vld [vmem:[#allocation2 + $0x648] sm:$0xff]  ;;  %v10943_v5 = vld [vmem:[#allocation2 + $0x200] sm:$0xff] }
 0x21e   :  { %880 = vmatpush.msrb.mxu0 %v10935_v40  ;;  %903 = vmatpush.msrb.mxu1 %v10936_v29  ;;  %v10944_v11 = vld [vmem:[#allocation2 + $0x600] sm:$0xff]  ;;  %v10949_v40 = vld [vmem:[#allocation2 + $0x1c8] sm:$0xff] }
 0x21f   :  { %926 = vmatpush.msrb.mxu2 %v10937_v1  ;;  %949 = vmatpush.msrb.mxu3 %v10938_v9  ;;  %v10947_v52 = vld [vmem:[#allocation2 + $0x1c0] sm:$0xff]  ;;  %v10950_v29 = vld [vmem:[#allocation2 + $0x5c8] sm:$0xff] }
 0x220   :  { %4444 = vrot.lane.b32.xlu0 %v4407_v30, %s11128_s29  ;;  %881 = vmatpush.msrb.mxu0 %v10939_v44  ;;  %v10948_v30 = vld [vmem:[#allocation2 + $0x5c0] sm:$0xff]  ;;  %v10953_v44 = vld [vmem:[#allocation2 + $0x188] sm:$0xff] }
 0x221   :  { %904 = vmatpush.msrb.mxu1 %v10940_v59  ;;  %927 = vmatpush.msrb.mxu2 %v10941_v31  ;;  %v10951_v1 = vld [vmem:[#allocation2 + $0x180] sm:$0xff]  ;;  %v10954_v59 = vld [vmem:[#allocation2 + $0x588] sm:$0xff] }
 0x222   :  { %950 = vmatpush.msrb.mxu3 %v10942_v43  ;;  %4438 = vrot.lane.b32.xlu2 %v4404_v26, %s11128_s29  ;;  %v4408_v26 = vperm.slane %v11713_v55, 6  ;;  %v10952_v9 = vld [vmem:[#allocation2 + $0x580] sm:$0xff]  ;;  %v10961_v55 = vld [vmem:[#allocation2 + $0x108] sm:$0xff] }
 0x223   :  { %882 = vmatpush.msrb.mxu0 %v10943_v5  ;;  %905 = vmatpush.msrb.mxu1 %v10944_v11  ;;  %v10955_v31 = vld [vmem:[#allocation2 + $0x140] sm:$0xff]  ;;  %v10957_v5 = vld [vmem:[#allocation2 + $0x148] sm:$0xff] }
 0x224   :  { %928 = vmatpush.msrb.mxu2 %v10945_v42  ;;  %951 = vmatpush.msrb.mxu3 %v10946_v4  ;;  %v10956_v43 = vld [vmem:[#allocation2 + $0x540] sm:$0xff]  ;;  %v10958_v11 = vld [vmem:[#allocation2 + $0x548] sm:$0xff] }
 0x225   :  { %883 = vmatpush.msrb.mxu0 %v10947_v52  ;;  %906 = vmatpush.msrb.mxu1 %v10948_v30  ;;  %v10959_v42 = vld [vmem:[#allocation2 + $0x100] sm:$0xff]  ;;  %v10962_v52 = vld [vmem:[#allocation2 + $0x508] sm:$0xff] }
 0x226   :  { %929 = vmatpush.msrb.mxu2 %v10949_v40  ;;  %952 = vmatpush.msrb.mxu3 %v10950_v29  ;;  %v10960_v4 = vld [vmem:[#allocation2 + $0x500] sm:$0xff]  ;;  %v10965_v29 = vld [vmem:[#allocation2 + $0xc8] sm:$0xff] }
 0x227   :  { %884 = vmatpush.msrb.mxu0 %v10951_v1  ;;  %907 = vmatpush.msrb.mxu1 %v10952_v9  ;;  %v10963_v30 = vld [vmem:[#allocation2 + $0xc0] sm:$0xff]  ;;  %v10966_v1 = vld [vmem:[#allocation2 + $0x4c8] sm:$0xff] }
 0x228   :  { %930 = vmatpush.msrb.mxu2 %v10953_v44  ;;  %953 = vmatpush.msrb.mxu3 %v10954_v59  ;;  %v10964_v40 = vld [vmem:[#allocation2 + $0x4c0] sm:$0xff]  ;;  %v10969_v59 = vld [vmem:[#allocation2 + $0x88] sm:$0xff] }
 0x229   :  { %885 = vmatpush.msrb.mxu0 %v10955_v31  ;;  %908 = vmatpush.msrb.mxu1 %v10956_v43  ;;  %v10967_v9 = vld [vmem:[#allocation2 + $0x80] sm:$0xff]  ;;  %v10970_v31 = vld [vmem:[#allocation2 + $0x488] sm:$0xff] }
 0x22a   :  { %931 = vmatpush.msrb.mxu2 %v10957_v5  ;;  %954 = vmatpush.msrb.mxu3 %v10958_v11  ;;  %v10968_v44 = vld [vmem:[#allocation2 + $0x480] sm:$0xff]  ;;  %v10973_v11 = vld [vmem:[#allocation2 + $0x48] sm:$0xff] }
 0x22b   :  { %4446 = vrot.lane.b32.xlu1 %v4408_v26, %s11128_s29  ;;  %886 = vmatpush.msrb.mxu0 %v10959_v42  ;;  %v4406_v26 = vperm.slane %v11765_v8, 6  ;;  %v10971_v43 = vld [vmem:[#allocation2 + $0x40] sm:$0xff]  ;;  %v10974_v42 = vld [vmem:[#allocation2 + $0x448] sm:$0xff] }
 0x22c   :  { %909 = vmatpush.msrb.mxu1 %v10960_v4  ;;  %932 = vmatpush.msrb.mxu2 %v10961_v55  ;;  %v10972_v5 = vld [vmem:[#allocation2 + $0x440] sm:$0xff]  ;;  %v12037_v4 = vpop.f32.mrf.mxu2  ;;  %v12040_v55 = vpop.f32.mrf.mxu3 }
 0x22d   :  { %955 = vmatpush.msrb.mxu3 %v10962_v52  ;;  %887 = vmatpush.msrb.mxu0 %v10963_v30  ;;  %v10975_v52 = vld [vmem:[#allocation2] sm:$0xff]  ;;  %v10977_v30 = vld [vmem:[#allocation2 + $0x8] sm:$0xff] }
 0x22e   :  { %910 = vmatpush.msrb.mxu1 %v10964_v40  ;;  %933 = vmatpush.msrb.mxu2 %v10965_v29  ;;  %v10976_v8 = vld [vmem:[#allocation2 + $0x400] sm:$0xff]  ;;  %v10978_v40 = vld [vmem:[#allocation2 + $0x408] sm:$0xff]  ;;  %v10979_v29 = vld.sshfl [vmem:[#allocation1] sm:$0xff pattern:$0x75316420] }
 0x22f   :  { %956 = vmatpush.msrb.mxu3 %v10966_v1  ;;  %888 = vmatpush.msrb.mxu0 %v10967_v9  ;;  %v140_v1 = vmul.f32 %v10979_v29, %v11771_v13  ;;  %v10980_v9 = vld [vmem:[#allocation2 + $0x3d0] sm:$0xff]  ;;  %v10991_v29 = vld [vmem:[#allocation2 + $0x358] sm:$0xff] }
 0x230   :  { %911 = vmatpush.msrb.mxu1 %v10968_v44  ;;  %934 = vmatpush.msrb.mxu2 %v10969_v59  ;;  %v10981_v44 = vld.sshfl [vmem:[#allocation1 + $0x8] sm:$0xff pattern:$0x75316420]  ;;  %v10982_v59 = vld [vmem:[#allocation2 + $0x7d0] sm:$0xff] }
 0x231   :  { %957 = vmatpush.msrb.mxu3 %v10970_v31  ;;  %889 = vmatpush.msrb.mxu0 %v10971_v43  ;;  %v10983_v31 = vld [vmem:[#allocation2 + $0x3d8] sm:$0xff]  ;;  %v152_v43 = vadd.f32 %v11784_v62, %v140_v1 }
 0x232   :  { %912 = vmatpush.msrb.mxu1 %v10972_v5  ;;  %935 = vmatpush.msrb.mxu2 %v10973_v11  ;;  %v10984_v5 = vld [vmem:[#allocation2 + $0x7d8] sm:$0xff]  ;;  %v10985_v11 = vld [vmem:[#allocation2 + $0x390] sm:$0xff] }
 0x233   :  { %958 = vmatpush.msrb.mxu3 %v10974_v42  ;;  %4442 = vrot.lane.b32.xlu2 %v4406_v26, %s11128_s29  ;;  %v141_v26 = vmul.f32 %v10981_v44, %v11771_v13  ;;  %v10990_v13 = vld [vmem:[#allocation2 + $0x750] sm:$0xff]  ;;  %v10992_v1 = vld [vmem:[#allocation2 + $0x758] sm:$0xff] }
 0x234   :  { %890 = vmatpush.msrb.mxu0 %v10975_v52  ;;  %913 = vmatpush.msrb.mxu1 %v10976_v8  ;;  %v10986_v52 = vld [vmem:[#allocation2 + $0x790] sm:$0xff]  ;;  %v10987_v8 = vld [vmem:[#allocation2 + $0x398] sm:$0xff] }
 0x235   :  { %936 = vmatpush.msrb.mxu2 %v10977_v30  ;;  %959 = vmatpush.msrb.mxu3 %v10978_v40  ;;  %v153_v42 = vadd.f32 %v11784_v62, %v141_v26  ;;  %v10988_v30 = vld [vmem:[#allocation2 + $0x798] sm:$0xff]  ;;  %v10989_v40 = vld [vmem:[#allocation2 + $0x350] sm:$0xff] }
 0x236   :  { %891 = vmatmul.f32.vlgmr.msrb.gmra.mxu0 %v12037_v4  ;;  %914 = vmatmul.f32.vlgmr.msrb.gmra.mxu1 %v12040_v55  ;;  %v10993_v44 = vld [vmem:[#allocation2 + $0x310] sm:$0xff]  ;;  %v10995_v26 = vld [vmem:[#allocation2 + $0x318] sm:$0xff] }
 0x237   :  { %937 = vmatmul.f32.vlgmr.msrb.gmra.mxu2 %v12037_v4  ;;  %960 = vmatmul.f32.vlgmr.msrb.gmra.mxu3 %v12040_v55  ;;  %v10994_v62 = vld [vmem:[#allocation2 + $0x710] sm:$0xff] }
 0x238   :  { %967 = vmatpush.msra.mxu0 %v10980_v9  ;;  %990 = vmatpush.msra.mxu1 %v10982_v59  ;;  %v12050_v9 = vmax.f32 %v152_v43, 0.0  ;;  %v12052_v59 = vmax.f32 %v153_v42, 0.0  ;;  %v10997_v43 = vld [vmem:[#allocation2 + $0x2d0] sm:$0xff]  ;;  %v11000_v42 = vld [vmem:[#allocation2 + $0x6d8] sm:$0xff] }
 0x239   :  { %1013 = vmatpush.msra.mxu2 %v10983_v31  ;;  %1036 = vmatpush.msra.mxu3 %v10984_v5  ;;  %v10996_v31 = vld [vmem:[#allocation2 + $0x718] sm:$0xff]  ;;  %v10998_v5 = vld [vmem:[#allocation2 + $0x6d0] sm:$0xff] }
 0x23a   :  { %968 = vmatpush.msra.mxu0 %v10985_v11  ;;  %991 = vmatpush.msra.mxu1 %v10986_v52  ;;  %v10999_v11 = vld [vmem:[#allocation2 + $0x2d8] sm:$0xff]  ;;  %v11001_v52 = vld [vmem:[#allocation2 + $0x290] sm:$0xff] }
 0x23b   :  { %1014 = vmatpush.msra.mxu2 %v10987_v8  ;;  %1037 = vmatpush.msra.mxu3 %v10988_v30  ;;  %v11002_v8 = vld [vmem:[#allocation2 + $0x690] sm:$0xff]  ;;  %v11003_v30 = vld [vmem:[#allocation2 + $0x298] sm:$0xff] }
 0x23c   :  { %969 = vmatpush.msra.mxu0 %v10989_v40  ;;  %992 = vmatpush.msra.mxu1 %v10990_v13  ;;  %v12058_v40 = vpop.permute.xlu0 %2408  ;;  %v11004_v13 = vld [vmem:[#allocation2 + $0x698] sm:$0xff] }
 0x23d   :  { %1015 = vmatpush.msra.mxu2 %v10991_v29  ;;  %1038 = vmatpush.msra.mxu3 %v10992_v1  ;;  %v11005_v29 = vld [vmem:[#allocation2 + $0x250] sm:$0xff]  ;;  %v12060_v1 = vpop.permute.xlu2 %2957 }
 0x23e   :  { %970 = vmatpush.msra.mxu0 %v10993_v44  ;;  %993 = vmatpush.msra.mxu1 %v10994_v62  ;;  %v11006_v44 = vld [vmem:[#allocation2 + $0x650] sm:$0xff]  ;;  %v11007_v62 = vld [vmem:[#allocation2 + $0x258] sm:$0xff] }
 0x23f   :  { %1016 = vmatpush.msra.mxu2 %v10995_v26  ;;  %1039 = vmatpush.msra.mxu3 %v10996_v31  ;;  %v11008_v26 = vld [vmem:[#allocation2 + $0x658] sm:$0xff]  ;;  %v11009_v31 = vld [vmem:[#allocation2 + $0x210] sm:$0xff] }
 0x240   :  { %894 = vmatmul.f32.gmra.mxu0 %v12050_v9  ;;  %917 = vmatmul.f32.gmra.mxu1 %v12052_v59 }
 0x241   :  { %940 = vmatmul.f32.gmra.mxu2 %v12050_v9  ;;  %963 = vmatmul.f32.gmra.mxu3 %v12052_v59 }
 0x242   :  { %971 = vmatpush.msra.mxu0 %v10997_v43  ;;  %994 = vmatpush.msra.mxu1 %v10998_v5  ;;  %v11010_v43 = vld [vmem:[#allocation2 + $0x610] sm:$0xff]  ;;  %v11011_v5 = vld [vmem:[#allocation2 + $0x218] sm:$0xff] }
 0x243   :  { %1017 = vmatpush.msra.mxu2 %v10999_v11  ;;  %1040 = vmatpush.msra.mxu3 %v11000_v42  ;;  %v11012_v11 = vld [vmem:[#allocation2 + $0x618] sm:$0xff]  ;;  %v11013_v42 = vld [vmem:[#allocation2 + $0x1d0] sm:$0xff] }
 0x244   :  { %972 = vmatpush.msra.mxu0 %v11001_v52  ;;  %995 = vmatpush.msra.mxu1 %v11002_v8  ;;  %v11014_v52 = vld [vmem:[#allocation4 + $0x38] sm:$0xff] }
 0x245   :  { %1018 = vmatpush.msra.mxu2 %v11003_v30  ;;  %1041 = vmatpush.msra.mxu3 %v11004_v13  ;;  %v4409_v8 = vperm.slane %v11014_v52, 6  ;;  %v11015_v30 = vld [vmem:[#allocation2 + $0x5d0] sm:$0xff]  ;;  %v11016_v13 = vld [vmem:[#allocation2 + $0x1d8] sm:$0xff] }
 0x246   :  { %973 = vmatpush.msra.mxu0 %v11005_v29  ;;  %996 = vmatpush.msra.mxu1 %v11006_v44  ;;  %v11017_v29 = vld [vmem:[#allocation2 + $0x5d8] sm:$0xff]  ;;  %v11018_v44 = vld [vmem:[#allocation2 + $0x190] sm:$0xff] }
 0x247   :  { %1019 = vmatpush.msra.mxu2 %v11007_v62  ;;  %1042 = vmatpush.msra.mxu3 %v11008_v26  ;;  %v11019_v62 = vld [vmem:[#allocation2 + $0x590] sm:$0xff]  ;;  %v11020_v26 = vld [vmem:[#allocation2 + $0x198] sm:$0xff] }
 0x248   :  { %974 = vmatpush.msra.mxu0 %v11009_v31  ;;  %997 = vmatpush.msra.mxu1 %v11010_v43  ;;  %v11021_v31 = vld [vmem:[#allocation2 + $0x598] sm:$0xff]  ;;  %v11022_v43 = vld [vmem:[#allocation2 + $0x150] sm:$0xff] }
 0x249   :  { %1020 = vmatpush.msra.mxu2 %v11011_v5  ;;  %1043 = vmatpush.msra.mxu3 %v11012_v11  ;;  %v11023_v5 = vld [vmem:[#allocation2 + $0x550] sm:$0xff]  ;;  %v12063_v11 = vpop.permute.xlu0 %2418  ;;  %v11025_v52 = vld [vmem:[#allocation2 + $0x558] sm:$0xff] }
 0x24a   :  { %975 = vmatpush.msra.mxu0 %v11013_v42  ;;  %998 = vmatpush.msra.mxu1 %v11015_v30  ;;  %v11024_v42 = vld [vmem:[#allocation2 + $0x158] sm:$0xff]  ;;  %v12065_v30 = vpop.permute.xlu2 %2959 }
 0x24b   :  { %1021 = vmatpush.msra.mxu2 %v11016_v13  ;;  %1044 = vmatpush.msra.mxu3 %v11017_v29  ;;  %v11026_v13 = vld [vmem:[#allocation2 + $0x110] sm:$0xff] }
 0x24c   :  { %976 = vmatpush.msra.mxu0 %v11018_v44  ;;  %999 = vmatpush.msra.mxu1 %v11019_v62  ;;  %v11027_v29 = vld [vmem:[#allocation2 + $0x510] sm:$0xff]  ;;  %v4411_v44 = vperm.slane %v11758_v33, 6  ;;  %v11028_v62 = vld [vmem:[#allocation2 + $0x118] sm:$0xff] }
 0x24d   :  { %1022 = vmatpush.msra.mxu2 %v11020_v26  ;;  %1045 = vmatpush.msra.mxu3 %v11021_v31  ;;  %v11030_v26 = vld [vmem:[#allocation2 + $0xd0] sm:$0xff]  ;;  %v11037_v33 = vld [vmem:[#allocation2 + $0x498] sm:$0xff] }
 0x24e   :  { %4448 = vrot.lane.b32.xlu2 %v4409_v8, %s11128_s29  ;;  %977 = vmatpush.msra.mxu0 %v11022_v43  ;;  %v11029_v8 = vld [vmem:[#allocation2 + $0x518] sm:$0xff]  ;;  %v11031_v31 = vld [vmem:[#allocation2 + $0x4d0] sm:$0xff] }
 0x24f   :  { %1000 = vmatpush.msra.mxu1 %v11023_v5  ;;  %1023 = vmatpush.msra.mxu2 %v11024_v42  ;;  %v11032_v43 = vld [vmem:[#allocation2 + $0xd8] sm:$0xff]  ;;  %v11034_v42 = vld [vmem:[#allocation2 + $0x90] sm:$0xff] }
 0x250   :  { %1046 = vmatpush.msra.mxu3 %v11025_v52  ;;  %978 = vmatpush.msra.mxu0 %v11026_v13  ;;  %v11033_v5 = vld [vmem:[#allocation2 + $0x4d8] sm:$0xff]  ;;  %v11035_v52 = vld [vmem:[#allocation2 + $0x490] sm:$0xff] }
 0x251   :  { %1001 = vmatpush.msra.mxu1 %v11027_v29  ;;  %1024 = vmatpush.msra.mxu2 %v11028_v62  ;;  %v11036_v13 = vld [vmem:[#allocation2 + $0x98] sm:$0xff]  ;;  %v11038_v29 = vld [vmem:[#allocation2 + $0x50] sm:$0xff] }
 0x252   :  { %1047 = vmatpush.msra.mxu3 %v11029_v8  ;;  %979 = vmatpush.msra.mxu0 %v11030_v26  ;;  %v11039_v62 = vld [vmem:[#allocation2 + $0x450] sm:$0xff]  ;;  %v11040_v8 = vld [vmem:[#allocation2 + $0x58] sm:$0xff] }
 0x253   :  { %1002 = vmatpush.msra.mxu1 %v11031_v31  ;;  %1025 = vmatpush.msra.mxu2 %v11032_v43  ;;  %v11041_v26 = vld [vmem:[#allocation2 + $0x458] sm:$0xff]  ;;  %v11042_v31 = vld [vmem:[#allocation2 + $0x10] sm:$0xff]  ;;  %v12069_v43 = vpop.permute.xlu0 %2945 }
 0x254   :  { %1048 = vmatpush.msra.mxu3 %v11033_v5  ;;  %4452 = vrot.lane.b32.xlu0 %v4411_v44, %s11128_s29  ;;  %v11043_v44 = vld [vmem:[#allocation2 + $0x410] sm:$0xff]  ;;  %v11044_v5 = vld [vmem:[#allocation2 + $0x18] sm:$0xff] }
 0x255   :  { %980 = vmatpush.msra.mxu0 %v11034_v42  ;;  %1003 = vmatpush.msra.mxu1 %v11035_v52  ;;  %v12071_v42 = vpop.permute.xlu2 %2965  ;;  %v11045_v52 = vld [vmem:[#allocation2 + $0x418] sm:$0xff] }
 0x256   :  { %1026 = vmatpush.msra.mxu2 %v11036_v13  ;;  %1049 = vmatpush.msra.mxu3 %v11037_v33  ;;  %v16701_v33 = vld [vmem:[#allocation76_spill] sm:$0xff] }
 0x257   :  { %981 = vmatpush.msra.mxu0 %v11038_v29  ;;  %1004 = vmatpush.msra.mxu1 %v11039_v62  ;;  %v16702_v29 = vld [vmem:[#allocation77_spill] sm:$0xff] }
 0x258   :  { %1027 = vmatpush.msra.mxu2 %v11040_v8  ;;  %1050 = vmatpush.msra.mxu3 %v11041_v26  ;;  %v16703_v8 = vld [vmem:[#allocation79_spill] sm:$0xff]  ;;  %v16704_v26 = vld [vmem:[#allocation80_spill] sm:$0xff] }
 0x259   :  { %982 = vmatpush.msra.mxu0 %v11042_v31  ;;  %1005 = vmatpush.msra.mxu1 %v11043_v44  ;;  %v16705_v31 = vld [vmem:[#allocation81_spill] sm:$0xff]  ;;  %v16706_v44 = vld [vmem:[#allocation82_spill] sm:$0xff] }
 0x25a   :  { %1028 = vmatpush.msra.mxu2 %v11044_v5  ;;  %1051 = vmatpush.msra.mxu3 %v11045_v52 }
 0x25b   :  { %983 = vmatmul.f32.vlgmr.msra.gmra.mxu0 %v12037_v4  ;;  %1006 = vmatmul.f32.vlgmr.msra.gmra.mxu1 %v12040_v55 }
 0x25c   :  { %1029 = vmatmul.f32.vlgmr.msra.gmra.mxu2 %v12037_v4  ;;  %1052 = vmatmul.f32.vlgmr.msra.gmra.mxu3 %v12040_v55 }
 0x25d   :  { %1059 = vmatpush.msrb.mxu0 %v11534_v34  ;;  %1082 = vmatpush.msrb.mxu1 %v11536_v37  ;;  %v12088_v34 = vpop.permute.xlu2 %2967  ;;  %v12092_v37 = vpop.permute.xlu0 %2951 }
 0x25e   :  { %1105 = vmatpush.msrb.mxu2 %v11541_v45  ;;  %1128 = vmatpush.msrb.mxu3 %v11543_v16  ;;  %v16687_v45 = vld [vmem:[#allocation68_spill] sm:$0xff]  ;;  %v16688_v16 = vld [vmem:[#allocation69_spill] sm:$0xff] }
 0x25f   :  { %1060 = vmatpush.msrb.mxu0 %v11549_v39  ;;  %1083 = vmatpush.msrb.mxu1 %v11551_v7  ;;  %v16690_v39 = vld [vmem:[#allocation71_spill] sm:$0xff]  ;;  %v16691_v7 = vld [vmem:[#allocation32_spill] sm:$0xff] }
 0x260   :  { %1106 = vmatpush.msrb.mxu2 %v11555_v0  ;;  %1129 = vmatpush.msrb.mxu3 %v11557_v48  ;;  %v16692_v0 = vld [vmem:[#allocation27_spill] sm:$0xff] }
 0x261   :  { %1061 = vmatpush.msrb.mxu0 %v11561_v58  ;;  %1084 = vmatpush.msrb.mxu1 %v11563_v60  ;;  %v12164_v48 = vsel %vm1462_vm5, %v16692_v0, %v16691_v7  ;;  %v16694_v58 = vld [vmem:[#allocation72_spill] sm:$0xff]  ;;  %v16695_v60 = vld [vmem:[#allocation73_spill] sm:$0xff] }
 0x262   :  { %1107 = vmatpush.msrb.mxu2 %v11567_v63  ;;  %1130 = vmatpush.msrb.mxu3 %v11569_v27  ;;  %v16696_v63 = vld [vmem:[#allocation20_spill] sm:$0xff] }
 0x263   :  { %1062 = vmatpush.msrb.mxu0 %v11573_v47  ;;  %1085 = vmatpush.msrb.mxu1 %v11575_v57  ;;  %v4410_v57 = vperm.slane %v11800_v14, 6  ;;  %v16689_v47 = vld [vmem:[#allocation70_spill] sm:$0xff]  ;;  %v16697_v27 = vld [vmem:[#allocation8_spill] sm:$0xff] }
 0x264   :  { %1108 = vmatpush.msrb.mxu2 %v11579_v18  ;;  %1131 = vmatpush.msrb.mxu3 %v11581_v61  ;;  %v4412_v61 = vperm.slane %v11629_v56, 6  ;;  %v12114_v18 = vpop.f32.mrf.mxu1  ;;  %v16677_v56 = vld [vmem:[#allocation87_spill] sm:$0xff]  ;;  %v11046_v14 = vld [vmem:[#allocation4 + $0x60] sm:$0xff] }
 0x265   :  { %986 = vmatmul.f32.gmra.mxu0 %v12050_v9  ;;  %1009 = vmatmul.f32.gmra.mxu1 %v12052_v59  ;;  %16675 = vst [vmem:[#allocation151_spill] sm:$0xff] %v12114_v18 }
 0x266   :  { %1032 = vmatmul.f32.gmra.mxu2 %v12050_v9  ;;  %1055 = vmatmul.f32.gmra.mxu3 %v12052_v59 }
 0x267   :  { %1063 = vmatpush.msrb.mxu0 %v11587_v17  ;;  %1086 = vmatpush.msrb.mxu1 %v11589_v10  ;;  %v12112_v17 = vpop.f32.mrf.mxu0 }
 0x268   :  { %1109 = vmatpush.msrb.mxu2 %v11594_v36  ;;  %1132 = vmatpush.msrb.mxu3 %v11596_v21  ;;  %16674 = vst [vmem:[#allocation150_spill] sm:$0xff] %v12112_v17  ;;  %v16685_v21 = vld [vmem:[#allocation66_spill] sm:$0xff] }
 0x269   :  { %1064 = vmatpush.msrb.mxu0 %v11600_v6  ;;  %1087 = vmatpush.msrb.mxu1 %v11604_v28  ;;  %v12118_v6 = vpop.permute.xlu2 %2969  ;;  %v4417_v28 = vperm.slane %v16677_v56, 6  ;;  %v16711_v56 = vld [vmem:[#allocation85_spill] sm:$0xff] }
 0x26a   :  { %1110 = vmatpush.msrb.mxu2 %v11606_v35  ;;  %1133 = vmatpush.msrb.mxu3 %v11615_v32  ;;  %v12122_v35 = vpop.permute.xlu0 %2953  ;;  %v16682_v32 = vld [vmem:[#allocation65_spill] sm:$0xff] }
 0x26b   :  { %1065 = vmatpush.msrb.mxu0 %v11619_v2  ;;  %1088 = vmatpush.msrb.mxu1 %v11621_v20  ;;  %v16676_v20 = vld [vmem:[#allocation59_spill] sm:$0xff]  ;;  %v16678_v2 = vld [vmem:[#allocation60_spill] sm:$0xff] }
 0x26c   :  { %1111 = vmatpush.msrb.mxu2 %v11625_v25  ;;  %1134 = vmatpush.msrb.mxu3 %v11627_v12  ;;  %v4413_v12 = vperm.slane %v11981_v41, 6  ;;  %v550_v25 = vpop.f32.mrf.mxu1  ;;  %16693 = vst [vmem:[#allocation60_spill] sm:$0xff] %v12164_v48  ;;  %v4414_v41 = vperm.slane %v11046_v14, 6 }
 0x26d   :  { %4450 = vrot.lane.b32.xlu2 %v4410_v57, %s11128_s29  ;;  %4454 = vrot.lane.b32.xlu1 %v4412_v61, %s11128_s29  ;;  %v16707_v61 = vld [vmem:[#allocation83_spill] sm:$0xff] }
 0x26e   :  { %1066 = vmatpush.msrb.mxu0 %v11634_v54  ;;  %1089 = vmatpush.msrb.mxu1 %v11638_v53  ;;  %v16680_v53 = vld [vmem:[#allocation63_spill] sm:$0xff]  ;;  %v12171_v54 = vsel %vm1348_vm6, %v16697_v27, %v16696_v63  ;;  %v16726_v27 = vld [vmem:[#allocation25_spill] sm:$0xff] }
 0x26f   :  { %1112 = vmatpush.msrb.mxu2 %v11640_v51  ;;  %1135 = vmatpush.msrb.mxu3 %v11644_v38  ;;  %v4416_v51 = vperm.slane %v12022_v24, 6  ;;  %v16686_v38 = vld [vmem:[#allocation67_spill] sm:$0xff] }
 0x270   :  { %1067 = vmatpush.msrb.mxu0 %v11646_v19  ;;  %1090 = vmatpush.msrb.mxu1 %v11650_v50  ;;  %v16679_v19 = vld [vmem:[#allocation62_spill] sm:$0xff] }
 0x271   :  { %1113 = vmatpush.msrb.mxu2 %v11652_v22  ;;  %1136 = vmatpush.msrb.mxu3 %v11659_v46  ;;  %v16681_v22 = vld [vmem:[#allocation64_spill] sm:$0xff]  ;;  %v527_v46 = vpop.f32.mrf.mxu0  ;;  %v12147_v36 = vpop.permute.xlu2 %3885  ;;  %16698 = vst [vmem:[#allocation62_spill] sm:$0xff] %v12171_v54  ;;  %v16699_v50 = vld [vmem:[#allocation74_spill] sm:$0xff] }
 0x272   :  { %1068 = vmatpush.msrb.mxu0 %v11663_v49  ;;  %1091 = vmatpush.msrb.mxu1 %v11665_v23  ;;  %v12145_v23 = vpop.permute.xlu1 %2973  ;;  %v12151_v24 = vpop.permute.xlu0 %2489  ;;  %v12155_v10 = vadd.f32 %v550_v25, %v527_v46  ;;  %v16700_v49 = vld [vmem:[#allocation75_spill] sm:$0xff]  ;;  %v16717_v46 = vld [vmem:[#allocation90_spill] sm:$0xff] }
 0x273   :  { %1114 = vmatpush.msrb.mxu2 %v16676_v20  ;;  %1137 = vmatpush.msrb.mxu3 %v16678_v2  ;;  %16683 = vst [vmem:[#allocation59_spill] sm:$0xff] %v12145_v23  ;;  %v12197_v20 = vpop.f32.mrf.mxu3  ;;  %v16718_v25 = vld [vmem:[#allocation91_spill] sm:$0xff] }
 0x274   :  { %1069 = vmatpush.msrb.mxu0 %v16679_v19  ;;  %1092 = vmatpush.msrb.mxu1 %v16680_v53  ;;  %16684 = vst [vmem:[#allocation87_spill] sm:$0xff] %v12151_v24  ;;  %v1496_v13 = vmul.f32 %v12164_v48, %v12155_v10  ;;  %v1382_v62 = vmul.f32 %v12171_v54, %v12155_v10  ;;  %v12207_v19 = vpop.f32.mrf.mxu1  ;;  %v16715_v53 = vld [vmem:[#allocation88_spill] sm:$0xff] }
 0x275   :  { %1115 = vmatpush.msrb.mxu2 %v16681_v22  ;;  %1138 = vmatpush.msrb.mxu3 %v16682_v32  ;;  %16709 = vst [vmem:[#allocation64_spill] sm:$0xff] %v12197_v20  ;;  %v16716_v22 = vld [vmem:[#allocation89_spill] sm:$0xff]  ;;  %v16719_v32 = vld [vmem:[#allocation92_spill] sm:$0xff] }
 0x276   :  { %4456 = vrot.lane.b32.xlu2 %v4413_v12, %s11128_s29  ;;  %4462 = vrot.lane.b32.xlu0 %v4416_v51, %s11128_s29  ;;  %v12195_v12 = vpop.f32.mrf.mxu2  ;;  %v16710_v51 = vld [vmem:[#allocation84_spill] sm:$0xff]  ;;  %16714 = vst [vmem:[#allocation66_spill] sm:$0xff] %v12207_v19 }
 0x277   :  { %4464 = vrot.lane.b32.xlu1 %v4417_v28, %s11128_s29  ;;  %1070 = vmatpush.msrb.mxu0 %v16685_v21  ;;  %16708 = vst [vmem:[#allocation63_spill] sm:$0xff] %v12195_v12  ;;  %v16712_v28 = vld [vmem:[#allocation86_spill] sm:$0xff]  ;;  %v11047_v21 = vld [vmem:[#allocation4 + $0x68] sm:$0xff] }
 0x278   :  { %1093 = vmatpush.msrb.mxu1 %v16686_v38  ;;  %1116 = vmatpush.msrb.mxu2 %v16687_v45  ;;  %v4415_v38 = vperm.slane %v11047_v21, 6  ;;  %v16720_v45 = vld [vmem:[#allocation93_spill] sm:$0xff]  ;;  %v16739_v21 = vld [vmem:[#allocation108_spill] sm:$0xff] }
 0x279   :  { %1139 = vmatpush.msrb.mxu3 %v16688_v16  ;;  %1071 = vmatpush.msrb.mxu0 %v16689_v47  ;;  %v12191_v57 = vpop.permute.xlu2 %3891  ;;  %v12205_v2 = vpop.f32.mrf.mxu0  ;;  %v16721_v16 = vld [vmem:[#allocation94_spill] sm:$0xff]  ;;  %v16722_v47 = vld [vmem:[#allocation95_spill] sm:$0xff] }
 0x27a   :  { %1094 = vmatpush.msrb.mxu1 %v16690_v39  ;;  %1117 = vmatpush.msrb.mxu2 %v16694_v58  ;;  %v12185_v5 = vpop.permute.xlu0 %2961  ;;  %v12189_v52 = vpop.permute.xlu1 %3889  ;;  %16713 = vst [vmem:[#allocation65_spill] sm:$0xff] %v12205_v2  ;;  %v16723_v39 = vld [vmem:[#allocation96_spill] sm:$0xff]  ;;  %v16724_v58 = vld [vmem:[#allocation97_spill] sm:$0xff] }
 0x27b   :  { %1140 = vmatpush.msrb.mxu3 %v16695_v60  ;;  %1072 = vmatpush.msrb.mxu0 %v16699_v50  ;;  %v16725_v60 = vld [vmem:[#allocation98_spill] sm:$0xff]  ;;  %v16727_v50 = vld [vmem:[#allocation28_spill] sm:$0xff]  ;;  %v16805_v2 = vld [vmem:[#allocation149_spill] sm:$0xff] }
 0x27c   :  { %1095 = vmatpush.msrb.mxu1 %v16700_v49  ;;  %1118 = vmatpush.msrb.mxu2 %v16701_v33  ;;  %v12226_v49 = vsel %vm2422_vm7, %v16727_v50, %v16726_v27 }
 0x27d   :  { %1141 = vmatpush.msrb.mxu3 %v16702_v29  ;;  %1073 = vmatpush.msrb.mxu0 %v16703_v8  ;;  %16728 = vst [vmem:[#allocation67_spill] sm:$0xff] %v12226_v49  ;;  %v596_v29 = vpop.f32.mrf.mxu3  ;;  %v16732_v8 = vld [vmem:[#allocation101_spill] sm:$0xff] }
 0x27e   :  { %1096 = vmatpush.msrb.mxu1 %v16704_v26  ;;  %1119 = vmatpush.msrb.mxu2 %v16705_v31  ;;  %v573_v33 = vpop.f32.mrf.mxu2  ;;  %v2456_v26 = vmul.f32 %v12226_v49, %v12155_v10 }
 0x27f   :  { %1142 = vmatpush.msrb.mxu3 %v16706_v44  ;;  %4458 = vrot.lane.b32.xlu2 %v4414_v41, %s11128_s29  ;;  %v16733_v44 = vld [vmem:[#allocation102_spill] sm:$0xff] }
 0x280   :  { %1531 = vrot.lane.b32.xlu0 %v1496_v13, %s11127_s28  ;;  %1954 = vrot.lane.b32.xlu1 %v1382_v62, %s11125_s26  ;;  %v16730_v13 = vld [vmem:[#allocation99_spill] sm:$0xff]  ;;  %v16731_v62 = vld [vmem:[#allocation100_spill] sm:$0xff] }
 0x281   :  { %1074 = vmatpush.msrb.mxu0 %v16707_v61  ;;  %1097 = vmatpush.msrb.mxu1 %v16710_v51  ;;  %v12230_v41 = vpop.permute.xlu2 %3893  ;;  %v16734_v61 = vld [vmem:[#allocation103_spill] sm:$0xff]  ;;  %v619_v51 = vpop.f32.mrf.mxu0 }
 0x282   :  { %1120 = vmatpush.msrb.mxu2 %v16711_v56  ;;  %1143 = vmatpush.msrb.mxu3 %v16712_v28  ;;  %v12219_v0 = vpop.permute.xlu0 %2971  ;;  %v12228_v14 = vpop.permute.xlu1 %3883  ;;  %v16735_v28 = vld [vmem:[#allocation104_spill] sm:$0xff] }
 0x283   :  { %1075 = vmatmul.f32.vlgmr.msrb.gmra.mxu0 %v12037_v4  ;;  %1098 = vmatmul.f32.vlgmr.msrb.gmra.mxu1 %v12040_v55  ;;  %16729 = vst [vmem:[#allocation68_spill] sm:$0xff] %v12228_v14  ;;  %v3947_v31 = vmul.f32 %v12228_v14, %v12155_v10  ;;  %v642_v56 = vpop.f32.mrf.mxu1 }
 0x284   :  { %1121 = vmatmul.f32.vlgmr.msrb.gmra.mxu2 %v12037_v4  ;;  %1144 = vmatmul.f32.vlgmr.msrb.gmra.mxu3 %v12040_v55 }
 0x285   :  { %1151 = vmatpush.msra.mxu0 %v16715_v53  ;;  %1174 = vmatpush.msra.mxu1 %v16716_v22  ;;  %v16736_v53 = vld [vmem:[#allocation105_spill] sm:$0xff]  ;;  %v12250_v22 = vadd.f32 %v642_v56, %v619_v51 }
 0x286   :  { %1197 = vmatpush.msra.mxu2 %v16717_v46  ;;  %1220 = vmatpush.msra.mxu3 %v16718_v25  ;;  %v16737_v46 = vld [vmem:[#allocation106_spill] sm:$0xff]  ;;  %v16738_v25 = vld [vmem:[#allocation107_spill] sm:$0xff]  ;;  %v16755_v51 = vld [vmem:[#allocation57_spill] sm:$0xff] }
 0x287   :  { %1152 = vmatpush.msra.mxu0 %v16719_v32  ;;  %1175 = vmatpush.msra.mxu1 %v16720_v45  ;;  %v12254_v32 = vadd.f32 %v596_v29, %v573_v33  ;;  %v16741_v45 = vld [vmem:[#allocation38_spill] sm:$0xff]  ;;  %v16748_v33 = vld [vmem:[#allocation113_spill] sm:$0xff]  ;;  %v12287_v56 = vsel %vm2975_vm8, %v16755_v51, %v12069_v43 }
 0x288   :  { %1198 = vmatpush.msra.mxu2 %v16721_v16  ;;  %1221 = vmatpush.msra.mxu3 %v16722_v47  ;;  %v16742_v16 = vld [vmem:[#allocation14_spill] sm:$0xff]  ;;  %16756 = vst [vmem:[#allocation72_spill] sm:$0xff] %v12287_v56 }
 0x289   :  { %1153 = vmatpush.msra.mxu0 %v16723_v39  ;;  %1176 = vmatpush.msra.mxu1 %v16724_v58  ;;  %v12261_v47 = vsel %vm1462_vm5, %v16742_v16, %v16741_v45  ;;  %v16745_v58 = vld [vmem:[#allocation110_spill] sm:$0xff]  ;;  %v12267_v50 = vpop.permute.xlu2 %3899 }
 0x28a   :  { %1199 = vmatpush.msra.mxu2 %v16725_v60  ;;  %1222 = vmatpush.msra.mxu3 %v16730_v13  ;;  %16743 = vst [vmem:[#allocation69_spill] sm:$0xff] %v12261_v47  ;;  %v12263_v39 = vpop.permute.xlu0 %3042  ;;  %v16746_v60 = vld [vmem:[#allocation111_spill] sm:$0xff]  ;;  %v16747_v13 = vld [vmem:[#allocation112_spill] sm:$0xff]  ;;  %v1498_v29 = vmul.f32 %v12261_v47, %v12250_v22  ;;  %v16856_v47 = vld [vmem:[#allocation21_spill] sm:$0xff] }
 0x28b   :  { %4460 = vrot.lane.b32.xlu2 %v4415_v38, %s11128_s29  ;;  %1154 = vmatpush.msra.mxu0 %v16731_v62  ;;  %v16740_v38 = vld [vmem:[#allocation109_spill] sm:$0xff]  ;;  %16744 = vst [vmem:[#allocation70_spill] sm:$0xff] %v12263_v39  ;;  %v16865_v39 = vld [vmem:[#allocation54_spill] sm:$0xff] }
 0x28c   :  { %1177 = vmatpush.msra.mxu1 %v16732_v8  ;;  %1200 = vmatpush.msra.mxu2 %v16733_v44  ;;  %v16749_v62 = vld [vmem:[#allocation9_spill] sm:$0xff]  ;;  %v16753_v44 = vld [vmem:[#allocation114_spill] sm:$0xff] }
 0x28d   :  { %1223 = vmatpush.msra.mxu3 %v16734_v61  ;;  %2491 = vrot.lane.b32.xlu1 %v2456_v26, %s11128_s29  ;;  %v12276_v8 = vsel %vm1348_vm6, %v16696_v63, %v16749_v62  ;;  %v12278_v26 = vpop.f32.mrf.mxu2  ;;  %v16754_v61 = vld [vmem:[#allocation115_spill] sm:$0xff] }
 0x28e   :  { %3981 = vrot.lane.b32.xlu0 %v3947_v31, %s11126_s27  ;;  %1078 = vmatmul.f32.gmra.mxu0 %v12050_v9  ;;  %16750 = vst [vmem:[#allocation71_spill] sm:$0xff] %v12276_v8  ;;  %v12280_v31 = vpop.f32.mrf.mxu3  ;;  %v1383_v63 = vmul.f32 %v12276_v8, %v12254_v32 }
 0x28f   :  { %1101 = vmatmul.f32.gmra.mxu1 %v12052_v59  ;;  %1124 = vmatmul.f32.gmra.mxu2 %v12050_v9  ;;  %16751 = vst [vmem:[#allocation32_spill] sm:$0xff] %v12278_v26 }
 0x290   :  { %1147 = vmatmul.f32.gmra.mxu3 %v12052_v59  ;;  %1155 = vmatpush.msra.mxu0 %v16735_v28  ;;  %16752 = vst [vmem:[#allocation27_spill] sm:$0xff] %v12280_v31  ;;  %v16757_v28 = vld [vmem:[#allocation116_spill] sm:$0xff]  ;;  %v16787_v31 = vld [vmem:[#allocation138_spill] sm:$0xff] }
 0x291   :  { %1178 = vmatpush.msra.mxu1 %v16736_v53  ;;  %1201 = vmatpush.msra.mxu2 %v16737_v46  ;;  %v16758_v53 = vld [vmem:[#allocation117_spill] sm:$0xff]  ;;  %v16759_v46 = vld [vmem:[#allocation118_spill] sm:$0xff] }
 0x292   :  { %1224 = vmatpush.msra.mxu3 %v16738_v25  ;;  %1156 = vmatpush.msra.mxu0 %v16739_v21  ;;  %v16760_v25 = vld [vmem:[#allocation119_spill] sm:$0xff]  ;;  %v3009_v21 = vmul.f32 %v12287_v56, %v12155_v10  ;;  %v12307_v51 = vpop.permute.xlu0 %3887  ;;  %v16829_v56 = vld [vmem:[#allocation26_spill] sm:$0xff] }
 0x293   :  { %1179 = vmatpush.msra.mxu1 %v16740_v38  ;;  %1202 = vmatpush.msra.mxu2 %v16745_v58  ;;  %v16761_v38 = vld [vmem:[#allocation120_spill] sm:$0xff]  ;;  %v16762_v58 = vld [vmem:[#allocation121_spill] sm:$0xff] }
 0x294   :  { %1225 = vmatpush.msra.mxu3 %v16746_v60  ;;  %1157 = vmatpush.msra.mxu0 %v16747_v13  ;;  %v16763_v60 = vld [vmem:[#allocation122_spill] sm:$0xff]  ;;  %v16764_v13 = vld [vmem:[#allocation123_spill] sm:$0xff] }
 0x295   :  { %1180 = vmatpush.msra.mxu1 %v16748_v33  ;;  %1203 = vmatpush.msra.mxu2 %v16753_v44  ;;  %v16765_v33 = vld [vmem:[#allocation124_spill] sm:$0xff]  ;;  %v16766_v44 = vld [vmem:[#allocation125_spill] sm:$0xff] }
 0x296   :  { %1226 = vmatpush.msra.mxu3 %v16754_v61  ;;  %1158 = vmatpush.msra.mxu0 %v16757_v28  ;;  %v16767_v61 = vld [vmem:[#allocation126_spill] sm:$0xff]  ;;  %v16769_v28 = vld [vmem:[#allocation128_spill] sm:$0xff] }
 0x297   :  { %1181 = vmatpush.msra.mxu1 %v16758_v53  ;;  %1204 = vmatpush.msra.mxu2 %v16759_v46  ;;  %v16770_v53 = vld [vmem:[#allocation55_spill] sm:$0xff] }
 0x298   :  { %1227 = vmatpush.msra.mxu3 %v16760_v25  ;;  %1535 = vrot.lane.b32.xlu2 %v1498_v29, %s11127_s28  ;;  %v16768_v29 = vld [vmem:[#allocation127_spill] sm:$0xff]  ;;  %v12316_v25 = vpop.permute.xlu2 %3905 }
 0x299   :  { %1956 = vrot.lane.b32.xlu0 %v1383_v63, %s11125_s26  ;;  %3044 = vrot.lane.b32.xlu1 %v3009_v21, %s11130_s9  ;;  %v16771_v63 = vld [vmem:[#allocation58_spill] sm:$0xff]  ;;  %v16773_v21 = vld [vmem:[#allocation129_spill] sm:$0xff] }
 0x29a   :  { %1159 = vmatpush.msra.mxu0 %v16761_v38  ;;  %1182 = vmatpush.msra.mxu1 %v16762_v58  ;;  %v12314_v46 = vsel %vm2975_vm8, %v16771_v63, %v16770_v53  ;;  %v16774_v38 = vld [vmem:[#allocation130_spill] sm:$0xff]  ;;  %v12323_v58 = vsel %vm1462_vm5, %v16691_v7, %v16742_v16  ;;  %v16782_v16 = vld [vmem:[#allocation135_spill] sm:$0xff] }
 0x29b   :  { %1205 = vmatpush.msra.mxu2 %v16763_v60  ;;  %1228 = vmatpush.msra.mxu3 %v16764_v13  ;;  %16772 = vst [vmem:[#allocation73_spill] sm:$0xff] %v12314_v46  ;;  %v16776_v60 = vld [vmem:[#allocation48_spill] sm:$0xff] }
 0x29c   :  { %1160 = vmatpush.msra.mxu0 %v16765_v33  ;;  %1183 = vmatpush.msra.mxu1 %v16766_v44  ;;  %16775 = vst [vmem:[#allocation20_spill] sm:$0xff] %v12323_v58  ;;  %v12328_v13 = vsel %vm2422_vm7, %v16726_v27, %v16776_v60  ;;  %v665_v33 = vpop.f32.mrf.mxu2  ;;  %v688_v44 = vpop.f32.mrf.mxu3  ;;  %v1497_v27 = vmul.f32 %v12323_v58, %v12254_v32  ;;  %v16857_v58 = vld [vmem:[#allocation10_spill] sm:$0xff] }
 0x29d   :  { %1206 = vmatpush.msra.mxu2 %v16767_v61  ;;  %1229 = vmatpush.msra.mxu3 %v16768_v29  ;;  %16777 = vst [vmem:[#allocation8_spill] sm:$0xff] %v12328_v13  ;;  %v16778_v61 = vld [vmem:[#allocation131_spill] sm:$0xff]  ;;  %v16779_v29 = vld [vmem:[#allocation132_spill] sm:$0xff]  ;;  %v2457_v7 = vmul.f32 %v12328_v13, %v12254_v32  ;;  %v12352_v26 = vadd.f32 %v688_v44, %v665_v33  ;;  %v16795_v44 = vld [vmem:[#allocation13_spill] sm:$0xff] }
 0x29e   :  { %1161 = vmatpush.msra.mxu0 %v16769_v28  ;;  %1184 = vmatpush.msra.mxu1 %v16773_v21  ;;  %v3011_v28 = vmul.f32 %v12314_v46, %v12250_v22  ;;  %v16780_v21 = vld [vmem:[#allocation133_spill] sm:$0xff]  ;;  %v16794_v33 = vld [vmem:[#allocation23_spill] sm:$0xff] }
 0x29f   :  { %1207 = vmatpush.msra.mxu2 %v16774_v38  ;;  %1230 = vmatpush.msra.mxu3 %v16778_v61  ;;  %v16781_v38 = vld [vmem:[#allocation134_spill] sm:$0xff]  ;;  %v12342_v61 = vpop.f32.mrf.mxu0 }
 0x2a0   :  { %1162 = vmatpush.msra.mxu0 %v16779_v29  ;;  %1185 = vmatpush.msra.mxu1 %v16780_v21  ;;  %16783 = vst [vmem:[#allocation74_spill] sm:$0xff] %v12342_v61  ;;  %v12344_v29 = vpop.f32.mrf.mxu1  ;;  %v16785_v21 = vld [vmem:[#allocation136_spill] sm:$0xff]  ;;  %v16803_v61 = vld [vmem:[#allocation147_spill] sm:$0xff] }
 0x2a1   :  { %1208 = vmatpush.msra.mxu2 %v16781_v38  ;;  %1231 = vmatpush.msra.mxu3 %v16782_v16  ;;  %16784 = vst [vmem:[#allocation75_spill] sm:$0xff] %v12344_v29  ;;  %v16786_v38 = vld [vmem:[#allocation137_spill] sm:$0xff]  ;;  %v16788_v16 = vld [vmem:[#allocation139_spill] sm:$0xff] }
 0x2a2   :  { %3048 = vrot.lane.b32.xlu2 %v3011_v28, %s11130_s9  ;;  %2493 = vrot.lane.b32.xlu0 %v2457_v7, %s11128_s29  ;;  %v16789_v28 = vld [vmem:[#allocation140_spill] sm:$0xff]  ;;  %v16790_v7 = vld [vmem:[#allocation141_spill] sm:$0xff] }
 0x2a3   :  { %1533 = vrot.lane.b32.xlu1 %v1497_v27, %s11127_s28  ;;  %1163 = vmatpush.msra.mxu0 %v16785_v21  ;;  %v12361_v27 = vsel %vm3076_vm9, %v12147_v36, %v12307_v51  ;;  %v12363_v21 = vpop.permute.xlu0 %3895 }
 0x2a4   :  { %1186 = vmatpush.msra.mxu1 %v16786_v38  ;;  %1209 = vmatpush.msra.mxu2 %v11967_v3  ;;  %16791 = vst [vmem:[#allocation76_spill] sm:$0xff] %v12361_v27  ;;  %v16792_v3 = vld [vmem:[#allocation142_spill] sm:$0xff]  ;;  %v12370_v38 = vsel %vm1348_vm6, %v16795_v44, %v16794_v33  ;;  %v12381_v29 = vpop.f32.mrf.mxu2 }
 0x2a5   :  { %1232 = vmatpush.msra.mxu3 %v16787_v31  ;;  %1164 = vmatpush.msra.mxu0 %v16788_v16  ;;  %v16793_v31 = vld [vmem:[#allocation143_spill] sm:$0xff]  ;;  %16796 = vst [vmem:[#allocation77_spill] sm:$0xff] %v12370_v38  ;;  %v12377_v16 = vpop.permute.xlu2 %3911  ;;  %v1385_v19 = vmul.f32 %v12370_v38, %v12352_v26 }
 0x2a6   :  { %1187 = vmatpush.msra.mxu1 %v16789_v28  ;;  %1210 = vmatpush.msra.mxu2 %v11979_v15  ;;  %v12375_v15 = vsel %vm2975_vm8, %v12069_v43, %v16771_v63  ;;  %v16798_v28 = vld [vmem:[#allocation144_spill] sm:$0xff]  ;;  %16800 = vst [vmem:[#allocation80_spill] sm:$0xff] %v12381_v29 }
 0x2a7   :  { %1233 = vmatpush.msra.mxu3 %v16790_v7  ;;  %1165 = vmatpush.msra.mxu0 %v16792_v3  ;;  %16797 = vst [vmem:[#allocation79_spill] sm:$0xff] %v12375_v15  ;;  %v16799_v7 = vld [vmem:[#allocation145_spill] sm:$0xff]  ;;  %v12383_v3 = vpop.f32.mrf.mxu3  ;;  %v3010_v43 = vmul.f32 %v12375_v15, %v12254_v32  ;;  %v16804_v63 = vld [vmem:[#allocation148_spill] sm:$0xff]  ;;  %v12486_v15 = vsel %vm2975_vm8, %v12092_v37, %v12122_v35 }
 0x2a8   :  { %1188 = vmatpush.msra.mxu1 %v16793_v31  ;;  %1211 = vmatpush.msra.mxu2 %v16798_v28  ;;  %16801 = vst [vmem:[#allocation81_spill] sm:$0xff] %v12383_v3  ;;  %v16802_v31 = vld [vmem:[#allocation146_spill] sm:$0xff]  ;;  %v3949_v28 = vmul.f32 %v12361_v27, %v12250_v22 }
 0x2a9   :  { %1234 = vmatpush.msra.mxu3 %v16799_v7  ;;  %1166 = vmatpush.msra.mxu0 %v16802_v31  ;;  %v12395_v7 = vpop.permute.xlu1 %3897  ;;  %v734_v31 = vpop.f32.mrf.mxu1  ;;  %v16810_v3 = vld [vmem:[#allocation34_spill] sm:$0xff]  ;;  %16821 = vst [vmem:[#allocation94_spill] sm:$0xff] %v12486_v15 }
 0x2aa   :  { %1189 = vmatpush.msra.mxu1 %v16803_v61  ;;  %1212 = vmatpush.msra.mxu2 %v16804_v63  ;;  %v711_v61 = vpop.f32.mrf.mxu0  ;;  %v16808_v63 = vld [vmem:[#allocation41_spill] sm:$0xff] }
 0x2ab   :  { %1235 = vmatpush.msra.mxu3 %v16805_v2  ;;  %1960 = vrot.lane.b32.xlu2 %v1385_v19, %s11125_s26  ;;  %v12406_v2 = vsel %vm3076_vm9, %v12228_v14, %v12147_v36  ;;  %v16807_v19 = vld [vmem:[#allocation50_spill] sm:$0xff]  ;;  %v12419_v29 = vpop.permute.xlu0 %3901  ;;  %v12437_v17 = vadd.f32 %v734_v31, %v711_v61 }
 0x2ac   :  { %3046 = vrot.lane.b32.xlu1 %v3010_v43, %s11130_s9  ;;  %3985 = vrot.lane.b32.xlu0 %v3949_v28, %s11126_s27  ;;  %16806 = vst [vmem:[#allocation82_spill] sm:$0xff] %v12406_v2  ;;  %v12412_v43 = vsel %vm2422_vm7, %v16808_v63, %v16807_v19  ;;  %v12417_v28 = vsel %vm1462_vm5, %v16741_v45, %v16810_v3  ;;  %v757_v12 = vpop.f32.mrf.mxu2 }
 0x2ad   :  { %1167 = vmatmul.f32.vlgmr.msra.gmra.mxu0 %v12037_v4  ;;  %1190 = vmatmul.f32.vlgmr.msra.gmra.mxu1 %v12040_v55  ;;  %16809 = vst [vmem:[#allocation83_spill] sm:$0xff] %v12412_v43  ;;  %v3948_v36 = vmul.f32 %v12406_v2, %v12254_v32  ;;  %v12425_v20 = vpop.permute.xlu2 %4438  ;;  %v16822_v2 = vld [vmem:[#allocation33_spill] sm:$0xff] }
 0x2ae   :  { %1213 = vmatmul.f32.vlgmr.msra.gmra.mxu2 %v12037_v4  ;;  %1236 = vmatmul.f32.vlgmr.msra.gmra.mxu3 %v12040_v55  ;;  %16811 = vst [vmem:[#allocation84_spill] sm:$0xff] %v12417_v28  ;;  %v2459_v4 = vmul.f32 %v12412_v43, %v12352_v26  ;;  %v1499_v55 = vmul.f32 %v12417_v28, %v12352_v26  ;;  %v16847_v28 = vld [vmem:[#allocation17_spill] sm:$0xff] }
 0x2af   :  { %v780_v18 = vpop.f32.mrf.mxu3 }
 0x2b0   :  { %v12516_v27 = vadd.f32 %v780_v18, %v757_v12 }
 0x2b1   :  { %v12433_v45 = vpop.permute.xlu1 %3903  ;;  %v12441_v46 = vpop.f32.mrf.mxu1 }
 0x2b2   :  { %v12439_v14 = vpop.f32.mrf.mxu0  ;;  %16813 = vst [vmem:[#allocation86_spill] sm:$0xff] %v12441_v46 }
 0x2b3   :  { %2497 = vrot.lane.b32.xlu2 %v2459_v4, %s11128_s29  ;;  %16812 = vst [vmem:[#allocation85_spill] sm:$0xff] %v12439_v14  ;;  %v12447_v4 = vsel %vm1348_vm6, %v16749_v62, %v16795_v44  ;;  %v12467_v44 = vpop.permute.xlu0 %3907  ;;  %v12481_v14 = vsel %vm2422_vm7, %v16776_v60, %v16808_v63 }
 0x2b4   :  { %3983 = vrot.lane.b32.xlu1 %v3948_v36, %s11126_s27  ;;  %1537 = vrot.lane.b32.xlu0 %v1499_v55, %s11127_s28  ;;  %16814 = vst [vmem:[#allocation88_spill] sm:$0xff] %v12447_v4  ;;  %v12452_v36 = vsel %vm2975_vm8, %v16770_v53, %v12092_v37  ;;  %v16816_v55 = vld [vmem:[#allocation15_spill] sm:$0xff]  ;;  %v1384_v61 = vmul.f32 %v12447_v4, %v12250_v22  ;;  %v12472_v53 = vpop.f32.mrf.mxu2 }
 0x2b5   :  { %1170 = vmatmul.f32.gmra.mxu0 %v12050_v9  ;;  %1193 = vmatmul.f32.gmra.mxu1 %v12052_v59  ;;  %16815 = vst [vmem:[#allocation89_spill] sm:$0xff] %v12452_v36  ;;  %v12463_v31 = vpop.permute.xlu2 %4442  ;;  %v12529_v38 = vsel %vm1348_vm6, %v16816_v55, %v16829_v56 }
 0x2b6   :  { %1216 = vmatmul.f32.gmra.mxu2 %v12050_v9  ;;  %1239 = vmatmul.f32.gmra.mxu3 %v12052_v59  ;;  %v12457_v9 = vsel %vm1348_vm6, %v16794_v33, %v16816_v55  ;;  %v3012_v59 = vmul.f32 %v12452_v36, %v12352_v26  ;;  %16818 = vst [vmem:[#allocation91_spill] sm:$0xff] %v12472_v53 }
 0x2b7   :  { %16817 = vst [vmem:[#allocation90_spill] sm:$0xff] %v12457_v9  ;;  %v1386_v62 = vmul.f32 %v12457_v9, %v12437_v17  ;;  %v12474_v33 = vpop.f32.mrf.mxu3  ;;  %v3013_v53 = vmul.f32 %v12486_v15, %v12437_v17  ;;  %v12514_v15 = vsel %vm3076_vm9, %v12307_v51, %v12189_v52  ;;  %v1387_v12 = vmul.f32 %v12529_v38, %v12516_v27  ;;  %v16844_v9 = vld [vmem:[#allocation18_spill] sm:$0xff] }
 0x2b8   :  { %16819 = vst [vmem:[#allocation92_spill] sm:$0xff] %v12474_v33  ;;  %v2458_v33 = vmul.f32 %v12481_v14, %v12250_v22  ;;  %v3950_v18 = vmul.f32 %v12514_v15, %v12352_v26 }
 0x2b9   :  { %v12476_v46 = vpop.permute.xlu1 %3909  ;;  %16820 = vst [vmem:[#allocation93_spill] sm:$0xff] %v12481_v14 }
 0x2ba   :  { %16825 = vst [vmem:[#allocation97_spill] sm:$0xff] %v12514_v15 }
 0x2bb   :  { %3050 = vrot.lane.b32.xlu2 %v3012_v59, %s11130_s9  ;;  %v826_v59 = vpop.f32.mrf.mxu1  ;;  %v12504_v37 = vpop.permute.xlu0 %3913  ;;  %16826 = vst [vmem:[#allocation98_spill] sm:$0xff] %v12516_v27 }
 0x2bc   :  { %1958 = vrot.lane.b32.xlu1 %v1384_v61, %s11125_s26  ;;  %1962 = vrot.lane.b32.xlu0 %v1386_v62, %s11125_s26  ;;  %v803_v61 = vpop.f32.mrf.mxu0  ;;  %v12491_v62 = vsel %vm2422_vm7, %v16807_v19, %v16822_v2  ;;  %v12509_v19 = vsel %vm3076_vm9, %v12189_v52, %v12191_v57  ;;  %v12518_v36 = vpop.f32.mrf.mxu2  ;;  %16830 = vst [vmem:[#allocation99_spill] sm:$0xff] %v12529_v38  ;;  %v16846_v38 = vld [vmem:[#allocation42_spill] sm:$0xff] }
 0x2bd   :  { %16823 = vst [vmem:[#allocation95_spill] sm:$0xff] %v12491_v62  ;;  %v12497_v60 = vpop.permute.xlu2 %4448  ;;  %v2460_v63 = vmul.f32 %v12491_v62, %v12437_v17  ;;  %v3951_v52 = vmul.f32 %v12509_v19, %v12437_v17  ;;  %v12590_v48 = vsel %vm1462_vm5, %v16847_v28, %v16846_v38 }
 0x2be   :  { %16824 = vst [vmem:[#allocation96_spill] sm:$0xff] %v12509_v19  ;;  %v16834_v19 = vld [vmem:[#allocation40_spill] sm:$0xff] }
 0x2bf   :  { %16848 = vst [vmem:[#allocation14_spill] sm:$0xff] %v12590_v48 }
 0x2c1   :  { %v12531_v54 = vpop.permute.xlu1 %4436 }
 0x2c3   :  { %3052 = vrot.lane.b32.xlu2 %v3013_v53, %s11130_s9  ;;  %v12544_v55 = vpop.permute.xlu0 %4440 }
 0x2c4   :  { %2495 = vrot.lane.b32.xlu1 %v2458_v33, %s11128_s29  ;;  %2499 = vrot.lane.b32.xlu0 %v2460_v63, %s11128_s29  ;;  %v12520_v33 = vpop.f32.mrf.mxu3  ;;  %v12522_v53 = vpop.f32.mrf.mxu0 }
 0x2c5   :  { %16827 = vst [vmem:[#allocation25_spill] sm:$0xff] %v12522_v53  ;;  %v12524_v63 = vpop.f32.mrf.mxu1  ;;  %v12556_v62 = vpop.f32.mrf.mxu2 }
 0x2c6   :  { %16828 = vst [vmem:[#allocation28_spill] sm:$0xff] %v12524_v63  ;;  %v16832_v63 = vld [vmem:[#allocation16_spill] sm:$0xff] }
 0x2c7   :  { %v12539_v51 = vpop.permute.xlu2 %4450  ;;  %v12549_v53 = vsel %vm1462_vm5, %v16810_v3, %v16832_v63  ;;  %v12554_v15 = vsel %vm1462_vm5, %v16832_v63, %v16834_v19  ;;  %16836 = vst [vmem:[#allocation103_spill] sm:$0xff] %v12556_v62 }
 0x2c8   :  { %16831 = vst [vmem:[#allocation100_spill] sm:$0xff] %v12539_v51  ;;  %v1500_v3 = vmul.f32 %v12549_v53, %v12437_v17 }
 0x2c9   :  { %16833 = vst [vmem:[#allocation101_spill] sm:$0xff] %v12549_v53  ;;  %v12571_v13 = vpop.permute.xlu1 %4434 }
 0x2ca   :  { %16835 = vst [vmem:[#allocation102_spill] sm:$0xff] %v12554_v15 }
 0x2cb   :  { %3989 = vrot.lane.b32.xlu2 %v3951_v52, %s11126_s27  ;;  %v16838_v52 = vld [vmem:[#allocation52_spill] sm:$0xff]  ;;  %16840 = vst [vmem:[#allocation106_spill] sm:$0xff] %v12571_v13 }
 0x2cc   :  { %3987 = vrot.lane.b32.xlu1 %v3950_v18, %s11126_s27  ;;  %1964 = vrot.lane.b32.xlu0 %v1387_v12, %s11125_s26  ;;  %v12558_v43 = vpop.f32.mrf.mxu3  ;;  %v12563_v18 = vsel %vm2422_vm7, %v16822_v2, %v16838_v52  ;;  %v1501_v12 = vmul.f32 %v12554_v15, %v12516_v27  ;;  %v895_v63 = vpop.f32.mrf.mxu0 }
 0x2cd   :  { %16837 = vst [vmem:[#allocation104_spill] sm:$0xff] %v12558_v43  ;;  %v2461_v49 = vmul.f32 %v12563_v18, %v12516_v27  ;;  %v918_v14 = vpop.f32.mrf.mxu1  ;;  %v12578_v43 = vadd.f32 %v826_v59, %v803_v61 }
 0x2ce   :  { %16839 = vst [vmem:[#allocation105_spill] sm:$0xff] %v12563_v18  ;;  %v12580_v62 = vadd.f32 %v918_v14, %v895_v63  ;;  %v12585_v18 = vsel %vm1348_vm6, %v16829_v56, %v16844_v9  ;;  %v941_v56 = vpop.f32.mrf.mxu2 }
 0x2cf   :  { %16842 = vst [vmem:[#allocation108_spill] sm:$0xff] %v12578_v43  ;;  %v1388_v61 = vmul.f32 %v12585_v18, %v12578_v43 }
 0x2d0   :  { %v12576_v2 = vpop.permute.xlu2 %4456  ;;  %16843 = vst [vmem:[#allocation109_spill] sm:$0xff] %v12580_v62  ;;  %v1504_v14 = vmul.f32 %v12590_v48, %v12580_v62 }
 0x2d1   :  { %16841 = vst [vmem:[#allocation107_spill] sm:$0xff] %v12576_v2  ;;  %v12605_v4 = vpop.permute.xlu1 %4446  ;;  %v16883_v2 = vld [vmem:[#allocation19_spill] sm:$0xff] }
 0x2d2   :  { %16845 = vst [vmem:[#allocation38_spill] sm:$0xff] %v12585_v18 }
 0x2d3   :  { %1541 = vrot.lane.b32.xlu2 %v1501_v12, %s11127_s28  ;;  %v12592_v12 = vpop.permute.xlu0 %4444 }
 0x2d4   :  { %1539 = vrot.lane.b32.xlu1 %v1500_v3, %s11127_s28  ;;  %2501 = vrot.lane.b32.xlu0 %v2461_v49, %s11128_s29  ;;  %v16849_v3 = vld [vmem:[#allocation61_spill] sm:$0xff]  ;;  %v964_v59 = vpop.f32.mrf.mxu3 }
 0x2d5   :  { %v12597_v49 = vsel %vm2975_vm8, %v12122_v35, %v16849_v3  ;;  %v12610_v35 = vadd.f32 %v964_v59, %v941_v56 }
 0x2d6   :  { %16850 = vst [vmem:[#allocation110_spill] sm:$0xff] %v12597_v49  ;;  %v3014_v63 = vmul.f32 %v12597_v49, %v12516_v27  ;;  %v12621_v49 = vsel %vm3076_vm9, %v12191_v57, %v12230_v41 }
 0x2d7   :  { %16851 = vst [vmem:[#allocation111_spill] sm:$0xff] %v12610_v35  ;;  %v3952_v57 = vmul.f32 %v12621_v49, %v12516_v27 }
 0x2d8   :  { %v12612_v8 = vpop.f32.mrf.mxu0  ;;  %v12614_v48 = vpop.f32.mrf.mxu1  ;;  %16855 = vst [vmem:[#allocation114_spill] sm:$0xff] %v12621_v49 }
 0x2d9   :  { %16852 = vst [vmem:[#allocation112_spill] sm:$0xff] %v12612_v8  ;;  %v12616_v18 = vpop.permute.xlu2 %4458 }
 0x2da   :  { %16853 = vst [vmem:[#allocation113_spill] sm:$0xff] %v12614_v48 }
 0x2db   :  { %1547 = vrot.lane.b32.xlu2 %v1504_v14, %s11127_s28  ;;  %16854 = vst [vmem:[#allocation9_spill] sm:$0xff] %v12616_v18  ;;  %v12626_v14 = vsel %vm1348_vm6, %v16857_v58, %v16856_v47  ;;  %v12633_v59 = vpop.permute.xlu0 %4452 }
 0x2dc   :  { %1966 = vrot.lane.b32.xlu1 %v1388_v61, %s11125_s26  ;;  %3054 = vrot.lane.b32.xlu0 %v3014_v63, %s11130_s9  ;;  %16858 = vst [vmem:[#allocation115_spill] sm:$0xff] %v12626_v14  ;;  %v16859_v61 = vld [vmem:[#allocation43_spill] sm:$0xff]  ;;  %v1391_v63 = vmul.f32 %v12626_v14, %v12610_v35 }
 0x2dd   :  { %v12631_v56 = vsel %vm2422_vm7, %v16838_v52, %v16859_v61  ;;  %16861 = vst [vmem:[#allocation116_spill] sm:$0xff] %v12633_v59 }
 0x2de   :  { %16860 = vst [vmem:[#allocation57_spill] sm:$0xff] %v12631_v56  ;;  %v2462_v48 = vmul.f32 %v12631_v56, %v12578_v43  ;;  %v12653_v56 = vsel %vm2422_vm7, %v12058_v40, %v16865_v39 }
 0x2df   :  { %v12643_v8 = vpop.permute.xlu1 %4454  ;;  %v12646_v52 = vpop.f32.mrf.mxu2  ;;  %16866 = vst [vmem:[#allocation120_spill] sm:$0xff] %v12653_v56 }
 0x2e0   :  { %16862 = vst [vmem:[#allocation117_spill] sm:$0xff] %v12643_v8  ;;  %v12648_v53 = vpop.f32.mrf.mxu3 }
 0x2e1   :  { %16863 = vst [vmem:[#allocation118_spill] sm:$0xff] %v12646_v52  ;;  %v2465_v52 = vmul.f32 %v12653_v56, %v12610_v35  ;;  %v16874_v56 = vld [vmem:[#allocation78_spill] sm:$0xff] }
 0x2e2   :  { %16864 = vst [vmem:[#allocation119_spill] sm:$0xff] %v12648_v53  ;;  %v987_v15 = vpop.f32.mrf.mxu0  ;;  %v1010_v14 = vpop.f32.mrf.mxu1 }
 0x2e3   :  { %1972 = vrot.lane.b32.xlu2 %v1391_v63, %s11125_s26  ;;  %v12658_v63 = vsel %vm2975_vm8, %v16849_v3, %v12060_v1  ;;  %v12677_v3 = vadd.f32 %v1010_v14, %v987_v15 }
 0x2e4   :  { %2503 = vrot.lane.b32.xlu1 %v2462_v48, %s11128_s29  ;;  %3991 = vrot.lane.b32.xlu0 %v3952_v57, %s11126_s27  ;;  %16867 = vst [vmem:[#allocation121_spill] sm:$0xff] %v12658_v63  ;;  %v16870_v57 = vld [vmem:[#allocation36_spill] sm:$0xff]  ;;  %v3015_v24 = vmul.f32 %v12658_v63, %v12578_v43  ;;  %v12689_v63 = vsel %vm2975_vm8, %v16874_v56, %v12071_v42 }
 0x2e5   :  { %v12660_v48 = vpop.permute.xlu2 %4460  ;;  %v12667_v53 = vsel %vm1462_vm5, %v16834_v19, %v16870_v57  ;;  %v12682_v19 = vadd.f32 %v12520_v33, %v12518_v36  ;;  %16875 = vst [vmem:[#allocation127_spill] sm:$0xff] %v12689_v63  ;;  %v12701_v15 = vsel %vm1462_vm5, %v16870_v57, %v16847_v28 }
 0x2e6   :  { %16868 = vst [vmem:[#allocation122_spill] sm:$0xff] %v12660_v48  ;;  %v1502_v18 = vmul.f32 %v12667_v53, %v12578_v43 }
 0x2e7   :  { %16871 = vst [vmem:[#allocation124_spill] sm:$0xff] %v12667_v53  ;;  %v1503_v36 = vmul.f32 %v12701_v15, %v12682_v19 }
 0x2e8   :  { %v12662_v49 = vpop.permute.xlu0 %4462  ;;  %16872 = vst [vmem:[#allocation125_spill] sm:$0xff] %v12682_v19 }
 0x2e9   :  { %16869 = vst [vmem:[#allocation123_spill] sm:$0xff] %v12662_v49  ;;  %v12684_v48 = vpop.permute.xlu1 %4464  ;;  %v1033_v33 = vpop.f32.mrf.mxu2  ;;  %v16882_v49 = vld [vmem:[#allocation44_spill] sm:$0xff] }
 0x2ea   :  { %16873 = vst [vmem:[#allocation126_spill] sm:$0xff] %v12684_v48  ;;  %v1056_v53 = vpop.f32.mrf.mxu3 }
 0x2eb   :  { %2509 = vrot.lane.b32.xlu2 %v2465_v52, %s11128_s29  ;;  %v12694_v52 = vsel %vm3076_vm9, %v12230_v41, %v12363_v21  ;;  %16877 = vst [vmem:[#allocation55_spill] sm:$0xff] %v12701_v15  ;;  %v12718_v28 = vadd.f32 %v1056_v53, %v1033_v33  ;;  %v16887_v33 = vld [vmem:[#allocation11_spill] sm:$0xff] }
 0x2ec   :  { %3056 = vrot.lane.b32.xlu1 %v3015_v24, %s11130_s9  ;;  %1543 = vrot.lane.b32.xlu0 %v1502_v18, %s11127_s28  ;;  %16876 = vst [vmem:[#allocation128_spill] sm:$0xff] %v12694_v52  ;;  %v3019_v24 = vmul.f32 %v12689_v63, %v12677_v3  ;;  %v3953_v14 = vmul.f32 %v12694_v52, %v12578_v43  ;;  %v16878_v63 = vld [vmem:[#allocation47_spill] sm:$0xff]  ;;  %v16880_v52 = vld [vmem:[#allocation29_spill] sm:$0xff] }
 0x2ed   :  { %16879 = vst [vmem:[#allocation58_spill] sm:$0xff] %v12718_v28  ;;  %v12725_v15 = vsel %vm1348_vm6, %v16844_v9, %v16880_v52 }
 0x2ee   :  { %16881 = vst [vmem:[#allocation129_spill] sm:$0xff] %v12725_v15  ;;  %v1389_v53 = vmul.f32 %v12725_v15, %v12682_v19  ;;  %v16890_v15 = vld [vmem:[#allocation45_spill] sm:$0xff] }
 0x2f2   :  { %v12705_v18 = vpop.permute.xlu0 %1531  ;;  %v12709_v41 = vpop.permute.xlu2 %1535 }
 0x2f3   :  { %v1564_v48 = vsel %vm1563_vm10, %v16878_v63, %v12705_v18  ;;  %3064 = vrot.lane.b32.xlu2 %v3019_v24, %s11130_s9  ;;  %v12720_v57 = vpop.permute.xlu1 %1954  ;;  %v12730_v63 = vsel %vm1462_vm5, %v16883_v2, %v16882_v49  ;;  %v12735_v24 = vsel %vm2975_vm8, %v12060_v1, %v12065_v30  ;;  %v16888_v1 = vld [vmem:[#allocation30_spill] sm:$0xff] }
 0x2f4   :  { %1545 = vrot.lane.b32.xlu1 %v1503_v36, %s11127_s28  ;;  %3993 = vrot.lane.b32.xlu0 %v3953_v14, %s11126_s27  ;;  %16884 = vst [vmem:[#allocation130_spill] sm:$0xff] %v12730_v63  ;;  %v3016_v9 = vmul.f32 %v12735_v24, %v12682_v19  ;;  %v12751_v14 = vsel %vm1348_vm6, %v16888_v1, %v16887_v33 }
 0x2f5   :  { %10108 = vmatpush.msk.msrb.mxu0 %vm91_vm0, %v1564_v48  ;;  %16885 = vst [vmem:[#allocation48_spill] sm:$0xff] %v12735_v24  ;;  %v1507_v48 = vmul.f32 %v12730_v63, %v12718_v28  ;;  %v12756_v63 = vsel %vm2422_vm7, %v16859_v61, %v16890_v15  ;;  %v1393_v24 = vmul.f32 %v12751_v14, %v12718_v28 }
 0x2f6   :  { %16889 = vst [vmem:[#allocation132_spill] sm:$0xff] %v12751_v14  ;;  %v16899_v14 = vld [vmem:[#allocation51_spill] sm:$0xff] }
 0x2f7   :  { %16891 = vst [vmem:[#allocation133_spill] sm:$0xff] %v12756_v63 }
 0x2fb   :  { %1553 = vrot.lane.b32.xlu2 %v1507_v48, %s11127_s28  ;;  %v2463_v48 = vmul.f32 %v12756_v63, %v12682_v19  ;;  %v12785_v63 = vsel %vm3076_vm9, %v12363_v21, %v12395_v7 }
 0x2fc   :  { %1968 = vrot.lane.b32.xlu1 %v1389_v53, %s11125_s26  ;;  %v12744_v36 = vpop.permute.xlu2 %3048  ;;  %3058 = vrot.lane.b32.xlu0 %v3016_v9, %s11130_s9  ;;  %v12763_v53 = vsel %vm2975_vm8, %v12065_v30, %v12185_v5  ;;  %16898 = vst [vmem:[#allocation140_spill] sm:$0xff] %v12785_v63 }
 0x2fd   :  { %16886 = vst [vmem:[#allocation131_spill] sm:$0xff] %v12744_v36  ;;  %v3017_v61 = vmul.f32 %v12763_v53, %v12580_v62 }
 0x2fe   :  { %16893 = vst [vmem:[#allocation135_spill] sm:$0xff] %v12763_v53 }
 0x2ff   :  { %v12767_v9 = vpop.permute.xlu1 %2491 }
 0x300   :  { %v12758_v59 = vpop.permute.xlu0 %3981  ;;  %16894 = vst [vmem:[#allocation136_spill] sm:$0xff] %v12767_v9  ;;  %v12771_v36 = vpop.f32.mrf.mxu0 }
 0x301   :  { %16892 = vst [vmem:[#allocation134_spill] sm:$0xff] %v12758_v59  ;;  %v12775_v8 = vpop.f32.mrf.mxu1 }
 0x302   :  { %16895 = vst [vmem:[#allocation137_spill] sm:$0xff] %v12771_v36  ;;  %v16900_v36 = vld [vmem:[#allocation49_spill] sm:$0xff] }
 0x303   :  { %16896 = vst [vmem:[#allocation138_spill] sm:$0xff] %v12775_v8  ;;  %1976 = vrot.lane.b32.xlu2 %v1393_v24, %s11125_s26  ;;  %v12790_v59 = vsel %vm2422_vm7, %v16900_v36, %v16899_v14 }
 0x304   :  { %2505 = vrot.lane.b32.xlu1 %v2463_v48, %s11128_s29  ;;  %3060 = vrot.lane.b32.xlu0 %v3017_v61, %s11130_s9  ;;  %16901 = vst [vmem:[#allocation141_spill] sm:$0xff] %v12790_v59  ;;  %v16904_v48 = vld [vmem:[#allocation37_spill] sm:$0xff]  ;;  %v3954_v61 = vmul.f32 %v12785_v63, %v12682_v19  ;;  %v2467_v21 = vmul.f32 %v12790_v59, %v12718_v28 }
 0x305   :  { %v12780_v30 = vpop.permute.xlu2 %1960  ;;  %v12799_v24 = vsel %vm1462_vm5, %v16846_v38, %v16904_v48  ;;  %v16907_v59 = vld [vmem:[#allocation53_spill] sm:$0xff] }
 0x306   :  { %16897 = vst [vmem:[#allocation139_spill] sm:$0xff] %v12780_v30  ;;  %v1505_v9 = vmul.f32 %v12799_v24, %v12610_v35 }
 0x307   :  { %v12792_v53 = vpop.f32.mrf.mxu2  ;;  %v12794_v8 = vpop.f32.mrf.mxu3  ;;  %16905 = vst [vmem:[#allocation23_spill] sm:$0xff] %v12799_v24  ;;  %v12821_v24 = vsel %vm2422_vm7, %v16899_v14, %v16907_v59 }
 0x308   :  { %16902 = vst [vmem:[#allocation142_spill] sm:$0xff] %v12792_v53 }
 0x309   :  { %16903 = vst [vmem:[#allocation143_spill] sm:$0xff] %v12794_v8 }
 0x30a   :  { %16908 = vst [vmem:[#allocation144_spill] sm:$0xff] %v12821_v24 }
 0x30b   :  { %v12807_v51 = vpop.permute.xlu0 %1956  ;;  %v12810_v53 = vpop.permute.xlu1 %3044  ;;  %2513 = vrot.lane.b32.xlu2 %v2467_v21, %s11128_s29  ;;  %v12828_v21 = vsel %vm1348_vm6, %v16880_v52, %v16857_v58 }
 0x30c   :  { %3995 = vrot.lane.b32.xlu1 %v3954_v61, %s11126_s27  ;;  %16906 = vst [vmem:[#allocation13_spill] sm:$0xff] %v12810_v53  ;;  %v1079_v8 = vpop.f32.mrf.mxu0  ;;  %1549 = vrot.lane.b32.xlu0 %v1505_v9, %s11127_s28  ;;  %v1102_v38 = vpop.f32.mrf.mxu1  ;;  %v12833_v9 = vsel %vm1348_vm6, %v16856_v47, %v16888_v1 }
 0x30d   :  { %v12814_v30 = vpop.permute.xlu2 %2497  ;;  %v12816_v63 = vadd.f32 %v1102_v38, %v1079_v8  ;;  %16909 = vst [vmem:[#allocation145_spill] sm:$0xff] %v12828_v21  ;;  %v1390_v8 = vmul.f32 %v12828_v21, %v12580_v62  ;;  %v1392_v14 = vmul.f32 %v12833_v9, %v12677_v3 }
 0x30e   :  { %16910 = vst [vmem:[#allocation146_spill] sm:$0xff] %v12833_v9 }
 0x30f   :  { %v2468_v61 = vmul.f32 %v12821_v24, %v12816_v63 }
 0x312   :  { %v1125_v38 = vpop.f32.mrf.mxu2 }
 0x313   :  { %v1148_v53 = vpop.f32.mrf.mxu3  ;;  %2515 = vrot.lane.b32.xlu2 %v2468_v61, %s11128_s29  ;;  %v12857_v61 = vsel %vm2422_vm7, %v16890_v15, %v12058_v40 }
 0x314   :  { %1970 = vrot.lane.b32.xlu1 %v1390_v8, %s11125_s26  ;;  %1974 = vrot.lane.b32.xlu0 %v1392_v14, %s11125_s26  ;;  %v12842_v52 = vpop.permute.xlu0 %2493  ;;  %v12850_v9 = vadd.f32 %v1148_v53, %v1125_v38  ;;  %16911 = vst [vmem:[#allocation147_spill] sm:$0xff] %v12857_v61  ;;  %v12867_v8 = vsel %vm2422_vm7, %v16865_v39, %v16900_v36 }
 0x315   :  { %v1534_v58 = vpop.permute.xlu1 %1533  ;;  %v12848_v24 = vpop.permute.xlu2 %3050  ;;  %16913 = vst [vmem:[#allocation149_spill] sm:$0xff] %v12867_v8  ;;  %v2464_v53 = vmul.f32 %v12857_v61, %v12580_v62  ;;  %v2466_v40 = vmul.f32 %v12867_v8, %v12677_v3  ;;  %v12887_v36 = vsel %vm3076_vm9, %v12395_v7, %v12267_v50 }
 0x316   :  { %v1565_v47 = vsel %vm1563_vm10, %v12705_v18, %v1534_v58  ;;  %v1566_v1 = vsel %vm1563_vm10, %v1534_v58, %v12709_v41  ;;  %v12862_v18 = vsel %vm2975_vm8, %v12118_v6, %v12219_v0  ;;  %16916 = vst [vmem:[#allocation34_spill] sm:$0xff] %v12887_v36  ;;  %v16917_v58 = vld [vmem:[#allocation39_spill] sm:$0xff] }
 0x317   :  { %10110 = vmatpush.msk.msrb.mxu1 %vm91_vm0, %v1565_v47  ;;  %10112 = vmatpush.msk.msrb.mxu2 %vm91_vm0, %v1566_v1  ;;  %16912 = vst [vmem:[#allocation148_spill] sm:$0xff] %v12862_v18  ;;  %v3022_v14 = vmul.f32 %v12862_v18, %v12850_v9  ;;  %v12892_v47 = vsel %vm1462_vm5, %v16882_v49, %v16917_v58 }
 0x318   :  { %16918 = vst [vmem:[#allocation15_spill] sm:$0xff] %v12892_v47  ;;  %v3955_v1 = vmul.f32 %v12887_v36, %v12580_v62  ;;  %v12909_v49 = vsel %vm2975_vm8, %v12185_v5, %v16874_v56 }
 0x319   :  { %16921 = vst [vmem:[#allocation16_spill] sm:$0xff] %v12909_v49  ;;  %v3018_v36 = vmul.f32 %v12909_v49, %v12610_v35  ;;  %v16928_v49 = vld [vmem:[#allocation24_spill] sm:$0xff] }
 0x31b   :  { %3070 = vrot.lane.b32.xlu2 %v3022_v14, %s11130_s9 }
 0x31c   :  { %2507 = vrot.lane.b32.xlu1 %v2464_v53, %s11128_s29  ;;  %2511 = vrot.lane.b32.xlu0 %v2466_v40, %s11128_s29  ;;  %v1508_v53 = vmul.f32 %v12892_v47, %v12816_v63  ;;  %v16932_v47 = vld [vmem:[#allocation22_spill] sm:$0xff] }
 0x31d   :  { %v12880_v38 = vpop.permute.xlu2 %3052 }
 0x31e   :  { %v12878_v15 = vpop.permute.xlu1 %3046  ;;  %v12882_v39 = vpop.permute.xlu0 %3985 }
 0x31f   :  { %16914 = vst [vmem:[#allocation50_spill] sm:$0xff] %v12878_v15  ;;  %v13244_v15 = vsel %vm2523_vm11, %v12605_v4, %v12497_v60 }
 0x320   :  { %16915 = vst [vmem:[#allocation41_spill] sm:$0xff] %v12882_v39 }
 0x321   :  { %16962 = vst [vmem:[#allocation160_spill] sm:$0xff] %v13244_v15 }
 0x324   :  { %3997 = vrot.lane.b32.xlu1 %v3955_v1, %s11126_s27  ;;  %1555 = vrot.lane.b32.xlu0 %v1508_v53, %s11127_s28  ;;  %v12915_v1 = vsel %vm2975_vm8, %v12088_v34, %v12118_v6  ;;  %v12934_v6 = vsel %vm1462_vm5, %v16904_v48, %v16883_v2 }
 0x325   :  { %v12902_v40 = vpop.permute.xlu2 %3989  ;;  %16922 = vst [vmem:[#allocation40_spill] sm:$0xff] %v12915_v1  ;;  %v1506_v8 = vmul.f32 %v12934_v6, %v12677_v3 }
 0x326   :  { %v12900_v14 = vpop.permute.xlu1 %3983  ;;  %16920 = vst [vmem:[#allocation26_spill] sm:$0xff] %v12902_v40  ;;  %v1538_v7 = vpop.permute.xlu0 %1537 }
 0x327   :  { %16919 = vst [vmem:[#allocation33_spill] sm:$0xff] %v12900_v14  ;;  %v1567_v18 = vsel %vm1563_vm10, %v12709_v41, %v1538_v7  ;;  %v3021_v41 = vmul.f32 %v12915_v1, %v12816_v63 }
 0x328   :  { %10114 = vmatpush.msk.msrb.mxu3 %vm91_vm0, %v1567_v18  ;;  %16925 = vst [vmem:[#allocation42_spill] sm:$0xff] %v12934_v6 }
 0x32a   :  { %v12917_v53 = vpop.f32.mrf.mxu0  ;;  %v12921_v61 = vpop.f32.mrf.mxu1 }
 0x32b   :  { %16923 = vst [vmem:[#allocation52_spill] sm:$0xff] %v12917_v53 }
 0x32c   :  { %16924 = vst [vmem:[#allocation18_spill] sm:$0xff] %v12921_v61  ;;  %3062 = vrot.lane.b32.xlu1 %v3018_v36, %s11130_s9  ;;  %3068 = vrot.lane.b32.xlu0 %v3021_v41, %s11130_s9  ;;  %v16927_v61 = vld [vmem:[#allocation31_spill] sm:$0xff] }
 0x32d   :  { %v12936_v18 = vpop.permute.xlu2 %1541  ;;  %v12943_v1 = vsel %vm1348_vm6, %v16928_v49, %v16927_v61 }
 0x32e   :  { %v12927_v5 = vpop.permute.xlu1 %1958  ;;  %v12929_v56 = vpop.permute.xlu0 %1962  ;;  %16929 = vst [vmem:[#allocation61_spill] sm:$0xff] %v12943_v1  ;;  %v1395_v2 = vmul.f32 %v12943_v1, %v12850_v9 }
 0x331   :  { %v12938_v53 = vpop.f32.mrf.mxu2  ;;  %v12945_v36 = vpop.f32.mrf.mxu3 }
 0x332   :  { %16926 = vst [vmem:[#allocation17_spill] sm:$0xff] %v12938_v53  ;;  %v1171_v41 = vpop.f32.mrf.mxu0  ;;  %v1194_v21 = vpop.f32.mrf.mxu1  ;;  %v16931_v53 = vld [vmem:[#allocation46_spill] sm:$0xff] }
 0x333   :  { %16930 = vst [vmem:[#allocation21_spill] sm:$0xff] %v12945_v36  ;;  %v12951_v48 = vadd.f32 %v1194_v21, %v1171_v41  ;;  %v12957_v39 = vsel %vm1462_vm5, %v16932_v47, %v16931_v53  ;;  %v12970_v21 = vsel %vm2975_vm8, %v12071_v42, %v12088_v34  ;;  %v12975_v41 = vsel %vm2422_vm7, %v16907_v59, %v12063_v11 }
 0x334   :  { %1551 = vrot.lane.b32.xlu1 %v1506_v8, %s11127_s28  ;;  %16933 = vst [vmem:[#allocation10_spill] sm:$0xff] %v12957_v39  ;;  %1980 = vrot.lane.b32.xlu0 %v1395_v2, %s11125_s26  ;;  %v3020_v1 = vmul.f32 %v12970_v21, %v12718_v28 }
 0x335   :  { %v1510_v6 = vmul.f32 %v12957_v39, %v12951_v48  ;;  %16934 = vst [vmem:[#allocation43_spill] sm:$0xff] %v12970_v21  ;;  %v12983_v14 = vpop.permute.xlu2 %1547 }
 0x336   :  { %v12960_v36 = vpop.permute.xlu1 %2495  ;;  %v12964_v40 = vpop.permute.xlu0 %2499  ;;  %16935 = vst [vmem:[#allocation54_spill] sm:$0xff] %v12975_v41 }
 0x337   :  { %1559 = vrot.lane.b32.xlu2 %v1510_v6, %s11127_s28  ;;  %v2469_v6 = vmul.f32 %v12975_v41, %v12850_v9 }
 0x339   :  { %v1217_v8 = vpop.f32.mrf.mxu2  ;;  %v1240_v2 = vpop.f32.mrf.mxu3 }
 0x33a   :  { %v12979_v39 = vadd.f32 %v1240_v2, %v1217_v8  ;;  %v12997_v8 = vsel %vm1348_vm6, %v16887_v33, %v16928_v49 }
 0x33b   :  { %16937 = vst [vmem:[#allocation78_spill] sm:$0xff] %v12997_v8  ;;  %v1394_v2 = vmul.f32 %v12997_v8, %v12816_v63 }
 0x33c   :  { %3066 = vrot.lane.b32.xlu1 %v3020_v1, %s11130_s9  ;;  %2517 = vrot.lane.b32.xlu0 %v2469_v6, %s11128_s29  ;;  %v1511_v34 = vmul.f32 %v16931_v53, %v12979_v39  ;;  %v13002_v1 = vsel %vm2975_vm8, %v12219_v0, %v12145_v23  ;;  %v13113_v53 = vsel %vm3076_vm9, %v12267_v50, %v12419_v29  ;;  %v11051_v50 = vld [vmem:[#allocation4] sm:$0xff] }
 0x33d   :  { %16938 = vst [vmem:[#allocation29_spill] sm:$0xff] %v13002_v1  ;;  %v3023_v6 = vmul.f32 %v13002_v1, %v12951_v48  ;;  %v13015_v33 = vpop.permute.xlu2 %1972 }
 0x33e   :  { %v12987_v42 = vpop.permute.xlu1 %3987  ;;  %v12991_v59 = vpop.permute.xlu0 %1964  ;;  %16951 = vst [vmem:[#allocation31_spill] sm:$0xff] %v13113_v53 }
 0x33f   :  { %16936 = vst [vmem:[#allocation36_spill] sm:$0xff] %v12987_v42  ;;  %1561 = vrot.lane.b32.xlu2 %v1511_v34, %s11127_s28  ;;  %v13012_v34 = vsel %vm3076_vm9, %v12419_v29, %v12433_v45  ;;  %v4953_v29 = vperm.slane %v11051_v50, 7 }
 0x340   :  { %16939 = vst [vmem:[#allocation44_spill] sm:$0xff] %v13012_v34  ;;  %v3957_v0 = vmul.f32 %v13012_v34, %v12677_v3  ;;  %v16944_v34 = vld [vmem:[#allocation12_spill] sm:$0xff] }
 0x344   :  { %1978 = vrot.lane.b32.xlu1 %v1394_v2, %s11125_s26  ;;  %3072 = vrot.lane.b32.xlu0 %v3023_v6, %s11130_s9  ;;  %v13029_v2 = vld [vmem:[%s16206_s3 + $0x8] sm:$0xff]  ;;  %v13034_v6 = vsel %vm1462_vm5, %v16917_v58, %v16932_v47 }
 0x345   :  { %16940 = vst [vmem:[#allocation19_spill] sm:$0xff] %v13034_v6  ;;  %10109 = vmatmul.msk.f32.vlgmr.msrb.gmra.mxu0 %vm159_vm1, %v13029_v2  ;;  %10111 = vmatmul.msk.f32.vlgmr.msrb.gmra.mxu1 %vm159_vm1, %v13029_v2 }
 0x346   :  { %v1540_v49 = vpop.permute.xlu1 %1539  ;;  %v13022_v8 = vpop.permute.xlu0 %2501  ;;  %10115 = vmatmul.msk.f32.vlgmr.msrb.gmra.mxu3 %vm159_vm1, %v13029_v2  ;;  %10113 = vmatmul.msk.f32.vlgmr.msrb.gmra.mxu2 %vm159_vm1, %v13029_v2 }
 0x347   :  { %v1568_v21 = vsel %vm1563_vm10, %v1538_v7, %v1540_v49  ;;  %v1569_v1 = vsel %vm1563_vm10, %v1540_v49, %v12936_v18  ;;  %4001 = vrot.lane.b32.xlu2 %v3957_v0, %s11126_s27  ;;  %v13042_v7 = vsel %vm3076_vm9, %v12433_v45, %v12316_v25  ;;  %v13058_v45 = vsel %vm3076_vm9, %v12316_v25, %v12467_v44  ;;  %v13067_v0 = vpop.permute.xlu2 %2509  ;;  %v11048_v25 = vld [vmem:[#allocation4 + $0x8] sm:$0xff] }
 0x348   :  { %10116 = vmatpush.msk.msra.mxu0 %vm91_vm0, %v1568_v21  ;;  %10118 = vmatpush.msk.msra.mxu1 %vm91_vm0, %v1569_v1  ;;  %16941 = vst [vmem:[#allocation11_spill] sm:$0xff] %v13042_v7  ;;  %v1509_v21 = vmul.f32 %v13034_v6, %v12850_v9  ;;  %v3958_v58 = vmul.f32 %v13042_v7, %v12718_v28  ;;  %v4954_v7 = vperm.slane %v11048_v25, 7  ;;  %v16948_v6 = vld [vmem:[#allocation56_spill] sm:$0xff] }
 0x349   :  { %16942 = vst [vmem:[#allocation30_spill] sm:$0xff] %v13058_v45  ;;  %v3959_v1 = vmul.f32 %v13058_v45, %v12816_v63  ;;  %v11049_v45 = vld [vmem:[#allocation4 + $0x18] sm:$0xff] }
 0x34c   :  { %1557 = vrot.lane.b32.xlu1 %v1509_v21, %s11127_s28  ;;  %4003 = vrot.lane.b32.xlu0 %v3958_v58, %s11126_s27  ;;  %v13073_v21 = vsel %vm1348_vm6, %v16927_v61, %v16944_v34 }
 0x34d   :  { %16945 = vst [vmem:[#allocation51_spill] sm:$0xff] %v13073_v21  ;;  %10117 = vmatmul.msk.f32.vlgmr.msra.gmra.mxu0 %vm159_vm1, %v13029_v2  ;;  %v1396_v58 = vmul.f32 %v13073_v21, %v12951_v48  ;;  %10119 = vmatmul.msk.f32.vlgmr.msra.gmra.mxu1 %vm159_vm1, %v13029_v2  ;;  %v13093_v21 = vsel %vm2422_vm7, %v12063_v11, %v16948_v6 }
 0x34e   :  { %v13061_v47 = vpop.permute.xlu1 %1966  ;;  %v13065_v49 = vpop.permute.xlu0 %3054  ;;  %16949 = vst [vmem:[#allocation53_spill] sm:$0xff] %v13093_v21  ;;  %v1397_v11 = vmul.f32 %v16944_v34, %v12979_v39  ;;  %v3956_v34 = vmul.f32 %v13113_v53, %v12610_v35  ;;  %v11052_v53 = vld [vmem:[#allocation4 + $0x10] sm:$0xff] }
 0x34f   :  { %16943 = vst [vmem:[#allocation45_spill] sm:$0xff] %v13065_v49  ;;  %4005 = vrot.lane.b32.xlu2 %v3959_v1, %s11126_s27  ;;  %v4956_v1 = vperm.slane %v11049_v45, 7  ;;  %v13087_v25 = vpop.permute.xlu2 %3064 }
 0x350   :  { %16947 = vst [vmem:[#allocation37_spill] sm:$0xff] %v13087_v25 }
 0x354   :  { %1982 = vrot.lane.b32.xlu1 %v1396_v58, %s11125_s26  ;;  %4987 = vrot.lane.b32.xlu0 %v4954_v7, %s11127_s28  ;;  %v13098_v58 = vsel %vm3076_vm9, %v12476_v46, %v12377_v16  ;;  %v2470_v7 = vmul.f32 %v13093_v21, %v12951_v48 }
 0x355   :  { %16950 = vst [vmem:[#allocation39_spill] sm:$0xff] %v13098_v58  ;;  %v3961_v45 = vmul.f32 %v13098_v58, %v12951_v48 }
 0x356   :  { %v13083_v41 = vpop.permute.xlu1 %2503  ;;  %v13085_v61 = vpop.permute.xlu0 %3991 }
 0x357   :  { %16946 = vst [vmem:[#allocation49_spill] sm:$0xff] %v13085_v61  ;;  %4991 = vrot.lane.b32.xlu2 %v4956_v1, %s11127_s28  ;;  %v13119_v58 = vpop.permute.xlu2 %1553  ;;  %v4955_v61 = vperm.slane %v11052_v53, 7 }
 0x35c   :  { %2519 = vrot.lane.b32.xlu1 %v2470_v7, %s11128_s29  ;;  %4009 = vrot.lane.b32.xlu0 %v3961_v45, %s11126_s27  ;;  %v11050_v7 = vld [vmem:[#allocation4 + $0x20] sm:$0xff] }
 0x35d   :  { %v4957_v45 = vperm.slane %v11050_v7, 7 }
 0x35e   :  { %v13106_v1 = vpop.permute.xlu1 %3056  ;;  %v1544_v42 = vpop.permute.xlu0 %1543 }
 0x35f   :  { %v1570_v21 = vsel %vm1563_vm10, %v12936_v18, %v1544_v42  ;;  %1984 = vrot.lane.b32.xlu2 %v1397_v11, %s11125_s26 }
 0x360   :  { %10120 = vmatpush.msk.msra.mxu2 %vm91_vm0, %v1570_v21 }
 0x361   :  { %10121 = vmatmul.msk.f32.vlgmr.msra.gmra.mxu2 %vm159_vm1, %v13029_v2 }
 0x364   :  { %3999 = vrot.lane.b32.xlu1 %v3956_v34, %s11126_s27  ;;  %4993 = vrot.lane.b32.xlu0 %v4957_v45, %s11127_s28  ;;  %v11053_v34 = vld [vmem:[#allocation4 + $0x28] sm:$0xff]  ;;  %v3963_v45 = vmul.f32 0.0, %v12504_v37 }
 0x365   :  { %v4958_v50 = vperm.slane %v11053_v34, 7  ;;  %v11054_v34 = vld [vmem:[#allocation4 + $0x38] sm:$0xff] }
 0x366   :  { %v1546_v18 = vpop.permute.xlu1 %1545  ;;  %v13130_v7 = vpop.permute.xlu0 %3993 }
 0x367   :  { %v1571_v11 = vsel %vm1563_vm10, %v1544_v42, %v1546_v18  ;;  %v1572_v21 = vsel %vm1563_vm10, %v1546_v18, %v12983_v14  ;;  %16952 = vst [vmem:[#allocation24_spill] sm:$0xff] %v13130_v7  ;;  %4985 = vrot.lane.b32.xlu2 %v4953_v29, %s11127_s28  ;;  %v13139_v42 = vpop.permute.xlu2 %1976  ;;  %v13151_v18 = vsel %vm2523_vm11, %v12531_v54, %v12425_v20 }
 0x368   :  { %10122 = vmatpush.msk.msra.mxu3 %vm91_vm0, %v1571_v11  ;;  %10124 = vmatpush.msk.msrb.mxu0 %vm91_vm0, %v1572_v21  ;;  %16953 = vst [vmem:[#allocation22_spill] sm:$0xff] %v13151_v18  ;;  %v4500_v21 = vmul.f32 %v13151_v18, %v12250_v22 }
 0x369   :  { %10123 = vmatmul.msk.f32.vlgmr.msra.gmra.mxu3 %vm159_vm1, %v13029_v2  ;;  %10125 = vmatmul.msk.f32.vlgmr.msrb.gmra.mxu0 %vm159_vm1, %v13029_v2 }
 0x36c   :  { %4989 = vrot.lane.b32.xlu1 %v4955_v61, %s11127_s28  ;;  %4995 = vrot.lane.b32.xlu0 %v4958_v50, %s11127_s28  ;;  %v13157_v61 = vsel %vm3076_vm9, %v12467_v44, %v12476_v46  ;;  %v4960_v50 = vperm.slane %v11054_v34, 7  ;;  %v11055_v46 = vld [vmem:[#allocation4 + $0x30] sm:$0xff]  ;;  %v13181_v34 = vsel %vm2523_vm11, %v12425_v20, %v12544_v55  ;;  %v4498_v20 = vmul.f32 %v12571_v13, %v12155_v10 }
 0x36d   :  { %16954 = vst [vmem:[#allocation152_spill] sm:$0xff] %v13157_v61  ;;  %v3960_v11 = vmul.f32 %v13157_v61, %v12850_v9  ;;  %v4959_v44 = vperm.slane %v11055_v46, 7  ;;  %v2471_v61 = vmul.f32 %v16948_v6, %v12979_v39 }
 0x36e   :  { %v13144_v29 = vpop.permute.xlu1 %1968  ;;  %v13146_v53 = vpop.permute.xlu0 %3058  ;;  %16956 = vst [vmem:[#allocation154_spill] sm:$0xff] %v13181_v34 }
 0x36f   :  { %4013 = vrot.lane.b32.xlu2 %v3963_v45, %s11126_s27  ;;  %v13165_v7 = vpop.permute.xlu2 %2513 }
 0x374   :  { %4007 = vrot.lane.b32.xlu1 %v3960_v11, %s11126_s27  ;;  %4536 = vrot.lane.b32.xlu0 %v4500_v21, %s11124_s25  ;;  %v11056_v11 = vld [vmem:[#allocation4 + $0x40] sm:$0xff] }
 0x375   :  { %v4961_v18 = vperm.slane %v11056_v11, 7  ;;  %v13212_v11 = vsel %vm2523_vm11, %v12571_v13, %v12531_v54 }
 0x376   :  { %v13167_v45 = vpop.permute.xlu1 %2505  ;;  %v13169_v49 = vpop.permute.xlu0 %3060  ;;  %16958 = vst [vmem:[#allocation156_spill] sm:$0xff] %v13212_v11 }
 0x377   :  { %4999 = vrot.lane.b32.xlu2 %v4960_v50, %s11127_s28  ;;  %v13185_v50 = vpop.permute.xlu2 %2515 }
 0x37c   :  { %4997 = vrot.lane.b32.xlu1 %v4959_v44, %s11127_s28  ;;  %2521 = vrot.lane.b32.xlu0 %v2471_v61, %s11128_s29  ;;  %v4501_v61 = vmul.f32 %v13181_v34, %v12352_v26  ;;  %v13201_v44 = vsel %vm2523_vm11, %v12544_v55, %v12463_v31  ;;  %v11057_v55 = vld [vmem:[#allocation4 + $0x48] sm:$0xff] }
 0x37d   :  { %16957 = vst [vmem:[#allocation155_spill] sm:$0xff] %v13201_v44  ;;  %v4962_v34 = vperm.slane %v11057_v55, 7  ;;  %v11059_v55 = vld [vmem:[#allocation4 + $0x50] sm:$0xff] }
 0x37e   :  { %v13176_v21 = vpop.permute.xlu1 %3995  ;;  %v13183_v25 = vpop.permute.xlu0 %1549  ;;  %v4963_v13 = vperm.slane %v11059_v55, 7  ;;  %v13251_v55 = vsel %vm2523_vm11, %v12463_v31, %v12592_v12 }
 0x37f   :  { %16955 = vst [vmem:[#allocation153_spill] sm:$0xff] %v13176_v21  ;;  %v1573_v46 = vsel %vm1563_vm10, %v12983_v14, %v13183_v25  ;;  %5001 = vrot.lane.b32.xlu2 %v4961_v18, %s11127_s28  ;;  %v4502_v14 = vmul.f32 %v13201_v44, %v12437_v17  ;;  %v13217_v6 = vpop.permute.xlu2 %3070  ;;  %v4503_v31 = vmul.f32 %v13251_v55, %v12516_v27 }
 0x380   :  { %10126 = vmatpush.msk.msrb.mxu1 %vm91_vm0, %v1573_v46  ;;  %16959 = vst [vmem:[#allocation157_spill] sm:$0xff] %v13217_v6 }
 0x381   :  { %10127 = vmatmul.msk.f32.vlgmr.msrb.gmra.mxu1 %vm159_vm1, %v13029_v2  ;;  %16963 = vst [vmem:[#allocation161_spill] sm:$0xff] %v13251_v55 }
 0x384   :  { %4538 = vrot.lane.b32.xlu1 %v4501_v61, %s11124_s25  ;;  %4532 = vrot.lane.b32.xlu0 %v4498_v20, %s11124_s25  ;;  %v4499_v61 = vmul.f32 %v13212_v11, %v12254_v32  ;;  %v11058_v20 = vld [vmem:[#allocation4 + $0x58] sm:$0xff] }
 0x385   :  { %v4964_v44 = vperm.slane %v11058_v20, 7 }
 0x386   :  { %v13207_v18 = vpop.permute.xlu1 %1970  ;;  %v13214_v46 = vpop.permute.xlu0 %1974 }
 0x387   :  { %4540 = vrot.lane.b32.xlu2 %v4502_v14, %s11124_s25  ;;  %v13230_v14 = vsel %vm2523_vm11, %v12592_v12, %v12605_v4  ;;  %v4505_v4 = vmul.f32 %v13244_v15, %v12682_v19  ;;  %v16965_v12 = vld [vmem:[#allocation139_spill] sm:$0xff] }
 0x388   :  { %16960 = vst [vmem:[#allocation158_spill] sm:$0xff] %v13230_v14 }
 0x38c   :  { %4534 = vrot.lane.b32.xlu1 %v4499_v61, %s11124_s25  ;;  %5003 = vrot.lane.b32.xlu0 %v4962_v34, %s11127_s28  ;;  %v4504_v61 = vmul.f32 %v13230_v14, %v12578_v43  ;;  %v11060_v34 = vld [vmem:[#allocation4 + $0x60] sm:$0xff] }
 0x38d   :  { %v4965_v20 = vperm.slane %v11060_v34, 7 }
 0x38e   :  { %v13223_v21 = vpop.permute.xlu1 %2507  ;;  %v13225_v54 = vpop.permute.xlu0 %2511 }
 0x38f   :  { %5007 = vrot.lane.b32.xlu2 %v4964_v44, %s11127_s28 }
 0x391   :  { %v13233_v11 = vpop.permute.xlu2 %1559 }
 0x394   :  { %5005 = vrot.lane.b32.xlu1 %v4963_v13, %s11127_s28  ;;  %4544 = vrot.lane.b32.xlu0 %v4504_v61, %s11124_s25  ;;  %v16964_v61 = vld [vmem:[#allocation35_spill] sm:$0xff] }
 0x395   :  { %v1987_v34 = vsel %vm1986_vm12, %v16964_v61, %v12720_v57 }
 0x396   :  { %v13239_v6 = vpop.permute.xlu1 %3997  ;;  %v13246_v44 = vpop.permute.xlu0 %1555 }
 0x397   :  { %16961 = vst [vmem:[#allocation159_spill] sm:$0xff] %v13239_v6  ;;  %v1576_v13 = vsel %vm1563_vm10, %v13119_v58, %v13246_v44  ;;  %5009 = vrot.lane.b32.xlu2 %v4965_v20, %s11127_s28  ;;  %v1991_v20 = vsel %vm1986_vm12, %v16965_v12, %v12929_v56  ;;  %v16967_v6 = vld [vmem:[#allocation100_spill] sm:$0xff] }
 0x398   :  { %10132 = vmatpush.msk.msra.mxu0 %vm91_vm0, %v1576_v13  ;;  %v11061_v13 = vld [vmem:[#allocation4 + $0x68] sm:$0xff]  ;;  %v13279_v55 = vsel %vm2523_vm11, %v12497_v60, %v16967_v6 }
 0x399   :  { %v1562_v14 = vpop.permute.xlu2 %1561  ;;  %10133 = vmatmul.msk.f32.vlgmr.msra.gmra.mxu0 %vm159_vm1, %v13029_v2  ;;  %v4966_v15 = vperm.slane %v11061_v13, 7  ;;  %16968 = vst [vmem:[#allocation100_spill] sm:$0xff] %v13279_v55  ;;  %v1995_v13 = vsel %vm1986_vm12, %v13144_v29, %v13207_v18 }
 0x39a   :  { %10140 = vmatpush.msk.msrb.mxu0 %vm91_vm0, %v1987_v34  ;;  %v13286_v34 = vld [vmem:[%s16206_s3] sm:$0xff] }
 0x39c   :  { %10148 = vmatpush.msk.msra.mxu0 %vm91_vm0, %v1991_v20  ;;  %4546 = vrot.lane.b32.xlu1 %v4505_v4, %s11124_s25  ;;  %v11062_v4 = vld [vmem:[#allocation4 + $0x70] sm:$0xff] }
 0x39d   :  { %4542 = vrot.lane.b32.xlu0 %v4503_v31, %s11124_s25  ;;  %v4967_v20 = vperm.slane %v11062_v4, 7  ;;  %v4506_v31 = vmul.f32 %v13279_v55, %v12580_v62 }
 0x39e   :  { %v13274_v61 = vpop.permute.xlu1 %3062  ;;  %v13281_v19 = vpop.permute.xlu0 %3068 }
 0x39f   :  { %16966 = vst [vmem:[#allocation139_spill] sm:$0xff] %v13274_v61  ;;  %5011 = vrot.lane.b32.xlu2 %v4966_v15, %s11127_s28  ;;  %v16970_v61 = vld [vmem:[#allocation117_spill] sm:$0xff]  ;;  %v16971_v15 = vld [vmem:[#allocation116_spill] sm:$0xff] }
 0x3a0   :  { %v13303_v4 = vsel %vm2523_vm11, %v16971_v15, %v16970_v61 }
 0x3a1   :  { %v13294_v60 = vpop.permute.xlu2 %4001  ;;  %10141 = vmatmul.msk.f32.vlgmr.msrb.gmra.mxu0 %vm159_vm1, %v13286_v34  ;;  %16972 = vst [vmem:[#allocation117_spill] sm:$0xff] %v13303_v4  ;;  %v4508_v62 = vmul.f32 %v13303_v4, %v12677_v3  ;;  %v16979_v4 = vld [vmem:[#allocation136_spill] sm:$0xff] }
 0x3a2   :  { %16969 = vst [vmem:[#allocation162_spill] sm:$0xff] %v13294_v60  ;;  %10156 = vmatpush.msk.msrb.mxu0 %vm91_vm0, %v1995_v13 }
 0x3a4   :  { %4548 = vrot.lane.b32.xlu1 %v4506_v31, %s11124_s25  ;;  %v11063_v31 = vld [vmem:[#allocation4 + $0x78] sm:$0xff] }
 0x3a5   :  { %5013 = vrot.lane.b32.xlu0 %v4967_v20, %s11127_s28  ;;  %v4968_v43 = vperm.slane %v11063_v31, 7  ;;  %v16973_v20 = vld [vmem:[#allocation107_spill] sm:$0xff] }
 0x3a6   :  { %v1552_v55 = vpop.permute.xlu1 %1551  ;;  %v13312_v13 = vpop.permute.xlu0 %1980 }
 0x3a7   :  { %v1574_v60 = vsel %vm1563_vm10, %v13183_v25, %v1552_v55  ;;  %v1575_v27 = vsel %vm1563_vm10, %v1552_v55, %v13119_v58  ;;  %4552 = vrot.lane.b32.xlu2 %v4508_v62, %s11124_s25  ;;  %v13322_v25 = vsel %vm2523_vm11, %v16970_v61, %v16973_v20  ;;  %v1579_v58 = vsel %vm1563_vm10, %v13233_v11, %v1562_v14 }
 0x3a8   :  { %10128 = vmatpush.msk.msrb.mxu2 %vm91_vm0, %v1574_v60  ;;  %10130 = vmatpush.msk.msrb.mxu3 %vm91_vm0, %v1575_v27  ;;  %16974 = vst [vmem:[#allocation116_spill] sm:$0xff] %v13322_v25  ;;  %v16976_v27 = vld [vmem:[#allocation9_spill] sm:$0xff]  ;;  %v1990_v61 = vsel %vm1986_vm12, %v12927_v5, %v16965_v12  ;;  %v4509_v14 = vmul.f32 %v13322_v25, %v12718_v28 }
 0x3a9   :  { %10129 = vmatmul.msk.f32.vlgmr.msrb.gmra.mxu2 %vm159_vm1, %v13029_v2  ;;  %v13326_v55 = vpop.permute.xlu2 %4005  ;;  %10131 = vmatmul.msk.f32.vlgmr.msrb.gmra.mxu3 %vm159_vm1, %v13029_v2  ;;  %v13335_v62 = vsel %vm2523_vm11, %v16973_v20, %v16976_v27  ;;  %v10880_v12 = vld [vmem:[#allocation4 + $0x88] ss:$0 sm:$0xff] }
 0x3aa   :  { %16975 = vst [vmem:[#allocation107_spill] sm:$0xff] %v13326_v55  ;;  %10149 = vmatmul.msk.f32.vlgmr.msra.gmra.mxu0 %vm159_vm1, %v13286_v34  ;;  %10138 = vmatpush.msk.msra.mxu3 %vm91_vm0, %v1579_v58  ;;  %v4510_v31 = vmul.f32 %v13335_v62, %v12816_v63  ;;  %v1994_v58 = vsel %vm1986_vm12, %v13061_v47, %v13144_v29 }
 0x3ab   :  { %16977 = vst [vmem:[#allocation9_spill] sm:$0xff] %v13335_v62  ;;  %v13370_v29 = vsel %vm2523_vm11, %v16967_v6, %v16971_v15  ;;  %v16981_v15 = vld [vmem:[#allocation123_spill] sm:$0xff]  ;;  %v2528_v55 = vsel %vm2523_vm11, %v12814_v30, %v12964_v40 }
 0x3ac   :  { %10146 = vmatpush.msk.msrb.mxu3 %vm91_vm0, %v1990_v61  ;;  %5015 = vrot.lane.b32.xlu1 %v4968_v43, %s11127_s28  ;;  %v3024_v43 = vmul.f32 %v12145_v23, %v12979_v39  ;;  %v10881_v61 = vld [vmem:[#allocation4 + $0x98] ss:$0 sm:$0xff]  ;;  %16978 = vst [vmem:[#allocation163_spill] sm:$0xff] %v13370_v29  ;;  %v4507_v6 = vmul.f32 %v13370_v29, %v12610_v35 }
 0x3ad   :  { %4554 = vrot.lane.b32.xlu0 %v4509_v14, %s11124_s25 }
 0x3ae   :  { %v13346_v60 = vpop.permute.xlu1 %3066  ;;  %v13350_v20 = vpop.permute.xlu0 %2517 }
 0x3af   :  { %4556 = vrot.lane.b32.xlu2 %v4510_v31, %s11124_s25 }
 0x3b1   :  { %v13356_v25 = vpop.permute.xlu2 %4991  ;;  %10139 = vmatmul.msk.f32.vlgmr.msra.gmra.mxu3 %vm159_vm1, %v13029_v2 }
 0x3b2   :  { %10157 = vmatmul.msk.f32.vlgmr.msrb.gmra.mxu0 %vm159_vm1, %v13286_v34  ;;  %10154 = vmatpush.msk.msra.mxu3 %vm91_vm0, %v1994_v58  ;;  %v16980_v58 = vld [vmem:[#allocation87_spill] sm:$0xff] }
 0x3b4   :  { %3074 = vrot.lane.b32.xlu1 %v3024_v43, %s11130_s9  ;;  %v2524_v43 = vsel %vm2523_vm11, %v16980_v58, %v16979_v4 }
 0x3b5   :  { %5538 = vrot.lane.b32.xlu0 %v10880_v12, %s11125_s26  ;;  %v16982_v12 = vld [vmem:[#allocation122_spill] sm:$0xff] }
 0x3b6   :  { %v13372_v14 = vpop.permute.xlu1 %1978  ;;  %v13377_v62 = vpop.permute.xlu0 %3072  ;;  %v13390_v23 = vsel %vm2523_vm11, %v16982_v12, %v16981_v15 }
 0x3b7   :  { %v1999_v31 = vsel %vm1986_vm12, %v13139_v42, %v13372_v14  ;;  %5542 = vrot.lane.b32.xlu2 %v10881_v61, %s11125_s26  ;;  %16983 = vst [vmem:[#allocation136_spill] sm:$0xff] %v13390_v23  ;;  %v1998_v61 = vsel %vm1986_vm12, %v13214_v46, %v13139_v42 }
 0x3b8   :  { %10164 = vmatpush.msk.msra.mxu0 %vm91_vm0, %v1999_v31  ;;  %v4512_v31 = vmul.f32 %v13390_v23, %v12951_v48 }
 0x3b9   :  { %v1985_v58 = vpop.permute.xlu2 %1984  ;;  %10147 = vmatmul.msk.f32.vlgmr.msrb.gmra.mxu3 %vm159_vm1, %v13286_v34 }
 0x3ba   :  { %10172 = vmatpush.msk.msrb.mxu0 %vm91_vm0, %v2524_v43  ;;  %10162 = vmatpush.msk.msrb.mxu3 %vm91_vm0, %v1998_v61  ;;  %v10882_v43 = vld [vmem:[#allocation4 + $0x80] ss:$0 sm:$0xff] }
 0x3bb   :  { %10165 = vmatmul.msk.f32.vlgmr.msra.gmra.mxu0 %vm159_vm1, %v13286_v34 }
 0x3bc   :  { %10180 = vmatpush.msk.msra.mxu0 %vm91_vm0, %v2528_v55  ;;  %4550 = vrot.lane.b32.xlu1 %v4507_v6, %s11124_s25  ;;  %v1988_v55 = vsel %vm1986_vm12, %v12720_v57, %v12807_v51  ;;  %v10884_v57 = vld [vmem:[#allocation4 + $0xa0] ss:$0 sm:$0xff] }
 0x3bd   :  { %4560 = vrot.lane.b32.xlu0 %v4512_v31, %s11124_s25  ;;  %v13463_v31 = vsel %vm2523_vm11, %v16976_v27, %v16982_v12  ;;  %v10885_v27 = vld [vmem:[#allocation4 + $0xa8] ss:$0 sm:$0xff]  ;;  %v2527_v12 = vsel %vm2523_vm11, %v12960_v36, %v12814_v30 }
 0x3be   :  { %v1558_v42 = vpop.permute.xlu1 %1557  ;;  %v13412_v28 = vpop.permute.xlu0 %4003  ;;  %16986 = vst [vmem:[#allocation122_spill] sm:$0xff] %v13463_v31 }
 0x3bf   :  { %v1577_v29 = vsel %vm1563_vm10, %v13246_v44, %v1558_v42  ;;  %v1578_v35 = vsel %vm1563_vm10, %v1558_v42, %v13233_v11  ;;  %5536 = vrot.lane.b32.xlu2 %v10882_v43, %s11125_s26  ;;  %v13425_v44 = vld [vmem:[%s16206_s3 + $0x10] sm:$0xff]  ;;  %v1989_v11 = vsel %vm1986_vm12, %v12807_v51, %v12927_v5  ;;  %v1993_v51 = vsel %vm1986_vm12, %v12991_v59, %v13061_v47 }
 0x3c0   :  { %10134 = vmatpush.msk.msra.mxu1 %vm91_vm0, %v1577_v29  ;;  %10136 = vmatpush.msk.msra.mxu2 %vm91_vm0, %v1578_v35  ;;  %v10883_v35 = vld [vmem:[#allocation4 + $0x90] ss:$0 sm:$0xff]  ;;  %v1992_v29 = vsel %vm1986_vm12, %v12929_v56, %v12991_v59  ;;  %v2532_v5 = vsel %vm2523_vm11, %v13167_v45, %v13223_v21  ;;  %v1996_v43 = vsel %vm1986_vm12, %v13207_v18, %v13015_v33 }
 0x3c1   :  { %10135 = vmatmul.msk.f32.vlgmr.msra.gmra.mxu1 %vm159_vm1, %v13029_v2  ;;  %v13430_v6 = vpop.permute.xlu2 %4985  ;;  %10137 = vmatmul.msk.f32.vlgmr.msra.gmra.mxu2 %vm159_vm1, %v13029_v2  ;;  %v16985_v56 = vld [vmem:[#allocation126_spill] sm:$0xff]  ;;  %v4511_v18 = vmul.f32 %v13463_v31, %v12850_v9 }
 0x3c2   :  { %16984 = vst [vmem:[#allocation123_spill] sm:$0xff] %v13430_v6  ;;  %10142 = vmatpush.msk.msrb.mxu1 %vm91_vm0, %v1988_v55  ;;  %10144 = vmatpush.msk.msrb.mxu2 %vm91_vm0, %v1989_v11  ;;  %v4514_v2 = vmul.f32 0.0, %v16985_v56  ;;  %v2000_v11 = vsel %vm1986_vm12, %v13372_v14, %v13312_v13  ;;  %v16988_v14 = vld [vmem:[#allocation13_spill] sm:$0xff] }
 0x3c3   :  { %10155 = vmatmul.msk.f32.vlgmr.msra.gmra.mxu3 %vm159_vm1, %v13286_v34  ;;  %10173 = vmatmul.msk.f32.vlgmr.msrb.gmra.mxu0 %vm159_vm1, %v13425_v44 }
 0x3c4   :  { %10150 = vmatpush.msk.msra.mxu1 %vm91_vm0, %v1992_v29  ;;  %10188 = vmatpush.msk.msrb.mxu0 %vm91_vm0, %v2532_v5  ;;  %v10887_v29 = vld [vmem:[#allocation4 + $0xb0] ss:$0 sm:$0xff] }
 0x3c5   :  { %10152 = vmatpush.msk.msra.mxu2 %vm91_vm0, %v1993_v51  ;;  %5540 = vrot.lane.b32.xlu1 %v10883_v35, %s11125_s26  ;;  %v2531_v51 = vsel %vm2523_vm11, %v13083_v41, %v13167_v45  ;;  %v16989_v5 = vld [vmem:[#allocation70_spill] sm:$0xff] }
 0x3c6   :  { %5544 = vrot.lane.b32.xlu0 %v10884_v57, %s11125_s26  ;;  %v1983_v59 = vpop.permute.xlu1 %1982  ;;  %v13456_v61 = vpop.permute.xlu0 %4987 }
 0x3c7   :  { %v2002_v47 = vsel %vm1986_vm12, %v1983_v59, %v1985_v58  ;;  %4564 = vrot.lane.b32.xlu2 %v4514_v2, %s11124_s25  ;;  %v1997_v58 = vsel %vm1986_vm12, %v13015_v33, %v13214_v46  ;;  %v2536_v33 = vsel %vm2523_vm11, %v13165_v7, %v13185_v50  ;;  %v10886_v46 = vld [vmem:[#allocation4 + $0xb8] ss:$0 sm:$0xff]  ;;  %v2001_v35 = vsel %vm1986_vm12, %v13312_v13, %v1983_v59  ;;  %v10888_v2 = vld [vmem:[#allocation4 + $0xc0] ss:$0 sm:$0xff] }
 0x3c8   :  { %10170 = vmatpush.msk.msra.mxu3 %vm91_vm0, %v2002_v47  ;;  %v3077_v13 = vsel %vm3076_vm9, %v16989_v5, %v16988_v14  ;;  %v2525_v47 = vsel %vm2523_vm11, %v16979_v4, %v12842_v52 }
 0x3c9   :  { %10143 = vmatmul.msk.f32.vlgmr.msrb.gmra.mxu1 %vm159_vm1, %v13286_v34  ;;  %v13473_v42 = vpop.permute.xlu2 %4013  ;;  %10145 = vmatmul.msk.f32.vlgmr.msrb.gmra.mxu2 %vm159_vm1, %v13286_v34 }
 0x3ca   :  { %16987 = vst [vmem:[#allocation126_spill] sm:$0xff] %v13473_v42  ;;  %10158 = vmatpush.msk.msrb.mxu1 %vm91_vm0, %v1996_v43  ;;  %10160 = vmatpush.msk.msrb.mxu2 %vm91_vm0, %v1997_v58  ;;  %v2526_v43 = vsel %vm2523_vm11, %v12842_v52, %v12960_v36  ;;  %v3081_v52 = vsel %vm3076_vm9, %v12848_v24, %v12880_v38 }
 0x3cb   :  { %10163 = vmatmul.msk.f32.vlgmr.msrb.gmra.mxu3 %vm159_vm1, %v13286_v34  ;;  %10181 = vmatmul.msk.f32.vlgmr.msra.gmra.mxu0 %vm159_vm1, %v13425_v44 }
 0x3cc   :  { %10178 = vmatpush.msk.msrb.mxu3 %vm91_vm0, %v2527_v12  ;;  %10196 = vmatpush.msk.msra.mxu0 %vm91_vm0, %v2536_v33 }
 0x3cd   :  { %4558 = vrot.lane.b32.xlu1 %v4511_v18, %s11124_s25 }
 0x3ce   :  { %5546 = vrot.lane.b32.xlu0 %v10885_v27, %s11125_s26  ;;  %v13495_v30 = vpop.permute.xlu1 %2519  ;;  %v13497_v55 = vpop.permute.xlu0 %4009  ;;  %v2535_v27 = vsel %vm2523_vm11, %v13225_v54, %v13165_v7 }
 0x3cf   :  { %5550 = vrot.lane.b32.xlu2 %v10886_v46, %s11125_s26 }
 0x3d1   :  { %10151 = vmatmul.msk.f32.vlgmr.msra.gmra.mxu1 %vm159_vm1, %v13286_v34  ;;  %v13507_v57 = vpop.permute.xlu2 %4999  ;;  %10153 = vmatmul.msk.f32.vlgmr.msra.gmra.mxu2 %vm159_vm1, %v13286_v34 }
 0x3d2   :  { %10166 = vmatpush.msk.msra.mxu1 %vm91_vm0, %v2000_v11  ;;  %10168 = vmatpush.msk.msra.mxu2 %vm91_vm0, %v2001_v35  ;;  %v2529_v11 = vsel %vm2523_vm11, %v12964_v40, %v13022_v8  ;;  %v3085_v40 = vsel %vm3076_vm9, %v13146_v53, %v13169_v49 }
 0x3d3   :  { %10171 = vmatmul.msk.f32.vlgmr.msra.gmra.mxu3 %vm159_vm1, %v13286_v34  ;;  %10189 = vmatmul.msk.f32.vlgmr.msrb.gmra.mxu0 %vm159_vm1, %v13425_v44 }
 0x3d4   :  { %10186 = vmatpush.msk.msra.mxu3 %vm91_vm0, %v2531_v51  ;;  %10204 = vmatpush.msk.msrb.mxu0 %vm91_vm0, %v3077_v13 }
 0x3d5   :  { %5548 = vrot.lane.b32.xlu1 %v10887_v29, %s11125_s26  ;;  %v2530_v29 = vsel %vm2523_vm11, %v13022_v8, %v13083_v41  ;;  %v10889_v41 = vld [vmem:[#allocation4 + $0xd8] ss:$0 sm:$0xff] }
 0x3d6   :  { %v13526_v45 = vpop.permute.xlu1 %3999  ;;  %v13528_v59 = vpop.permute.xlu0 %4993 }
 0x3d7   :  { %5552 = vrot.lane.b32.xlu2 %v10888_v2, %s11125_s26  ;;  %v13550_v4 = vsel %vm1563_vm10, %v13356_v25, %v13528_v59  ;;  %v2533_v2 = vsel %vm2523_vm11, %v13223_v21, %v13067_v0 }
 0x3d8   :  { %16990 = vst [vmem:[#allocation13_spill] sm:$0xff] %v13550_v4  ;;  %v5053_v36 = vmul.f32 %v13550_v4, %v12437_v17  ;;  %v17028_v4 = vld [vmem:[#allocation41_spill] sm:$0xff] }
 0x3d9   :  { %10159 = vmatmul.msk.f32.vlgmr.msrb.gmra.mxu1 %vm159_vm1, %v13286_v34  ;;  %v13539_v58 = vpop.permute.xlu2 %5001  ;;  %10161 = vmatmul.msk.f32.vlgmr.msrb.gmra.mxu2 %vm159_vm1, %v13286_v34 }
 0x3da   :  { %10174 = vmatpush.msk.msrb.mxu1 %vm91_vm0, %v2525_v47  ;;  %10176 = vmatpush.msk.msrb.mxu2 %vm91_vm0, %v2526_v43  ;;  %v2534_v47 = vsel %vm2523_vm11, %v13067_v0, %v13225_v54  ;;  %v3089_v0 = vsel %vm3076_vm9, %v13346_v60, %v13281_v19  ;;  %v10890_v54 = vld [vmem:[#allocation4 + $0xe0] ss:$0 sm:$0xff] }
 0x3db   :  { %10179 = vmatmul.msk.f32.vlgmr.msrb.gmra.mxu3 %vm159_vm1, %v13425_v44  ;;  %10197 = vmatmul.msk.f32.vlgmr.msra.gmra.mxu0 %vm159_vm1, %v13425_v44 }
 0x3dc   :  { %10194 = vmatpush.msk.msrb.mxu3 %vm91_vm0, %v2535_v27  ;;  %10212 = vmatpush.msk.msra.mxu0 %vm91_vm0, %v3081_v52 }
 0x3de   :  { %v4990_v7 = vpop.permute.xlu1 %4989  ;;  %v13572_v18 = vpop.permute.xlu0 %4995 }
 0x3df   :  { %v13566_v12 = vsel %vm1563_vm10, %v13456_v61, %v4990_v7  ;;  %v13570_v33 = vsel %vm1563_vm10, %v4990_v7, %v13356_v25  ;;  %5091 = vrot.lane.b32.xlu2 %v5053_v36, %s11123_s0  ;;  %v13587_v25 = vld [vmem:[%s16206_s3 + $0x18] sm:$0xff]  ;;  %v2537_v7 = vsel %vm2523_vm11, %v13185_v50, %v13350_v20  ;;  %v16995_v50 = vld [vmem:[#allocation131_spill] sm:$0xff] }
 0x3e0   :  { %16991 = vst [vmem:[#allocation164_spill] sm:$0xff] %v13566_v12  ;;  %v5052_v46 = vmul.f32 %v13570_v33, %v12352_v26  ;;  %v5051_v35 = vmul.f32 %v13566_v12, %v12250_v22 }
 0x3e1   :  { %16992 = vst [vmem:[#allocation165_spill] sm:$0xff] %v13570_v33  ;;  %10167 = vmatmul.msk.f32.vlgmr.msra.gmra.mxu1 %vm159_vm1, %v13286_v34  ;;  %v13592_v51 = vpop.permute.xlu2 %4540  ;;  %10169 = vmatmul.msk.f32.vlgmr.msra.gmra.mxu2 %vm159_vm1, %v13286_v34  ;;  %v13613_v34 = vsel %vm1563_vm10, %v13430_v6, %v13456_v61  ;;  %v5049_v61 = vmul.f32 %v13430_v6, %v12155_v10 }
 0x3e2   :  { %10182 = vmatpush.msk.msra.mxu1 %vm91_vm0, %v2529_v11  ;;  %10184 = vmatpush.msk.msra.mxu2 %vm91_vm0, %v2530_v29  ;;  %16993 = vst [vmem:[#allocation166_spill] sm:$0xff] %v13613_v34  ;;  %v5050_v43 = vmul.f32 %v13613_v34, %v12254_v32  ;;  %v2538_v11 = vsel %vm2523_vm11, %v13350_v20, %v13495_v30 }
 0x3e3   :  { %10187 = vmatmul.msk.f32.vlgmr.msra.gmra.mxu3 %vm159_vm1, %v13425_v44  ;;  %10205 = vmatmul.msk.f32.vlgmr.msrb.gmra.mxu0 %vm159_vm1, %v13587_v25  ;;  %v3080_v29 = vsel %vm3076_vm9, %v16995_v50, %v12848_v24 }
 0x3e4   :  { %5089 = vrot.lane.b32.xlu1 %v5052_v46, %s11123_s0  ;;  %10220 = vmatpush.msk.msrb.mxu0 %vm91_vm0, %v3085_v40  ;;  %v10891_v46 = vld [vmem:[#allocation4 + $0xc8] ss:$0 sm:$0xff] }
 0x3e5   :  { %5087 = vrot.lane.b32.xlu0 %v5051_v35, %s11123_s0  ;;  %v13664_v35 = vsel %vm3076_vm9, %v12377_v16, %v12504_v37  ;;  %v3084_v16 = vsel %vm3076_vm9, %v13106_v1, %v13146_v53 }
 0x3e6   :  { %v13608_v8 = vpop.permute.xlu1 %4007  ;;  %v13615_v13 = vpop.permute.xlu0 %4536  ;;  %16994 = vst [vmem:[#allocation167_spill] sm:$0xff] %v13664_v35  ;;  %v3962_v20 = vmul.f32 %v13664_v35, %v12979_v39 }
 0x3e7   :  { %5558 = vrot.lane.b32.xlu2 %v10889_v41, %s11125_s26 }
 0x3e9   :  { %10175 = vmatmul.msk.f32.vlgmr.msrb.gmra.mxu1 %vm159_vm1, %v13425_v44  ;;  %10177 = vmatmul.msk.f32.vlgmr.msrb.gmra.mxu2 %vm159_vm1, %v13425_v44  ;;  %v13639_v21 = vpop.permute.xlu2 %5007 }
 0x3ea   :  { %10190 = vmatpush.msk.msrb.mxu1 %vm91_vm0, %v2533_v2  ;;  %10192 = vmatpush.msk.msrb.mxu2 %vm91_vm0, %v2534_v47  ;;  %v16997_v2 = vld [vmem:[#allocation50_spill] sm:$0xff] }
 0x3eb   :  { %10195 = vmatmul.msk.f32.vlgmr.msrb.gmra.mxu3 %vm159_vm1, %v13425_v44  ;;  %10213 = vmatmul.msk.f32.vlgmr.msra.gmra.mxu0 %vm159_vm1, %v13587_v25  ;;  %v3078_v47 = vsel %vm3076_vm9, %v16988_v14, %v16997_v2 }
 0x3ec   :  { %5085 = vrot.lane.b32.xlu1 %v5050_v43, %s11123_s0  ;;  %10228 = vmatpush.msk.msra.mxu0 %vm91_vm0, %v3089_v0  ;;  %v3079_v43 = vsel %vm3076_vm9, %v16997_v2, %v16995_v50  ;;  %v16998_v0 = vld [vmem:[#allocation37_spill] sm:$0xff] }
 0x3ed   :  { %5083 = vrot.lane.b32.xlu0 %v5049_v61, %s11123_s0  ;;  %v10893_v61 = vld [vmem:[#allocation4 + $0xd0] ss:$0 sm:$0xff] }
 0x3ee   :  { %v4998_v27 = vpop.permute.xlu1 %4997  ;;  %v2522_v52 = vpop.permute.xlu0 %2521 }
 0x3ef   :  { %v2539_v36 = vsel %vm2523_vm11, %v13495_v30, %v2522_v52  ;;  %5560 = vrot.lane.b32.xlu2 %v10890_v54, %s11125_s26  ;;  %v10892_v30 = vld [vmem:[#allocation4 + $0xe8] ss:$0 sm:$0xff]  ;;  %v13698_v53 = vsel %vm1563_vm10, %v13572_v18, %v4998_v27  ;;  %v3088_v54 = vsel %vm3076_vm9, %v16998_v0, %v13346_v60  ;;  %v16999_v52 = vld [vmem:[#allocation108_spill] sm:$0xff] }
 0x3f0   :  { %10202 = vmatpush.msk.msra.mxu3 %vm91_vm0, %v2539_v36  ;;  %16996 = vst [vmem:[#allocation131_spill] sm:$0xff] %v13698_v53  ;;  %v5055_v14 = vmul.f32 %v13698_v53, %v16999_v52 }
 0x3f1   :  { %10183 = vmatmul.msk.f32.vlgmr.msra.gmra.mxu1 %vm159_vm1, %v13425_v44  ;;  %10185 = vmatmul.msk.f32.vlgmr.msra.gmra.mxu2 %vm159_vm1, %v13425_v44  ;;  %v13683_v37 = vpop.permute.xlu2 %5009 }
 0x3f2   :  { %10198 = vmatpush.msk.msra.mxu1 %vm91_vm0, %v2537_v7  ;;  %10200 = vmatpush.msk.msra.mxu2 %vm91_vm0, %v2538_v11  ;;  %v13734_v7 = vsel %vm1563_vm10, %v13528_v59, %v13572_v18  ;;  %v17001_v11 = vld [vmem:[#allocation45_spill] sm:$0xff] }
 0x3f3   :  { %10203 = vmatmul.msk.f32.vlgmr.msra.gmra.mxu3 %vm159_vm1, %v13425_v44  ;;  %10221 = vmatmul.msk.f32.vlgmr.msrb.gmra.mxu0 %vm159_vm1, %v13587_v25  ;;  %17000 = vst [vmem:[#allocation50_spill] sm:$0xff] %v13734_v7  ;;  %v3082_v50 = vsel %vm3076_vm9, %v12880_v38, %v17001_v11  ;;  %v3083_v59 = vsel %vm3076_vm9, %v17001_v11, %v13106_v1  ;;  %v17003_v38 = vld [vmem:[#allocation98_spill] sm:$0xff]  ;;  %v17005_v1 = vld [vmem:[#allocation109_spill] sm:$0xff] }
 0x3f4   :  { %10210 = vmatpush.msk.msrb.mxu3 %vm91_vm0, %v3080_v29  ;;  %10236 = vmatpush.msk.msrb.mxu0 %vm91_vm0, %v12155_v10  ;;  %v13741_v29 = vsel %vm1563_vm10, %v4998_v27, %v13507_v57  ;;  %v5054_v18 = vmul.f32 %v13734_v7, %v17003_v38  ;;  %v17004_v27 = vld [vmem:[#allocation125_spill] sm:$0xff]  ;;  %v13933_v7 = vpop.f32.mrf.mxu2 }
 0x3f5   :  { %5554 = vrot.lane.b32.xlu0 %v10891_v46, %s11125_s26  ;;  %4011 = vrot.lane.b32.xlu1 %v3962_v20, %s11126_s27  ;;  %17002 = vst [vmem:[#allocation37_spill] sm:$0xff] %v13741_v29  ;;  %v13748_v20 = vld [vmem:[%s16206_s3 + $0x20] sm:$0xff] }
 0x3f6   :  { %10218 = vmatpush.msk.msra.mxu3 %vm91_vm0, %v3084_v16  ;;  %v13687_v24 = vpop.permute.xlu1 %4538  ;;  %v13694_v41 = vpop.permute.xlu0 %4532 }
 0x3f7   :  { %v13692_v40 = vsel %vm2422_vm7, %v13687_v24, %v13592_v51  ;;  %5562 = vrot.lane.b32.xlu2 %v10892_v30, %s11125_s26  ;;  %v5056_v30 = vmul.f32 %v13741_v29, %v17004_v27 }
 0x3f9   :  { %10191 = vmatmul.msk.f32.vlgmr.msrb.gmra.mxu1 %vm159_vm1, %v13425_v44  ;;  %10193 = vmatmul.msk.f32.vlgmr.msrb.gmra.mxu2 %vm159_vm1, %v13425_v44  ;;  %v5012_v46 = vpop.permute.xlu2 %5011 }
 0x3fa   :  { %10206 = vmatpush.msk.msrb.mxu1 %vm91_vm0, %v3078_v47  ;;  %10208 = vmatpush.msk.msrb.mxu2 %vm91_vm0, %v3079_v43  ;;  %v17007_v43 = vld [vmem:[#allocation139_spill] sm:$0xff] }
 0x3fb   :  { %10211 = vmatmul.msk.f32.vlgmr.msrb.gmra.mxu3 %vm159_vm1, %v13587_v25  ;;  %10229 = vmatmul.msk.f32.vlgmr.msra.gmra.mxu0 %vm159_vm1, %v13587_v25  ;;  %v3087_v11 = vsel %vm3076_vm9, %v17007_v43, %v16998_v0  ;;  %v13812_v0 = vsel %vm1563_vm10, %v13639_v21, %v13683_v37 }
 0x3fc   :  { %10226 = vmatpush.msk.msrb.mxu3 %vm91_vm0, %v3088_v54  ;;  %10244 = vmatpush.msk.msra.mxu0 %vm91_vm0, %v12437_v17  ;;  %v13783_v54 = vsel %vm1563_vm10, %v13507_v57, %v13539_v58  ;;  %17009 = vst [vmem:[#allocation98_spill] sm:$0xff] %v13812_v0 }
 0x3fd   :  { %5095 = vrot.lane.b32.xlu0 %v5055_v14, %s11123_s0  ;;  %5556 = vrot.lane.b32.xlu1 %v10893_v61, %s11125_s26  ;;  %v3086_v61 = vsel %vm3076_vm9, %v13169_v49, %v17007_v43  ;;  %17008 = vst [vmem:[#allocation45_spill] sm:$0xff] %v13783_v54  ;;  %v10894_v14 = vld [vmem:[#allocation4 + $0xf0] ss:$0 sm:$0xff]  ;;  %v5057_v49 = vmul.f32 %v13783_v54, %v17005_v1 }
 0x3fe   :  { %v13727_v60 = vpop.permute.xlu1 %4534  ;;  %v13729_v36 = vpop.permute.xlu0 %5003 }
 0x401   :  { %10199 = vmatmul.msk.f32.vlgmr.msra.gmra.mxu1 %vm159_vm1, %v13425_v44  ;;  %10201 = vmatmul.msk.f32.vlgmr.msra.gmra.mxu2 %vm159_vm1, %v13425_v44 }
 0x402   :  { %10214 = vmatpush.msk.msra.mxu1 %vm91_vm0, %v3082_v50  ;;  %10216 = vmatpush.msk.msra.mxu2 %vm91_vm0, %v3083_v59  ;;  %v13790_v50 = vpop.permute.xlu2 %4552 }
 0x403   :  { %10219 = vmatmul.msk.f32.vlgmr.msra.gmra.mxu3 %vm159_vm1, %v13587_v25  ;;  %10237 = vmatmul.msk.f32.vlgmr.msrb.gmra.mxu0 %vm159_vm1, %v13748_v20 }
 0x404   :  { %10252 = vmatpush.msk.msrb.mxu0 %vm91_vm0, %v17005_v1 }
 0x405   :  { %5093 = vrot.lane.b32.xlu0 %v5054_v18, %s11123_s0  ;;  %5097 = vrot.lane.b32.xlu1 %v5056_v30, %s11123_s0  ;;  %v17011_v30 = vld [vmem:[#allocation157_spill] sm:$0xff] }
 0x406   :  { %v5006_v44 = vpop.permute.xlu1 %5005  ;;  %v13773_v2 = vpop.permute.xlu0 %4544  ;;  %v3091_v43 = vsel %vm3076_vm9, %v17011_v30, %v13377_v62 }
 0x407   :  { %v13771_v16 = vsel %vm1563_vm10, %v13729_v36, %v5006_v44  ;;  %v13818_v18 = vsel %vm1563_vm10, %v5006_v44, %v13639_v21  ;;  %v13836_v21 = vsel %vm2523_vm11, %v16981_v15, %v16985_v56  ;;  %v13858_v56 = vsel %vm1563_vm10, %v13683_v37, %v5012_v46  ;;  %v10895_v37 = vld [vmem:[#allocation4 + $0xf8] ss:$0 sm:$0xff] }
 0x408   :  { %17006 = vst [vmem:[#allocation108_spill] sm:$0xff] %v13771_v16  ;;  %v5059_v47 = vmul.f32 %v13771_v16, %v12677_v3 }
 0x409   :  { %10207 = vmatmul.msk.f32.vlgmr.msrb.gmra.mxu1 %vm159_vm1, %v13587_v25  ;;  %10209 = vmatmul.msk.f32.vlgmr.msrb.gmra.mxu2 %vm159_vm1, %v13587_v25  ;;  %17010 = vst [vmem:[#allocation125_spill] sm:$0xff] %v13818_v18 }
 0x40a   :  { %10222 = vmatpush.msk.msrb.mxu1 %vm91_vm0, %v3086_v61  ;;  %10224 = vmatpush.msk.msrb.mxu2 %vm91_vm0, %v3087_v11  ;;  %v5061_v61 = vmul.f32 %v13812_v0, %v12816_v63  ;;  %17012 = vst [vmem:[#allocation109_spill] sm:$0xff] %v13836_v21  ;;  %v17015_v11 = vld [vmem:[#allocation134_spill] sm:$0xff]  ;;  %v13928_v0 = vpop.f32.mrf.mxu0 }
 0x40b   :  { %10227 = vmatmul.msk.f32.vlgmr.msrb.gmra.mxu3 %vm159_vm1, %v13587_v25  ;;  %10245 = vmatmul.msk.f32.vlgmr.msra.gmra.mxu0 %vm159_vm1, %v13748_v20  ;;  %17016 = vst [vmem:[#allocation139_spill] sm:$0xff] %v13858_v56 }
 0x40c   :  { %5103 = vrot.lane.b32.xlu2 %v5059_v47, %s11123_s0  ;;  %10260 = vmatpush.msk.msra.mxu0 %vm91_vm0, %v12816_v63  ;;  %v3090_v47 = vsel %vm3076_vm9, %v13281_v19, %v17011_v30  ;;  %v17013_v19 = vld [vmem:[#allocation58_spill] sm:$0xff]  ;;  %v13844_v30 = vpop.permute.xlu2 %4556 }
 0x40d   :  { %5564 = vrot.lane.b32.xlu0 %v10894_v14, %s11125_s26  ;;  %5099 = vrot.lane.b32.xlu1 %v5057_v49, %s11123_s0  ;;  %v5060_v44 = vmul.f32 %v13818_v18, %v17013_v19  ;;  %v17014_v14 = vld [vmem:[#allocation33_spill] sm:$0xff] }
 0x40e   :  { %v13807_v57 = vpop.permute.xlu1 %4546  ;;  %v4015_v49 = vsel %vm2975_vm8, %v17015_v11, %v17014_v14  ;;  %v4016_v6 = vsel %vm2975_vm8, %v17014_v14, %v17028_v4 }
 0x40f   :  { %v13814_v59 = vpop.permute.xlu0 %4542 }
 0x411   :  { %10215 = vmatmul.msk.f32.vlgmr.msra.gmra.mxu1 %vm159_vm1, %v13587_v25  ;;  %10217 = vmatmul.msk.f32.vlgmr.msra.gmra.mxu2 %vm159_vm1, %v13587_v25 }
 0x412   :  { %10230 = vmatpush.msk.msra.mxu1 %vm91_vm0, %v3090_v47  ;;  %10232 = vmatpush.msk.msra.mxu2 %vm91_vm0, %v3091_v43  ;;  %v4513_v47 = vmul.f32 %v13836_v21, %v12979_v39 }
 0x413   :  { %10253 = vmatmul.msk.f32.vlgmr.msrb.gmra.mxu0 %vm159_vm1, %v13748_v20 }
 0x414   :  { %5107 = vrot.lane.b32.xlu2 %v5061_v61, %s11123_s0  ;;  %10268 = vmatpush.msk.msrb.mxu0 %vm91_vm0, %v4015_v49  ;;  %v5062_v49 = vmul.f32 %v13858_v56, %v12850_v9  ;;  %v13924_v56 = vpop.f32.mrf.mxu1 }
 0x415   :  { %5105 = vrot.lane.b32.xlu0 %v5060_v44, %s11123_s0  ;;  %4562 = vrot.lane.b32.xlu1 %v4513_v47, %s11124_s25  ;;  %v17019_v47 = vld [vmem:[#allocation26_spill] sm:$0xff] }
 0x416   :  { %v13854_v15 = vpop.permute.xlu1 %4548 }
 0x417   :  { %v13863_v43 = vsel %vm2422_vm7, %v13807_v57, %v13854_v15  ;;  %v5014_v11 = vpop.permute.xlu0 %5013 }
 0x418   :  { %v13866_v61 = vsel %vm1563_vm10, %v5012_v46, %v5014_v11  ;;  %v17018_v46 = vld [vmem:[#allocation49_spill] sm:$0xff] }
 0x419   :  { %17017 = vst [vmem:[#allocation157_spill] sm:$0xff] %v13866_v61  ;;  %v5063_v44 = vmul.f32 %v13866_v61, %v12951_v48  ;;  %10223 = vmatmul.msk.f32.vlgmr.msrb.gmra.mxu1 %vm159_vm1, %v13587_v25  ;;  %10225 = vmatmul.msk.f32.vlgmr.msrb.gmra.mxu2 %vm159_vm1, %v13587_v25  ;;  %v4019_v5 = vsel %vm2975_vm8, %v17019_v47, %v17018_v46  ;;  %v13888_v61 = vpop.permute.xlu2 %5542 }
 0x41a   :  { %10238 = vmatpush.msk.msrb.mxu1 %vm91_vm0, %v12254_v32  ;;  %10240 = vmatpush.msk.msrb.mxu2 %vm91_vm0, %v12250_v22 }
 0x41b   :  { %10261 = vmatmul.msk.f32.vlgmr.msra.gmra.mxu0 %vm159_vm1, %v13748_v20 }
 0x41c   :  { %5109 = vrot.lane.b32.xlu2 %v5062_v49, %s11123_s0  ;;  %10276 = vmatpush.msk.msra.mxu0 %vm91_vm0, %v4019_v5  ;;  %v13902_v5 = vsel %vm1563_vm10, %v13539_v58, %v13729_v36  ;;  %v13909_v49 = vld [vmem:[%s16206_s3 + $0x28] sm:$0xff]  ;;  %v17021_v58 = vld [vmem:[#allocation159_spill] sm:$0xff] }
 0x41d   :  { %5111 = vrot.lane.b32.xlu0 %v5063_v44, %s11123_s0  ;;  %5566 = vrot.lane.b32.xlu1 %v10895_v37, %s11125_s26  ;;  %17020 = vst [vmem:[#allocation58_spill] sm:$0xff] %v13902_v5  ;;  %v4023_v36 = vsel %vm2975_vm8, %v17021_v58, %v13526_v45 }
 0x41e   :  { %v5016_v54 = vpop.permute.xlu1 %5015 }
 0x41f   :  { %v4555_v29 = vpop.permute.xlu0 %4554  ;;  %v5065_v44 = vmul.f32 0.0, %v5016_v54  ;;  %v13939_v53 = vsel %vm1563_vm10, %v5014_v11, %v5016_v54  ;;  %v13971_v11 = vpop.f32.mrf.mxu1 }
 0x420   :  { %v13893_v33 = vsel %vm2422_vm7, %v13790_v50, %v4555_v29  ;;  %v13897_v12 = vsel %vm2422_vm7, %v4555_v29, %v13844_v30  ;;  %v17022_v29 = vld [vmem:[#allocation111_spill] sm:$0xff]  ;;  %17024 = vst [vmem:[#allocation134_spill] sm:$0xff] %v13939_v53  ;;  %v5064_v54 = vmul.f32 %v13939_v53, %v12979_v39 }
 0x421   :  { %10231 = vmatmul.msk.f32.vlgmr.msra.gmra.mxu1 %vm159_vm1, %v13587_v25  ;;  %10233 = vmatmul.msk.f32.vlgmr.msra.gmra.mxu2 %vm159_vm1, %v13587_v25  ;;  %v5058_v37 = vmul.f32 %v13902_v5, %v17022_v29  ;;  %v13935_v5 = vpop.permute.xlu2 %5536 }
 0x422   :  { %10246 = vmatpush.msk.msra.mxu1 %vm91_vm0, %v17003_v38  ;;  %10248 = vmatpush.msk.msra.mxu2 %vm91_vm0, %v16999_v52  ;;  %17023 = vst [vmem:[#allocation33_spill] sm:$0xff] %v13935_v5 }
 0x423   :  { %10269 = vmatmul.msk.f32.vlgmr.msrb.gmra.mxu0 %vm159_vm1, %v13909_v49 }
 0x424   :  { %10284 = vmatpush.msk.msrb.mxu0 %vm91_vm0, %v4023_v36  ;;  %v13979_v36 = vpop.f32.mrf.mxu2 }
 0x425   :  { %5115 = vrot.lane.b32.xlu0 %v5065_v44, %s11123_s0  ;;  %5101 = vrot.lane.b32.xlu1 %v5058_v37, %s11123_s0  ;;  %v13973_v44 = vpop.f32.mrf.mxu0 }
 0x426   :  { %v3075_v18 = vpop.permute.xlu1 %3074 }
 0x427   :  { %v3092_v16 = vsel %vm3076_vm9, %v13377_v62, %v3075_v18  ;;  %v5539_v35 = vpop.permute.xlu0 %5538  ;;  %v5600_v62 = vmul.f32 %v13935_v5, %v12155_v10  ;;  %v13964_v10 = vpop.f32.mrf.mxu3 }
 0x428   :  { %10234 = vmatpush.msk.msra.mxu3 %vm91_vm0, %v3092_v16  ;;  %v14001_v34 = vpop.f32.mrf.mxu1 }
 0x429   :  { %10235 = vmatmul.msk.f32.vlgmr.msra.gmra.mxu3 %vm159_vm1, %v13587_v25  ;;  %10239 = vmatmul.msk.f32.vlgmr.msrb.gmra.mxu1 %vm159_vm1, %v13748_v20  ;;  %v17025_v25 = vld [vmem:[#allocation107_spill] sm:$0xff]  ;;  %17027 = vst [vmem:[#allocation26_spill] sm:$0xff] %v14001_v34 }
 0x42a   :  { %10241 = vmatmul.msk.f32.vlgmr.msrb.gmra.mxu2 %vm159_vm1, %v13748_v20  ;;  %10242 = vmatpush.msk.msrb.mxu3 %vm91_vm0, %v12352_v26  ;;  %v4027_v16 = vsel %vm2975_vm8, %v17025_v25, %v13608_v8 }
 0x42b   :  { %10254 = vmatpush.msk.msrb.mxu1 %vm91_vm0, %v17022_v29  ;;  %10256 = vmatpush.msk.msrb.mxu2 %vm91_vm0, %v12677_v3 }
 0x42c   :  { %10277 = vmatmul.msk.f32.vlgmr.msra.gmra.mxu0 %vm159_vm1, %v13909_v49  ;;  %10250 = vmatpush.msk.msra.mxu3 %vm91_vm0, %v17004_v27 }
 0x42d   :  { %10292 = vmatpush.msk.msra.mxu0 %vm91_vm0, %v4027_v16  ;;  %5634 = vrot.lane.b32.xlu0 %v5600_v62, %s11122_s1  ;;  %v4566_v62 = vsel %vm2422_vm7, %v13694_v41, %v13727_v60  ;;  %v13997_v16 = vpop.permute.xlu2 %4564  ;;  %v14020_v23 = vpop.f32.mrf.mxu0 }
 0x42e   :  { %5113 = vrot.lane.b32.xlu1 %v5064_v54, %s11123_s0  ;;  %v13969_v18 = vpop.permute.xlu1 %4550  ;;  %17026 = vst [vmem:[#allocation49_spill] sm:$0xff] %v13997_v16 }
 0x42f   :  { %v13981_v37 = vpop.permute.xlu0 %4560  ;;  %v13999_v54 = vpop.f32.mrf.mxu3 }
 0x431   :  { %10243 = vmatmul.msk.f32.vlgmr.msrb.gmra.mxu3 %vm159_vm1, %v13748_v20  ;;  %10247 = vmatmul.msk.f32.vlgmr.msra.gmra.mxu1 %vm159_vm1, %v13748_v20 }
 0x432   :  { %10249 = vmatmul.msk.f32.vlgmr.msra.gmra.mxu2 %vm159_vm1, %v13748_v20  ;;  %10258 = vmatpush.msk.msrb.mxu3 %vm91_vm0, %v17013_v19 }
 0x433   :  { %10262 = vmatpush.msk.msra.mxu1 %vm91_vm0, %v12850_v9  ;;  %10264 = vmatpush.msk.msra.mxu2 %vm91_vm0, %v12951_v48 }
 0x434   :  { %10285 = vmatmul.msk.f32.vlgmr.msrb.gmra.mxu0 %vm159_vm1, %v13909_v49 }
 0x435   :  { %10300 = vmatpush.msk.msrb.mxu0 %vm91_vm0, %v4566_v62  ;;  %v17031_v62 = vld [vmem:[#allocation36_spill] sm:$0xff] }
 0x436   :  { %v4017_v31 = vsel %vm2975_vm8, %v17028_v4, %v17031_v62  ;;  %v4570_v4 = vsel %vm2422_vm7, %v13592_v51, %v13814_v59  ;;  %v17035_v51 = vld [vmem:[#allocation24_spill] sm:$0xff] }
 0x437   :  { %v5541_v53 = vpop.permute.xlu1 %5540 }
 0x438   :  { %v14007_v21 = vsel %vm1986_vm12, %v5539_v35, %v5541_v53  ;;  %v14011_v41 = vsel %vm1986_vm12, %v5541_v53, %v13888_v61  ;;  %v14032_v53 = vpop.f32.mrf.mxu2 }
 0x439   :  { %17029 = vst [vmem:[#allocation159_spill] sm:$0xff] %v14007_v21  ;;  %10255 = vmatmul.msk.f32.vlgmr.msrb.gmra.mxu1 %vm159_vm1, %v13748_v20  ;;  %10251 = vmatmul.msk.f32.vlgmr.msra.gmra.mxu3 %vm159_vm1, %v13748_v20  ;;  %v5602_v14 = vmul.f32 %v14007_v21, %v12250_v22  ;;  %v5603_v34 = vmul.f32 %v14011_v41, %v12352_v26  ;;  %v5545_v22 = vpop.permute.xlu0 %5544  ;;  %v5551_v21 = vpop.permute.xlu2 %5550 }
 0x43a   :  { %17030 = vst [vmem:[#allocation111_spill] sm:$0xff] %v14011_v41  ;;  %10257 = vmatmul.msk.f32.vlgmr.msrb.gmra.mxu2 %vm159_vm1, %v13748_v20  ;;  %10270 = vmatpush.msk.msrb.mxu1 %vm91_vm0, %v4016_v6  ;;  %v14044_v26 = vsel %vm1986_vm12, %v13888_v61, %v5545_v22  ;;  %v14048_v6 = vsel %vm1986_vm12, %v13935_v5, %v5539_v35  ;;  %v14064_v35 = vld [vmem:[%s16206_s3 + $0x30] sm:$0xff] }
 0x43b   :  { %10272 = vmatpush.msk.msrb.mxu2 %vm91_vm0, %v4017_v31  ;;  %10266 = vmatpush.msk.msra.mxu3 %vm91_vm0, %v12979_v39  ;;  %17032 = vst [vmem:[#allocation107_spill] sm:$0xff] %v14032_v53  ;;  %v4020_v41 = vsel %vm2975_vm8, %v17018_v46, %v17035_v51  ;;  %v4018_v61 = vsel %vm2975_vm8, %v17031_v62, %v17019_v47  ;;  %v14083_v47 = vpop.f32.mrf.mxu0 }
 0x43c   :  { %10293 = vmatmul.msk.f32.vlgmr.msra.gmra.mxu0 %vm159_vm1, %v13909_v49  ;;  %5640 = vrot.lane.b32.xlu2 %v5603_v34, %s11122_s1  ;;  %17033 = vst [vmem:[#allocation41_spill] sm:$0xff] %v14044_v26  ;;  %v14055_v34 = vpop.f32.mrf.mxu3  ;;  %v5601_v53 = vmul.f32 %v14048_v6, %v12254_v32 }
 0x43d   :  { %10308 = vmatpush.msk.msra.mxu0 %vm91_vm0, %v4570_v4  ;;  %5638 = vrot.lane.b32.xlu1 %v5602_v14, %s11122_s1  ;;  %17034 = vst [vmem:[#allocation36_spill] sm:$0xff] %v14048_v6  ;;  %v17036_v14 = vld [vmem:[#allocation153_spill] sm:$0xff]  ;;  %v5604_v4 = vmul.f32 %v14044_v26, %v12437_v17  ;;  %v4574_v17 = vsel %vm2422_vm7, %v13854_v15, %v13969_v18 }
 0x43e   :  { %v4021_v46 = vsel %vm2975_vm8, %v17035_v51, %v17036_v14  ;;  %v14074_v5 = vpop.f32.mrf.mxu1  ;;  %v4022_v62 = vsel %vm2975_vm8, %v17036_v14, %v17021_v58  ;;  %v17039_v51 = vld [vmem:[#allocation162_spill] sm:$0xff] }
 0x43f   :  { %v14050_v31 = vpop.permute.xlu1 %4558  ;;  %17037 = vst [vmem:[#allocation24_spill] sm:$0xff] %v14074_v5  ;;  %v4024_v15 = vsel %vm2975_vm8, %v13526_v45, %v17039_v51  ;;  %v4025_v45 = vsel %vm2975_vm8, %v17039_v51, %v13412_v28  ;;  %v4026_v51 = vsel %vm2975_vm8, %v13412_v28, %v17025_v25 }
 0x441   :  { %10263 = vmatmul.msk.f32.vlgmr.msra.gmra.mxu1 %vm159_vm1, %v13748_v20  ;;  %10259 = vmatmul.msk.f32.vlgmr.msrb.gmra.mxu3 %vm159_vm1, %v13748_v20  ;;  %v5553_v14 = vpop.permute.xlu2 %5552 }
 0x442   :  { %10265 = vmatmul.msk.f32.vlgmr.msra.gmra.mxu2 %vm159_vm1, %v13748_v20  ;;  %10278 = vmatpush.msk.msra.mxu1 %vm91_vm0, %v4020_v41  ;;  %v5547_v41 = vpop.permute.xlu0 %5546 }
 0x443   :  { %10280 = vmatpush.msk.msra.mxu2 %vm91_vm0, %v4021_v46  ;;  %10274 = vmatpush.msk.msrb.mxu3 %vm91_vm0, %v4018_v61  ;;  %v14102_v46 = vsel %vm1986_vm12, %v5545_v22, %v5547_v41 }
 0x444   :  { %10301 = vmatmul.msk.f32.vlgmr.msrb.gmra.mxu0 %vm159_vm1, %v14064_v35  ;;  %5642 = vrot.lane.b32.xlu2 %v5604_v4, %s11122_s1  ;;  %v14093_v32 = vpop.f32.mrf.mxu2  ;;  %17040 = vst [vmem:[#allocation162_spill] sm:$0xff] %v14102_v46 }
 0x445   :  { %10316 = vmatpush.msk.msrb.mxu0 %vm91_vm0, %v4574_v17  ;;  %5636 = vrot.lane.b32.xlu1 %v5601_v53, %s11122_s1  ;;  %17038 = vst [vmem:[#allocation153_spill] sm:$0xff] %v14093_v32  ;;  %v14124_v17 = vpop.f32.mrf.mxu3 }
 0x446   :  { %17043 = vst [vmem:[#allocation170_spill] sm:$0xff] %v14124_v17 }
 0x447   :  { %v5549_v61 = vpop.permute.xlu1 %5548 }
 0x448   :  { %v14105_v4 = vsel %vm1986_vm12, %v5547_v41, %v5549_v61  ;;  %v14108_v53 = vsel %vm1986_vm12, %v5549_v61, %v5551_v21  ;;  %v14140_v41 = vpop.f32.mrf.mxu0 }
 0x449   :  { %17041 = vst [vmem:[#allocation168_spill] sm:$0xff] %v14105_v4  ;;  %10271 = vmatmul.msk.f32.vlgmr.msrb.gmra.mxu1 %vm159_vm1, %v13909_v49  ;;  %10267 = vmatmul.msk.f32.vlgmr.msra.gmra.mxu3 %vm159_vm1, %v13748_v20  ;;  %v5606_v58 = vmul.f32 %v14105_v4, %v16999_v52  ;;  %v5607_v22 = vmul.f32 %v14108_v53, %v17004_v27  ;;  %v14133_v27 = vpop.f32.mrf.mxu1 }
 0x44a   :  { %17042 = vst [vmem:[#allocation169_spill] sm:$0xff] %v14108_v53  ;;  %10273 = vmatmul.msk.f32.vlgmr.msrb.gmra.mxu2 %vm159_vm1, %v13909_v49  ;;  %10286 = vmatpush.msk.msrb.mxu1 %vm91_vm0, %v4024_v15  ;;  %v4578_v20 = vsel %vm2422_vm7, %v13844_v30, %v14050_v31  ;;  %v5605_v52 = vmul.f32 %v14102_v46, %v17003_v38 }
 0x44b   :  { %10288 = vmatpush.msk.msrb.mxu2 %vm91_vm0, %v4025_v45  ;;  %10282 = vmatpush.msk.msra.mxu3 %vm91_vm0, %v4022_v62  ;;  %v14144_v30 = vsel %vm1986_vm12, %v5551_v21, %v5553_v14  ;;  %v4028_v38 = vsel %vm2975_vm8, %v13608_v8, %v13497_v55  ;;  %v14167_v8 = vpop.permute.xlu2 %5091  ;;  %v4567_v45 = vsel %vm2422_vm7, %v13727_v60, %v13615_v13 }
 0x44c   :  { %10309 = vmatmul.msk.f32.vlgmr.msra.gmra.mxu0 %vm159_vm1, %v14064_v35  ;;  %5646 = vrot.lane.b32.xlu0 %v5606_v58, %s11122_s1  ;;  %17044 = vst [vmem:[#allocation171_spill] sm:$0xff] %v14144_v30  ;;  %v14146_v62 = vpop.f32.mrf.mxu2  ;;  %v5608_v21 = vmul.f32 %v14144_v30, %v17005_v1 }
 0x44d   :  { %10324 = vmatpush.msk.msra.mxu0 %vm91_vm0, %v4578_v20  ;;  %5648 = vrot.lane.b32.xlu1 %v5607_v22, %s11122_s1  ;;  %v14169_v15 = vpop.f32.mrf.mxu3 }
 0x44e   :  { %5644 = vrot.lane.b32.xlu2 %v5605_v52, %s11122_s1 }
 0x450   :  { %v14177_v61 = vpop.f32.mrf.mxu0 }
 0x451   :  { %10279 = vmatmul.msk.f32.vlgmr.msra.gmra.mxu1 %vm159_vm1, %v13909_v49  ;;  %10275 = vmatmul.msk.f32.vlgmr.msrb.gmra.mxu3 %vm159_vm1, %v13909_v49  ;;  %v14171_v28 = vpop.f32.mrf.mxu1 }
 0x452   :  { %10281 = vmatmul.msk.f32.vlgmr.msra.gmra.mxu2 %vm159_vm1, %v13909_v49  ;;  %10294 = vmatpush.msk.msra.mxu1 %vm91_vm0, %v4028_v38 }
 0x453   :  { %10290 = vmatpush.msk.msrb.mxu3 %vm91_vm0, %v4026_v51  ;;  %v5559_v52 = vpop.permute.xlu2 %5558 }
 0x454   :  { %10317 = vmatmul.msk.f32.vlgmr.msrb.gmra.mxu0 %vm159_vm1, %v14064_v35  ;;  %5650 = vrot.lane.b32.xlu0 %v5608_v21, %s11122_s1  ;;  %v14182_v58 = vpop.f32.mrf.mxu2  ;;  %v14207_v21 = vld [vmem:[%s16206_s3 + $0x38] sm:$0xff] }
 0x455   :  { %v14195_v20 = vpop.f32.mrf.mxu3 }
 0x456   :  { %v14173_v25 = vpop.permute.xlu1 %5089 }
 0x457   :  { %v14175_v1 = vpop.permute.xlu0 %5087 }
 0x458   :  { %v14212_v46 = vpop.f32.mrf.mxu0 }
 0x459   :  { %10283 = vmatmul.msk.f32.vlgmr.msra.gmra.mxu3 %vm159_vm1, %v13909_v49  ;;  %10287 = vmatmul.msk.f32.vlgmr.msrb.gmra.mxu1 %vm159_vm1, %v13909_v49  ;;  %v14197_v38 = vpop.f32.mrf.mxu1 }
 0x45a   :  { %10289 = vmatmul.msk.f32.vlgmr.msrb.gmra.mxu2 %vm159_vm1, %v13909_v49  ;;  %10302 = vmatpush.msk.msrb.mxu1 %vm91_vm0, %v4567_v45  ;;  %v4571_v45 = vsel %vm2422_vm7, %v13814_v59, %v13773_v2 }
 0x45c   :  { %10325 = vmatmul.msk.f32.vlgmr.msra.gmra.mxu0 %vm159_vm1, %v14064_v35 }
 0x45d   :  { %v14224_v53 = vpop.f32.mrf.mxu3 }
 0x45e   :  { %v14193_v22 = vpop.permute.xlu1 %5085 }
 0x45f   :  { %v5084_v60 = vpop.permute.xlu0 %5083 }
 0x460   :  { %v5117_v51 = vsel %vm1462_vm5, %v5084_v60, %v14193_v22  ;;  %v14216_v60 = vpop.f32.mrf.mxu2 }
 0x461   :  { %10332 = vmatpush.msk.msrb.mxu0 %vm91_vm0, %v5117_v51  ;;  %10291 = vmatmul.msk.f32.vlgmr.msrb.gmra.mxu3 %vm159_vm1, %v13909_v49  ;;  %17045 = vst [vmem:[#allocation172_spill] sm:$0xff] %v14216_v60  ;;  %v14232_v32 = vpop.f32.mrf.mxu1 }
 0x462   :  { %10295 = vmatmul.msk.f32.vlgmr.msra.gmra.mxu1 %vm159_vm1, %v13909_v49  ;;  %17047 = vst [vmem:[#allocation174_spill] sm:$0xff] %v14232_v32 }
 0x463   :  { %10310 = vmatpush.msk.msra.mxu1 %vm91_vm0, %v4571_v45  ;;  %v5561_v45 = vpop.permute.xlu2 %5560 }
 0x464   :  { %10333 = vmatmul.msk.f32.vlgmr.msrb.gmra.mxu0 %vm159_vm1, %v14207_v21 }
 0x467   :  { %v5555_v51 = vpop.permute.xlu0 %5554  ;;  %v4012_v26 = vpop.permute.xlu1 %4011 }
 0x468   :  { %v14222_v30 = vsel %vm1986_vm12, %v5553_v14, %v5555_v51  ;;  %v4029_v59 = vsel %vm2975_vm8, %v13497_v55, %v4012_v26  ;;  %v4030_v4 = vsel %vm2975_vm8, %v4012_v26, %v13473_v42  ;;  %v4568_v14 = vsel %vm2422_vm7, %v13615_v13, %v13687_v24  ;;  %v14250_v26 = vpop.f32.mrf.mxu2 }
 0x469   :  { %17046 = vst [vmem:[#allocation173_spill] sm:$0xff] %v14222_v30  ;;  %v5609_v6 = vmul.f32 %v14222_v30, %v17022_v29  ;;  %10296 = vmatpush.msk.msra.mxu2 %vm91_vm0, %v4029_v59  ;;  %10298 = vmatpush.msk.msra.mxu3 %vm91_vm0, %v4030_v4  ;;  %v4572_v55 = vsel %vm2422_vm7, %v13773_v2, %v13807_v57  ;;  %v14246_v29 = vpop.f32.mrf.mxu0 }
 0x46a   :  { %10297 = vmatmul.msk.f32.vlgmr.msra.gmra.mxu2 %vm159_vm1, %v13909_v49  ;;  %17048 = vst [vmem:[#allocation175_spill] sm:$0xff] %v14250_v26  ;;  %10299 = vmatmul.msk.f32.vlgmr.msra.gmra.mxu3 %vm159_vm1, %v13909_v49  ;;  %v4575_v13 = vsel %vm2422_vm7, %v13969_v18, %v13790_v50  ;;  %v14275_v18 = vpop.f32.mrf.mxu3 }
 0x46b   :  { %10306 = vmatpush.msk.msrb.mxu3 %vm91_vm0, %v13692_v40  ;;  %10304 = vmatpush.msk.msrb.mxu2 %vm91_vm0, %v4568_v14  ;;  %17051 = vst [vmem:[#allocation178_spill] sm:$0xff] %v14275_v18 }
 0x46c   :  { %5652 = vrot.lane.b32.xlu0 %v5609_v6, %s11122_s1  ;;  %10303 = vmatmul.msk.f32.vlgmr.msrb.gmra.mxu1 %vm159_vm1, %v14064_v35  ;;  %v14279_v6 = vpop.f32.mrf.mxu1 }
 0x46d   :  { %10312 = vmatpush.msk.msra.mxu2 %vm91_vm0, %v4572_v55  ;;  %10314 = vmatpush.msk.msra.mxu3 %vm91_vm0, %v13863_v43  ;;  %v5563_v43 = vpop.permute.xlu2 %5562 }
 0x46e   :  { %10318 = vmatpush.msk.msrb.mxu1 %vm91_vm0, %v4575_v13 }
 0x46f   :  { %v14263_v24 = vpop.permute.xlu0 %5095  ;;  %v5557_v40 = vpop.permute.xlu1 %5556 }
 0x470   :  { %v14266_v2 = vsel %vm1986_vm12, %v5555_v51, %v5557_v40  ;;  %v14269_v57 = vsel %vm1986_vm12, %v5557_v40, %v5559_v52  ;;  %v14300_v51 = vsel %vm1986_vm12, %v5559_v52, %v5561_v45  ;;  %v5118_v52 = vsel %vm1462_vm5, %v14193_v22, %v14175_v1 }
 0x471   :  { %17049 = vst [vmem:[#allocation176_spill] sm:$0xff] %v14266_v2  ;;  %v5610_v50 = vmul.f32 %v14266_v2, %v12677_v3  ;;  %v5611_v49 = vmul.f32 %v14269_v57, %v17013_v19  ;;  %v4579_v3 = vsel %vm2422_vm7, %v14050_v31, %v13981_v37  ;;  %v14290_v19 = vpop.f32.mrf.mxu0  ;;  %v14327_v40 = vsel %vm1986_vm12, %v5561_v45, %v5563_v43 }
 0x472   :  { %17050 = vst [vmem:[#allocation177_spill] sm:$0xff] %v14269_v57  ;;  %10305 = vmatmul.msk.f32.vlgmr.msrb.gmra.mxu2 %vm159_vm1, %v14064_v35  ;;  %10307 = vmatmul.msk.f32.vlgmr.msrb.gmra.mxu3 %vm159_vm1, %v14064_v35  ;;  %v14313_v55 = vpop.f32.mrf.mxu3 }
 0x473   :  { %10320 = vmatpush.msk.msrb.mxu2 %vm91_vm0, %v13893_v33  ;;  %5656 = vrot.lane.b32.xlu2 %v5611_v49, %s11122_s1  ;;  %v14296_v33 = vpop.f32.mrf.mxu2  ;;  %17052 = vst [vmem:[#allocation179_spill] sm:$0xff] %v14300_v51 }
 0x474   :  { %5654 = vrot.lane.b32.xlu1 %v5610_v50, %s11122_s1  ;;  %10311 = vmatmul.msk.f32.vlgmr.msra.gmra.mxu1 %vm159_vm1, %v14064_v35  ;;  %v14321_v13 = vpop.f32.mrf.mxu1  ;;  %17053 = vst [vmem:[#allocation180_spill] sm:$0xff] %v14327_v40 }
 0x475   :  { %10322 = vmatpush.msk.msrb.mxu3 %vm91_vm0, %v13897_v12  ;;  %10326 = vmatpush.msk.msra.mxu1 %vm91_vm0, %v4579_v3  ;;  %v5612_v12 = vmul.f32 %v14300_v51, %v12816_v63  ;;  %v14311_v14 = vpop.permute.xlu2 %5103 }
 0x477   :  { %v5094_v4 = vpop.permute.xlu0 %5093  ;;  %v5098_v59 = vpop.permute.xlu1 %5097 }
 0x478   :  { %v5121_v31 = vsel %vm1462_vm5, %v14167_v8, %v5094_v4 }
 0x479   :  { %10340 = vmatpush.msk.msra.mxu0 %vm91_vm0, %v5121_v31  ;;  %v14332_v3 = vpop.f32.mrf.mxu0 }
 0x47a   :  { %10341 = vmatmul.msk.f32.vlgmr.msra.gmra.mxu0 %vm159_vm1, %v14207_v21  ;;  %10313 = vmatmul.msk.f32.vlgmr.msra.gmra.mxu2 %vm159_vm1, %v14064_v35 }
 0x47b   :  { %10315 = vmatmul.msk.f32.vlgmr.msra.gmra.mxu3 %vm159_vm1, %v14064_v35  ;;  %v14334_v31 = vpop.f32.mrf.mxu2 }
 0x47c   :  { %5658 = vrot.lane.b32.xlu1 %v5612_v12, %s11122_s1  ;;  %10319 = vmatmul.msk.f32.vlgmr.msrb.gmra.mxu1 %vm159_vm1, %v14064_v35  ;;  %v5613_v12 = vmul.f32 %v14327_v40, %v12850_v9  ;;  %v14353_v9 = vpop.f32.mrf.mxu1 }
 0x47d   :  { %10334 = vmatpush.msk.msrb.mxu1 %vm91_vm0, %v5118_v52  ;;  %v5108_v45 = vpop.permute.xlu2 %5107  ;;  %17055 = vst [vmem:[#allocation182_spill] sm:$0xff] %v14353_v9 }
 0x47f   :  { %v5565_v63 = vpop.permute.xlu0 %5564  ;;  %v5100_v50 = vpop.permute.xlu1 %5099 }
 0x480   :  { %v14330_v49 = vsel %vm1986_vm12, %v5563_v43, %v5565_v63  ;;  %v5122_v43 = vsel %vm1462_vm5, %v5094_v4, %v14263_v24  ;;  %v5120_v4 = vsel %vm1462_vm5, %v14173_v25, %v14167_v8 }
 0x481   :  { %17054 = vst [vmem:[#allocation181_spill] sm:$0xff] %v14330_v49  ;;  %v5614_v22 = vmul.f32 %v14330_v49, %v12951_v48  ;;  %v14350_v48 = vpop.f32.mrf.mxu3  ;;  %v14364_v42 = vpop.f32.mrf.mxu0 }
 0x482   :  { %10321 = vmatmul.msk.f32.vlgmr.msrb.gmra.mxu2 %vm159_vm1, %v14064_v35 }
 0x483   :  { %5662 = vrot.lane.b32.xlu2 %v5614_v22, %s11122_s1  ;;  %10323 = vmatmul.msk.f32.vlgmr.msrb.gmra.mxu3 %vm159_vm1, %v14064_v35  ;;  %v14369_v2 = vpop.f32.mrf.mxu2 }
 0x484   :  { %5660 = vrot.lane.b32.xlu1 %v5613_v12, %s11122_s1  ;;  %10327 = vmatmul.msk.f32.vlgmr.msra.gmra.mxu1 %vm159_vm1, %v14064_v35  ;;  %17056 = vst [vmem:[#allocation183_spill] sm:$0xff] %v14369_v2 }
 0x485   :  { %10342 = vmatpush.msk.msra.mxu1 %vm91_vm0, %v5122_v43  ;;  %v5119_v43 = vsel %vm1462_vm5, %v14175_v1, %v14173_v25  ;;  %v5110_v25 = vpop.permute.xlu2 %5109 }
 0x487   :  { %v4563_v52 = vpop.permute.xlu1 %4562  ;;  %v5106_v8 = vpop.permute.xlu0 %5105 }
 0x488   :  { %v4580_v22 = vsel %vm2422_vm7, %v13981_v37, %v4563_v52  ;;  %v4581_v12 = vsel %vm2422_vm7, %v4563_v52, %v13997_v16  ;;  %v5123_v37 = vsel %vm1462_vm5, %v14263_v24, %v5098_v59  ;;  %v5124_v52 = vsel %vm1462_vm5, %v5098_v59, %v5100_v50 }
 0x489   :  { %10328 = vmatpush.msk.msra.mxu2 %vm91_vm0, %v4580_v22  ;;  %10330 = vmatpush.msk.msra.mxu3 %vm91_vm0, %v4581_v12  ;;  %v14384_v22 = vpop.f32.mrf.mxu3 }
 0x48a   :  { %10329 = vmatmul.msk.f32.vlgmr.msra.gmra.mxu2 %vm159_vm1, %v14064_v35  ;;  %17057 = vst [vmem:[#allocation184_spill] sm:$0xff] %v14384_v22 }
 0x48b   :  { %10338 = vmatpush.msk.msrb.mxu3 %vm91_vm0, %v5120_v4  ;;  %10336 = vmatpush.msk.msrb.mxu2 %vm91_vm0, %v5119_v43  ;;  %v14389_v4 = vpop.f32.mrf.mxu1  ;;  %v14402_v43 = vpop.f32.mrf.mxu2 }
 0x48c   :  { %10331 = vmatmul.msk.f32.vlgmr.msra.gmra.mxu3 %vm159_vm1, %v14064_v35  ;;  %10335 = vmatmul.msk.f32.vlgmr.msrb.gmra.mxu1 %vm159_vm1, %v14207_v21  ;;  %17059 = vst [vmem:[#allocation186_spill] sm:$0xff] %v14389_v4  ;;  %v5127_v35 = vsel %vm1462_vm5, %v14311_v14, %v5106_v8 }
 0x48d   :  { %10344 = vmatpush.msk.msra.mxu2 %vm91_vm0, %v5123_v37  ;;  %10346 = vmatpush.msk.msra.mxu3 %vm91_vm0, %v5124_v52  ;;  %17061 = vst [vmem:[#allocation188_spill] sm:$0xff] %v14402_v43  ;;  %v5128_v37 = vsel %vm1462_vm5, %v5106_v8, %v5108_v45 }
 0x48f   :  { %v5567_v1 = vpop.permute.xlu1 %5566 }
 0x490   :  { %v14387_v24 = vsel %vm1986_vm12, %v5565_v63, %v5567_v1  ;;  %v5616_v12 = vmul.f32 0.0, %v5567_v1  ;;  %v14400_v63 = vpop.f32.mrf.mxu0 }
 0x491   :  { %17058 = vst [vmem:[#allocation185_spill] sm:$0xff] %v14387_v24  ;;  %v5615_v59 = vmul.f32 %v14387_v24, %v12979_v39  ;;  %v5112_v39 = vpop.permute.xlu0 %5111  ;;  %v14415_v8 = vpop.f32.mrf.mxu3 }
 0x492   :  { %10337 = vmatmul.msk.f32.vlgmr.msrb.gmra.mxu2 %vm159_vm1, %v14207_v21  ;;  %5666 = vrot.lane.b32.xlu2 %v5616_v12, %s11122_s1  ;;  %17060 = vst [vmem:[#allocation187_spill] sm:$0xff] %v14400_v63  ;;  %v5130_v16 = vsel %vm1462_vm5, %v5110_v25, %v5112_v39 }
 0x493   :  { %10352 = vmatpush.msk.msrb.mxu2 %vm91_vm0, %v5127_v35  ;;  %5664 = vrot.lane.b32.xlu0 %v5615_v59, %s11122_s1  ;;  %17062 = vst [vmem:[#allocation189_spill] sm:$0xff] %v14415_v8  ;;  %v5129_v35 = vsel %vm1462_vm5, %v5108_v45, %v5110_v25  ;;  %v14433_v45 = vpop.f32.mrf.mxu2 }
 0x494   :  { %10339 = vmatmul.msk.f32.vlgmr.msrb.gmra.mxu3 %vm159_vm1, %v14207_v21  ;;  %10343 = vmatmul.msk.f32.vlgmr.msra.gmra.mxu1 %vm159_vm1, %v14207_v21 }
 0x495   :  { %10354 = vmatpush.msk.msrb.mxu3 %vm91_vm0, %v5128_v37 }
 0x496   :  { %v5641_v52 = vpop.permute.xlu2 %5640 }
 0x497   :  { %v5102_v1 = vpop.permute.xlu1 %5101 }
 0x498   :  { %v5125_v12 = vsel %vm1462_vm5, %v5100_v50, %v5102_v1  ;;  %v5126_v59 = vsel %vm1462_vm5, %v5102_v1, %v14311_v14  ;;  %v14423_v50 = vpop.f32.mrf.mxu1  ;;  %v14431_v14 = vpop.f32.mrf.mxu0 }
 0x499   :  { %10348 = vmatpush.msk.msrb.mxu0 %vm91_vm0, %v5125_v12  ;;  %10350 = vmatpush.msk.msrb.mxu1 %vm91_vm0, %v5126_v59  ;;  %v14435_v25 = vpop.permute.xlu0 %5115 }
 0x49a   :  { %10345 = vmatmul.msk.f32.vlgmr.msra.gmra.mxu2 %vm159_vm1, %v14207_v21  ;;  %10349 = vmatmul.msk.f32.vlgmr.msrb.gmra.mxu0 %vm159_vm1, %v14207_v21  ;;  %17063 = vst [vmem:[#allocation190_spill] sm:$0xff] %v14435_v25 }
 0x49b   :  { %10356 = vmatpush.msk.msra.mxu0 %vm91_vm0, %v5129_v35  ;;  %10358 = vmatpush.msk.msra.mxu1 %vm91_vm0, %v5130_v16  ;;  %v6055_v16 = vld [vmem:[%s16207_s4] sm:$0xff] }
 0x49c   :  { %10347 = vmatmul.msk.f32.vlgmr.msra.gmra.mxu3 %vm159_vm1, %v14207_v21  ;;  %10351 = vmatmul.msk.f32.vlgmr.msrb.gmra.mxu1 %vm159_vm1, %v14207_v21 }
 0x49d   :  { %6058 = vperm.xlu0 %10564, %v6055_v16  }
 0x49e   :  { %v5643_v59 = vpop.permute.xlu2 %5642 }
 0x49f   :  { %v5671_v35 = vsel %vm1348_vm6, %v5641_v52, %v5643_v59 }
 0x4a0   :  { %v5114_v37 = vpop.permute.xlu1 %5113 }
 0x4a1   :  { %v5131_v1 = vsel %vm1462_vm5, %v5112_v39, %v5114_v37  ;;  %v5132_v12 = vsel %vm1462_vm5, %v5114_v37, %v14435_v25  ;;  %v14449_v39 = vpop.f32.mrf.mxu3  ;;  %v14454_v37 = vpop.f32.mrf.mxu1 }
 0x4a2   :  { %10360 = vmatpush.msk.msra.mxu2 %vm91_vm0, %v5131_v1  ;;  %10362 = vmatpush.msk.msra.mxu3 %vm91_vm0, %v5132_v12  ;;  %v14459_v1 = vpop.f32.mrf.mxu0  ;;  %v14461_v12 = vpop.f32.mrf.mxu2 }
 0x4a3   :  { %10353 = vmatmul.msk.f32.vlgmr.msrb.gmra.mxu2 %vm159_vm1, %v14207_v21  ;;  %10357 = vmatmul.msk.f32.vlgmr.msra.gmra.mxu0 %vm159_vm1, %v14207_v21  ;;  %17064 = vst [vmem:[#allocation191_spill] sm:$0xff] %v14461_v12  ;;  %v5635_v30 = vpop.permute.xlu0 %5634 }
 0x4a4   :  { %10355 = vmatmul.msk.f32.vlgmr.msrb.gmra.mxu3 %vm159_vm1, %v14207_v21  ;;  %10359 = vmatmul.msk.f32.vlgmr.msra.gmra.mxu1 %vm159_vm1, %v14207_v21 }
 0x4a5   :  { %10370 = vmatpush.msk.msrb.mxu3 %vm91_vm0, %v5671_v35  ;;  %v14475_v35 = vld [vmem:[%s16206_s3 + $0x40] sm:$0xff] }
 0x4a8   :  { %v5645_v51 = vpop.permute.xlu2 %5644 }
 0x4a9   :  { %v14467_v16 = vpop.f32.mrf.mxu3  ;;  %v14469_v24 = vpop.f32.mrf.mxu1  ;;  %v5672_v4 = vsel %vm1348_vm6, %v5643_v59, %v5645_v51 }
 0x4aa   :  { %17065 = vst [vmem:[#allocation192_spill] sm:$0xff] %v14467_v16  ;;  %v14478_v49 = vpop.f32.mrf.mxu0 }
 0x4ab   :  { %10361 = vmatmul.msk.f32.vlgmr.msra.gmra.mxu2 %vm159_vm1, %v14207_v21  ;;  %17066 = vst [vmem:[#allocation193_spill] sm:$0xff] %v14469_v24 }
 0x4ac   :  { %10363 = vmatmul.msk.f32.vlgmr.msra.gmra.mxu3 %vm159_vm1, %v14207_v21  ;;  %17067 = vst [vmem:[#allocation194_spill] sm:$0xff] %v14478_v49  ;;  %v14482_v21 = vpop.f32.mrf.mxu2 }
 0x4ad   :  { %17068 = vst [vmem:[#allocation195_spill] sm:$0xff] %v14482_v21 }
 0x4af   :  { %v5639_v25 = vpop.permute.xlu1 %5638 }
 0x4b0   :  { %v5670_v40 = vsel %vm1348_vm6, %v5639_v25, %v5641_v52 }
 0x4b1   :  { %10368 = vmatpush.msk.msrb.mxu2 %vm91_vm0, %v5670_v40  ;;  %v14488_v8 = vpop.f32.mrf.mxu3  ;;  %v14492_v40 = vpop.f32.mrf.mxu1 }
 0x4b2   :  { %17069 = vst [vmem:[#allocation196_spill] sm:$0xff] %v14488_v8 }
 0x4b3   :  { %10369 = vmatmul.msk.f32.vlgmr.msrb.gmra.mxu2 %vm159_vm1, %v14475_v35  ;;  %17070 = vst [vmem:[#allocation197_spill] sm:$0xff] %v14492_v40 }
 0x4b4   :  { %10371 = vmatmul.msk.f32.vlgmr.msrb.gmra.mxu3 %vm159_vm1, %v14475_v35 }
 0x4b7   :  { %v5637_v52 = vpop.permute.xlu1 %5636 }
 0x4b8   :  { %v5668_v57 = vsel %vm1348_vm6, %v5635_v30, %v5637_v52  ;;  %v5669_v43 = vsel %vm1348_vm6, %v5637_v52, %v5639_v25  ;;  %v14500_v30 = vpop.f32.mrf.mxu0  ;;  %v14502_v25 = vpop.f32.mrf.mxu2 }
 0x4b9   :  { %10364 = vmatpush.msk.msrb.mxu0 %vm91_vm0, %v5668_v57  ;;  %10366 = vmatpush.msk.msrb.mxu1 %vm91_vm0, %v5669_v43  ;;  %17071 = vst [vmem:[#allocation198_spill] sm:$0xff] %v14500_v30  ;;  %v14507_v59 = vpop.f32.mrf.mxu3 }
 0x4ba   :  { %10365 = vmatmul.msk.f32.vlgmr.msrb.gmra.mxu0 %vm159_vm1, %v14475_v35  ;;  %10367 = vmatmul.msk.f32.vlgmr.msrb.gmra.mxu1 %vm159_vm1, %v14475_v35  ;;  %17072 = vst [vmem:[#allocation199_spill] sm:$0xff] %v14502_v25 }
 0x4bb   :  { %10372 = vmatpush.msk.msra.mxu0 %vm91_vm0, %v5672_v4  ;;  %17073 = vst [vmem:[#allocation200_spill] sm:$0xff] %v14507_v59  ;;  %v14516_v4 = vpop.f32.mrf.mxu1 }
 0x4be   :  { %v5647_v52 = vpop.permute.xlu0 %5646 }
 0x4bf   :  { %v5649_v57 = vpop.permute.xlu1 %5648  ;;  %v5673_v43 = vsel %vm1348_vm6, %v5645_v51, %v5647_v52 }
 0x4c0   :  { %v5674_v40 = vsel %vm1348_vm6, %v5647_v52, %v5649_v57  ;;  %10374 = vmatpush.msk.msra.mxu1 %vm91_vm0, %v5673_v43  ;;  %v14519_v25 = vpop.f32.mrf.mxu0  ;;  %v14521_v43 = vpop.f32.mrf.mxu2 }
 0x4c1   :  { %10376 = vmatpush.msk.msra.mxu2 %vm91_vm0, %v5674_v40  ;;  %v14526_v40 = vpop.f32.mrf.mxu3 }
 0x4c2   :  { %10373 = vmatmul.msk.f32.vlgmr.msra.gmra.mxu0 %vm159_vm1, %v14475_v35  ;;  %10375 = vmatmul.msk.f32.vlgmr.msra.gmra.mxu1 %vm159_vm1, %v14475_v35 }
 0x4c3   :  { %10377 = vmatmul.msk.f32.vlgmr.msra.gmra.mxu2 %vm159_vm1, %v14475_v35  ;;  %v14528_v59 = vpop.f32.mrf.mxu1 }
 0x4c4   :  { %17074 = vst [vmem:[#allocation201_spill] sm:$0xff] %v14528_v59 }
 0x4c6   :  { %v5651_v51 = vpop.permute.xlu0 %5650 }
 0x4c7   :  { %v5675_v52 = vsel %vm1348_vm6, %v5649_v57, %v5651_v51 }
 0x4c8   :  { %10378 = vmatpush.msk.msra.mxu3 %vm91_vm0, %v5675_v52  ;;  %v14530_v26 = vpop.f32.mrf.mxu0  ;;  %v14532_v18 = vpop.f32.mrf.mxu2 }
 0x4c9   :  { %10379 = vmatmul.msk.f32.vlgmr.msra.gmra.mxu3 %vm159_vm1, %v14475_v35  ;;  %17075 = vst [vmem:[#allocation202_spill] sm:$0xff] %v14532_v18  ;;  %v14534_v17 = vpop.f32.mrf.mxu3 }
 0x4ca   :  { %17076 = vst [vmem:[#allocation203_spill] sm:$0xff] %v14534_v17 }
 0x4cb   :  { %v14536_v57 = vpop.f32.mrf.mxu1 }
 0x4cc   :  { %17077 = vst [vmem:[#allocation204_spill] sm:$0xff] %v14536_v57 }
 0x4cd   :  { %v5657_v57 = vpop.permute.xlu2 %5656 }
 0x4d0   :  { %v14538_v30 = vpop.f32.mrf.mxu0  ;;  %v14540_v32 = vpop.f32.mrf.mxu2 }
 0x4d1   :  { %17078 = vst [vmem:[#allocation205_spill] sm:$0xff] %v14538_v30  ;;  %v14542_v5 = vpop.f32.mrf.mxu3 }
 0x4d2   :  { %17079 = vst [vmem:[#allocation206_spill] sm:$0xff] %v14540_v32 }
 0x4d3   :  { %17080 = vst [vmem:[#allocation207_spill] sm:$0xff] %v14542_v5  ;;  %v14548_v21 = vpop.f32.mrf.mxu1 }
 0x4d4   :  { %17081 = vst [vmem:[#allocation208_spill] sm:$0xff] %v14548_v21 }
 0x4d8   :  { %v14550_v22 = vpop.f32.mrf.mxu0  ;;  %v14552_v24 = vpop.f32.mrf.mxu2 }
 0x4d9   :  { %17082 = vst [vmem:[#allocation209_spill] sm:$0xff] %v14550_v22  ;;  %v14556_v5 = vpop.f32.mrf.mxu3 }
 0x4da   :  { %17083 = vst [vmem:[#allocation210_spill] sm:$0xff] %v14552_v24 }
 0x4db   :  { %17084 = vst [vmem:[#allocation211_spill] sm:$0xff] %v14556_v5 }
 0x4dd   :  { %v5663_v5 = vpop.permute.xlu2 %5662 }
 0x4de   :  { %v5653_v52 = vpop.permute.xlu0 %5652 }
 0x4df   :  { %v5676_v8 = vsel %vm1348_vm6, %v5651_v51, %v5653_v52 }
 0x4e0   :  { %10380 = vmatpush.msk.msrb.mxu0 %vm91_vm0, %v5676_v8  ;;  %v14564_v8 = vpop.f32.mrf.mxu1  ;;  %v14566_v24 = vpop.f32.mrf.mxu0 }
 0x4e1   :  { %10381 = vmatmul.msk.f32.vlgmr.msrb.gmra.mxu0 %vm159_vm1, %v14475_v35 }
 0x4e6   :  { %v5655_v30 = vpop.permute.xlu1 %5654 }
 0x4e7   :  { %v5677_v32 = vsel %vm1348_vm6, %v5653_v52, %v5655_v30  ;;  %v5678_v2 = vsel %vm1348_vm6, %v5655_v30, %v5657_v57  ;;  %v14569_v30 = vpop.f32.mrf.mxu2 }
 0x4e8   :  { %10382 = vmatpush.msk.msrb.mxu1 %vm91_vm0, %v5677_v32  ;;  %10384 = vmatpush.msk.msrb.mxu2 %vm91_vm0, %v5678_v2  ;;  %v14574_v32 = vpop.f32.mrf.mxu3  ;;  %v14576_v2 = vpop.f32.mrf.mxu1 }
 0x4e9   :  { %10383 = vmatmul.msk.f32.vlgmr.msrb.gmra.mxu1 %vm159_vm1, %v14475_v35  ;;  %10385 = vmatmul.msk.f32.vlgmr.msrb.gmra.mxu2 %vm159_vm1, %v14475_v35  ;;  %17085 = vst [vmem:[#allocation212_spill] sm:$0xff] %v14576_v2 }
 0x4ee   :  { %v5659_v51 = vpop.permute.xlu1 %5658 }
 0x4ef   :  { %v5679_v52 = vsel %vm1348_vm6, %v5657_v57, %v5659_v51  ;;  %v14582_v57 = vpop.f32.mrf.mxu0 }
 0x4f0   :  { %10386 = vmatpush.msk.msrb.mxu3 %vm91_vm0, %v5679_v52  ;;  %v14588_v52 = vpop.f32.mrf.mxu2  ;;  %v14590_v2 = vpop.f32.mrf.mxu3 }
 0x4f1   :  { %10387 = vmatmul.msk.f32.vlgmr.msrb.gmra.mxu3 %vm159_vm1, %v14475_v35  ;;  %17086 = vst [vmem:[#allocation213_spill] sm:$0xff] %v14588_v52  ;;  %v14592_v9 = vpop.f32.mrf.mxu1 }
 0x4f2   :  { %17087 = vst [vmem:[#allocation214_spill] sm:$0xff] %v14590_v2 }
 0x4f3   :  { %17088 = vst [vmem:[#allocation215_spill] sm:$0xff] %v14592_v9 }
 0x4f6   :  { %v5661_v21 = vpop.permute.xlu1 %5660 }
 0x4f7   :  { %v5680_v22 = vsel %vm1348_vm6, %v5659_v51, %v5661_v21  ;;  %v5681_v17 = vsel %vm1348_vm6, %v5661_v21, %v5663_v5  ;;  %v14594_v51 = vpop.f32.mrf.mxu0 }
 0x4f8   :  { %10388 = vmatpush.msk.msra.mxu0 %vm91_vm0, %v5680_v22  ;;  %10390 = vmatpush.msk.msra.mxu1 %vm91_vm0, %v5681_v17  ;;  %17089 = vst [vmem:[#allocation216_spill] sm:$0xff] %v14594_v51  ;;  %v14596_v21 = vpop.f32.mrf.mxu2  ;;  %v14598_v22 = vpop.permute.xlu2 %5666 }
 0x4f9   :  { %10389 = vmatmul.msk.f32.vlgmr.msra.gmra.mxu0 %vm159_vm1, %v14475_v35  ;;  %10391 = vmatmul.msk.f32.vlgmr.msra.gmra.mxu1 %vm159_vm1, %v14475_v35  ;;  %17090 = vst [vmem:[#allocation217_spill] sm:$0xff] %v14596_v21  ;;  %v14600_v49 = vpop.f32.mrf.mxu3  ;;  %v14611_v21 = vpop.f32.mrf.mxu1 }
 0x4fa   :  { %17091 = vst [vmem:[#allocation218_spill] sm:$0xff] %v14598_v22 }
 0x4fb   :  { %17092 = vst [vmem:[#allocation219_spill] sm:$0xff] %v14600_v49 }
 0x4fc   :  { %17093 = vst [vmem:[#allocation220_spill] sm:$0xff] %v14611_v21 }
 0x4ff   :  { %v14613_v9 = vpop.f32.mrf.mxu0 }
 0x500   :  { %17094 = vst [vmem:[#allocation221_spill] sm:$0xff] %v14613_v9  ;;  %v14615_v49 = vpop.f32.mrf.mxu2 }
 0x501   :  { %17095 = vst [vmem:[#allocation222_spill] sm:$0xff] %v14615_v49  ;;  %v4654_v51 = vpop.f32.mrf.mxu1 }
 0x505   :  { %v5665_v17 = vpop.permute.xlu0 %5664 }
 0x506   :  { %v5682_v18 = vsel %vm1348_vm6, %v5663_v5, %v5665_v17  ;;  %v5683_v59 = vsel %vm1348_vm6, %v5665_v17, %v14598_v22  ;;  %v14617_v5 = vpop.f32.mrf.mxu3 }
 0x507   :  { %10392 = vmatpush.msk.msra.mxu2 %vm91_vm0, %v5682_v18  ;;  %10394 = vmatpush.msk.msra.mxu3 %vm91_vm0, %v5683_v59  ;;  %17096 = vst [vmem:[#allocation223_spill] sm:$0xff] %v14617_v5  ;;  %v4634_v17 = vpop.f32.mrf.mxu0  ;;  %vm6340_vm0 = vcmask 64512  }
 0x508   :  { %10393 = vmatmul.msk.f32.vlgmr.msra.gmra.mxu2 %vm159_vm1, %v14475_v35  ;;  %10395 = vmatmul.msk.f32.vlgmr.msra.gmra.mxu3 %vm159_vm1, %v14475_v35  ;;  %v14619_v22 = vpop.f32.mrf.mxu2 }
 0x509   :  { %v14623_v59 = vpop.f32.mrf.mxu1 }
 0x50a   :  { %17098 = vst [vmem:[#allocation225_spill] sm:$0xff] %v14623_v59 }
 0x50e   :  { %v14621_v18 = vpop.f32.mrf.mxu3 }
 0x50f   :  { %17097 = vst [vmem:[#allocation224_spill] sm:$0xff] %v14621_v18  ;;  %v14625_v2 = vpop.f32.mrf.mxu0 }
 0x510   :  { %17099 = vst [vmem:[#allocation226_spill] sm:$0xff] %v14625_v2  ;;  %v14627_v52 = vpop.f32.mrf.mxu2 }
 0x511   :  { %17100 = vst [vmem:[#allocation227_spill] sm:$0xff] %v14627_v52  ;;  %v14631_v21 = vpop.f32.mrf.mxu1 }
 0x512   :  { %17102 = vst [vmem:[#allocation229_spill] sm:$0xff] %v14631_v21 }
 0x516   :  { %v14629_v35 = vpop.f32.mrf.mxu3 }
 0x517   :  { %17101 = vst [vmem:[#allocation228_spill] sm:$0xff] %v14629_v35  ;;  %v14633_v9 = vpop.f32.mrf.mxu0 }
 0x518   :  { %17103 = vst [vmem:[#allocation230_spill] sm:$0xff] %v14633_v9  ;;  %v14635_v49 = vpop.f32.mrf.mxu2 }
 0x519   :  { %17104 = vst [vmem:[#allocation231_spill] sm:$0xff] %v14635_v49  ;;  %v14639_v16 = vpop.f32.mrf.mxu1 }
 0x51a   :  { %17106 = vst [vmem:[#allocation233_spill] sm:$0xff] %v14639_v16 }
 0x51e   :  { %v14637_v5 = vpop.f32.mrf.mxu3 }
 0x51f   :  { %17105 = vst [vmem:[#allocation232_spill] sm:$0xff] %v14637_v5  ;;  %v14641_v60 = vpop.f32.mrf.mxu0 }
 0x520   :  { %17107 = vst [vmem:[#allocation234_spill] sm:$0xff] %v14641_v60  ;;  %v14643_v63 = vpop.f32.mrf.mxu2 }
 0x521   :  { %17108 = vst [vmem:[#allocation235_spill] sm:$0xff] %v14643_v63  ;;  %v5205_v18 = vpop.f32.mrf.mxu1 }
 0x526   :  { %v14645_v59 = vpop.f32.mrf.mxu3 }
 0x527   :  { %17109 = vst [vmem:[#allocation236_spill] sm:$0xff] %v14645_v59  ;;  %v5185_v52 = vpop.f32.mrf.mxu0  ;;  %v2056_v59 = vadd.f32 %v14140_v41, %v13928_v0 }
 0x528   :  { %v5225_v2 = vpop.f32.mrf.mxu2 }
 0x529   :  { %v14649_v21 = vpop.f32.mrf.mxu1 }
 0x52a   :  { %17111 = vst [vmem:[#allocation238_spill] sm:$0xff] %v14649_v21  ;;  %v2895_v21 = vadd.f32 %v14290_v19, %v2056_v59 }
 0x52c   :  { %v3448_v0 = vadd.f32 %v14431_v14, %v2895_v21 }
 0x52e   :  { %v14647_v35 = vpop.f32.mrf.mxu3 }
 0x52f   :  { %17110 = vst [vmem:[#allocation237_spill] sm:$0xff] %v14647_v35  ;;  %v14651_v9 = vpop.f32.mrf.mxu0  ;;  %v2076_v35 = vadd.f32 %v14133_v27, %v13924_v56  ;;  %v2136_v56 = vadd.f32 %v14177_v61, %v13973_v44  ;;  %v3835_v27 = vadd.f32 %v14519_v25, %v3448_v0 }
 0x530   :  { %17112 = vst [vmem:[#allocation239_spill] sm:$0xff] %v14651_v9  ;;  %v14653_v49 = vpop.f32.mrf.mxu2 }
 0x531   :  { %17113 = vst [vmem:[#allocation240_spill] sm:$0xff] %v14653_v49  ;;  %v14659_v60 = vpop.f32.mrf.mxu1  ;;  %v2896_v49 = vadd.f32 %v14279_v6, %v2076_v35  ;;  %v2116_v6 = vadd.f32 %v14169_v15, %v13964_v10 }
 0x532   :  { %17115 = vst [vmem:[#allocation242_spill] sm:$0xff] %v14659_v60  ;;  %v2096_v60 = vadd.f32 %v14146_v62, %v13933_v7  ;;  %v4386_v7 = vadd.f32 %v14566_v24, %v3835_v27  ;;  %v17121_v27 = vld [vmem:[#allocation107_spill] sm:$0xff] }
 0x533   :  { %v3449_v41 = vadd.f32 %v14423_v50, %v2896_v49  ;;  %v2899_v49 = vadd.f32 %v14332_v3, %v2136_v56  ;;  %v2898_v21 = vadd.f32 %v14313_v55, %v2116_v6  ;;  %v2176_v3 = vadd.f32 %v14182_v58, %v13979_v36 }
 0x534   :  { %v2897_v35 = vadd.f32 %v14296_v33, %v2096_v60  ;;  %v4937_v44 = vadd.f32 %v4634_v17, %v4386_v7  ;;  %v2156_v33 = vadd.f32 %v14171_v28, %v13971_v11  ;;  %v2216_v55 = vadd.f32 %v14212_v46, %v14020_v23  ;;  %v17124_v7 = vld [vmem:[#allocation201_spill] sm:$0xff] }
 0x535   :  { %v3836_v19 = vadd.f32 %v14516_v4, %v3449_v41  ;;  %v3452_v24 = vadd.f32 %v14459_v1, %v2899_v49  ;;  %v2296_v11 = vadd.f32 %v14246_v29, %v14083_v47  ;;  %v2276_v58 = vadd.f32 %v14224_v53, %v14055_v34  ;;  %v17116_v53 = vld [vmem:[#allocation26_spill] sm:$0xff]  ;;  %v17120_v41 = vld [vmem:[#allocation187_spill] sm:$0xff] }
 0x536   :  { %v14655_v5 = vpop.f32.mrf.mxu3  ;;  %v3450_v50 = vadd.f32 %v14433_v45, %v2897_v35  ;;  %v5488_v15 = vadd.f32 %v5185_v52, %v4937_v44  ;;  %v3451_v45 = vadd.f32 %v14449_v39, %v2898_v21  ;;  %v2900_v39 = vadd.f32 %v14321_v13, %v2156_v33  ;;  %v17125_v49 = vld [vmem:[#allocation202_spill] sm:$0xff]  ;;  %v17130_v33 = vld [vmem:[#allocation203_spill] sm:$0xff] }
 0x537   :  { %17114 = vst [vmem:[#allocation241_spill] sm:$0xff] %v14655_v5  ;;  %v14657_v16 = vpop.f32.mrf.mxu0  ;;  %v4387_v62 = vadd.f32 %v14564_v8, %v3836_v19  ;;  %v3839_v52 = vadd.f32 %v14530_v26, %v3452_v24  ;;  %v2901_v1 = vadd.f32 %v14334_v31, %v2176_v3  ;;  %v2903_v34 = vadd.f32 %v14364_v42, %v2216_v55  ;;  %v17122_v19 = vld [vmem:[#allocation172_spill] sm:$0xff]  ;;  %v17128_v21 = vld [vmem:[#allocation194_spill] sm:$0xff] }
 0x538   :  { %v14663_v63 = vpop.f32.mrf.mxu2  ;;  %v3837_v10 = vadd.f32 %v14521_v43, %v3450_v50  ;;  %v2196_v43 = vadd.f32 %v14195_v20, %v13999_v54  ;;  %v3838_v36 = vadd.f32 %v14526_v40, %v3451_v45  ;;  %v14717_v54 = vpop.permute.xlu0 %6058  ;;  %v2236_v13 = vadd.f32 %v14197_v38, %v17116_v53  ;;  %v17123_v42 = vld [vmem:[#allocation192_spill] sm:$0xff]  ;;  %v17126_v50 = vld [vmem:[#allocation239_spill] sm:$0xff]  ;;  %v17138_v53 = vld [vmem:[#allocation225_spill] sm:$0xff] }
 0x539   :  { %v14673_v5 = vpop.f32.mrf.mxu1  ;;  %v4938_v61 = vadd.f32 %v4654_v51, %v4387_v62  ;;  %v4390_v23 = vadd.f32 %v14582_v57, %v3839_v52  ;;  %v3453_v40 = vadd.f32 %v14454_v37, %v2900_v39  ;;  %v2907_v56 = vadd.f32 %v17120_v41, %v2296_v11  ;;  %v17131_v24 = vld [vmem:[#allocation212_spill] sm:$0xff]  ;;  %v17133_v52 = vld [vmem:[#allocation183_spill] sm:$0xff]  ;;  %v17135_v39 = vld [vmem:[#allocation193_spill] sm:$0xff] }
 0x53a   :  { %v4388_v8 = vadd.f32 %v14569_v30, %v3837_v10  ;;  %v4389_v20 = vadd.f32 %v14574_v32, %v3838_v36  ;;  %v2902_v31 = vadd.f32 %v14350_v48, %v2196_v43  ;;  %v17117_v30 = vld [vmem:[#allocation191_spill] sm:$0xff]  ;;  %v2256_v6 = vadd.f32 %v17122_v19, %v17121_v27  ;;  %v17134_v36 = vld [vmem:[#allocation205_spill] sm:$0xff]  ;;  %v17143_v41 = vld [vmem:[#allocation228_spill] sm:$0xff] }
 0x53b   :  { %v5489_v60 = vadd.f32 %v5205_v18, %v4938_v61  ;;  %v3454_v57 = vadd.f32 %v17117_v30, %v2901_v1  ;;  %v3840_v38 = vadd.f32 %v17124_v7, %v3453_v40  ;;  %v17127_v61 = vld [vmem:[#allocation237_spill] sm:$0xff]  ;;  %v3456_v10 = vadd.f32 %v17128_v21, %v2903_v34 }
 0x53c   :  { %v4939_v28 = vadd.f32 %v14619_v22, %v4388_v8  ;;  %v17118_v22 = vld [vmem:[#allocation226_spill] sm:$0xff]  ;;  %v3455_v35 = vadd.f32 %v17123_v42, %v2902_v31  ;;  %v17132_v8 = vld [vmem:[#allocation213_spill] sm:$0xff]  ;;  %v2905_v11 = vadd.f32 %v17133_v52, %v2256_v6  ;;  %v17139_v31 = vld [vmem:[#allocation227_spill] sm:$0xff] }
 0x53d   :  { %v4941_v32 = vadd.f32 %v17118_v22, %v4390_v23  ;;  %v3841_v37 = vadd.f32 %v17125_v49, %v3454_v57  ;;  %v4391_v45 = vadd.f32 %v17131_v24, %v3840_v38  ;;  %v17136_v23 = vld [vmem:[#allocation214_spill] sm:$0xff]  ;;  %v17140_v57 = vld [vmem:[#allocation195_spill] sm:$0xff] }
 0x53e   :  { %v14668_v12 = vpop.f32.mrf.mxu3  ;;  %v5490_v26 = vadd.f32 %v5225_v2, %v4939_v28  ;;  %v17119_v2 = vld [vmem:[#allocation224_spill] sm:$0xff]  ;;  %v3842_v3 = vadd.f32 %v17130_v33, %v3455_v35  ;;  %v3843_v28 = vadd.f32 %v17134_v36, %v3456_v10  ;;  %v3458_v22 = vadd.f32 %v17140_v57, %v2905_v11  ;;  %v17144_v6 = vld [vmem:[#allocation238_spill] sm:$0xff]  ;;  %v17150_v21 = vld [vmem:[#allocation241_spill] sm:$0xff] }
 0x53f   :  { %v14671_v9 = vpop.f32.mrf.mxu0  ;;  %v4940_v18 = vadd.f32 %v17119_v2, %v4389_v20  ;;  %v5492_v44 = vadd.f32 %v17126_v50, %v4941_v32  ;;  %v17141_v32 = vld [vmem:[#allocation216_spill] sm:$0xff]  ;;  %v17147_v49 = vld [vmem:[#allocation206_spill] sm:$0xff] }
 0x540   :  { %v14683_v59 = vpop.f32.mrf.mxu2  ;;  %v4394_v2 = vadd.f32 %v17141_v32, %v3843_v28  ;;  %v17145_v35 = vld [vmem:[#allocation240_spill] sm:$0xff]  ;;  %v17148_v50 = vld [vmem:[#allocation230_spill] sm:$0xff] }
 0x541   :  { %v5756_v4 = vpop.f32.mrf.mxu1  ;;  %v17154_v28 = vld [vmem:[#allocation24_spill] sm:$0xff] }
 0x542   :  { %v6040_v17 = vadd.f32 %v5756_v4, %v5489_v60 }
 0x544   :  { %v14724_v29 = vadd.f32 %v14717_v54, %v6040_v17 }
 0x546   :  { %v14692_v14 = vpop.f32.mrf.mxu3 }
 0x547   :  { %v5736_v25 = vpop.f32.mrf.mxu0 }
 0x548   :  { %v6039_v51 = vadd.f32 %v5736_v25, %v5488_v15  ;;  %v5776_v46 = vpop.f32.mrf.mxu2  ;;  %v5491_v25 = vadd.f32 %v17127_v61, %v4940_v18  ;;  %v17129_v15 = vld [vmem:[#allocation182_spill] sm:$0xff]  ;;  %v17142_v18 = vld [vmem:[#allocation204_spill] sm:$0xff]  ;;  %v17149_v61 = vld [vmem:[#allocation215_spill] sm:$0xff] }
 0x549   :  { %v6041_v0 = vadd.f32 %v5776_v46, %v5490_v26  ;;  %v2904_v60 = vadd.f32 %v17129_v15, %v2236_v13  ;;  %v4393_v46 = vadd.f32 %v17136_v23, %v3842_v3  ;;  %v5836_v20 = vpop.f32.mrf.mxu1  ;;  %v17137_v26 = vld [vmem:[#allocation184_spill] sm:$0xff]  ;;  %v4942_v13 = vadd.f32 %v17138_v53, %v4391_v45  ;;  %v17151_v3 = vld [vmem:[#allocation207_spill] sm:$0xff]  ;;  %v17152_v45 = vld [vmem:[#allocation217_spill] sm:$0xff] }
 0x54a   :  { %v14721_v47 = vadd.f32 %v14717_v54, %v6039_v51  ;;  %v4392_v51 = vadd.f32 %v17132_v8, %v3841_v37  ;;  %v2906_v34 = vadd.f32 %v17137_v26, %v2276_v58  ;;  %v3845_v37 = vadd.f32 %v17147_v49, %v3458_v22  ;;  %v17156_v23 = vld [vmem:[#allocation198_spill] sm:$0xff]  ;;  %v17157_v26 = vld [vmem:[#allocation219_spill] sm:$0xff]  ;;  %v17160_v22 = vld [vmem:[#allocation209_spill] sm:$0xff] }
 0x54b   :  { %v14750_v43 = vadd.f32 %v14717_v54, %v6041_v0  ;;  %v3457_v1 = vadd.f32 %v17135_v39, %v2904_v60  ;;  %v4944_v27 = vadd.f32 %v17143_v41, %v4393_v46  ;;  %v5493_v42 = vadd.f32 %v17144_v6, %v4942_v13  ;;  %v17155_v39 = vld [vmem:[#allocation174_spill] sm:$0xff] }
 0x54c   :  { %v6077_v4 = vadd.f32 %v14724_v29, %v14721_v47  ;;  %v4943_v40 = vadd.f32 %v17139_v31, %v4392_v51  ;;  %v4396_v8 = vadd.f32 %v17152_v45, %v3845_v37  ;;  %v3460_v46 = vadd.f32 %v17156_v23, %v2907_v56  ;;  %v17159_v31 = vld [vmem:[#allocation242_spill] sm:$0xff] }
 0x54d   :  { %v3844_v0 = vadd.f32 %v17142_v18, %v3457_v1  ;;  %v5495_v10 = vadd.f32 %v17150_v21, %v4944_v27  ;;  %v6044_v60 = vadd.f32 %v5836_v20, %v5493_v42  ;;  %v2316_v1 = vadd.f32 %v17155_v39, %v17154_v28  ;;  %v17162_v6 = vld [vmem:[#allocation170_spill] sm:$0xff] }
 0x54e   :  { %v5796_v62 = vpop.f32.mrf.mxu3  ;;  %v6078_v30 = vadd.f32 %v6077_v4, %v14750_v43  ;;  %v5494_v7 = vadd.f32 %v17145_v35, %v4943_v40  ;;  %v3847_v32 = vadd.f32 %v17160_v22, %v3460_v46  ;;  %v17163_v42 = vld [vmem:[#allocation178_spill] sm:$0xff]  ;;  %v17174_v46 = vld [vmem:[#allocation200_spill] sm:$0xff] }
 0x54f   :  { %v5816_v48 = vpop.f32.mrf.mxu0  ;;  %v6042_v17 = vadd.f32 %v5796_v62, %v5491_v25  ;;  %v17146_v62 = vld [vmem:[#allocation196_spill] sm:$0xff]  ;;  %v4395_v25 = vadd.f32 %v17149_v61, %v3844_v0  ;;  %v2356_v35 = vadd.f32 %v17163_v42, %v17162_v6  ;;  %v17166_v49 = vld [vmem:[#allocation186_spill] sm:$0xff] }
 0x550   :  { %v6043_v55 = vadd.f32 %v5816_v48, %v5492_v44  ;;  %v5856_v19 = vpop.f32.mrf.mxu2  ;;  %v3459_v48 = vadd.f32 %v17146_v62, %v2906_v34  ;;  %v4945_v44 = vadd.f32 %v17148_v50, %v4394_v2  ;;  %v17158_v34 = vld [vmem:[#allocation231_spill] sm:$0xff]  ;;  %v17161_v2 = vld [vmem:[#allocation232_spill] sm:$0xff]  ;;  %v2908_v37 = vadd.f32 %v17166_v49, %v2316_v1  ;;  %v17167_v50 = vld [vmem:[#allocation221_spill] sm:$0xff] }
 0x551   :  { %v14767_v58 = vadd.f32 %v14717_v54, %v6042_v17  ;;  %v6045_v33 = vadd.f32 %v5856_v19, %v5494_v7  ;;  %v17153_v17 = vld [vmem:[#allocation229_spill] sm:$0xff]  ;;  %v4947_v53 = vadd.f32 %v17158_v34, %v4396_v8  ;;  %v17165_v62 = vld [vmem:[#allocation175_spill] sm:$0xff]  ;;  %v17182_v49 = vld [vmem:[#allocation236_spill] sm:$0xff] }
 0x552   :  { %v14770_v38 = vadd.f32 %v14717_v54, %v6043_v55  ;;  %v3846_v24 = vadd.f32 %v17151_v3, %v3459_v48  ;;  %v4946_v55 = vadd.f32 %v17153_v17, %v4395_v25  ;;  %v5496_v52 = vadd.f32 %v14657_v16, %v4945_v44  ;;  %v17164_v7 = vld [vmem:[#allocation153_spill] sm:$0xff]  ;;  %v17171_v17 = vld [vmem:[#allocation188_spill] sm:$0xff]  ;;  %v17173_v1 = vld [vmem:[#allocation199_spill] sm:$0xff] }
 0x553   :  { %v6079_v15 = vadd.f32 %v6078_v30, %v14767_v58  ;;  %v14790_v30 = vadd.f32 %v14717_v54, %v6044_v60  ;;  %v14793_v16 = vadd.f32 %v14717_v54, %v6045_v33  ;;  %v5498_v56 = vadd.f32 %v14663_v63, %v4947_v53  ;;  %v17169_v60 = vld [vmem:[#allocation234_spill] sm:$0xff]  ;;  %v17170_v8 = vld [vmem:[#allocation189_spill] sm:$0xff] }
 0x554   :  { %v4397_v20 = vadd.f32 %v17157_v26, %v3846_v24  ;;  %v5497_v40 = vadd.f32 %v17159_v31, %v4946_v55  ;;  %v2336_v48 = vadd.f32 %v17165_v62, %v17164_v7  ;;  %v4398_v44 = vadd.f32 %v17167_v50, %v3847_v32  ;;  %v17178_v32 = vld [vmem:[#allocation233_spill] sm:$0xff]  ;;  %v17181_v62 = vld [vmem:[#allocation235_spill] sm:$0xff] }
 0x555   :  { %v6080_v11 = vadd.f32 %v6079_v15, %v14770_v38 }
 0x556   :  { %v5876_v4 = vpop.f32.mrf.mxu3  ;;  %v4948_v18 = vadd.f32 %v17161_v2, %v4397_v20  ;;  %v4949_v33 = vadd.f32 %v17169_v60, %v4398_v44  ;;  %v17175_v20 = vld [vmem:[#allocation220_spill] sm:$0xff] }
 0x557   :  { %v6046_v36 = vadd.f32 %v5876_v4, %v5495_v10  ;;  %v6081_v41 = vadd.f32 %v6080_v11, %v14790_v30  ;;  %v17168_v10 = vld [vmem:[#allocation197_spill] sm:$0xff] }
 0x558   :  { %v5499_v25 = vadd.f32 %v14668_v12, %v4948_v18  ;;  %v3461_v15 = vadd.f32 %v17168_v10, %v2908_v37  ;;  %v2909_v12 = vadd.f32 %v17171_v17, %v2336_v48 }
 0x559   :  { %v14800_v27 = vadd.f32 %v14717_v54, %v6046_v36  ;;  %v6082_v63 = vadd.f32 %v6081_v41, %v14793_v16  ;;  %v5500_v36 = vadd.f32 %v14671_v9, %v4949_v33  ;;  %v17177_v9 = vld [vmem:[#allocation211_spill] sm:$0xff] }
 0x55a   :  { %v3462_v23 = vadd.f32 %v17173_v1, %v2909_v12 }
 0x55b   :  { %v6083_v3 = vadd.f32 %v6082_v63, %v14800_v27 }
 0x55e   :  { %v5896_v51 = vpop.f32.mrf.mxu0 }
 0x55f   :  { %v6047_v57 = vadd.f32 %v5896_v51, %v5496_v52  ;;  %v2910_v51 = vadd.f32 %v17170_v8, %v2356_v35  ;;  %v17172_v52 = vld [vmem:[#allocation208_spill] sm:$0xff] }
 0x560   :  { %v3848_v11 = vadd.f32 %v17172_v52, %v3461_v15 }
 0x561   :  { %v14811_v4 = vadd.f32 %v14717_v54, %v6047_v57  ;;  %v3463_v26 = vadd.f32 %v17174_v46, %v2910_v51 }
 0x562   :  { %v4399_v34 = vadd.f32 %v17175_v20, %v3848_v11 }
 0x563   :  { %v6084_v28 = vadd.f32 %v6083_v3, %v14811_v4  ;;  %v3850_v22 = vadd.f32 %v17177_v9, %v3463_v26 }
 0x564   :  { %v4950_v2 = vadd.f32 %v17178_v32, %v4399_v34 }
 0x566   :  { %v5916_v13 = vpop.f32.mrf.mxu1  ;;  %v5501_v42 = vadd.f32 %v14673_v5, %v4950_v2 }
 0x567   :  { %v6048_v19 = vadd.f32 %v5916_v13, %v5497_v40  ;;  %v17176_v40 = vld [vmem:[#allocation210_spill] sm:$0xff] }
 0x568   :  { %v3849_v57 = vadd.f32 %v17176_v40, %v3462_v23 }
 0x569   :  { %v14817_v24 = vadd.f32 %v14717_v54, %v6048_v19  ;;  %v17180_v19 = vld [vmem:[#allocation223_spill] sm:$0xff] }
 0x56a   :  { %v4401_v6 = vadd.f32 %v17180_v19, %v3850_v22 }
 0x56b   :  { %v6085_v53 = vadd.f32 %v6084_v28, %v14817_v24 }
 0x56c   :  { %v5936_v0 = vpop.f32.mrf.mxu2  ;;  %v4952_v37 = vadd.f32 %v17182_v49, %v4401_v6 }
 0x56d   :  { %v6049_v21 = vadd.f32 %v5936_v0, %v5498_v56  ;;  %v17179_v0 = vld [vmem:[#allocation222_spill] sm:$0xff] }
 0x56e   :  { %v4400_v56 = vadd.f32 %v17179_v0, %v3849_v57 }
 0x56f   :  { %v14825_v39 = vadd.f32 %v14717_v54, %v6049_v21 }
 0x570   :  { %v4951_v48 = vadd.f32 %v17181_v62, %v4400_v56 }
 0x571   :  { %v6086_v18 = vadd.f32 %v6085_v53, %v14825_v39 }
 0x572   :  { %v5502_v44 = vadd.f32 %v14683_v59, %v4951_v48 }
 0x574   :  { %v5956_v61 = vpop.f32.mrf.mxu3 }
 0x575   :  { %v6050_v45 = vadd.f32 %v5956_v61, %v5499_v25  ;;  %v5503_v61 = vadd.f32 %v14692_v14, %v4952_v37 }
 0x576   :  { %v5976_v55 = vpop.f32.mrf.mxu0  ;;  %v5996_v41 = vpop.f32.mrf.mxu1 }
 0x577   :  { %v14832_v13 = vadd.f32 %v14717_v54, %v6050_v45  ;;  %v6051_v31 = vadd.f32 %v5976_v55, %v5500_v36  ;;  %v6052_v50 = vadd.f32 %v5996_v41, %v5501_v42 }
 0x579   :  { %v6087_v35 = vadd.f32 %v6086_v18, %v14832_v13  ;;  %v14843_v7 = vadd.f32 %v14717_v54, %v6051_v31  ;;  %v14851_v5 = vadd.f32 %v14717_v54, %v6052_v50 }
 0x57b   :  { %v6088_v25 = vadd.f32 %v6087_v35, %v14843_v7 }
 0x57d   :  { %v6089_v33 = vadd.f32 %v6088_v25, %v14851_v5 }
 0x58b   :  { %v6016_v63 = vpop.f32.mrf.mxu2  ;;  %v6036_v21 = vpop.f32.mrf.mxu3 }
 0x58c   :  { %v6053_v10 = vadd.f32 %v6016_v63, %v5502_v44  ;;  %v6054_v15 = vadd.f32 %v6036_v21, %v5503_v61 }
 0x58e   :  { %v14854_v60 = vadd.f32 %v14717_v54, %v6053_v10  ;;  %v14858_v3 = vadd.f32 %v14717_v54, %v6054_v15 }
 0x590   :  { %v6090_v59 = vadd.f32 %v6089_v33, %v14854_v60 }
 0x592   :  { %v6091_v14 = vadd.f32 %v6090_v59, %v14858_v3 }
 0x594   :  { %6092 = vadd.xlane.f32.xlu1 %v6091_v14 }
 0x607   :  { %v6093_v45 = vpop.xlane.xlu1 %6092 }
 0x608   :  { %v14862_v8 = vmul.f32 0.00048828125, %v6093_v45 }
 0x60a   :  { %v6095_v51 = vsub.f32 %v14721_v47, %v14862_v8  ;;  %v6096_v17 = vsub.f32 %v14724_v29, %v14862_v8  ;;  %v6097_v12 = vsub.f32 %v14750_v43, %v14862_v8  ;;  %v6098_v52 = vsub.f32 %v14767_v58, %v14862_v8 }
 0x60b   :  { %v6099_v11 = vsub.f32 %v14770_v38, %v14862_v8  ;;  %v6100_v1 = vsub.f32 %v14790_v30, %v14862_v8  ;;  %v6101_v26 = vsub.f32 %v14793_v16, %v14862_v8  ;;  %v6102_v53 = vsub.f32 %v14800_v27, %v14862_v8 }
 0x60c   :  { %v6111_v55 = vmul.f32 %v6095_v51, %v6095_v51  ;;  %v6112_v54 = vmul.f32 %v6096_v17, %v6096_v17  ;;  %v6113_v36 = vmul.f32 %v6097_v12, %v6097_v12  ;;  %v6114_v23 = vmul.f32 %v6098_v52, %v6098_v52 }
 0x60d   :  { %v6115_v20 = vmul.f32 %v6099_v11, %v6099_v11  ;;  %v6116_v31 = vmul.f32 %v6100_v1, %v6100_v1  ;;  %v6103_v57 = vsub.f32 %v14811_v4, %v14862_v8  ;;  %v6117_v9 = vmul.f32 %v6101_v26, %v6101_v26  ;;  %v6145_v1 = vld [vmem:[%s16214_s11] sm:$0xff] }
 0x60e   :  { %v6127_v28 = vadd.f32 %v6112_v54, %v6111_v55  ;;  %v6104_v32 = vsub.f32 %v14817_v24, %v14862_v8  ;;  %v6118_v2 = vmul.f32 %v6102_v53, %v6102_v53  ;;  %v6105_v0 = vsub.f32 %v14825_v39, %v14862_v8 }
 0x60f   :  { %v6119_v56 = vmul.f32 %v6103_v57, %v6103_v57  ;;  %v6106_v19 = vsub.f32 %v14832_v13, %v14862_v8  ;;  %v6107_v35 = vsub.f32 %v14843_v7, %v14862_v8  ;;  %v6108_v49 = vsub.f32 %v14851_v5, %v14862_v8 }
 0x610   :  { %v6128_v46 = vadd.f32 %v6127_v28, %v6113_v36  ;;  %v6120_v6 = vmul.f32 %v6104_v32, %v6104_v32  ;;  %v6121_v62 = vmul.f32 %v6105_v0, %v6105_v0  ;;  %v6109_v44 = vsub.f32 %v14854_v60, %v14862_v8 }
 0x611   :  { %v6122_v37 = vmul.f32 %v6106_v19, %v6106_v19  ;;  %v6123_v61 = vmul.f32 %v6107_v35, %v6107_v35  ;;  %v6110_v63 = vsub.f32 %v14858_v3, %v14862_v8  ;;  %v6124_v21 = vmul.f32 %v6108_v49, %v6108_v49  ;;  %v17183_v35 = vld [vmem:[#allocation102_spill] sm:$0xff] }
 0x612   :  { %v6129_v34 = vadd.f32 %v6128_v46, %v6114_v23  ;;  %v6125_v15 = vmul.f32 %v6109_v44, %v6109_v44  ;;  %v17186_v44 = vld [vmem:[#allocation55_spill] sm:$0xff] }
 0x613   :  { %v6126_v59 = vmul.f32 %v6110_v63, %v6110_v63 }
 0x614   :  { %v6130_v40 = vadd.f32 %v6129_v34, %v6115_v20  ;;  %v6179_v20 = vld [vmem:[%s16215_s12] sm:$0xff] }
 0x616   :  { %v6131_v22 = vadd.f32 %v6130_v40, %v6116_v31 }
 0x618   :  { %v6132_v18 = vadd.f32 %v6131_v22, %v6117_v9 }
 0x61a   :  { %v6133_v41 = vadd.f32 %v6132_v18, %v6118_v2 }
 0x61c   :  { %v6134_v42 = vadd.f32 %v6133_v41, %v6119_v56 }
 0x61e   :  { %v6135_v48 = vadd.f32 %v6134_v42, %v6120_v6 }
 0x620   :  { %v6136_v50 = vadd.f32 %v6135_v48, %v6121_v62  ;;  %v17184_v48 = vld [vmem:[#allocation124_spill] sm:$0xff] }
 0x622   :  { %v6137_v25 = vadd.f32 %v6136_v50, %v6122_v37  ;;  %v17185_v37 = vld [vmem:[#allocation101_spill] sm:$0xff] }
 0x624   :  { %v6138_v10 = vadd.f32 %v6137_v25, %v6123_v61  ;;  %v17187_v25 = vld [vmem:[#allocation20_spill] sm:$0xff] }
 0x626   :  { %v6139_v33 = vadd.f32 %v6138_v10, %v6124_v21  ;;  %v17188_v21 = vld [vmem:[#allocation69_spill] sm:$0xff] }
 0x628   :  { %v6140_v14 = vadd.f32 %v6139_v33, %v6125_v15 }
 0x62a   :  { %v6141_v45 = vadd.f32 %v6140_v14, %v6126_v59 }
 0x62c   :  { %6142 = vadd.xlane.f32.xlu2 %v6141_v45 }
 0x69f   :  { %v6143_v51 = vpop.xlane.xlu2 %6142 }
 0x6a0   :  { %v6144_v17 = vmul.f32 0.00048828125, %v6143_v51 }
 0x6a2   :  { %v6146_v12 = vadd.f32 1e-05, %v6144_v17 }
 0x6a4   :  { %10898 = vrsqrt.f32 %v6146_v12  ;;  %vm6153_vm14 = vweird.f32 %v6146_v12 }
 0x6aa   :  { %v10899_v55 = vpop.eup %10898 }
 0x6ab   :  { %v6148_v54 = vmul.f32 %v10899_v55, %v6146_v12  ;;  %vm6154_vm13 = vweird.f32 %v10899_v55 }
 0x6ac   :  { %vm6155_vm15 = vmor %vm6153_vm14, %vm6154_vm13 }
 0x6ad   :  { %v6149_v52 = vmul.f32 %v10899_v55, %v6148_v54 }
 0x6af   :  { %v6150_v11 = vmul.f32 0.5, %v6149_v52 }
 0x6b1   :  { %v6151_v36 = vsub.f32 1.5, %v6150_v11  ;;  %v17189_v11 = vld [vmem:[#allocation15_spill] sm:$0xff] }
 0x6b3   :  { %v6152_v28 = vmul.f32 %v10899_v55, %v6151_v36 }
 0x6b5   :  { %v6156_v23 = vsel %vm6155_vm15, %v10899_v55, %v6152_v28  ;;  %v17190_v28 = vld [vmem:[#allocation46_spill] sm:$0xff] }
 0x6b6   :  { %v6157_v46 = vmul.f32 %v6156_v23, %v6145_v1  ;;  %v17191_v23 = vld [vmem:[#allocation71_spill] sm:$0xff] }
 0x6b8   :  { %6160 = vperm.xlu0 %10564, %v6157_v46   ;;  %v6180_v26 = vmul.f32 %v6157_v46, %v14862_v8 }
 0x6ba   :  { %v6181_v34 = vsub.f32 %v6179_v20, %v6180_v26  ;;  %v17192_v26 = vld [vmem:[#allocation88_spill] sm:$0xff] }
 0x6c0   :  { %6184 = vperm.xlu0 %10564, %v6181_v34   ;;  %v17193_v34 = vld [vmem:[#allocation60_spill] sm:$0xff] }
 0x72a   :  { %v14903_v53 = vpop.permute.xlu0 %6160 }
 0x72b   :  { %v6168_v31 = vmul.f32 %v14903_v53, %v14790_v30  ;;  %v6169_v40 = vmul.f32 %v14903_v53, %v14793_v16  ;;  %v6167_v57 = vmul.f32 %v14903_v53, %v14770_v38  ;;  %v6170_v8 = vmul.f32 %v14903_v53, %v14800_v27 }
 0x72c   :  { %v6164_v22 = vmul.f32 %v14903_v53, %v14724_v29  ;;  %v6165_v32 = vmul.f32 %v14903_v53, %v14750_v43  ;;  %v6175_v30 = vmul.f32 %v14903_v53, %v14843_v7  ;;  %v6178_v16 = vmul.f32 %v14903_v53, %v14858_v3 }
 0x72d   :  { %v6163_v15 = vmul.f32 %v14903_v53, %v14721_v47  ;;  %v6166_v33 = vmul.f32 %v14903_v53, %v14767_v58  ;;  %v6172_v54 = vmul.f32 %v14903_v53, %v14817_v24  ;;  %v6173_v52 = vmul.f32 %v14903_v53, %v14825_v39 }
 0x732   :  { %v14913_v9 = vpop.permute.xlu0 %6184 }
 0x733   :  { %v6192_v2 = vadd.f32 %v14913_v9, %v6168_v31  ;;  %v6193_v38 = vadd.f32 %v14913_v9, %v6169_v40  ;;  %v6191_v27 = vadd.f32 %v14913_v9, %v6167_v57  ;;  %v6194_v18 = vadd.f32 %v14913_v9, %v6170_v8  ;;  %v17194_v40 = vld [vmem:[#allocation84_spill] sm:$0xff] }
 0x734   :  { %v6188_v0 = vadd.f32 %v14913_v9, %v6164_v22  ;;  %v6189_v29 = vadd.f32 %v14913_v9, %v6165_v32  ;;  %v6199_v43 = vadd.f32 %v14913_v9, %v6175_v30  ;;  %v6202_v56 = vadd.f32 %v14913_v9, %v6178_v16 }
 0x735   :  { %v14931_v7 = vmax.f32 %v6192_v2, 0.0  ;;  %v14933_v41 = vmax.f32 %v6193_v38, 0.0  ;;  %v14935_v3 = vmax.f32 %v6191_v27, 0.0  ;;  %v14937_v19 = vmax.f32 %v6194_v18, 0.0 }
 0x736   :  { %v14939_v6 = vmax.f32 %v6188_v0, 0.0  ;;  %v14941_v42 = vmax.f32 %v6189_v29, 0.0  ;;  %v14959_v45 = vmax.f32 %v6199_v43, 0.0  ;;  %v14961_v51 = vmax.f32 %v6202_v56, 0.0  ;;  %v17195_v0 = vld [vmem:[#allocation99_spill] sm:$0xff]  ;;  %v17196_v43 = vld [vmem:[#allocation38_spill] sm:$0xff] }
 0x737   :  { %v6249_v62 = vmul.f32 %v14931_v7, %v17183_v35  ;;  %v6250_v49 = vmul.f32 %v14933_v41, %v17184_v48  ;;  %v6248_v50 = vmul.f32 %v14935_v3, %v17185_v37  ;;  %v6251_v61 = vmul.f32 %v14937_v19, %v17186_v44  ;;  %v17197_v56 = vld [vmem:[#allocation90_spill] sm:$0xff] }
 0x738   :  { %v6245_v63 = vmul.f32 %v14939_v6, %v17187_v25  ;;  %v6246_v10 = vmul.f32 %v14941_v42, %v17188_v21  ;;  %v6187_v12 = vadd.f32 %v14913_v9, %v6163_v15  ;;  %v6190_v55 = vadd.f32 %v14913_v9, %v6166_v33 }
 0x739   :  { %v10575_v59 = vpack.i.bf16 %v6250_v49, %v6249_v62  ;;  %v10580_v14 = vpack.i.bf16 %v6248_v50, %v6251_v61  ;;  %v6256_v36 = vmul.f32 %v14959_v45, %v17189_v11  ;;  %v6259_v1 = vmul.f32 %v14961_v51, %v17190_v28  ;;  %v17198_v62 = vld [vmem:[#allocation129_spill] sm:$0xff]  ;;  %v17199_v49 = vld [vmem:[#allocation23_spill] sm:$0xff]  ;;  %v17200_v50 = vld [vmem:[#allocation42_spill] sm:$0xff] }
 0x73a   :  { %v10565_v17 = vpack.i.bf16 %v6246_v10, %v6245_v63  ;;  %v14968_v47 = vmax.f32 %v6187_v12, 0.0  ;;  %v14970_v58 = vmax.f32 %v6190_v55, 0.0  ;;  %v6229_v46 = vmul.f32 %v14939_v6, %v17191_v23  ;;  %v17203_v12 = vld [vmem:[#allocation61_spill] sm:$0xff]  ;;  %v17205_v11 = vld [vmem:[#allocation14_spill] sm:$0xff] }
 0x73b   :  { %10576 = vrot.lane.b32.xlu2 %v10575_v59, %s11127_s28  ;;  %10581 = vrot.lane.b32.xlu1 %v10580_v14, %s11127_s28  ;;  %v6230_v20 = vmul.f32 %v14941_v42, %v17192_v26  ;;  %v6196_v39 = vadd.f32 %v14913_v9, %v6172_v54  ;;  %v6197_v57 = vadd.f32 %v14913_v9, %v6173_v52  ;;  %v17202_v14 = vld [vmem:[#allocation132_spill] sm:$0xff]  ;;  %v17204_v54 = vld [vmem:[#allocation51_spill] sm:$0xff]  ;;  %v17206_v28 = vld [vmem:[#allocation130_spill] sm:$0xff] }
 0x73c   :  { %10566 = vrot.lane.b32.xlu0 %v10565_v17, %s11127_s28  ;;  %v6244_v31 = vmul.f32 %v14968_v47, %v17193_v34  ;;  %v6247_v24 = vmul.f32 %v14970_v58, %v17194_v40  ;;  %v10600_v8 = vpack.i.bf16 %v6256_v36, %v6259_v1  ;;  %v6171_v2 = vmul.f32 %v14903_v53, %v14811_v4 }
 0x73d   :  { %v10605_v22 = vpack.i.bf16 %v6230_v20, %v6229_v46  ;;  %v14990_v30 = vmax.f32 %v6196_v39, 0.0  ;;  %v14992_v16 = vmax.f32 %v6197_v57, 0.0  ;;  %v6174_v38 = vmul.f32 %v14903_v53, %v14832_v13  ;;  %v17207_v20 = vld [vmem:[#allocation8_spill] sm:$0xff]  ;;  %v17210_v57 = vld [vmem:[#allocation83_spill] sm:$0xff] }
 0x73e   :  { %v10570_v32 = vpack.i.bf16 %v6244_v31, %v6247_v24  ;;  %v6176_v27 = vmul.f32 %v14903_v53, %v14851_v5  ;;  %v6177_v18 = vmul.f32 %v14903_v53, %v14854_v60  ;;  %v6233_v29 = vmul.f32 %v14931_v7, %v17195_v0  ;;  %v17208_v31 = vld [vmem:[#allocation93_spill] sm:$0xff]  ;;  %v17209_v24 = vld [vmem:[#allocation67_spill] sm:$0xff] }
 0x73f   :  { %v6234_v4 = vmul.f32 %v14933_v41, %v17196_v43  ;;  %v6232_v35 = vmul.f32 %v14935_v3, %v17197_v56  ;;  %v6235_v13 = vmul.f32 %v14937_v19, %v17198_v62  ;;  %v6195_v48 = vadd.f32 %v14913_v9, %v6171_v2  ;;  %v17212_v2 = vld [vmem:[#allocation10_spill] sm:$0xff] }
 0x740   :  { %v6198_v5 = vadd.f32 %v14913_v9, %v6174_v38  ;;  %v6200_v60 = vadd.f32 %v14913_v9, %v6176_v27  ;;  %v6201_v53 = vadd.f32 %v14913_v9, %v6177_v18  ;;  %v6253_v37 = vmul.f32 %v14990_v30, %v17199_v49  ;;  %v17201_v9 = vld [vmem:[#allocation145_spill] sm:$0xff] }
 0x741   :  { %v6254_v44 = vmul.f32 %v14992_v16, %v17200_v50  ;;  %v10615_v61 = vpack.i.bf16 %v6234_v4, %v6233_v29  ;;  %v10620_v25 = vpack.i.bf16 %v6232_v35, %v6235_v13  ;;  %v15021_v63 = vmax.f32 %v6195_v48, 0.0  ;;  %v17213_v29 = vld [vmem:[#allocation95_spill] sm:$0xff]  ;;  %v17214_v4 = vld [vmem:[#allocation133_spill] sm:$0xff]  ;;  %v17215_v35 = vld [vmem:[#allocation120_spill] sm:$0xff] }
 0x742   :  { %v15023_v21 = vmax.f32 %v6198_v5, 0.0  ;;  %v15025_v10 = vmax.f32 %v6200_v60, 0.0  ;;  %v15027_v15 = vmax.f32 %v6201_v53, 0.0  ;;  %v7068_v34 = vmul.f32 %v14939_v6, %v17207_v20  ;;  %v17216_v13 = vld [vmem:[#allocation149_spill] sm:$0xff]  ;;  %v17217_v5 = vld [vmem:[#allocation62_spill] sm:$0xff] }
 0x743   :  { %10601 = vrot.lane.b32.xlu2 %v10600_v8, %s11127_s28  ;;  %10606 = vrot.lane.b32.xlu1 %v10605_v22, %s11125_s26  ;;  %v10585_v33 = vpack.i.bf16 %v6254_v44, %v6253_v37  ;;  %v6236_v59 = vmul.f32 %v15021_v63, %v17201_v9  ;;  %v6252_v36 = vmul.f32 %v15021_v63, %v17205_v11  ;;  %v17211_v22 = vld [vmem:[#allocation19_spill] sm:$0xff]  ;;  %v17218_v53 = vld [vmem:[#allocation77_spill] sm:$0xff] }
 0x744   :  { %10571 = vrot.lane.b32.xlu0 %v10570_v32, %s11127_s28  ;;  %v6239_v17 = vmul.f32 %v15023_v21, %v17202_v14  ;;  %v6241_v55 = vmul.f32 %v15025_v10, %v17203_v12  ;;  %v6242_v52 = vmul.f32 %v15027_v15, %v17204_v54  ;;  %v6255_v1 = vmul.f32 %v15023_v21, %v17206_v28 }
 0x745   :  { %v7069_v40 = vmul.f32 %v14941_v42, %v17208_v31  ;;  %v7067_v39 = vmul.f32 %v14968_v47, %v17209_v24  ;;  %v7070_v8 = vmul.f32 %v14970_v58, %v17210_v57  ;;  %v6257_v32 = vmul.f32 %v15025_v10, %v17211_v22 }
 0x746   :  { %v10630_v23 = vpack.i.bf16 %v6236_v59, %v6239_v17  ;;  %v10635_v46 = vpack.i.bf16 %v6242_v52, %v6241_v55  ;;  %v10590_v26 = vpack.i.bf16 %v6252_v36, %v6255_v1  ;;  %v6258_v38 = vmul.f32 %v15027_v15, %v17212_v2  ;;  %v17221_v59 = vld [vmem:[#allocation144_spill] sm:$0xff]  ;;  %v17223_v55 = vld [vmem:[#allocation115_spill] sm:$0xff]  ;;  %v17224_v52 = vld [vmem:[#allocation146_spill] sm:$0xff] }
 0x747   :  { %v10645_v27 = vpack.i.bf16 %v7069_v40, %v7068_v34  ;;  %v10650_v18 = vpack.i.bf16 %v7067_v39, %v7070_v8  ;;  %v7071_v43 = vmul.f32 %v14935_v3, %v17213_v29  ;;  %v7074_v56 = vmul.f32 %v14937_v19, %v17214_v4  ;;  %v17222_v17 = vld [vmem:[#allocation56_spill] sm:$0xff]  ;;  %v17227_v34 = vld [vmem:[#allocation110_spill] sm:$0xff]  ;;  %v17228_v40 = vld [vmem:[#allocation121_spill] sm:$0xff] }
 0x748   :  { %v10595_v0 = vpack.i.bf16 %v6258_v38, %v6257_v32  ;;  %v7076_v62 = vmul.f32 %v14990_v30, %v17215_v35  ;;  %v7077_v48 = vmul.f32 %v14992_v16, %v17216_v13  ;;  %v6228_v60 = vmul.f32 %v14968_v47, %v17217_v5  ;;  %v17229_v39 = vld [vmem:[#allocation78_spill] sm:$0xff]  ;;  %v17230_v8 = vld [vmem:[#allocation12_spill] sm:$0xff] }
 0x749   :  { %v6231_v49 = vmul.f32 %v14970_v58, %v17218_v53  ;;  %v10660_v37 = vpack.i.bf16 %v7071_v43, %v7074_v56  ;;  %v7079_v14 = vmul.f32 %v14959_v45, %v17221_v59  ;;  %v7082_v12 = vmul.f32 %v14961_v51, %v17222_v17  ;;  %v17233_v43 = vld [vmem:[#allocation135_spill] sm:$0xff] }
 0x74a   :  { %v10665_v50 = vpack.i.bf16 %v7077_v48, %v7076_v62  ;;  %v6237_v54 = vmul.f32 %v14990_v30, %v17223_v55  ;;  %v6238_v11 = vmul.f32 %v14992_v16, %v17224_v52  ;;  %v7507_v31 = vmul.f32 %v14931_v7, %v17227_v34  ;;  %v17234_v56 = vld [vmem:[#allocation43_spill] sm:$0xff]  ;;  %v17235_v62 = vld [vmem:[#allocation105_spill] sm:$0xff] }
 0x74b   :  { %10616 = vrot.lane.b32.xlu2 %v10615_v61, %s11125_s26  ;;  %10621 = vrot.lane.b32.xlu1 %v10620_v25, %s11125_s26  ;;  %v10610_v44 = vpack.i.bf16 %v6228_v60, %v6231_v49  ;;  %v17219_v61 = vld [vmem:[#allocation54_spill] sm:$0xff]  ;;  %v10680_v28 = vpack.i.bf16 %v7079_v14, %v7082_v12  ;;  %v7508_v24 = vmul.f32 %v14933_v41, %v17228_v40  ;;  %v17236_v48 = vld [vmem:[#allocation57_spill] sm:$0xff]  ;;  %v17241_v14 = vld [vmem:[#allocation147_spill] sm:$0xff] }
 0x74c   :  { %10586 = vrot.lane.b32.xlu0 %v10585_v33, %s11127_s28  ;;  %v7080_v25 = vmul.f32 %v15025_v10, %v17219_v61  ;;  %v17220_v33 = vld [vmem:[#allocation53_spill] sm:$0xff]  ;;  %v10625_v1 = vpack.i.bf16 %v6238_v11, %v6237_v54  ;;  %v6240_v57 = vmul.f32 %v14959_v45, %v17229_v39  ;;  %v6243_v22 = vmul.f32 %v14961_v51, %v17230_v8 }
 0x74d   :  { %v7081_v9 = vmul.f32 %v15027_v15, %v17220_v33  ;;  %v10695_v2 = vpack.i.bf16 %v7508_v24, %v7507_v31  ;;  %v7510_v4 = vmul.f32 %v15021_v63, %v17233_v43  ;;  %v7513_v35 = vmul.f32 %v15023_v21, %v17234_v56  ;;  %v17242_v12 = vld [vmem:[#allocation141_spill] sm:$0xff]  ;;  %v17247_v31 = vld [vmem:[#allocation79_spill] sm:$0xff] }
 0x74e   :  { %v10640_v38 = vpack.i.bf16 %v6240_v57, %v6243_v22  ;;  %v7072_v13 = vmul.f32 %v14931_v7, %v17235_v62  ;;  %v7073_v5 = vmul.f32 %v14933_v41, %v17236_v48  ;;  %v7075_v17 = vmul.f32 %v15021_v63, %v17241_v14  ;;  %v17248_v24 = vld [vmem:[#allocation73_spill] sm:$0xff] }
 0x74f   :  { %v10675_v36 = vpack.i.bf16 %v7081_v9, %v7080_v25  ;;  %v10710_v53 = vpack.i.bf16 %v7510_v4, %v7513_v35  ;;  %v17239_v25 = vld [vmem:[#allocation76_spill] sm:$0xff]  ;;  %v17240_v9 = vld [vmem:[#allocation97_spill] sm:$0xff]  ;;  %v7078_v55 = vmul.f32 %v15023_v21, %v17242_v12  ;;  %v7503_v40 = vmul.f32 %v14939_v6, %v17247_v31  ;;  %v17253_v4 = vld [vmem:[#allocation94_spill] sm:$0xff] }
 0x750   :  { %v10655_v49 = vpack.i.bf16 %v7073_v5, %v7072_v13  ;;  %v8278_v33 = vmul.f32 %v14941_v42, %v17239_v25  ;;  %v8279_v59 = vmul.f32 %v14970_v58, %v17240_v9  ;;  %v7504_v39 = vmul.f32 %v14941_v42, %v17248_v24  ;;  %v17254_v35 = vld [vmem:[#allocation48_spill] sm:$0xff] }
 0x751   :  { %v10670_v11 = vpack.i.bf16 %v7075_v17, %v7078_v55  ;;  %v7506_v56 = vmul.f32 %v14935_v3, %v17253_v4  ;;  %v7509_v62 = vmul.f32 %v14937_v19, %v17254_v35 }
 0x752   :  { %v10725_v52 = vpack.i.bf16 %v8279_v59, %v8278_v33  ;;  %v10685_v22 = vpack.i.bf16 %v7504_v39, %v7503_v40  ;;  %v17259_v33 = vld [vmem:[#allocation148_spill] sm:$0xff]  ;;  %v17260_v59 = vld [vmem:[#allocation29_spill] sm:$0xff] }
 0x753   :  { %10631 = vrot.lane.b32.xlu2 %v10630_v23, %s11125_s26  ;;  %10636 = vrot.lane.b32.xlu1 %v10635_v46, %s11125_s26  ;;  %v17225_v23 = vld [vmem:[#allocation72_spill] sm:$0xff]  ;;  %v10700_v5 = vpack.i.bf16 %v7506_v56, %v7509_v62  ;;  %v7515_v9 = vmul.f32 %v15025_v10, %v17259_v33  ;;  %v7516_v14 = vmul.f32 %v15027_v15, %v17260_v59 }
 0x754   :  { %10591 = vrot.lane.b32.xlu0 %v10590_v26, %s11127_s28  ;;  %v7502_v46 = vmul.f32 %v14968_v47, %v17225_v23  ;;  %v17226_v26 = vld [vmem:[#allocation89_spill] sm:$0xff] }
 0x755   :  { %v7505_v20 = vmul.f32 %v14970_v58, %v17226_v26  ;;  %v10715_v55 = vpack.i.bf16 %v7516_v14, %v7515_v9  ;;  %v17277_v9 = vld [vmem:[#allocation152_spill] sm:$0xff]  ;;  %v17278_v14 = vld [vmem:[#allocation167_spill] sm:$0xff] }
 0x756   :  { %v8289_v59 = vmul.f32 %v15025_v10, %v17277_v9 }
 0x757   :  { %v10690_v32 = vpack.i.bf16 %v7502_v46, %v7505_v20  ;;  %v17245_v46 = vld [vmem:[#allocation140_spill] sm:$0xff]  ;;  %v17246_v20 = vld [vmem:[#allocation34_spill] sm:$0xff] }
 0x758   :  { %v8283_v26 = vmul.f32 %v14937_v19, %v17245_v46  ;;  %v8284_v34 = vmul.f32 %v15021_v63, %v17246_v20 }
 0x75a   :  { %v10740_v8 = vpack.i.bf16 %v8284_v34, %v8283_v26  ;;  %v17265_v26 = vld [vmem:[#allocation68_spill] sm:$0xff] }
 0x75b   :  { %10646 = vrot.lane.b32.xlu2 %v10645_v27, %s11128_s29  ;;  %10651 = vrot.lane.b32.xlu1 %v10650_v18, %s11128_s29  ;;  %v17231_v27 = vld [vmem:[#allocation16_spill] sm:$0xff]  ;;  %v8276_v20 = vmul.f32 %v14968_v47, %v17265_v26  ;;  %v17279_v26 = vld [vmem:[#allocation50_spill] sm:$0xff] }
 0x75c   :  { %10596 = vrot.lane.b32.xlu0 %v10595_v0, %s11127_s28  ;;  %v7511_v18 = vmul.f32 %v14990_v30, %v17231_v27  ;;  %v17232_v0 = vld [vmem:[#allocation127_spill] sm:$0xff]  ;;  %v17266_v34 = vld [vmem:[#allocation96_spill] sm:$0xff] }
 0x75d   :  { %v7512_v29 = vmul.f32 %v14992_v16, %v17232_v0  ;;  %v8280_v31 = vmul.f32 %v14935_v3, %v17266_v34 }
 0x75f   :  { %v10705_v60 = vpack.i.bf16 %v7512_v29, %v7511_v18  ;;  %v17251_v18 = vld [vmem:[#allocation31_spill] sm:$0xff]  ;;  %v10730_v39 = vpack.i.bf16 %v8276_v20, %v8280_v31  ;;  %v9151_v20 = vmul.f32 %v14931_v7, %v17279_v26 }
 0x760   :  { %v8285_v0 = vmul.f32 %v14990_v30, %v17251_v18  ;;  %v17252_v29 = vld [vmem:[#allocation39_spill] sm:$0xff] }
 0x761   :  { %v8290_v43 = vmul.f32 %v15027_v15, %v17252_v29 }
 0x763   :  { %10661 = vrot.lane.b32.xlu2 %v10660_v37, %s11128_s29  ;;  %10666 = vrot.lane.b32.xlu1 %v10665_v50, %s11128_s29  ;;  %v17237_v37 = vld [vmem:[#allocation40_spill] sm:$0xff]  ;;  %v10755_v48 = vpack.i.bf16 %v8290_v43, %v8285_v0  ;;  %v17271_v0 = vld [vmem:[#allocation114_spill] sm:$0xff] }
 0x764   :  { %10611 = vrot.lane.b32.xlu0 %v10610_v44, %s11125_s26  ;;  %v7514_v50 = vmul.f32 %v14959_v45, %v17237_v37  ;;  %v17238_v44 = vld [vmem:[#allocation59_spill] sm:$0xff]  ;;  %v8281_v29 = vmul.f32 %v14931_v7, %v17271_v0  ;;  %v17272_v43 = vld [vmem:[#allocation44_spill] sm:$0xff] }
 0x765   :  { %v7517_v61 = vmul.f32 %v14961_v51, %v17238_v44  ;;  %v8286_v4 = vmul.f32 %v14992_v16, %v17272_v43 }
 0x767   :  { %v10720_v54 = vpack.i.bf16 %v7514_v50, %v7517_v61  ;;  %v17257_v50 = vld [vmem:[#allocation106_spill] sm:$0xff]  ;;  %v17258_v61 = vld [vmem:[#allocation155_spill] sm:$0xff]  ;;  %v10745_v62 = vpack.i.bf16 %v8286_v4, %v8281_v29 }
 0x768   :  { %v8711_v44 = vmul.f32 %v14968_v47, %v17257_v50  ;;  %v8715_v25 = vmul.f32 %v14935_v3, %v17258_v61  ;;  %v17276_v50 = vld [vmem:[#allocation131_spill] sm:$0xff] }
 0x769   :  { %v17285_v29 = vld [vmem:[#allocation47_spill] sm:$0xff] }
 0x76a   :  { %v10770_v12 = vpack.i.bf16 %v8711_v44, %v8715_v25  ;;  %v9152_v44 = vmul.f32 %v14933_v41, %v17276_v50  ;;  %v17286_v50 = vld [vmem:[#allocation139_spill] sm:$0xff] }
 0x76b   :  { %10676 = vrot.lane.b32.xlu2 %v10675_v36, %s11128_s29  ;;  %10681 = vrot.lane.b32.xlu1 %v10680_v28, %s11128_s29  ;;  %v17243_v36 = vld [vmem:[#allocation82_spill] sm:$0xff] }
 0x76c   :  { %10626 = vrot.lane.b32.xlu0 %v10625_v1, %s11125_s26  ;;  %v8277_v28 = vmul.f32 %v14939_v6, %v17243_v36  ;;  %v17244_v1 = vld [vmem:[#allocation128_spill] sm:$0xff] }
 0x76d   :  { %v8282_v23 = vmul.f32 %v14933_v41, %v17244_v1 }
 0x76f   :  { %v10735_v57 = vpack.i.bf16 %v8282_v23, %v8277_v28  ;;  %v17263_v28 = vld [vmem:[#allocation161_spill] sm:$0xff] }
 0x770   :  { %v8716_v1 = vmul.f32 %v14931_v7, %v17263_v28  ;;  %v17264_v23 = vld [vmem:[#allocation117_spill] sm:$0xff] }
 0x771   :  { %v8721_v46 = vmul.f32 %v14992_v16, %v17264_v23 }
 0x773   :  { %10691 = vrot.lane.b32.xlu2 %v10690_v32, %s11130_s9  ;;  %10696 = vrot.lane.b32.xlu1 %v10695_v2, %s11130_s9  ;;  %v17249_v32 = vld [vmem:[#allocation11_spill] sm:$0xff]  ;;  %v10785_v24 = vpack.i.bf16 %v8721_v46, %v8716_v1  ;;  %v15229_v1 = vld [vmem:[%s16208_s5 + $0x8] sm:$0xff] }
 0x774   :  { %10641 = vrot.lane.b32.xlu0 %v10640_v38, %s11125_s26  ;;  %v8287_v2 = vmul.f32 %v15023_v21, %v17249_v32  ;;  %v17250_v38 = vld [vmem:[#allocation30_spill] sm:$0xff] }
 0x775   :  { %v8288_v27 = vmul.f32 %v14959_v45, %v17250_v38 }
 0x777   :  { %v10750_v13 = vpack.i.bf16 %v8288_v27, %v8287_v2  ;;  %v17269_v2 = vld [vmem:[#allocation122_spill] sm:$0xff]  ;;  %v17270_v27 = vld [vmem:[#allocation109_spill] sm:$0xff] }
 0x778   :  { %v8724_v38 = vmul.f32 %v15025_v10, %v17269_v2  ;;  %v8726_v18 = vmul.f32 %v14961_v51, %v17270_v27  ;;  %v17283_v2 = vld [vmem:[#allocation156_spill] sm:$0xff]  ;;  %v17284_v27 = vld [vmem:[#allocation158_spill] sm:$0xff] }
 0x77a   :  { %v10800_v35 = vpack.i.bf16 %v8724_v38, %v8726_v18  ;;  %v8712_v38 = vmul.f32 %v14939_v6, %v17283_v2  ;;  %v8717_v18 = vmul.f32 %v14933_v41, %v17284_v27 }
 0x77b   :  { %10706 = vrot.lane.b32.xlu2 %v10705_v60, %s11130_s9  ;;  %10711 = vrot.lane.b32.xlu1 %v10710_v53, %s11130_s9  ;;  %v17255_v60 = vld [vmem:[#allocation22_spill] sm:$0xff] }
 0x77c   :  { %10656 = vrot.lane.b32.xlu0 %v10655_v49, %s11128_s29  ;;  %v8713_v53 = vmul.f32 %v14941_v42, %v17255_v60  ;;  %v17256_v49 = vld [vmem:[#allocation154_spill] sm:$0xff]  ;;  %v17274_v60 = vld [vmem:[#allocation13_spill] sm:$0xff] }
 0x77d   :  { %v8714_v37 = vmul.f32 %v14970_v58, %v17256_v49  ;;  %v17275_v49 = vld [vmem:[#allocation166_spill] sm:$0xff] }
 0x77f   :  { %v10765_v17 = vpack.i.bf16 %v8714_v37, %v8713_v53  ;;  %v9150_v53 = vmul.f32 %v14935_v3, %v17274_v60  ;;  %v9147_v37 = vmul.f32 %v14939_v6, %v17275_v49  ;;  %v10775_v60 = vpack.i.bf16 %v8717_v18, %v8712_v38  ;;  %v17296_v38 = vld [vmem:[#allocation164_spill] sm:$0xff] }
 0x780   :  { %v9148_v27 = vmul.f32 %v14941_v42, %v17296_v38 }
 0x783   :  { %10721 = vrot.lane.b32.xlu2 %v10720_v54, %s11130_s9  ;;  %10726 = vrot.lane.b32.xlu1 %v10725_v52, %s11126_s27  ;;  %v17261_v54 = vld [vmem:[#allocation160_spill] sm:$0xff] }
 0x784   :  { %10671 = vrot.lane.b32.xlu0 %v10670_v11, %s11128_s29  ;;  %v8718_v52 = vmul.f32 %v14937_v19, %v17261_v54  ;;  %v17262_v11 = vld [vmem:[#allocation100_spill] sm:$0xff] }
 0x785   :  { %v8719_v36 = vmul.f32 %v15021_v63, %v17262_v11 }
 0x787   :  { %v10780_v40 = vpack.i.bf16 %v8719_v36, %v8718_v52  ;;  %v10815_v36 = vpack.i.bf16 %v9152_v44, %v9147_v37  ;;  %v9159_v44 = vmul.f32 %v15025_v10, %v17286_v50  ;;  %v17300_v50 = vld [vmem:[#allocation173_spill] sm:$0xff] }
 0x78b   :  { %10736 = vrot.lane.b32.xlu2 %v10735_v57, %s11126_s27  ;;  %10741 = vrot.lane.b32.xlu1 %v10740_v8, %s11126_s27  ;;  %v17267_v57 = vld [vmem:[#allocation163_spill] sm:$0xff] }
 0x78c   :  { %10686 = vrot.lane.b32.xlu0 %v10685_v22, %s11130_s9  ;;  %v8720_v8 = vmul.f32 %v14990_v30, %v17267_v57  ;;  %v17268_v22 = vld [vmem:[#allocation136_spill] sm:$0xff] }
 0x78d   :  { %v8725_v32 = vmul.f32 %v15027_v15, %v17268_v22  ;;  %v17282_v22 = vld [vmem:[#allocation98_spill] sm:$0xff] }
 0x78f   :  { %v10795_v56 = vpack.i.bf16 %v8725_v32, %v8720_v8  ;;  %v9158_v32 = vmul.f32 %v14959_v45, %v17282_v22 }
 0x793   :  { %10751 = vrot.lane.b32.xlu2 %v10750_v13, %s11126_s27  ;;  %10756 = vrot.lane.b32.xlu1 %v10755_v48, %s11126_s27  ;;  %v17273_v48 = vld [vmem:[#allocation123_spill] sm:$0xff] }
 0x794   :  { %10701 = vrot.lane.b32.xlu0 %v10700_v5, %s11130_s9  ;;  %v9146_v5 = vmul.f32 %v14968_v47, %v17273_v48 }
 0x795   :  { %v10577_v13 = vpop.permute.xlu2 %10576 }
 0x796   :  { %v10579_v61 = vunpack.i.h.bf16 %v10577_v13  ;;  %v10578_v25 = vunpack.i.l.bf16 %v10577_v13  ;;  %v10810_v52 = vpack.i.bf16 %v9146_v5, %v9150_v53 }
 0x798   :  { %v6314_v11 = vsel %vm1563_vm10, %v10578_v25, %v10579_v61 }
 0x79b   :  { %10766 = vrot.lane.b32.xlu2 %v10765_v17, %s11124_s25  ;;  %10771 = vrot.lane.b32.xlu1 %v10770_v12, %s11124_s25  ;;  %v8291_v17 = vmul.f32 %v14961_v51, %v17278_v14  ;;  %v17289_v14 = vld [vmem:[#allocation111_spill] sm:$0xff] }
 0x79c   :  { %10716 = vrot.lane.b32.xlu0 %v10715_v55, %s11130_s9 }
 0x79d   :  { %v10760_v28 = vpack.i.bf16 %v8289_v59, %v8291_v17  ;;  %v9584_v17 = vmul.f32 %v14970_v58, %v17289_v14  ;;  %v17302_v14 = vld [vmem:[#allocation37_spill] sm:$0xff] }
 0x7a3   :  { %10781 = vrot.lane.b32.xlu2 %v10780_v40, %s11124_s25  ;;  %10786 = vrot.lane.b32.xlu1 %v10785_v24, %s11124_s25  ;;  %v17280_v40 = vld [vmem:[#allocation108_spill] sm:$0xff] }
 0x7a4   :  { %10731 = vrot.lane.b32.xlu0 %v10730_v39, %s11126_s27  ;;  %v9156_v24 = vmul.f32 %v14992_v16, %v17280_v40  ;;  %v17281_v39 = vld [vmem:[#allocation125_spill] sm:$0xff] }
 0x7a5   :  { %v9157_v57 = vmul.f32 %v15023_v21, %v17281_v39 }
 0x7a6   :  { %v10825_v13 = vpack.i.bf16 %v9156_v24, %v9151_v20  ;;  %v17293_v24 = vld [vmem:[#allocation168_spill] sm:$0xff] }
 0x7a7   :  { %v10830_v5 = vpack.i.bf16 %v9158_v32, %v9157_v57  ;;  %v9587_v39 = vmul.f32 %v14933_v41, %v17293_v24  ;;  %v17295_v32 = vld [vmem:[#allocation171_spill] sm:$0xff] }
 0x7a8   :  { %v9589_v2 = vmul.f32 %v15021_v63, %v17295_v32 }
 0x7ab   :  { %10796 = vrot.lane.b32.xlu2 %v10795_v56, %s11124_s25  ;;  %10801 = vrot.lane.b32.xlu1 %v10800_v35, %s11124_s25 }
 0x7ac   :  { %10746 = vrot.lane.b32.xlu0 %v10745_v62, %s11126_s27 }
 0x7ad   :  { %v15234_v23 = vpop.permute.xlu1 %10581 }
 0x7ae   :  { %v10567_v33 = vpop.permute.xlu0 %10566  ;;  %v10584_v8 = vunpack.i.h.bf16 %v15234_v23  ;;  %v10583_v0 = vunpack.i.l.bf16 %v15234_v23 }
 0x7af   :  { %v10569_v12 = vunpack.i.h.bf16 %v10567_v33  ;;  %v10568_v55 = vunpack.i.l.bf16 %v10567_v33  ;;  %v17288_v33 = vld [vmem:[#allocation159_spill] sm:$0xff] }
 0x7b0   :  { %v6313_v62 = vsel %vm1563_vm10, %v10584_v8, %v10578_v25  ;;  %v6315_v48 = vsel %vm1563_vm10, %v10579_v61, %v10583_v0  ;;  %v17287_v25 = vld [vmem:[#allocation134_spill] sm:$0xff]  ;;  %v9583_v9 = vmul.f32 %v14941_v42, %v17288_v33 }
 0x7b1   :  { %v6310_v54 = vsel %vm1563_vm10, %v10568_v55, %v10569_v12  ;;  %v9161_v61 = vmul.f32 %v14961_v51, %v17287_v25  ;;  %v17301_v25 = vld [vmem:[#allocation181_spill] sm:$0xff] }
 0x7b2   :  { %6399 = vmatpush.msrb.mxu2 %v6310_v54  ;;  %v17291_v54 = vld [vmem:[#allocation9_spill] sm:$0xff] }
 0x7b3   :  { %10811 = vrot.lane.b32.xlu2 %v10810_v52, %s11123_s0  ;;  %10816 = vrot.lane.b32.xlu1 %v10815_v36, %s11123_s0  ;;  %v8723_v52 = vmul.f32 %v14959_v45, %v17291_v54  ;;  %v10840_v36 = vpack.i.bf16 %v9159_v44, %v9161_v61  ;;  %v9590_v44 = vmul.f32 %v14990_v30, %v17300_v50 }
 0x7b4   :  { %6479 = vmatpush.msra.mxu2 %v6314_v11  ;;  %10761 = vrot.lane.b32.xlu0 %v10760_v28, %s11126_s27  ;;  %v10602_v11 = vpop.permute.xlu2 %10601  ;;  %v10845_v28 = vpack.i.bf16 %v9584_v17, %v9583_v9  ;;  %v9595_v61 = vmul.f32 %v15027_v15, %v17301_v25  ;;  %v9153_v17 = vmul.f32 %v14937_v19, %v17302_v14 }
 0x7b5   :  { %10398 = vmatmul.msk.f32.vlgmr.msrb.gmra.mxu2 %vm6340_vm0, %v15229_v1  ;;  %v15290_v26 = vpop.permute.xlu1 %10606  ;;  %v10604_v57 = vunpack.i.h.bf16 %v10602_v11  ;;  %v10603_v33 = vunpack.i.l.bf16 %v10602_v11 }
 0x7b6   :  { %v10572_v46 = vpop.permute.xlu0 %10571  ;;  %v10608_v54 = vunpack.i.l.bf16 %v15290_v26 }
 0x7b7   :  { %v10574_v34 = vunpack.i.h.bf16 %v10572_v46  ;;  %v10573_v31 = vunpack.i.l.bf16 %v10572_v46 }
 0x7b9   :  { %v6308_v43 = vsel %vm1563_vm10, %v17285_v29, %v10574_v34  ;;  %v6309_v4 = vsel %vm1563_vm10, %v10574_v34, %v10568_v55  ;;  %v6311_v56 = vsel %vm1563_vm10, %v10569_v12, %v10573_v31  ;;  %v6312_v35 = vsel %vm1563_vm10, %v10573_v31, %v10584_v8  ;;  %v17290_v12 = vld [vmem:[#allocation116_spill] sm:$0xff]  ;;  %v17294_v8 = vld [vmem:[#allocation169_spill] sm:$0xff] }
 0x7ba   :  { %6359 = vmatpush.msrb.mxu0 %v6308_v43  ;;  %6379 = vmatpush.msrb.mxu1 %v6309_v4  ;;  %v8722_v55 = vmul.f32 %v15023_v21, %v17290_v12  ;;  %v17292_v31 = vld [vmem:[#allocation36_spill] sm:$0xff]  ;;  %v9588_v22 = vmul.f32 %v14937_v19, %v17294_v8  ;;  %v17297_v4 = vld [vmem:[#allocation165_spill] sm:$0xff] }
 0x7bb   :  { %6419 = vmatpush.msrb.mxu3 %v6311_v56  ;;  %10396 = vmatmul.msk.f32.vlgmr.msrb.gmra.mxu0 %vm6340_vm0, %v15229_v1  ;;  %v9582_v40 = vmul.f32 %v14939_v6, %v17292_v31  ;;  %v9149_v56 = vmul.f32 %v14970_v58, %v17297_v4  ;;  %v10875_v31 = vpack.i.bf16 %v9595_v61, %v9590_v44  ;;  %v17305_v4 = vld [vmem:[#allocation58_spill] sm:$0xff] }
 0x7bc   :  { %10397 = vmatmul.msk.f32.vlgmr.msrb.gmra.mxu1 %vm6340_vm0, %v15229_v1  ;;  %10399 = vmatmul.msk.f32.vlgmr.msrb.gmra.mxu3 %vm6340_vm0, %v15229_v1  ;;  %v10790_v23 = vpack.i.bf16 %v8723_v52, %v8722_v55  ;;  %v10609_v55 = vunpack.i.h.bf16 %v15290_v26  ;;  %v17303_v52 = vld [vmem:[#allocation45_spill] sm:$0xff] }
 0x7bd   :  { %6439 = vmatpush.msra.mxu0 %v6312_v35  ;;  %6459 = vmatpush.msra.mxu1 %v6313_v62  ;;  %v15318_v62 = vpop.permute.xlu2 %10616 }
 0x7be   :  { %6499 = vmatpush.msra.mxu3 %v6315_v48  ;;  %10826 = vrot.lane.b32.xlu2 %v10825_v13, %s11123_s0  ;;  %v10587_v53 = vpop.permute.xlu0 %10586  ;;  %v10860_v13 = vpack.i.bf16 %v9589_v2, %v9588_v22  ;;  %v10805_v48 = vpack.i.bf16 %v9149_v56, %v9148_v27  ;;  %v10619_v12 = vunpack.i.h.bf16 %v15318_v62  ;;  %v10618_v11 = vunpack.i.l.bf16 %v15318_v62  ;;  %v17304_v2 = vld [vmem:[#allocation35_spill] sm:$0xff] }
 0x7bf   :  { %10831 = vrot.lane.b32.xlu1 %v10830_v5, %s11123_s0  ;;  %10776 = vrot.lane.b32.xlu0 %v10775_v60, %s11124_s25  ;;  %v10589_v49 = vunpack.i.h.bf16 %v10587_v53  ;;  %v10588_v37 = vunpack.i.l.bf16 %v10587_v53  ;;  %v17298_v60 = vld [vmem:[#allocation177_spill] sm:$0xff]  ;;  %v6714_v26 = vsel %vm1986_vm12, %v10608_v54, %v10609_v55  ;;  %v9155_v56 = vmul.f32 %v14990_v30, %v17305_v4 }
 0x7c0   :  { %10402 = vmatmul.msk.f32.vlgmr.msra.gmra.mxu2 %vm6340_vm0, %v15229_v1  ;;  %v9592_v53 = vmul.f32 %v15023_v21, %v17298_v60 }
 0x7c1   :  { %v6318_v59 = vsel %vm1563_vm10, %v10588_v37, %v10589_v49 }
 0x7c2   :  { %6559 = vmatpush.msrb.mxu2 %v6318_v59 }
 0x7c3   :  { %10400 = vmatmul.msk.f32.vlgmr.msra.gmra.mxu0 %vm6340_vm0, %v15229_v1 }
 0x7c4   :  { %10401 = vmatmul.msk.f32.vlgmr.msra.gmra.mxu1 %vm6340_vm0, %v15229_v1  ;;  %10403 = vmatmul.msk.f32.vlgmr.msra.gmra.mxu3 %vm6340_vm0, %v15229_v1 }
 0x7c6   :  { %10841 = vrot.lane.b32.xlu2 %v10840_v36, %s11123_s0  ;;  %v10592_v46 = vpop.permute.xlu0 %10591  ;;  %v9154_v36 = vmul.f32 %v15021_v63, %v17303_v52  ;;  %v17309_v52 = vld [vmem:[#allocation41_spill] sm:$0xff] }
 0x7c7   :  { %10846 = vrot.lane.b32.xlu1 %v10845_v28, %s11122_s1  ;;  %10791 = vrot.lane.b32.xlu0 %v10790_v23, %s11124_s25  ;;  %v10594_v20 = vunpack.i.h.bf16 %v10592_v46  ;;  %v10593_v34 = vunpack.i.l.bf16 %v10592_v46  ;;  %v10622_v28 = vpop.permute.xlu1 %10621 }
 0x7c8   :  { %10406 = vmatmul.msk.f32.vlgmr.msrb.gmra.mxu2 %vm6340_vm0, %v15229_v1  ;;  %v10820_v24 = vpack.i.bf16 %v9154_v36, %v9153_v17  ;;  %v10624_v22 = vunpack.i.h.bf16 %v10622_v28  ;;  %v10623_v32 = vunpack.i.l.bf16 %v10622_v28  ;;  %v9585_v36 = vmul.f32 %v14935_v3, %v17309_v52 }
 0x7c9   :  { %v6316_v18 = vsel %vm1563_vm10, %v10583_v0, %v10594_v20  ;;  %v6317_v29 = vsel %vm1563_vm10, %v10594_v20, %v10588_v37  ;;  %v6319_v43 = vsel %vm1563_vm10, %v10589_v49, %v10593_v34  ;;  %v6320_v35 = vsel %vm1563_vm10, %v10593_v34, %v10604_v57  ;;  %v17299_v49 = vld [vmem:[#allocation179_spill] sm:$0xff] }
 0x7ca   :  { %6519 = vmatpush.msrb.mxu0 %v6316_v18  ;;  %6539 = vmatpush.msrb.mxu1 %v6317_v29  ;;  %v10855_v0 = vpack.i.bf16 %v9587_v39, %v9582_v40  ;;  %v9593_v37 = vmul.f32 %v14959_v45, %v17299_v49  ;;  %v6718_v40 = vsel %vm1986_vm12, %v10618_v11, %v10619_v12  ;;  %v10632_v29 = vpop.permute.xlu2 %10631 }
 0x7cb   :  { %6579 = vmatpush.msrb.mxu3 %v6319_v43  ;;  %10404 = vmatmul.msk.f32.vlgmr.msrb.gmra.mxu0 %vm6340_vm0, %v15229_v1  ;;  %v6719_v60 = vsel %vm1986_vm12, %v10619_v12, %v10623_v32  ;;  %v10633_v44 = vunpack.i.l.bf16 %v10632_v29 }
 0x7cc   :  { %10405 = vmatmul.msk.f32.vlgmr.msrb.gmra.mxu1 %vm6340_vm0, %v15229_v1  ;;  %10407 = vmatmul.msk.f32.vlgmr.msrb.gmra.mxu3 %vm6340_vm0, %v15229_v1  ;;  %v10870_v34 = vpack.i.bf16 %v9593_v37, %v9592_v53  ;;  %v17307_v53 = vld [vmem:[#allocation180_spill] sm:$0xff] }
 0x7cd   :  { %6599 = vmatpush.msra.mxu0 %v6320_v35  ;;  %v17306_v35 = vld [vmem:[#allocation157_spill] sm:$0xff]  ;;  %v9594_v49 = vmul.f32 %v15025_v10, %v17307_v53 }
 0x7ce   :  { %10856 = vrot.lane.b32.xlu2 %v10855_v0, %s11122_s1  ;;  %v10597_v5 = vpop.permute.xlu0 %10596  ;;  %v9160_v0 = vmul.f32 %v15027_v15, %v17306_v35 }
 0x7cf   :  { %10861 = vrot.lane.b32.xlu1 %v10860_v13, %s11122_s1  ;;  %10806 = vrot.lane.b32.xlu0 %v10805_v48, %s11123_s0  ;;  %v10599_v9 = vunpack.i.h.bf16 %v10597_v5  ;;  %v10598_v59 = vunpack.i.l.bf16 %v10597_v5  ;;  %v10637_v62 = vpop.permute.xlu1 %10636  ;;  %v10016_v13 = vld [vmem:[%s16209_s6] sm:$0xff]  ;;  %v10634_v48 = vunpack.i.h.bf16 %v10632_v29  ;;  %v6717_v5 = vsel %vm1986_vm12, %v10624_v22, %v10618_v11 }
 0x7d0   :  { %v10835_v37 = vpack.i.bf16 %v9160_v0, %v9155_v56 }
 0x7d1   :  { %v6321_v23 = vsel %vm1563_vm10, %v10604_v57, %v10598_v59  ;;  %v6322_v46 = vsel %vm1563_vm10, %v10598_v59, %v10599_v9  ;;  %v6323_v20 = vsel %vm1563_vm10, %v10599_v9, %v10603_v33  ;;  %v6720_v25 = vsel %vm1986_vm12, %v10623_v32, %v10634_v48  ;;  %v17310_v32 = vld [vmem:[#allocation162_spill] sm:$0xff] }
 0x7d2   :  { %6619 = vmatpush.msra.mxu1 %v6321_v23  ;;  %6639 = vmatpush.msra.mxu2 %v6322_v46  ;;  %v10639_v9 = vunpack.i.h.bf16 %v10637_v62  ;;  %v10638_v59 = vunpack.i.l.bf16 %v10637_v62  ;;  %v10647_v11 = vpop.permute.xlu2 %10646 }
 0x7d3   :  { %6659 = vmatpush.msra.mxu3 %v6323_v20  ;;  %10408 = vmatmul.msk.f32.vlgmr.msra.gmra.mxu0 %vm6340_vm0, %v15229_v1 }
 0x7d4   :  { %10409 = vmatmul.msk.f32.vlgmr.msra.gmra.mxu1 %vm6340_vm0, %v15229_v1  ;;  %10410 = vmatmul.msk.f32.vlgmr.msra.gmra.mxu2 %vm6340_vm0, %v15229_v1  ;;  %v6726_v28 = vsel %vm1986_vm12, %v10638_v59, %v10639_v9 }
 0x7d5   :  { %10411 = vmatmul.msk.f32.vlgmr.msra.gmra.mxu3 %vm6340_vm0, %v15229_v1  ;;  %6802 = vmatpush.msrb.mxu2 %v6714_v26  ;;  %v15358_v1 = vld [vmem:[%s16208_s5] sm:$0xff] }
 0x7d6   :  { %10871 = vrot.lane.b32.xlu2 %v10870_v34, %s11122_s1  ;;  %v10612_v39 = vpop.permute.xlu0 %10611 }
 0x7d7   :  { %6882 = vmatpush.msra.mxu2 %v6718_v40  ;;  %10876 = vrot.lane.b32.xlu1 %v10875_v31, %s11122_s1  ;;  %v10614_v57 = vunpack.i.h.bf16 %v10612_v39  ;;  %v10613_v8 = vunpack.i.l.bf16 %v10612_v39  ;;  %v10652_v23 = vpop.permute.xlu1 %10651  ;;  %v10649_v31 = vunpack.i.h.bf16 %v10647_v11 }
 0x7d8   :  { %10821 = vrot.lane.b32.xlu0 %v10820_v24, %s11123_s0  ;;  %v10654_v40 = vunpack.i.h.bf16 %v10652_v23  ;;  %v10648_v24 = vunpack.i.l.bf16 %v10647_v11  ;;  %v10038_v11 = vld [vmem:[%s16211_s8] sm:$0xff] }
 0x7d9   :  { %v6712_v38 = vsel %vm1986_vm12, %v17304_v2, %v10614_v57  ;;  %v6713_v27 = vsel %vm1986_vm12, %v10614_v57, %v10608_v54  ;;  %v6715_v18 = vsel %vm1986_vm12, %v10609_v55, %v10613_v8  ;;  %v6716_v43 = vsel %vm1986_vm12, %v10613_v8, %v10624_v22  ;;  %v17308_v55 = vld [vmem:[#allocation33_spill] sm:$0xff] }
 0x7da   :  { %6762 = vmatpush.msrb.mxu0 %v6712_v38  ;;  %6782 = vmatpush.msrb.mxu1 %v6713_v27  ;;  %v9581_v54 = vmul.f32 %v14968_v47, %v17308_v55  ;;  %v10653_v22 = vunpack.i.l.bf16 %v10652_v23  ;;  %v9586_v2 = vmul.f32 %v14931_v7, %v17310_v32  ;;  %v17311_v38 = vld [vmem:[#allocation176_spill] sm:$0xff]  ;;  %v7133_v4 = vsel %vm2523_vm11, %v10648_v24, %v10649_v31  ;;  %v10662_v56 = vpop.permute.xlu2 %10661 }
 0x7db   :  { %6822 = vmatpush.msrb.mxu3 %v6715_v18  ;;  %10412 = vmatmul.msk.f32.vlgmr.msrb.gmra.mxu0 %vm6340_vm0, %v15358_v1  ;;  %v9591_v27 = vmul.f32 %v14992_v16, %v17311_v38  ;;  %v17312_v18 = vld [vmem:[#allocation87_spill] sm:$0xff] }
 0x7dc   :  { %10413 = vmatmul.msk.f32.vlgmr.msrb.gmra.mxu1 %vm6340_vm0, %v15358_v1  ;;  %10414 = vmatmul.msk.f32.vlgmr.msrb.gmra.mxu2 %vm6340_vm0, %v15358_v1  ;;  %v10850_v46 = vpack.i.bf16 %v9581_v54, %v9585_v36  ;;  %v7131_v29 = vsel %vm2523_vm11, %v17312_v18, %v10654_v40  ;;  %v7134_v35 = vsel %vm2523_vm11, %v10649_v31, %v10653_v22 }
 0x7dd   :  { %10415 = vmatmul.msk.f32.vlgmr.msrb.gmra.mxu3 %vm6340_vm0, %v15358_v1  ;;  %6842 = vmatpush.msra.mxu0 %v6716_v43  ;;  %v7132_v43 = vsel %vm2523_vm11, %v10654_v40, %v10648_v24  ;;  %v10865_v0 = vpack.i.bf16 %v9591_v27, %v9586_v2  ;;  %v17314_v27 = vld [vmem:[#allocation70_spill] sm:$0xff] }
 0x7de   :  { %6862 = vmatpush.msra.mxu1 %v6717_v5  ;;  %6902 = vmatpush.msra.mxu3 %v6719_v60  ;;  %v10627_v50 = vpop.permute.xlu0 %10626  ;;  %v10664_v5 = vunpack.i.h.bf16 %v10662_v56  ;;  %v10663_v60 = vunpack.i.l.bf16 %v10662_v56 }
 0x7df   :  { %9639 = vrot.lane.b32.xlu2 %v9594_v49, %s11122_s1  ;;  %10019 = vperm.xlu1 %10563, %v10016_v13   ;;  %v10629_v61 = vunpack.i.h.bf16 %v10627_v50  ;;  %v10628_v33 = vunpack.i.l.bf16 %v10627_v50 }
 0x7e0   :  { %10836 = vrot.lane.b32.xlu0 %v10835_v37, %s11123_s0  ;;  %6922 = vmatpush.msrb.mxu0 %v6720_v25  ;;  %v10667_v37 = vpop.permute.xlu1 %10666  ;;  %v7135_v50 = vsel %vm2523_vm11, %v10653_v22, %v10664_v5  ;;  %v17313_v25 = vld [vmem:[#allocation185_spill] sm:$0xff] }
 0x7e1   :  { %v6721_v14 = vsel %vm1986_vm12, %v10634_v48, %v10628_v33  ;;  %v6722_v17 = vsel %vm1986_vm12, %v10628_v33, %v10629_v61  ;;  %v6723_v12 = vsel %vm1986_vm12, %v10629_v61, %v10633_v44  ;;  %v9596_v61 = vmul.f32 %v14961_v51, %v17313_v25 }
 0x7e2   :  { %6942 = vmatpush.msrb.mxu1 %v6721_v14  ;;  %6962 = vmatpush.msrb.mxu2 %v6722_v17  ;;  %v15443_v14 = vld [vmem:[%s16208_s5 + $0x10] sm:$0xff]  ;;  %v10669_v17 = vunpack.i.h.bf16 %v10667_v37  ;;  %v10677_v55 = vpop.permute.xlu2 %10676 }
 0x7e3   :  { %6982 = vmatpush.msrb.mxu3 %v6723_v12  ;;  %10416 = vmatmul.msk.f32.vlgmr.msra.gmra.mxu0 %vm6340_vm0, %v15358_v1  ;;  %v10668_v12 = vunpack.i.l.bf16 %v10667_v37  ;;  %v10679_v23 = vunpack.i.h.bf16 %v10677_v55 }
 0x7e4   :  { %10417 = vmatmul.msk.f32.vlgmr.msra.gmra.mxu1 %vm6340_vm0, %v15358_v1  ;;  %10418 = vmatmul.msk.f32.vlgmr.msra.gmra.mxu2 %vm6340_vm0, %v15358_v1 }
 0x7e5   :  { %10419 = vmatmul.msk.f32.vlgmr.msra.gmra.mxu3 %vm6340_vm0, %v15358_v1  ;;  %7042 = vmatpush.msra.mxu2 %v6726_v28  ;;  %v7141_v36 = vsel %vm2523_vm11, %v10668_v12, %v10669_v17 }
 0x7e6   :  { %v10642_v20 = vpop.permute.xlu0 %10641 }
 0x7e7   :  { %v10644_v26 = vunpack.i.h.bf16 %v10642_v20  ;;  %v10643_v34 = vunpack.i.l.bf16 %v10642_v20 }
 0x7e8   :  { %10851 = vrot.lane.b32.xlu0 %v10850_v46, %s11122_s1  ;;  %v10682_v28 = vpop.permute.xlu1 %10681  ;;  %v10678_v46 = vunpack.i.l.bf16 %v10677_v55 }
 0x7e9   :  { %v6724_v39 = vsel %vm1986_vm12, %v10633_v44, %v10644_v26  ;;  %v6725_v57 = vsel %vm1986_vm12, %v10644_v26, %v10638_v59  ;;  %v6727_v8 = vsel %vm1986_vm12, %v10639_v9, %v10643_v34  ;;  %v10684_v20 = vunpack.i.h.bf16 %v10682_v28 }
 0x7ea   :  { %7002 = vmatpush.msra.mxu0 %v6724_v39  ;;  %7022 = vmatpush.msra.mxu1 %v6725_v57  ;;  %v10683_v26 = vunpack.i.l.bf16 %v10682_v28  ;;  %v10692_v40 = vpop.permute.xlu2 %10691  ;;  %v7145_v39 = vsel %vm2523_vm11, %v10678_v46, %v10679_v23 }
 0x7eb   :  { %7062 = vmatpush.msra.mxu3 %v6727_v8  ;;  %10420 = vmatmul.msk.f32.vlgmr.msrb.gmra.mxu0 %vm6340_vm0, %v15358_v1  ;;  %v7144_v24 = vsel %vm2523_vm11, %v10684_v20, %v10678_v46  ;;  %v10694_v8 = vunpack.i.h.bf16 %v10692_v40  ;;  %v10693_v2 = vunpack.i.l.bf16 %v10692_v40 }
 0x7ec   :  { %10421 = vmatmul.msk.f32.vlgmr.msrb.gmra.mxu1 %vm6340_vm0, %v15358_v1  ;;  %10422 = vmatmul.msk.f32.vlgmr.msrb.gmra.mxu2 %vm6340_vm0, %v15358_v1  ;;  %v7146_v57 = vsel %vm2523_vm11, %v10679_v23, %v10683_v26 }
 0x7ed   :  { %10423 = vmatmul.msk.f32.vlgmr.msrb.gmra.mxu3 %vm6340_vm0, %v15358_v1  ;;  %7181 = vmatpush.msrb.mxu0 %v7131_v29  ;;  %v7566_v18 = vsel %vm3076_vm9, %v17314_v27, %v10694_v8 }
 0x7ee   :  { %7201 = vmatpush.msrb.mxu1 %v7132_v43  ;;  %7221 = vmatpush.msrb.mxu2 %v7133_v4  ;;  %v10657_v62 = vpop.permute.xlu0 %10656 }
 0x7ef   :  { %7241 = vmatpush.msrb.mxu3 %v7134_v35  ;;  %v10659_v13 = vunpack.i.h.bf16 %v10657_v62  ;;  %v10658_v48 = vunpack.i.l.bf16 %v10657_v62 }
 0x7f0   :  { %10866 = vrot.lane.b32.xlu0 %v10865_v0, %s11122_s1  ;;  %v10697_v38 = vpop.permute.xlu1 %10696 }
 0x7f1   :  { %v7136_v53 = vsel %vm2523_vm11, %v10664_v5, %v10658_v48  ;;  %v7137_v49 = vsel %vm2523_vm11, %v10658_v48, %v10659_v13  ;;  %v7138_v44 = vsel %vm2523_vm11, %v10659_v13, %v10663_v60  ;;  %v10699_v0 = vunpack.i.h.bf16 %v10697_v38 }
 0x7f2   :  { %v10698_v62 = vunpack.i.l.bf16 %v10697_v38  ;;  %v10707_v5 = vpop.permute.xlu2 %10706 }
 0x7f3   :  { %10424 = vmatmul.msk.f32.vlgmr.msra.gmra.mxu0 %vm6340_vm0, %v15358_v1  ;;  %v10708_v25 = vunpack.i.l.bf16 %v10707_v5 }
 0x7f4   :  { %10425 = vmatmul.msk.f32.vlgmr.msra.gmra.mxu1 %vm6340_vm0, %v15358_v1  ;;  %10426 = vmatmul.msk.f32.vlgmr.msra.gmra.mxu2 %vm6340_vm0, %v15358_v1 }
 0x7f5   :  { %10427 = vmatmul.msk.f32.vlgmr.msra.gmra.mxu3 %vm6340_vm0, %v15358_v1  ;;  %7261 = vmatpush.msra.mxu0 %v7135_v50  ;;  %v6222_v50 = vld [vmem:[%s16208_s5 + $0x18] sm:$0xff] }
 0x7f6   :  { %7281 = vmatpush.msra.mxu1 %v7136_v53  ;;  %7301 = vmatpush.msra.mxu2 %v7137_v49  ;;  %v10672_v33 = vpop.permute.xlu0 %10671  ;;  %v7572_v53 = vsel %vm3076_vm9, %v10698_v62, %v10699_v0 }
 0x7f7   :  { %7321 = vmatpush.msra.mxu3 %v7138_v44  ;;  %v10674_v9 = vunpack.i.h.bf16 %v10672_v33  ;;  %v10673_v59 = vunpack.i.l.bf16 %v10672_v33  ;;  %v10709_v44 = vunpack.i.h.bf16 %v10707_v5 }
 0x7f8   :  { %9643 = vrot.lane.b32.xlu0 %v9596_v61, %s11122_s1  ;;  %v10712_v49 = vpop.permute.xlu1 %10711 }
 0x7f9   :  { %v7139_v1 = vsel %vm2523_vm11, %v10663_v60, %v10674_v9  ;;  %v7140_v54 = vsel %vm2523_vm11, %v10674_v9, %v10668_v12  ;;  %v7142_v52 = vsel %vm2523_vm11, %v10669_v17, %v10673_v59  ;;  %v7143_v31 = vsel %vm2523_vm11, %v10673_v59, %v10684_v20 }
 0x7fa   :  { %v10714_v61 = vunpack.i.h.bf16 %v10712_v49  ;;  %v10713_v33 = vunpack.i.l.bf16 %v10712_v49  ;;  %v15604_v49 = vld [vmem:[%s16208_s5 + $0x28] sm:$0xff] }
 0x7fb   :  { %10428 = vmatmul.msk.f32.vlgmr.msrb.gmra.mxu0 %vm6340_vm0, %v15443_v14 }
 0x7fc   :  { %10429 = vmatmul.msk.f32.vlgmr.msrb.gmra.mxu1 %vm6340_vm0, %v15443_v14  ;;  %10430 = vmatmul.msk.f32.vlgmr.msrb.gmra.mxu2 %vm6340_vm0, %v15443_v14  ;;  %v7575_v59 = vsel %vm3076_vm9, %v10714_v61, %v10708_v25  ;;  %v7577_v12 = vsel %vm3076_vm9, %v10709_v44, %v10713_v33 }
 0x7fd   :  { %10431 = vmatmul.msk.f32.vlgmr.msrb.gmra.mxu3 %vm6340_vm0, %v15443_v14  ;;  %7341 = vmatpush.msrb.mxu0 %v7139_v1  ;;  %v10722_v1 = vpop.permute.xlu2 %10721 }
 0x7fe   :  { %7361 = vmatpush.msrb.mxu1 %v7140_v54  ;;  %7381 = vmatpush.msrb.mxu2 %v7141_v36  ;;  %v10687_v34 = vpop.permute.xlu0 %10686  ;;  %v10723_v36 = vunpack.i.l.bf16 %v10722_v1 }
 0x7ff   :  { %7401 = vmatpush.msrb.mxu3 %v7142_v52  ;;  %v10689_v22 = vunpack.i.h.bf16 %v10687_v34  ;;  %v10688_v32 = vunpack.i.l.bf16 %v10687_v34  ;;  %v10724_v52 = vunpack.i.h.bf16 %v10722_v1 }
 0x800   :  { %10041 = vperm.xlu0 %10564, %v10038_v11  }
 0x801   :  { %v7567_v43 = vsel %vm3076_vm9, %v10694_v8, %v10688_v32  ;;  %v7568_v4 = vsel %vm3076_vm9, %v10688_v32, %v10689_v22  ;;  %v7569_v56 = vsel %vm3076_vm9, %v10689_v22, %v10693_v2  ;;  %v7578_v11 = vsel %vm3076_vm9, %v10713_v33, %v10724_v52 }
 0x803   :  { %10432 = vmatmul.msk.f32.vlgmr.msra.gmra.mxu0 %vm6340_vm0, %v15443_v14 }
 0x804   :  { %10433 = vmatmul.msk.f32.vlgmr.msra.gmra.mxu1 %vm6340_vm0, %v15443_v14  ;;  %10434 = vmatmul.msk.f32.vlgmr.msra.gmra.mxu2 %vm6340_vm0, %v15443_v14 }
 0x805   :  { %10435 = vmatmul.msk.f32.vlgmr.msra.gmra.mxu3 %vm6340_vm0, %v15443_v14  ;;  %7421 = vmatpush.msra.mxu0 %v7143_v31 }
 0x806   :  { %7441 = vmatpush.msra.mxu1 %v7144_v24  ;;  %7461 = vmatpush.msra.mxu2 %v7145_v39  ;;  %v10702_v29 = vpop.permute.xlu0 %10701 }
 0x807   :  { %7481 = vmatpush.msra.mxu3 %v7146_v57  ;;  %v10704_v35 = vunpack.i.h.bf16 %v10702_v29  ;;  %v10703_v13 = vunpack.i.l.bf16 %v10702_v29 }
 0x809   :  { %v7570_v48 = vsel %vm3076_vm9, %v10693_v2, %v10704_v35  ;;  %v7571_v60 = vsel %vm3076_vm9, %v10704_v35, %v10698_v62  ;;  %v7573_v37 = vsel %vm3076_vm9, %v10699_v0, %v10703_v13  ;;  %v7574_v9 = vsel %vm3076_vm9, %v10703_v13, %v10714_v61 }
 0x80b   :  { %10436 = vmatmul.msk.f32.vlgmr.msrb.gmra.mxu0 %vm6340_vm0, %v15443_v14 }
 0x80c   :  { %10437 = vmatmul.msk.f32.vlgmr.msrb.gmra.mxu1 %vm6340_vm0, %v15443_v14  ;;  %10438 = vmatmul.msk.f32.vlgmr.msrb.gmra.mxu2 %vm6340_vm0, %v15443_v14 }
 0x80d   :  { %10439 = vmatmul.msk.f32.vlgmr.msrb.gmra.mxu3 %vm6340_vm0, %v15443_v14  ;;  %7616 = vmatpush.msrb.mxu0 %v7566_v18 }
 0x80e   :  { %7636 = vmatpush.msrb.mxu1 %v7567_v43  ;;  %7656 = vmatpush.msrb.mxu2 %v7568_v4  ;;  %v10717_v17 = vpop.permute.xlu0 %10716 }
 0x80f   :  { %7676 = vmatpush.msrb.mxu3 %v7569_v56  ;;  %v10719_v55 = vunpack.i.h.bf16 %v10717_v17  ;;  %v10718_v54 = vunpack.i.l.bf16 %v10717_v17 }
 0x811   :  { %v7579_v28 = vsel %vm3076_vm9, %v10724_v52, %v10718_v54  ;;  %v7580_v23 = vsel %vm3076_vm9, %v10718_v54, %v10719_v55  ;;  %v7581_v46 = vsel %vm3076_vm9, %v10719_v55, %v10723_v36 }
 0x813   :  { %10440 = vmatmul.msk.f32.vlgmr.msra.gmra.mxu0 %vm6340_vm0, %v15443_v14 }
 0x814   :  { %10441 = vmatmul.msk.f32.vlgmr.msra.gmra.mxu1 %vm6340_vm0, %v15443_v14  ;;  %10442 = vmatmul.msk.f32.vlgmr.msra.gmra.mxu2 %vm6340_vm0, %v15443_v14 }
 0x815   :  { %10443 = vmatmul.msk.f32.vlgmr.msra.gmra.mxu3 %vm6340_vm0, %v15443_v14  ;;  %7696 = vmatpush.msra.mxu0 %v7570_v48  ;;  %v7576_v14 = vsel %vm3076_vm9, %v10708_v25, %v10709_v44 }
 0x816   :  { %7716 = vmatpush.msra.mxu1 %v7571_v60  ;;  %7736 = vmatpush.msra.mxu2 %v7572_v53  ;;  %v10732_v20 = vpop.permute.xlu0 %10731 }
 0x817   :  { %7756 = vmatpush.msra.mxu3 %v7573_v37  ;;  %v10733_v24 = vunpack.i.l.bf16 %v10732_v20 }
 0x81b   :  { %10444 = vmatmul.msk.f32.vlgmr.msrb.gmra.mxu0 %vm6340_vm0, %v6222_v50 }
 0x81c   :  { %10445 = vmatmul.msk.f32.vlgmr.msrb.gmra.mxu1 %vm6340_vm0, %v6222_v50  ;;  %10446 = vmatmul.msk.f32.vlgmr.msrb.gmra.mxu2 %vm6340_vm0, %v6222_v50 }
 0x81d   :  { %10447 = vmatmul.msk.f32.vlgmr.msrb.gmra.mxu3 %vm6340_vm0, %v6222_v50  ;;  %7776 = vmatpush.msrb.mxu0 %v7574_v9 }
 0x81e   :  { %7796 = vmatpush.msrb.mxu1 %v7575_v59  ;;  %7816 = vmatpush.msrb.mxu2 %v7576_v14 }
 0x81f   :  { %7836 = vmatpush.msrb.mxu3 %v7577_v12 }
 0x823   :  { %10448 = vmatmul.msk.f32.vlgmr.msra.gmra.mxu0 %vm6340_vm0, %v6222_v50 }
 0x824   :  { %10449 = vmatmul.msk.f32.vlgmr.msra.gmra.mxu1 %vm6340_vm0, %v6222_v50  ;;  %10450 = vmatmul.msk.f32.vlgmr.msra.gmra.mxu2 %vm6340_vm0, %v6222_v50 }
 0x825   :  { %10451 = vmatmul.msk.f32.vlgmr.msra.gmra.mxu3 %vm6340_vm0, %v6222_v50  ;;  %7856 = vmatpush.msra.mxu0 %v7578_v11 }
 0x826   :  { %7876 = vmatpush.msra.mxu1 %v7579_v28  ;;  %7896 = vmatpush.msra.mxu2 %v7580_v23 }
 0x827   :  { %7916 = vmatpush.msra.mxu3 %v7581_v46 }
 0x82b   :  { %10452 = vmatmul.msk.f32.vlgmr.msrb.gmra.mxu0 %vm6340_vm0, %v6222_v50 }
 0x82c   :  { %10453 = vmatmul.msk.f32.vlgmr.msrb.gmra.mxu1 %vm6340_vm0, %v6222_v50  ;;  %10454 = vmatmul.msk.f32.vlgmr.msrb.gmra.mxu2 %vm6340_vm0, %v6222_v50 }
 0x82d   :  { %10455 = vmatmul.msk.f32.vlgmr.msrb.gmra.mxu3 %vm6340_vm0, %v6222_v50  ;;  %7955 = vmatpush.msrb.mxu0 %v14968_v47 }
 0x82e   :  { %7975 = vmatpush.msrb.mxu1 %v14939_v6  ;;  %7995 = vmatpush.msrb.mxu2 %v14941_v42  ;;  %v6223_v42 = vld [vmem:[%s16208_s5 + $0x20] sm:$0xff] }
 0x82f   :  { %8015 = vmatpush.msrb.mxu3 %v14970_v58 }
 0x833   :  { %10456 = vmatmul.msk.f32.vlgmr.msra.gmra.mxu0 %vm6340_vm0, %v6222_v50 }
 0x834   :  { %10457 = vmatmul.msk.f32.vlgmr.msra.gmra.mxu1 %vm6340_vm0, %v6222_v50  ;;  %10458 = vmatmul.msk.f32.vlgmr.msra.gmra.mxu2 %vm6340_vm0, %v6222_v50 }
 0x835   :  { %10459 = vmatmul.msk.f32.vlgmr.msra.gmra.mxu3 %vm6340_vm0, %v6222_v50  ;;  %8035 = vmatpush.msra.mxu0 %v14935_v3  ;;  %v10727_v3 = vpop.permute.xlu1 %10726 }
 0x836   :  { %8055 = vmatpush.msra.mxu1 %v14931_v7  ;;  %8075 = vmatpush.msra.mxu2 %v14933_v41  ;;  %v10729_v34 = vunpack.i.h.bf16 %v10727_v3  ;;  %v10728_v31 = vunpack.i.l.bf16 %v10727_v3 }
 0x837   :  { %8095 = vmatpush.msra.mxu3 %v14937_v19 }
 0x838   :  { %v15532_v6 = vpop.f32.mrf.mxu0  ;;  %v15537_v47 = vpop.f32.mrf.mxu2  ;;  %v8343_v22 = vsel %vm2975_vm8, %v10729_v34, %v10733_v24 }
 0x839   :  { %v15539_v58 = vpop.f32.mrf.mxu1 }
 0x83b   :  { %10460 = vmatmul.msk.f32.vlgmr.msrb.gmra.mxu0 %vm6340_vm0, %v6223_v42 }
 0x83c   :  { %10461 = vmatmul.msk.f32.vlgmr.msrb.gmra.mxu1 %vm6340_vm0, %v6223_v42  ;;  %10462 = vmatmul.msk.f32.vlgmr.msrb.gmra.mxu2 %vm6340_vm0, %v6223_v42 }
 0x83d   :  { %10463 = vmatmul.msk.f32.vlgmr.msrb.gmra.mxu3 %vm6340_vm0, %v6223_v42  ;;  %8115 = vmatpush.msrb.mxu0 %v15021_v63  ;;  %v10734_v63 = vunpack.i.h.bf16 %v10732_v20  ;;  %v10742_v57 = vpop.permute.xlu1 %10741  ;;  %v17315_v20 = vld [vmem:[#allocation126_spill] sm:$0xff] }
 0x83e   :  { %8135 = vmatpush.msrb.mxu1 %v14990_v30  ;;  %8155 = vmatpush.msrb.mxu2 %v14992_v16  ;;  %v10737_v30 = vpop.permute.xlu2 %10736  ;;  %v10743_v27 = vunpack.i.l.bf16 %v10742_v57  ;;  %v10744_v18 = vunpack.i.h.bf16 %v10742_v57 }
 0x83f   :  { %8175 = vmatpush.msrb.mxu3 %v15023_v21  ;;  %v15549_v7 = vpop.f32.mrf.mxu3  ;;  %v10738_v40 = vunpack.i.l.bf16 %v10737_v30  ;;  %v10739_v43 = vunpack.i.h.bf16 %v10737_v30 }
 0x840   :  { %v15551_v41 = vpop.f32.mrf.mxu0  ;;  %v8347_v62 = vsel %vm2975_vm8, %v10743_v27, %v10744_v18 }
 0x841   :  { %v15553_v19 = vpop.f32.mrf.mxu1  ;;  %v8346_v0 = vsel %vm2975_vm8, %v10739_v43, %v10743_v27 }
 0x843   :  { %10464 = vmatmul.msk.f32.vlgmr.msra.gmra.mxu0 %vm6340_vm0, %v6223_v42  ;;  %v15556_v26 = vpop.f32.mrf.mxu2 }
 0x844   :  { %10465 = vmatmul.msk.f32.vlgmr.msra.gmra.mxu1 %vm6340_vm0, %v6223_v42  ;;  %10466 = vmatmul.msk.f32.vlgmr.msra.gmra.mxu2 %vm6340_vm0, %v6223_v42 }
 0x845   :  { %10467 = vmatmul.msk.f32.vlgmr.msra.gmra.mxu3 %vm6340_vm0, %v6223_v42  ;;  %8195 = vmatpush.msra.mxu0 %v14959_v45  ;;  %v8340_v45 = vsel %vm2975_vm8, %v10734_v63, %v10738_v40  ;;  %v10757_v56 = vpop.permute.xlu1 %10756 }
 0x846   :  { %8215 = vmatpush.msra.mxu1 %v15025_v10  ;;  %8235 = vmatpush.msra.mxu2 %v15027_v15  ;;  %v8341_v10 = vsel %vm2975_vm8, %v10738_v40, %v10728_v31  ;;  %v8342_v15 = vsel %vm2975_vm8, %v10728_v31, %v10729_v34  ;;  %v10752_v13 = vpop.permute.xlu2 %10751  ;;  %v10758_v5 = vunpack.i.l.bf16 %v10757_v56  ;;  %v10759_v23 = vunpack.i.h.bf16 %v10757_v56 }
 0x847   :  { %8255 = vmatpush.msra.mxu3 %v14961_v51  ;;  %v15565_v16 = vpop.f32.mrf.mxu3  ;;  %v10747_v51 = vpop.permute.xlu0 %10746  ;;  %v10754_v50 = vunpack.i.h.bf16 %v10752_v13  ;;  %v10753_v44 = vunpack.i.l.bf16 %v10752_v13 }
 0x848   :  { %v15567_v21 = vpop.f32.mrf.mxu0  ;;  %v10748_v2 = vunpack.i.l.bf16 %v10747_v51  ;;  %v10749_v37 = vunpack.i.h.bf16 %v10747_v51  ;;  %v8348_v33 = vsel %vm2975_vm8, %v10744_v18, %v10758_v5 }
 0x849   :  { %v15569_v39 = vpop.f32.mrf.mxu1  ;;  %v8351_v14 = vsel %vm2975_vm8, %v10753_v44, %v10754_v50 }
 0x84a   :  { %v8344_v4 = vsel %vm2975_vm8, %v10733_v24, %v10748_v2  ;;  %v8345_v35 = vsel %vm2975_vm8, %v10748_v2, %v10739_v43  ;;  %v8349_v9 = vsel %vm2975_vm8, %v10758_v5, %v10749_v37  ;;  %v8350_v59 = vsel %vm2975_vm8, %v10749_v37, %v10753_v44 }
 0x84b   :  { %10468 = vmatmul.msk.f32.vlgmr.msrb.gmra.mxu0 %vm6340_vm0, %v6223_v42  ;;  %v15578_v8 = vpop.f32.mrf.mxu2 }
 0x84c   :  { %10469 = vmatmul.msk.f32.vlgmr.msrb.gmra.mxu1 %vm6340_vm0, %v6223_v42  ;;  %10470 = vmatmul.msk.f32.vlgmr.msrb.gmra.mxu2 %vm6340_vm0, %v6223_v42 }
 0x84d   :  { %10471 = vmatmul.msk.f32.vlgmr.msrb.gmra.mxu3 %vm6340_vm0, %v6223_v42  ;;  %8390 = vmatpush.msrb.mxu0 %v8340_v45  ;;  %v10772_v46 = vpop.permute.xlu1 %10771 }
 0x84e   :  { %8410 = vmatpush.msrb.mxu1 %v8341_v10  ;;  %8430 = vmatpush.msrb.mxu2 %v8342_v15  ;;  %v10767_v52 = vpop.permute.xlu2 %10766  ;;  %v10774_v10 = vunpack.i.h.bf16 %v10772_v46  ;;  %v10773_v15 = vunpack.i.l.bf16 %v10772_v46 }
 0x84f   :  { %8450 = vmatpush.msrb.mxu3 %v8343_v22  ;;  %v15581_v32 = vpop.f32.mrf.mxu3  ;;  %v10762_v61 = vpop.permute.xlu0 %10761  ;;  %v10769_v57 = vunpack.i.h.bf16 %v10767_v52  ;;  %v10768_v45 = vunpack.i.l.bf16 %v10767_v52 }
 0x850   :  { %v15583_v38 = vpop.f32.mrf.mxu0  ;;  %v10764_v12 = vunpack.i.h.bf16 %v10762_v61  ;;  %v10763_v36 = vunpack.i.l.bf16 %v10762_v61 }
 0x851   :  { %v15585_v29 = vpop.f32.mrf.mxu1  ;;  %v8777_v18 = vsel %vm2422_vm7, %v10768_v45, %v10769_v57  ;;  %v8778_v43 = vsel %vm2422_vm7, %v10769_v57, %v10773_v15 }
 0x852   :  { %v8354_v3 = vsel %vm2975_vm8, %v10759_v23, %v10763_v36  ;;  %v8355_v30 = vsel %vm2975_vm8, %v10763_v36, %v17315_v20 }
 0x853   :  { %10472 = vmatmul.msk.f32.vlgmr.msra.gmra.mxu0 %vm6340_vm0, %v6223_v42 }
 0x854   :  { %10473 = vmatmul.msk.f32.vlgmr.msra.gmra.mxu1 %vm6340_vm0, %v6223_v42  ;;  %10474 = vmatmul.msk.f32.vlgmr.msra.gmra.mxu2 %vm6340_vm0, %v6223_v42 }
 0x855   :  { %10475 = vmatmul.msk.f32.vlgmr.msra.gmra.mxu3 %vm6340_vm0, %v6223_v42  ;;  %8470 = vmatpush.msra.mxu0 %v8344_v4  ;;  %v8352_v42 = vsel %vm2975_vm8, %v10754_v50, %v10764_v12  ;;  %v10787_v27 = vpop.permute.xlu1 %10786 }
 0x856   :  { %8490 = vmatpush.msra.mxu1 %v8345_v35  ;;  %8510 = vmatpush.msra.mxu2 %v8346_v0  ;;  %v10782_v2 = vpop.permute.xlu2 %10781  ;;  %v10788_v56 = vunpack.i.l.bf16 %v10787_v27  ;;  %v10789_v36 = vunpack.i.h.bf16 %v10787_v27 }
 0x857   :  { %8530 = vmatpush.msra.mxu3 %v8347_v62  ;;  %v15595_v48 = vpop.f32.mrf.mxu2  ;;  %v10784_v37 = vunpack.i.h.bf16 %v10782_v2  ;;  %v10783_v50 = vunpack.i.l.bf16 %v10782_v2 }
 0x858   :  { %v15597_v60 = vpop.f32.mrf.mxu3  ;;  %v15599_v53 = vpop.f32.mrf.mxu0 }
 0x859   :  { %v15606_v25 = vpop.f32.mrf.mxu1 }
 0x85b   :  { %10476 = vmatmul.msk.f32.vlgmr.msrb.gmra.mxu0 %vm6340_vm0, %v15604_v49 }
 0x85c   :  { %10477 = vmatmul.msk.f32.vlgmr.msrb.gmra.mxu1 %vm6340_vm0, %v15604_v49  ;;  %10478 = vmatmul.msk.f32.vlgmr.msrb.gmra.mxu2 %vm6340_vm0, %v15604_v49 }
 0x85d   :  { %10479 = vmatmul.msk.f32.vlgmr.msrb.gmra.mxu3 %vm6340_vm0, %v15604_v49  ;;  %8550 = vmatpush.msrb.mxu0 %v8348_v33 }
 0x85e   :  { %8570 = vmatpush.msrb.mxu1 %v8349_v9  ;;  %8590 = vmatpush.msrb.mxu2 %v8350_v59  ;;  %v10797_v61 = vpop.permute.xlu2 %10796  ;;  %v8782_v59 = vsel %vm2422_vm7, %v10783_v50, %v10784_v37 }
 0x85f   :  { %8610 = vmatpush.msrb.mxu3 %v8351_v14  ;;  %v6804_v17 = vpop.f32.mrf.mxu2 }
 0x860   :  { %v15621_v1 = vadd.f32 %v6804_v17, %v15537_v47  ;;  %v6824_v55 = vpop.f32.mrf.mxu3  ;;  %v15623_v54 = vpop.f32.mrf.mxu0  ;;  %v10798_v17 = vunpack.i.l.bf16 %v10797_v61 }
 0x861   :  { %v15626_v11 = vadd.f32 %v6824_v55, %v15549_v7  ;;  %v15628_v28 = vpop.f32.mrf.mxu1  ;;  %v10777_v47 = vpop.permute.xlu0 %10776  ;;  %v8353_v7 = vsel %vm2975_vm8, %v10764_v12, %v10759_v23 }
 0x862   :  { %v10778_v34 = vunpack.i.l.bf16 %v10777_v47  ;;  %v10779_v13 = vunpack.i.h.bf16 %v10777_v47 }
 0x863   :  { %10480 = vmatmul.msk.f32.vlgmr.msra.gmra.mxu0 %vm6340_vm0, %v15604_v49 }
 0x864   :  { %10481 = vmatmul.msk.f32.vlgmr.msra.gmra.mxu1 %vm6340_vm0, %v15604_v49  ;;  %10482 = vmatmul.msk.f32.vlgmr.msra.gmra.mxu2 %vm6340_vm0, %v15604_v49  ;;  %v8781_v33 = vsel %vm2422_vm7, %v10779_v13, %v10783_v50 }
 0x865   :  { %10483 = vmatmul.msk.f32.vlgmr.msra.gmra.mxu3 %vm6340_vm0, %v15604_v49  ;;  %8630 = vmatpush.msra.mxu0 %v8352_v42 }
 0x866   :  { %8650 = vmatpush.msra.mxu1 %v8353_v7  ;;  %8670 = vmatpush.msra.mxu2 %v8354_v3  ;;  %v10802_v7 = vpop.permute.xlu1 %10801  ;;  %v10812_v27 = vpop.permute.xlu2 %10811 }
 0x867   :  { %8690 = vmatpush.msra.mxu3 %v8355_v30  ;;  %v6884_v63 = vpop.f32.mrf.mxu2  ;;  %v10804_v57 = vunpack.i.h.bf16 %v10802_v7 }
 0x868   :  { %v15644_v31 = vadd.f32 %v6884_v63, %v15556_v26  ;;  %v6904_v40 = vpop.f32.mrf.mxu3  ;;  %v15646_v24 = vpop.f32.mrf.mxu0  ;;  %v8775_v26 = vsel %vm2422_vm7, %v10774_v10, %v10778_v34 }
 0x869   :  { %v15649_v51 = vadd.f32 %v6904_v40, %v15565_v16  ;;  %v15651_v22 = vpop.f32.mrf.mxu1  ;;  %v8776_v16 = vsel %vm2422_vm7, %v10778_v34, %v10768_v45  ;;  %v10792_v9 = vpop.permute.xlu0 %10791  ;;  %v10803_v45 = vunpack.i.l.bf16 %v10802_v7 }
 0x86a   :  { %v10793_v23 = vunpack.i.l.bf16 %v10792_v9  ;;  %v10794_v42 = vunpack.i.h.bf16 %v10792_v9 }
 0x86b   :  { %10484 = vmatmul.msk.f32.vlgmr.msrb.gmra.mxu0 %vm6340_vm0, %v15604_v49 }
 0x86c   :  { %10485 = vmatmul.msk.f32.vlgmr.msrb.gmra.mxu1 %vm6340_vm0, %v15604_v49  ;;  %10486 = vmatmul.msk.f32.vlgmr.msrb.gmra.mxu2 %vm6340_vm0, %v15604_v49  ;;  %v8785_v3 = vsel %vm2422_vm7, %v10789_v36, %v10793_v23  ;;  %v8786_v20 = vsel %vm2422_vm7, %v10793_v23, %v10794_v42 }
 0x86d   :  { %10487 = vmatmul.msk.f32.vlgmr.msrb.gmra.mxu3 %vm6340_vm0, %v15604_v49  ;;  %8825 = vmatpush.msrb.mxu0 %v8775_v26  ;;  %v10799_v26 = vunpack.i.h.bf16 %v10797_v61 }
 0x86e   :  { %8845 = vmatpush.msrb.mxu1 %v8776_v16  ;;  %8865 = vmatpush.msrb.mxu2 %v8777_v18  ;;  %v10817_v16 = vpop.permute.xlu1 %10816 }
 0x86f   :  { %8885 = vmatpush.msrb.mxu3 %v8778_v43  ;;  %v6964_v4 = vpop.f32.mrf.mxu2  ;;  %v8789_v18 = vsel %vm2422_vm7, %v10799_v26, %v10803_v45  ;;  %v17316_v43 = vld [vmem:[#allocation49_spill] sm:$0xff] }
 0x870   :  { %v15666_v35 = vadd.f32 %v6964_v4, %v15578_v8  ;;  %v6984_v0 = vpop.f32.mrf.mxu3  ;;  %v15668_v62 = vpop.f32.mrf.mxu0  ;;  %v8779_v8 = vsel %vm2422_vm7, %v10773_v15, %v10788_v56  ;;  %v8790_v4 = vsel %vm2422_vm7, %v10803_v45, %v17316_v43 }
 0x871   :  { %v15671_v5 = vadd.f32 %v6984_v0, %v15581_v32  ;;  %v15673_v44 = vpop.f32.mrf.mxu1  ;;  %v8780_v32 = vsel %vm2422_vm7, %v10788_v56, %v10779_v13  ;;  %v10807_v10 = vpop.permute.xlu0 %10806  ;;  %v10818_v0 = vunpack.i.l.bf16 %v10817_v16 }
 0x872   :  { %v10808_v61 = vunpack.i.l.bf16 %v10807_v10 }
 0x873   :  { %10488 = vmatmul.msk.f32.vlgmr.msra.gmra.mxu0 %vm6340_vm0, %v15604_v49 }
 0x874   :  { %10489 = vmatmul.msk.f32.vlgmr.msra.gmra.mxu1 %vm6340_vm0, %v15604_v49  ;;  %10490 = vmatmul.msk.f32.vlgmr.msra.gmra.mxu2 %vm6340_vm0, %v15604_v49 }
 0x875   :  { %10491 = vmatmul.msk.f32.vlgmr.msra.gmra.mxu3 %vm6340_vm0, %v15604_v49  ;;  %8905 = vmatpush.msra.mxu0 %v8779_v8  ;;  %v15695_v49 = vld [vmem:[%s16208_s5 + $0x30] sm:$0xff]  ;;  %v10809_v8 = vunpack.i.h.bf16 %v10807_v10 }
 0x876   :  { %8925 = vmatpush.msra.mxu1 %v8780_v32  ;;  %8945 = vmatpush.msra.mxu2 %v8781_v33  ;;  %v10814_v33 = vunpack.i.h.bf16 %v10812_v27 }
 0x877   :  { %8965 = vmatpush.msra.mxu3 %v8782_v59  ;;  %v7044_v14 = vpop.f32.mrf.mxu2 }
 0x878   :  { %v15688_v12 = vadd.f32 %v7044_v14, %v15595_v48  ;;  %v7064_v55 = vpop.f32.mrf.mxu3  ;;  %v15690_v52 = vpop.f32.mrf.mxu0  ;;  %v8783_v48 = vsel %vm2422_vm7, %v10784_v37, %v10798_v17  ;;  %v10813_v14 = vunpack.i.l.bf16 %v10812_v27 }
 0x879   :  { %v15698_v46 = vadd.f32 %v7064_v55, %v15597_v60  ;;  %v15700_v47 = vpop.f32.mrf.mxu1  ;;  %v8784_v60 = vsel %vm2422_vm7, %v10798_v17, %v10789_v36  ;;  %v10822_v59 = vpop.permute.xlu0 %10821  ;;  %v9212_v55 = vsel %vm1462_vm5, %v10808_v61, %v10809_v8 }
 0x87a   :  { %v10827_v17 = vpop.permute.xlu2 %10826  ;;  %v9213_v36 = vsel %vm1462_vm5, %v10809_v8, %v10813_v14  ;;  %v10832_v27 = vpop.permute.xlu1 %10831 }
 0x87b   :  { %10492 = vmatmul.msk.f32.vlgmr.msrb.gmra.mxu0 %vm6340_vm0, %v15695_v49  ;;  %v10829_v8 = vunpack.i.h.bf16 %v10827_v17 }
 0x87c   :  { %10493 = vmatmul.msk.f32.vlgmr.msrb.gmra.mxu1 %vm6340_vm0, %v15695_v49  ;;  %10494 = vmatmul.msk.f32.vlgmr.msrb.gmra.mxu2 %vm6340_vm0, %v15695_v49 }
 0x87d   :  { %10495 = vmatmul.msk.f32.vlgmr.msrb.gmra.mxu3 %vm6340_vm0, %v15695_v49  ;;  %8985 = vmatpush.msrb.mxu0 %v8783_v48 }
 0x87e   :  { %9005 = vmatpush.msrb.mxu1 %v8784_v60  ;;  %9025 = vmatpush.msrb.mxu2 %v8785_v3  ;;  %v10819_v3 = vunpack.i.h.bf16 %v10817_v16  ;;  %v6785_v16 = vadd.f32 %v15606_v25, %v15539_v58 }
 0x87f   :  { %9045 = vmatpush.msrb.mxu3 %v8786_v20  ;;  %v7223_v30 = vpop.f32.mrf.mxu2  ;;  %v10823_v20 = vunpack.i.l.bf16 %v10822_v59 }
 0x880   :  { %v15715_v63 = vadd.f32 %v7223_v30, %v15621_v1  ;;  %v7243_v34 = vpop.f32.mrf.mxu3  ;;  %v15717_v40 = vpop.f32.mrf.mxu0  ;;  %v8787_v1 = vsel %vm2422_vm7, %v10794_v42, %v10804_v57  ;;  %v10828_v42 = vunpack.i.l.bf16 %v10827_v17 }
 0x881   :  { %v15720_v15 = vadd.f32 %v7243_v34, %v15626_v11  ;;  %v15722_v2 = vpop.f32.mrf.mxu1  ;;  %v8788_v11 = vsel %vm2422_vm7, %v10804_v57, %v10799_v26  ;;  %v10824_v34 = vunpack.i.h.bf16 %v10822_v59  ;;  %v15776_v45 = vpop.permute.xlu0 %10836  ;;  %v9216_v26 = vsel %vm1462_vm5, %v10819_v3, %v10823_v20 }
 0x882   :  { %v9215_v10 = vsel %vm1462_vm5, %v10828_v42, %v10819_v3 }
 0x883   :  { %10496 = vmatmul.msk.f32.vlgmr.msra.gmra.mxu0 %vm6340_vm0, %v15695_v49 }
 0x884   :  { %10497 = vmatmul.msk.f32.vlgmr.msra.gmra.mxu1 %vm6340_vm0, %v15695_v49  ;;  %10498 = vmatmul.msk.f32.vlgmr.msra.gmra.mxu2 %vm6340_vm0, %v15695_v49 }
 0x885   :  { %10499 = vmatmul.msk.f32.vlgmr.msra.gmra.mxu3 %vm6340_vm0, %v15695_v49  ;;  %9065 = vmatpush.msra.mxu0 %v8787_v1  ;;  %v9217_v1 = vsel %vm1462_vm5, %v10823_v20, %v10824_v34 }
 0x886   :  { %9085 = vmatpush.msra.mxu1 %v8788_v11  ;;  %9105 = vmatpush.msra.mxu2 %v8789_v18 }
 0x887   :  { %9125 = vmatpush.msra.mxu3 %v8790_v4  ;;  %v7303_v56 = vpop.f32.mrf.mxu2  ;;  %v15795_v4 = vld [vmem:[%s16208_s5 + $0x38] sm:$0xff] }
 0x888   :  { %v15738_v13 = vadd.f32 %v7303_v56, %v15644_v31  ;;  %v7323_v37 = vpop.f32.mrf.mxu3  ;;  %v15740_v50 = vpop.f32.mrf.mxu0  ;;  %v9210_v31 = vsel %vm1462_vm5, %v10814_v33, %v10818_v0  ;;  %v10833_v56 = vunpack.i.l.bf16 %v10832_v27 }
 0x889   :  { %v15743_v32 = vadd.f32 %v7323_v37, %v15649_v51  ;;  %v15745_v9 = vpop.f32.mrf.mxu1  ;;  %v9211_v51 = vsel %vm1462_vm5, %v10818_v0, %v10808_v61  ;;  %v7487_v0 = vadd.f32 %v15700_v47, %v6785_v16  ;;  %v6845_v61 = vadd.f32 %v15623_v54, %v15551_v41  ;;  %v15832_v20 = vpop.permute.xlu0 %10851 }
 0x88a   :  { %v9220_v59 = vsel %vm1462_vm5, %v10829_v8, %v10833_v56 }
 0x88b   :  { %10500 = vmatmul.msk.f32.vlgmr.msrb.gmra.mxu0 %vm6340_vm0, %v15695_v49  ;;  %v7490_v17 = vadd.f32 %v15717_v40, %v6845_v61 }
 0x88c   :  { %10501 = vmatmul.msk.f32.vlgmr.msrb.gmra.mxu1 %vm6340_vm0, %v15695_v49  ;;  %10502 = vmatmul.msk.f32.vlgmr.msrb.gmra.mxu2 %vm6340_vm0, %v15695_v49 }
 0x88d   :  { %10503 = vmatmul.msk.f32.vlgmr.msrb.gmra.mxu3 %vm6340_vm0, %v15695_v49  ;;  %9260 = vmatpush.msrb.mxu0 %v9210_v31  ;;  %v6865_v31 = vadd.f32 %v15628_v28, %v15553_v19 }
 0x88e   :  { %9280 = vmatpush.msrb.mxu1 %v9211_v51  ;;  %9300 = vmatpush.msrb.mxu2 %v9212_v55 }
 0x88f   :  { %9320 = vmatpush.msrb.mxu3 %v9213_v36  ;;  %v7383_v23 = vpop.f32.mrf.mxu2  ;;  %v10847_v36 = vpop.permute.xlu1 %10846 }
 0x890   :  { %v15760_v7 = vadd.f32 %v7383_v23, %v15666_v35  ;;  %v7403_v48 = vpop.f32.mrf.mxu3  ;;  %v15762_v60 = vpop.f32.mrf.mxu0  ;;  %v9214_v35 = vsel %vm1462_vm5, %v10813_v14, %v10828_v42  ;;  %v10839_v23 = vunpack.i.h.bf16 %v15776_v45  ;;  %v7491_v42 = vadd.f32 %v15722_v2, %v6865_v31 }
 0x891   :  { %v15765_v30 = vadd.f32 %v7403_v48, %v15671_v5  ;;  %v15767_v57 = vpop.f32.mrf.mxu1  ;;  %v6765_v5 = vadd.f32 %v15599_v53, %v15532_v6  ;;  %v10838_v53 = vunpack.i.l.bf16 %v15776_v45  ;;  %v17317_v45 = vld [vmem:[#allocation190_spill] sm:$0xff] }
 0x893   :  { %10504 = vmatmul.msk.f32.vlgmr.msra.gmra.mxu0 %vm6340_vm0, %v15695_v49  ;;  %v7486_v11 = vadd.f32 %v15690_v52, %v6765_v5  ;;  %v10834_v52 = vunpack.i.h.bf16 %v10832_v27  ;;  %v9218_v47 = vsel %vm1462_vm5, %v10824_v34, %v10838_v53  ;;  %v9219_v33 = vsel %vm1462_vm5, %v10838_v53, %v10829_v8 }
 0x894   :  { %10505 = vmatmul.msk.f32.vlgmr.msra.gmra.mxu1 %vm6340_vm0, %v15695_v49  ;;  %10506 = vmatmul.msk.f32.vlgmr.msra.gmra.mxu2 %vm6340_vm0, %v15695_v49  ;;  %v10848_v53 = vunpack.i.l.bf16 %v10847_v36 }
 0x895   :  { %10507 = vmatmul.msk.f32.vlgmr.msra.gmra.mxu3 %vm6340_vm0, %v15695_v49  ;;  %9340 = vmatpush.msra.mxu0 %v9214_v35  ;;  %v9221_v14 = vsel %vm1462_vm5, %v10833_v56, %v10834_v52 }
 0x896   :  { %9360 = vmatpush.msra.mxu1 %v9215_v10  ;;  %9380 = vmatpush.msra.mxu2 %v9216_v26  ;;  %v6945_v26 = vadd.f32 %v15651_v22, %v15569_v39  ;;  %v10853_v22 = vunpack.i.l.bf16 %v15832_v20 }
 0x897   :  { %9400 = vmatpush.msra.mxu3 %v9217_v1  ;;  %v7463_v6 = vpop.f32.mrf.mxu2  ;;  %v10854_v1 = vunpack.i.h.bf16 %v15832_v20 }
 0x898   :  { %v15790_v49 = vadd.f32 %v7463_v6, %v15688_v12  ;;  %v7483_v18 = vpop.f32.mrf.mxu3  ;;  %v7618_v43 = vpop.f32.mrf.mxu0 }
 0x899   :  { %v15799_v58 = vadd.f32 %v7483_v18, %v15698_v46  ;;  %v15801_v25 = vadd.f32 %v7618_v43, %v7486_v11  ;;  %v7638_v37 = vpop.f32.mrf.mxu1  ;;  %v10842_v46 = vpop.permute.xlu2 %10841  ;;  %v7495_v18 = vadd.f32 %v15745_v9, %v6945_v26  ;;  %v7005_v9 = vadd.f32 %v15668_v62, %v15583_v38 }
 0x89a   :  { %v15803_v12 = vadd.f32 %v7638_v37, %v7487_v0  ;;  %v10844_v19 = vunpack.i.h.bf16 %v10842_v46  ;;  %v10843_v28 = vunpack.i.l.bf16 %v10842_v46  ;;  %v15865_v0 = vpop.permute.xlu1 %10861  ;;  %v7025_v46 = vadd.f32 %v15673_v44, %v15585_v29 }
 0x89b   :  { %10508 = vmatmul.msk.f32.vlgmr.msrb.gmra.mxu0 %vm6340_vm0, %v15795_v4  ;;  %v7498_v61 = vadd.f32 %v15762_v60, %v7005_v9  ;;  %v10863_v31 = vunpack.i.l.bf16 %v15865_v0  ;;  %v10864_v29 = vunpack.i.h.bf16 %v15865_v0 }
 0x89c   :  { %10509 = vmatmul.msk.f32.vlgmr.msrb.gmra.mxu1 %vm6340_vm0, %v15795_v4  ;;  %10510 = vmatmul.msk.f32.vlgmr.msrb.gmra.mxu2 %vm6340_vm0, %v15795_v4  ;;  %v9223_v2 = vsel %vm1462_vm5, %v10844_v19, %v10839_v23  ;;  %v9224_v35 = vsel %vm1462_vm5, %v10839_v23, %v10843_v28  ;;  %v9225_v5 = vsel %vm1462_vm5, %v10843_v28, %v17317_v45 }
 0x89d   :  { %10511 = vmatmul.msk.f32.vlgmr.msrb.gmra.mxu3 %vm6340_vm0, %v15795_v4  ;;  %9420 = vmatpush.msrb.mxu0 %v9218_v47  ;;  %v9652_v23 = vsel %vm1348_vm6, %v10863_v31, %v10864_v29 }
 0x89e   :  { %9440 = vmatpush.msrb.mxu1 %v9219_v33  ;;  %9460 = vmatpush.msrb.mxu2 %v9220_v59 }
 0x89f   :  { %9480 = vmatpush.msrb.mxu3 %v9221_v14  ;;  %v7658_v51 = vpop.f32.mrf.mxu2 }
 0x8a0   :  { %v15823_v41 = vadd.f32 %v7658_v51, %v15715_v63  ;;  %v7678_v54 = vpop.f32.mrf.mxu3  ;;  %v7698_v55 = vpop.f32.mrf.mxu0  ;;  %v9222_v63 = vsel %vm1462_vm5, %v10834_v52, %v10844_v19 }
 0x8a1   :  { %v15828_v48 = vadd.f32 %v7678_v54, %v15720_v15  ;;  %v15830_v3 = vadd.f32 %v7698_v55, %v7490_v17  ;;  %v7718_v40 = vpop.f32.mrf.mxu1  ;;  %v6925_v15 = vadd.f32 %v15646_v24, %v15567_v21  ;;  %v10857_v10 = vpop.permute.xlu2 %10856  ;;  %v10849_v24 = vunpack.i.h.bf16 %v10847_v36 }
 0x8a2   :  { %v15834_v34 = vadd.f32 %v7718_v40, %v7491_v42  ;;  %v10858_v39 = vunpack.i.l.bf16 %v10857_v10  ;;  %v7499_v17 = vadd.f32 %v15767_v57, %v7025_v46  ;;  %v10859_v60 = vunpack.i.h.bf16 %v10857_v10 }
 0x8a3   :  { %10512 = vmatmul.msk.f32.vlgmr.msra.gmra.mxu0 %vm6340_vm0, %v15795_v4  ;;  %v7494_v27 = vadd.f32 %v15740_v50, %v6925_v15  ;;  %v9647_v8 = vsel %vm1348_vm6, %v10848_v53, %v10849_v24  ;;  %v9648_v47 = vsel %vm1348_vm6, %v10849_v24, %v10853_v22 }
 0x8a4   :  { %10513 = vmatmul.msk.f32.vlgmr.msra.gmra.mxu1 %vm6340_vm0, %v15795_v4  ;;  %10514 = vmatmul.msk.f32.vlgmr.msra.gmra.mxu2 %vm6340_vm0, %v15795_v4  ;;  %v9646_v37 = vsel %vm1348_vm6, %v10858_v39, %v10848_v53  ;;  %v9651_v36 = vsel %vm1348_vm6, %v10859_v60, %v10863_v31 }
 0x8a5   :  { %10515 = vmatmul.msk.f32.vlgmr.msra.gmra.mxu3 %vm6340_vm0, %v15795_v4  ;;  %9500 = vmatpush.msra.mxu0 %v9222_v63 }
 0x8a6   :  { %9520 = vmatpush.msra.mxu1 %v9223_v2  ;;  %9540 = vmatpush.msra.mxu2 %v9224_v35 }
 0x8a7   :  { %9560 = vmatpush.msra.mxu3 %v9225_v5  ;;  %v7738_v21 = vpop.f32.mrf.mxu2 }
 0x8a8   :  { %v15856_v16 = vadd.f32 %v7738_v21, %v15738_v13  ;;  %v7758_v11 = vpop.f32.mrf.mxu3  ;;  %v7778_v6 = vpop.f32.mrf.mxu0  ;;  %v9645_v13 = vsel %vm1348_vm6, %v10854_v1, %v10858_v39 }
 0x8a9   :  { %v15860_v43 = vadd.f32 %v7758_v11, %v15743_v32  ;;  %v15862_v56 = vadd.f32 %v7778_v6, %v7494_v27  ;;  %v7798_v50 = vpop.f32.mrf.mxu1  ;;  %v10867_v32 = vpop.permute.xlu0 %10866 }
 0x8aa   :  { %v15867_v52 = vadd.f32 %v7798_v50, %v7495_v18  ;;  %v10868_v38 = vunpack.i.l.bf16 %v10867_v32  ;;  %v10872_v42 = vpop.permute.xlu2 %10871  ;;  %v10869_v15 = vunpack.i.h.bf16 %v10867_v32 }
 0x8ab   :  { %10516 = vmatmul.msk.f32.vlgmr.msrb.gmra.mxu0 %vm6340_vm0, %v15795_v4  ;;  %v10874_v45 = vunpack.i.h.bf16 %v10872_v42  ;;  %v10873_v5 = vunpack.i.l.bf16 %v10872_v42 }
 0x8ac   :  { %10517 = vmatmul.msk.f32.vlgmr.msrb.gmra.mxu1 %vm6340_vm0, %v15795_v4  ;;  %10518 = vmatmul.msk.f32.vlgmr.msrb.gmra.mxu2 %vm6340_vm0, %v15795_v4  ;;  %v9650_v57 = vsel %vm1348_vm6, %v10868_v38, %v10859_v60 }
 0x8ad   :  { %10519 = vmatmul.msk.f32.vlgmr.msrb.gmra.mxu3 %vm6340_vm0, %v15795_v4  ;;  %9695 = vmatpush.msrb.mxu0 %v9645_v13  ;;  %v9656_v26 = vsel %vm1348_vm6, %v10873_v5, %v10874_v45 }
 0x8ae   :  { %9715 = vmatpush.msrb.mxu1 %v9646_v37  ;;  %9735 = vmatpush.msrb.mxu2 %v9647_v8 }
 0x8af   :  { %9755 = vmatpush.msrb.mxu3 %v9648_v47  ;;  %v7818_v33 = vpop.f32.mrf.mxu2 }
 0x8b0   :  { %v15887_v62 = vadd.f32 %v7818_v33, %v15760_v7  ;;  %v7838_v59 = vpop.f32.mrf.mxu3  ;;  %v7858_v14 = vpop.f32.mrf.mxu0  ;;  %v9649_v7 = vsel %vm1348_vm6, %v10853_v22, %v10868_v38 }
 0x8b1   :  { %v15892_v51 = vadd.f32 %v7838_v59, %v15765_v30  ;;  %v15894_v54 = vadd.f32 %v7858_v14, %v7498_v61  ;;  %v7878_v44 = vpop.f32.mrf.mxu1  ;;  %v10877_v30 = vpop.permute.xlu1 %10876 }
 0x8b2   :  { %v15897_v55 = vadd.f32 %v7878_v44, %v7499_v17  ;;  %v10878_v28 = vunpack.i.l.bf16 %v10877_v30  ;;  %v9640_v11 = vpop.permute.xlu2 %9639  ;;  %v10879_v6 = vunpack.i.h.bf16 %v10877_v30  ;;  %v9644_v39 = vpop.permute.xlu0 %9643 }
 0x8b3   :  { %10520 = vmatmul.msk.f32.vlgmr.msra.gmra.mxu0 %vm6340_vm0, %v15795_v4  ;;  %v9657_v0 = vsel %vm1348_vm6, %v10874_v45, %v9640_v11 }
 0x8b4   :  { %10521 = vmatmul.msk.f32.vlgmr.msra.gmra.mxu1 %vm6340_vm0, %v15795_v4  ;;  %10522 = vmatmul.msk.f32.vlgmr.msra.gmra.mxu2 %vm6340_vm0, %v15795_v4 }
 0x8b5   :  { %10523 = vmatmul.msk.f32.vlgmr.msra.gmra.mxu3 %vm6340_vm0, %v15795_v4  ;;  %9775 = vmatpush.msra.mxu0 %v9649_v7  ;;  %v15917_v4 = vld [vmem:[%s16208_s5 + $0x40] sm:$0xff] }
 0x8b6   :  { %9795 = vmatpush.msra.mxu1 %v9650_v57  ;;  %9815 = vmatpush.msra.mxu2 %v9651_v36 }
 0x8b7   :  { %9835 = vmatpush.msra.mxu3 %v9652_v23  ;;  %v7898_v19 = vpop.f32.mrf.mxu2 }
 0x8b8   :  { %v15912_v40 = vadd.f32 %v7898_v19, %v15790_v49  ;;  %v7918_v20 = vpop.f32.mrf.mxu3  ;;  %v7957_v63 = vpop.f32.mrf.mxu0 }
 0x8b9   :  { %v15920_v2 = vadd.f32 %v7918_v20, %v15799_v58  ;;  %v15923_v35 = vadd.f32 %v7957_v63, %v15801_v25  ;;  %v7977_v10 = vpop.f32.mrf.mxu1  ;;  %v9653_v58 = vsel %vm1348_vm6, %v10864_v29, %v10878_v28  ;;  %v9654_v25 = vsel %vm1348_vm6, %v10878_v28, %v10869_v15 }
 0x8ba   :  { %v15926_v49 = vadd.f32 %v7977_v10, %v15803_v12  ;;  %v9655_v12 = vsel %vm1348_vm6, %v10869_v15, %v10873_v5 }
 0x8bb   :  { %10524 = vmatmul.msk.f32.vlgmr.msrb.gmra.mxu0 %vm6340_vm0, %v15917_v4 }
 0x8bc   :  { %10525 = vmatmul.msk.f32.vlgmr.msrb.gmra.mxu1 %vm6340_vm0, %v15917_v4  ;;  %10526 = vmatmul.msk.f32.vlgmr.msrb.gmra.mxu2 %vm6340_vm0, %v15917_v4 }
 0x8bd   :  { %10527 = vmatmul.msk.f32.vlgmr.msrb.gmra.mxu3 %vm6340_vm0, %v15917_v4  ;;  %9855 = vmatpush.msrb.mxu0 %v9653_v58 }
 0x8be   :  { %9875 = vmatpush.msrb.mxu1 %v9654_v25  ;;  %9895 = vmatpush.msrb.mxu2 %v9655_v12 }
 0x8bf   :  { %9915 = vmatpush.msrb.mxu3 %v9656_v26  ;;  %v7997_v27 = vpop.f32.mrf.mxu2 }
 0x8c0   :  { %v8262_v21 = vadd.f32 %v7997_v27, %v15823_v41  ;;  %v8017_v24 = vpop.f32.mrf.mxu3  ;;  %v8037_v1 = vpop.f32.mrf.mxu0  ;;  %v9659_v41 = vsel %vm1348_vm6, %v10879_v6, %v9644_v39 }
 0x8c1   :  { %v8263_v53 = vadd.f32 %v8017_v24, %v15828_v48  ;;  %v8264_v18 = vadd.f32 %v8037_v1, %v15830_v3  ;;  %v8057_v22 = vpop.f32.mrf.mxu1  ;;  %v9658_v48 = vsel %vm1348_vm6, %v9640_v11, %v10879_v6  ;;  %v17318_v3 = vld [vmem:[#allocation218_spill] sm:$0xff] }
 0x8c2   :  { %v8265_v50 = vadd.f32 %v8057_v22, %v15834_v34  ;;  %v9660_v34 = vsel %vm1348_vm6, %v9644_v39, %v17318_v3 }
 0x8c3   :  { %10528 = vmatmul.msk.f32.vlgmr.msra.gmra.mxu0 %vm6340_vm0, %v15917_v4 }
 0x8c4   :  { %10529 = vmatmul.msk.f32.vlgmr.msra.gmra.mxu1 %vm6340_vm0, %v15917_v4  ;;  %10530 = vmatmul.msk.f32.vlgmr.msra.gmra.mxu2 %vm6340_vm0, %v15917_v4 }
 0x8c5   :  { %10531 = vmatmul.msk.f32.vlgmr.msra.gmra.mxu3 %vm6340_vm0, %v15917_v4  ;;  %9935 = vmatpush.msra.mxu0 %v9657_v0 }
 0x8c6   :  { %9955 = vmatpush.msra.mxu1 %v9658_v48  ;;  %9975 = vmatpush.msra.mxu2 %v9659_v41 }
 0x8c7   :  { %9995 = vmatpush.msra.mxu3 %v9660_v34  ;;  %v8077_v13 = vpop.f32.mrf.mxu2 }
 0x8c8   :  { %v8266_v32 = vadd.f32 %v8077_v13, %v15856_v16  ;;  %v8097_v9 = vpop.f32.mrf.mxu3  ;;  %v8117_v37 = vpop.f32.mrf.mxu0 }
 0x8c9   :  { %v8267_v8 = vadd.f32 %v8097_v9, %v15860_v43  ;;  %v8268_v47 = vadd.f32 %v8117_v37, %v15862_v56  ;;  %v8137_v46 = vpop.f32.mrf.mxu1 }
 0x8ca   :  { %v8269_v61 = vadd.f32 %v8137_v46, %v15867_v52 }
 0x8cb   :  { %10532 = vmatmul.msk.f32.vlgmr.msrb.gmra.mxu0 %vm6340_vm0, %v15917_v4 }
 0x8cc   :  { %10533 = vmatmul.msk.f32.vlgmr.msrb.gmra.mxu1 %vm6340_vm0, %v15917_v4  ;;  %10534 = vmatmul.msk.f32.vlgmr.msrb.gmra.mxu2 %vm6340_vm0, %v15917_v4 }
 0x8cd   :  { %10535 = vmatmul.msk.f32.vlgmr.msrb.gmra.mxu3 %vm6340_vm0, %v15917_v4 }
 0x8cf   :  { %v8157_v16 = vpop.f32.mrf.mxu2 }
 0x8d0   :  { %v8270_v43 = vadd.f32 %v8157_v16, %v15887_v62  ;;  %v8177_v33 = vpop.f32.mrf.mxu3  ;;  %v8197_v56 = vpop.f32.mrf.mxu0 }
 0x8d1   :  { %v8271_v38 = vadd.f32 %v8177_v33, %v15892_v51  ;;  %v8272_v52 = vadd.f32 %v8197_v56, %v15894_v54  ;;  %v8217_v59 = vpop.f32.mrf.mxu1 }
 0x8d2   :  { %v8273_v14 = vadd.f32 %v8217_v59, %v15897_v55 }
 0x8d3   :  { %10536 = vmatmul.msk.f32.vlgmr.msra.gmra.mxu0 %vm6340_vm0, %v15917_v4 }
 0x8d4   :  { %10537 = vmatmul.msk.f32.vlgmr.msra.gmra.mxu1 %vm6340_vm0, %v15917_v4  ;;  %10538 = vmatmul.msk.f32.vlgmr.msra.gmra.mxu2 %vm6340_vm0, %v15917_v4 }
 0x8d5   :  { %10539 = vmatmul.msk.f32.vlgmr.msra.gmra.mxu3 %vm6340_vm0, %v15917_v4 }
 0x8d7   :  { %v8237_v62 = vpop.f32.mrf.mxu2 }
 0x8d8   :  { %v8274_v31 = vadd.f32 %v8237_v62, %v15912_v40  ;;  %v8257_v17 = vpop.f32.mrf.mxu3  ;;  %v8392_v51 = vpop.f32.mrf.mxu0 }
 0x8d9   :  { %v8275_v54 = vadd.f32 %v8257_v17, %v15920_v2  ;;  %v8695_v29 = vadd.f32 %v8392_v51, %v15923_v35  ;;  %v8412_v44 = vpop.f32.mrf.mxu1  ;;  %v16049_v51 = vpop.permute.xlu0 %10041 }
 0x8da   :  { %v8696_v60 = vadd.f32 %v8412_v44, %v15926_v49 }
 0x8df   :  { %v8432_v55 = vpop.f32.mrf.mxu2 }
 0x8e0   :  { %v15985_v7 = vadd.f32 %v8432_v55, %v8262_v21  ;;  %v8452_v30 = vpop.f32.mrf.mxu3  ;;  %v8472_v57 = vpop.f32.mrf.mxu0 }
 0x8e1   :  { %v15987_v36 = vadd.f32 %v8452_v30, %v8263_v53  ;;  %v15989_v23 = vadd.f32 %v8472_v57, %v8264_v18  ;;  %v8492_v42 = vpop.f32.mrf.mxu1 }
 0x8e2   :  { %v15991_v19 = vadd.f32 %v8492_v42, %v8265_v50  ;;  %v17319_v42 = vld [vmem:[#allocation150_spill] sm:$0xff] }
 0x8e7   :  { %v8512_v28 = vpop.f32.mrf.mxu2 }
 0x8e8   :  { %v15993_v40 = vadd.f32 %v8512_v28, %v8266_v32  ;;  %v8532_v20 = vpop.f32.mrf.mxu3  ;;  %v8552_v63 = vpop.f32.mrf.mxu0  ;;  %v17320_v28 = vld [vmem:[#allocation151_spill] sm:$0xff] }
 0x8e9   :  { %v15995_v4 = vadd.f32 %v8532_v20, %v8267_v8  ;;  %v15997_v15 = vadd.f32 %v8552_v63, %v8268_v47  ;;  %v8572_v2 = vpop.f32.mrf.mxu1  ;;  %v548_v20 = vadd.f32 %v17320_v28, %v17319_v42 }
 0x8ea   :  { %v15999_v35 = vadd.f32 %v8572_v2, %v8269_v61 }
 0x8ef   :  { %v8592_v45 = vpop.f32.mrf.mxu2 }
 0x8f0   :  { %v16001_v5 = vadd.f32 %v8592_v45, %v8270_v43  ;;  %v8612_v10 = vpop.f32.mrf.mxu3  ;;  %v8632_v49 = vpop.f32.mrf.mxu0  ;;  %v17321_v45 = vld [vmem:[#allocation63_spill] sm:$0xff] }
 0x8f1   :  { %v16003_v58 = vadd.f32 %v8612_v10, %v8271_v38  ;;  %v16005_v25 = vadd.f32 %v8632_v49, %v8272_v52  ;;  %v8652_v12 = vpop.f32.mrf.mxu1  ;;  %v17322_v10 = vld [vmem:[#allocation64_spill] sm:$0xff] }
 0x8f2   :  { %v16007_v26 = vadd.f32 %v8652_v12, %v8273_v14  ;;  %v594_v49 = vadd.f32 %v17322_v10, %v17321_v45  ;;  %v16059_v12 = vpop.permute.xlu1 %10019 }
 0x8f7   :  { %v8672_v27 = vpop.f32.mrf.mxu2 }
 0x8f8   :  { %v16009_v21 = vadd.f32 %v8672_v27, %v8274_v31  ;;  %v8692_v24 = vpop.f32.mrf.mxu3  ;;  %v8827_v1 = vpop.f32.mrf.mxu0 }
 0x8f9   :  { %v16011_v11 = vadd.f32 %v8692_v24, %v8275_v54  ;;  %v8847_v6 = vpop.f32.mrf.mxu1  ;;  %v9130_v17 = vadd.f32 %v8827_v1, %v8695_v29 }
 0x8fa   :  { %v9131_v54 = vadd.f32 %v8847_v6, %v8696_v60  ;;  %v10044_v60 = vadd.f32 %v16049_v51, %v548_v20  ;;  %v10045_v6 = vadd.f32 %v16049_v51, %v594_v49  ;;  %v17328_v49 = vld [vmem:[#allocation75_spill] sm:$0xff] }
 0x8ff   :  { %v8867_v53 = vpop.f32.mrf.mxu2 }
 0x900   :  { %v8887_v18 = vpop.f32.mrf.mxu3  ;;  %v8907_v39 = vpop.f32.mrf.mxu0  ;;  %v9132_v1 = vadd.f32 %v8867_v53, %v15985_v7  ;;  %v17323_v53 = vld [vmem:[#allocation65_spill] sm:$0xff] }
 0x901   :  { %v8927_v22 = vpop.f32.mrf.mxu1 }
 0x907   :  { %v16013_v50 = vpop.f32.mrf.mxu2 }
 0x908   :  { %v16015_v0 = vpop.f32.mrf.mxu3  ;;  %v16017_v41 = vpop.f32.mrf.mxu0 }
 0x909   :  { %v16019_v48 = vpop.f32.mrf.mxu1 }
 0x90f   :  { %v16021_v3 = vpop.f32.mrf.mxu2 }
 0x910   :  { %v16023_v34 = vpop.f32.mrf.mxu3  ;;  %v16025_v13 = vpop.f32.mrf.mxu0 }
 0x911   :  { %v16027_v32 = vpop.f32.mrf.mxu1 }
 0x917   :  { %v16029_v9 = vpop.f32.mrf.mxu2 }
 0x918   :  { %v16031_v37 = vpop.f32.mrf.mxu3  ;;  %v9262_v8 = vpop.f32.mrf.mxu0 }
 0x919   :  { %v9282_v47 = vpop.f32.mrf.mxu1  ;;  %v9565_v44 = vadd.f32 %v9262_v8, %v9130_v17  ;;  %v9133_v8 = vadd.f32 %v8887_v18, %v15987_v36  ;;  %v17325_v36 = vld [vmem:[#allocation32_spill] sm:$0xff]  ;;  %v17326_v18 = vld [vmem:[#allocation27_spill] sm:$0xff] }
 0x91a   :  { %v9566_v63 = vadd.f32 %v9282_v47, %v9131_v54  ;;  %v9134_v47 = vadd.f32 %v8907_v39, %v15989_v23  ;;  %v686_v23 = vadd.f32 %v17326_v18, %v17325_v36  ;;  %v17332_v36 = vld [vmem:[#allocation86_spill] sm:$0xff]  ;;  %v17333_v18 = vld [vmem:[#allocation91_spill] sm:$0xff] }
 0x91f   :  { %v9302_v46 = vpop.f32.mrf.mxu2 }
 0x920   :  { %v9322_v61 = vpop.f32.mrf.mxu3  ;;  %v9342_v16 = vpop.f32.mrf.mxu0 }
 0x921   :  { %v9362_v43 = vpop.f32.mrf.mxu1  ;;  %v9568_v42 = vadd.f32 %v9322_v61, %v9133_v8  ;;  %v9569_v28 = vadd.f32 %v9342_v16, %v9134_v47 }
 0x927   :  { %v16033_v33 = vpop.f32.mrf.mxu2 }
 0x928   :  { %v16035_v56 = vpop.f32.mrf.mxu3  ;;  %v16037_v38 = vpop.f32.mrf.mxu0 }
 0x929   :  { %v16039_v52 = vpop.f32.mrf.mxu1 }
 0x92f   :  { %v16041_v59 = vpop.f32.mrf.mxu2 }
 0x930   :  { %v16043_v14 = vpop.f32.mrf.mxu3  ;;  %v16045_v62 = vpop.f32.mrf.mxu0 }
 0x931   :  { %v16047_v31 = vpop.f32.mrf.mxu1 }
 0x937   :  { %v16051_v55 = vpop.f32.mrf.mxu2 }
 0x938   :  { %v16053_v30 = vpop.f32.mrf.mxu3  ;;  %v9697_v57 = vpop.f32.mrf.mxu0 }
 0x939   :  { %v10000_v2 = vadd.f32 %v9697_v57, %v9565_v44  ;;  %v9717_v29 = vpop.f32.mrf.mxu1  ;;  %v9567_v44 = vadd.f32 %v9302_v46, %v9132_v1  ;;  %v9135_v57 = vadd.f32 %v8927_v22, %v15991_v19  ;;  %v17327_v46 = vld [vmem:[#allocation74_spill] sm:$0xff] }
 0x93a   :  { %v10001_v24 = vadd.f32 %v9717_v29, %v9566_v63  ;;  %v17324_v63 = vld [vmem:[#allocation66_spill] sm:$0xff]  ;;  %v732_v19 = vadd.f32 %v17328_v49, %v17327_v46  ;;  %v17329_v29 = vld [vmem:[#allocation80_spill] sm:$0xff] }
 0x93b   :  { %v10022_v27 = vadd.f32 %v16059_v12, %v10000_v2  ;;  %v640_v2 = vadd.f32 %v17324_v63, %v17323_v53  ;;  %v9570_v22 = vadd.f32 %v9362_v43, %v9135_v57  ;;  %v9137_v57 = vadd.f32 %v16015_v0, %v15995_v4 }
 0x93c   :  { %v10023_v54 = vadd.f32 %v16059_v12, %v10001_v24 }
 0x93d   :  { %v10060_v17 = vadd.f32 %v10044_v60, %v10022_v27  ;;  %v17330_v27 = vld [vmem:[#allocation81_spill] sm:$0xff]  ;;  %v10046_v1 = vadd.f32 %v16049_v51, %v640_v2  ;;  %v9572_v4 = vadd.f32 %v16035_v56, %v9137_v57 }
 0x93e   :  { %v10061_v20 = vadd.f32 %v10045_v6, %v10023_v54  ;;  %v778_v60 = vadd.f32 %v17330_v27, %v17329_v29  ;;  %v10047_v6 = vadd.f32 %v16049_v51, %v686_v23  ;;  %v17334_v23 = vld [vmem:[#allocation92_spill] sm:$0xff] }
 0x93f   :  { %10076 = vst [vmem:[%s16216_s13] sm:$0xff] %v10060_v17  ;;  %v9737_v7 = vpop.f32.mrf.mxu2  ;;  %v10048_v17 = vadd.f32 %v16049_v51, %v732_v19 }
 0x940   :  { %v10002_v39 = vadd.f32 %v9737_v7, %v9567_v44  ;;  %v9757_v45 = vpop.f32.mrf.mxu3  ;;  %v9777_v10 = vpop.f32.mrf.mxu0  ;;  %10077 = vst [vmem:[%s16216_s13 + $0x8] sm:$0xff] %v10061_v20  ;;  %v9136_v44 = vadd.f32 %v16013_v50, %v15993_v40  ;;  %v9138_v20 = vadd.f32 %v16017_v41, %v15997_v15  ;;  %v9139_v40 = vadd.f32 %v16019_v48, %v15999_v35  ;;  %v17331_v41 = vld [vmem:[#allocation85_spill] sm:$0xff] }
 0x941   :  { %v10003_v61 = vadd.f32 %v9757_v45, %v9568_v42  ;;  %v10004_v16 = vadd.f32 %v9777_v10, %v9569_v28  ;;  %v9797_v8 = vpop.f32.mrf.mxu1  ;;  %v10049_v28 = vadd.f32 %v16049_v51, %v778_v60  ;;  %v17336_v45 = vld [vmem:[#allocation28_spill] sm:$0xff] }
 0x942   :  { %v10024_v24 = vadd.f32 %v16059_v12, %v10002_v39  ;;  %v10005_v54 = vadd.f32 %v9797_v8, %v9570_v22  ;;  %v9571_v2 = vadd.f32 %v16033_v33, %v9136_v44  ;;  %v9573_v50 = vadd.f32 %v16037_v38, %v9138_v20  ;;  %v17335_v38 = vld [vmem:[#allocation25_spill] sm:$0xff]  ;;  %v17337_v22 = vld [vmem:[#allocation103_spill] sm:$0xff] }
 0x943   :  { %v10025_v47 = vadd.f32 %v16059_v12, %v10003_v61  ;;  %v10026_v43 = vadd.f32 %v16059_v12, %v10004_v16  ;;  %v824_v33 = vadd.f32 %v17332_v36, %v17331_v41  ;;  %v870_v39 = vadd.f32 %v17334_v23, %v17333_v18  ;;  %v17338_v61 = vld [vmem:[#allocation104_spill] sm:$0xff]  ;;  %v17345_v41 = vld [vmem:[#allocation142_spill] sm:$0xff]  ;;  %v17346_v36 = vld [vmem:[#allocation143_spill] sm:$0xff] }
 0x944   :  { %v10062_v42 = vadd.f32 %v10046_v1, %v10024_v24  ;;  %v10027_v63 = vadd.f32 %v16059_v12, %v10005_v54  ;;  %v916_v10 = vadd.f32 %v17336_v45, %v17335_v38  ;;  %v9574_v46 = vadd.f32 %v16039_v52, %v9139_v40  ;;  %v17344_v40 = vld [vmem:[#allocation138_spill] sm:$0xff] }
 0x945   :  { %v10063_v7 = vadd.f32 %v10047_v6, %v10025_v47  ;;  %v10064_v53 = vadd.f32 %v10048_v17, %v10026_v43  ;;  %v962_v16 = vadd.f32 %v17338_v61, %v17337_v22  ;;  %v10050_v27 = vadd.f32 %v16049_v51, %v824_v33 }
 0x946   :  { %10078 = vst [vmem:[%s16216_s13 + $0x10] sm:$0xff] %v10062_v42  ;;  %v10065_v15 = vadd.f32 %v10049_v28, %v10027_v63  ;;  %v10051_v60 = vadd.f32 %v16049_v51, %v870_v39  ;;  %v10052_v6 = vadd.f32 %v16049_v51, %v916_v10  ;;  %v9140_v47 = vadd.f32 %v16021_v3, %v16001_v5  ;;  %v17342_v63 = vld [vmem:[#allocation119_spill] sm:$0xff] }
 0x947   :  { %10079 = vst [vmem:[%s16216_s13 + $0x18] sm:$0xff] %v10063_v7  ;;  %v9817_v0 = vpop.f32.mrf.mxu2  ;;  %v9141_v43 = vadd.f32 %v16023_v34, %v16003_v58  ;;  %v10053_v54 = vadd.f32 %v16049_v51, %v962_v16  ;;  %v9142_v44 = vadd.f32 %v16025_v13, %v16005_v25  ;;  %v9143_v5 = vadd.f32 %v16027_v32, %v16007_v26  ;;  %v17339_v13 = vld [vmem:[#allocation112_spill] sm:$0xff]  ;;  %v17340_v7 = vld [vmem:[#allocation113_spill] sm:$0xff] }
 0x948   :  { %10080 = vst [vmem:[%s16216_s13 + $0x20] sm:$0xff] %v10064_v53  ;;  %v10006_v35 = vadd.f32 %v9817_v0, %v9571_v2  ;;  %v9837_v48 = vpop.f32.mrf.mxu3  ;;  %v9857_v56 = vpop.f32.mrf.mxu0  ;;  %v9575_v20 = vadd.f32 %v16041_v59, %v9140_v47  ;;  %v1008_v59 = vadd.f32 %v17340_v7, %v17339_v13  ;;  %v17341_v53 = vld [vmem:[#allocation118_spill] sm:$0xff]  ;;  %v1146_v33 = vadd.f32 %v17346_v36, %v17345_v41 }
 0x949   :  { %10081 = vst [vmem:[%s16216_s13 + $0x28] sm:$0xff] %v10065_v15  ;;  %v10007_v49 = vadd.f32 %v9837_v48, %v9572_v4  ;;  %v10008_v19 = vadd.f32 %v9857_v56, %v9573_v50  ;;  %v9877_v24 = vpop.f32.mrf.mxu1  ;;  %v9576_v58 = vadd.f32 %v16043_v14, %v9141_v43  ;;  %v9577_v3 = vadd.f32 %v16045_v62, %v9142_v44  ;;  %v17343_v62 = vld [vmem:[#allocation137_spill] sm:$0xff] }
 0x94a   :  { %v10028_v29 = vadd.f32 %v16059_v12, %v10006_v35  ;;  %v10009_v8 = vadd.f32 %v9877_v24, %v9574_v46  ;;  %v1054_v2 = vadd.f32 %v17342_v63, %v17341_v53  ;;  %v1100_v4 = vadd.f32 %v17344_v40, %v17343_v62  ;;  %v17349_v24 = vld [vmem:[#allocation17_spill] sm:$0xff] }
 0x94b   :  { %v10029_v1 = vadd.f32 %v16059_v12, %v10007_v49  ;;  %v10030_v52 = vadd.f32 %v16059_v12, %v10008_v19  ;;  %v9578_v50 = vadd.f32 %v16047_v31, %v9143_v5  ;;  %v10054_v23 = vadd.f32 %v16049_v51, %v1008_v59 }
 0x94c   :  { %v10066_v17 = vadd.f32 %v10050_v27, %v10028_v29  ;;  %v10031_v28 = vadd.f32 %v16059_v12, %v10009_v8  ;;  %v10055_v39 = vadd.f32 %v16049_v51, %v1054_v2  ;;  %v10056_v56 = vadd.f32 %v16049_v51, %v1100_v4  ;;  %v17347_v27 = vld [vmem:[#allocation52_spill] sm:$0xff] }
 0x94d   :  { %v10067_v57 = vadd.f32 %v10051_v60, %v10029_v1  ;;  %v10068_v42 = vadd.f32 %v10052_v6, %v10030_v52  ;;  %v9144_v45 = vadd.f32 %v16029_v9, %v16009_v21  ;;  %v10057_v46 = vadd.f32 %v16049_v51, %v1146_v33  ;;  %v17350_v1 = vld [vmem:[#allocation21_spill] sm:$0xff] }
 0x94e   :  { %10082 = vst [vmem:[%s16216_s13 + $0x30] sm:$0xff] %v10066_v17  ;;  %v10069_v25 = vadd.f32 %v10053_v54, %v10031_v28  ;;  %v9145_v49 = vadd.f32 %v16031_v37, %v16011_v11  ;;  %v17348_v11 = vld [vmem:[#allocation18_spill] sm:$0xff]  ;;  %v1238_v52 = vadd.f32 %v17350_v1, %v17349_v24 }
 0x94f   :  { %10083 = vst [vmem:[%s16216_s13 + $0x38] sm:$0xff] %v10067_v57  ;;  %v9897_v34 = vpop.f32.mrf.mxu2  ;;  %v9579_v16 = vadd.f32 %v16051_v55, %v9144_v45  ;;  %v1192_v37 = vadd.f32 %v17348_v11, %v17347_v27 }
 0x950   :  { %10540 = vst [vmem:[%s16216_s13 + $0x40] sm:$0xff] %v10068_v42  ;;  %v10010_v26 = vadd.f32 %v9897_v34, %v9575_v20  ;;  %v9917_v32 = vpop.f32.mrf.mxu3  ;;  %v9937_v14 = vpop.f32.mrf.mxu0  ;;  %v9580_v29 = vadd.f32 %v16053_v30, %v9145_v49  ;;  %v10059_v43 = vadd.f32 %v16049_v51, %v1238_v52 }
 0x951   :  { %10541 = vst [vmem:[%s16216_s13 + $0x48] sm:$0xff] %v10069_v25  ;;  %v10011_v15 = vadd.f32 %v9917_v32, %v9576_v58  ;;  %v10012_v0 = vadd.f32 %v9937_v14, %v9577_v3  ;;  %v9957_v35 = vpop.f32.mrf.mxu1  ;;  %v10058_v8 = vadd.f32 %v16049_v51, %v1192_v37 }
 0x952   :  { %v10032_v18 = vadd.f32 %v16059_v12, %v10010_v26  ;;  %v10013_v38 = vadd.f32 %v9957_v35, %v9578_v50 }
 0x953   :  { %v10033_v48 = vadd.f32 %v16059_v12, %v10011_v15  ;;  %v10034_v31 = vadd.f32 %v16059_v12, %v10012_v0 }
 0x954   :  { %v10070_v10 = vadd.f32 %v10054_v23, %v10032_v18  ;;  %v10035_v61 = vadd.f32 %v16059_v12, %v10013_v38 }
 0x955   :  { %v10071_v19 = vadd.f32 %v10055_v39, %v10033_v48  ;;  %v10072_v22 = vadd.f32 %v10056_v56, %v10034_v31 }
 0x956   :  { %10542 = vst [vmem:[%s16216_s13 + $0x50] sm:$0xff] %v10070_v10  ;;  %v10073_v21 = vadd.f32 %v10057_v46, %v10035_v61 }
 0x957   :  { %10543 = vst [vmem:[%s16216_s13 + $0x58] sm:$0xff] %v10071_v19  ;;  %v9977_v9 = vpop.f32.mrf.mxu2 }
 0x958   :  { %10544 = vst [vmem:[%s16216_s13 + $0x60] sm:$0xff] %v10072_v22  ;;  %v10014_v55 = vadd.f32 %v9977_v9, %v9579_v16  ;;  %v9997_v60 = vpop.f32.mrf.mxu3 }
 0x959   :  { %10545 = vst [vmem:[%s16216_s13 + $0x68] sm:$0xff] %v10073_v21  ;;  %v10015_v30 = vadd.f32 %v9997_v60, %v9580_v29 }
 0x95a   :  { %v10036_v6 = vadd.f32 %v16059_v12, %v10014_v55 }
 0x95b   :  { %v10037_v47 = vadd.f32 %v16059_v12, %v10015_v30 }
 0x95c   :  { %v10074_v17 = vadd.f32 %v10058_v8, %v10036_v6 }
 0x95d   :  { %v10075_v54 = vadd.f32 %v10059_v43, %v10037_v47 }
 0x95e   :  { %10546 = vst [vmem:[%s16216_s13 + $0x70] sm:$0xff] %v10074_v17 }
 0x95f   :  { %10547 = vst [vmem:[%s16216_s13 + $0x78] sm:$0xff] %v10075_v54 }
 0x960   :  { %10097 = vsyncpa [#allocation3], 1 }
 0x961   :  { %10098 = vsyncpa [#allocation5], 1 }

</bundles_post_ra>
